<compile_context>
chip_gen: v7x
topology: tpu7x:2x2x1
jax: 0.10.0
libtpu: 0.0.40
codegen_flags: <defaults>
</compile_context>

<pallas_src>
import jax
import jax.numpy as jnp
from jax.experimental import pallas as pl
from jax.experimental.pallas import tpu as pltpu


# ---------------------------------------------------------------------------
# Fused kernel: one grid step == one image.  Inter-stage activations stay in VMEM.
# ---------------------------------------------------------------------------
def _demo_kernel(p1_ref, w1_ref, b1_ref, w2_ref, b2_ref, w3_ref, b3_ref,
                 wf1_ref, bf1_ref, wf2_ref, bf2_ref,
                 o_ref,
                 act2_ref, act3_ref, patch_ref, poolA_ref, poolB_ref, feats_ref):
    f32 = jnp.float32
    bf16 = jnp.bfloat16

    # Zero the padded-activation halos once per image (interiors fully overwritten).
    act2_ref[...] = jnp.zeros_like(act2_ref)
    act3_ref[...] = jnp.zeros_like(act3_ref)

    # -------- Stage 1: conv1 (im2col'd in XLA) + bias + 2x2 max-pool --------
    # p1 rows are conv-output positions (h*32 + w); 4 chunks of 8 output rows each.
    b1 = b1_ref[...]
    for ci in range(4):
        rows = p1_ref[0, ci * 256:(ci + 1) * 256, :]                    # (256, 80) bf16
        acc = jnp.dot(rows, w1_ref[...], preferred_element_type=f32) + b1   # (256, 32)
        y = acc.reshape(4, 2, 32, 32)                                   # (ho, hpair, w, c)
        y = jnp.maximum(y[:, 0], y[:, 1])                               # H-pool -> (4, 32, 32)
        poolA_ref[...] = y.reshape(128, 32)
        pooled = jnp.maximum(poolA_ref[pl.ds(0, 64, 2), :],             # W-pool -> (64, 32)
                             poolA_ref[pl.ds(1, 64, 2), :])             # rows ordered (ho, wo)
        act2_ref[2 + ci * 4:6 + ci * 4, 2:18, :] = pooled.reshape(4, 16, 32)

    # -------- Stage 2: conv2 + bias + 2x2 max-pool ---------------------------
    for kh in range(5):
        for kw in range(5):
            t = kh * 5 + kw
            xs = act2_ref[kh:kh + 16, kw:kw + 16, :]                    # (16, 16, 32) f32
            patch_ref[:, t * 32:(t + 1) * 32] = xs.reshape(256, 32).astype(bf16)
    acc = jnp.dot(patch_ref[...], w2_ref[...],
                  preferred_element_type=f32) + b2_ref[...]             # (256, 32) f32
    y = acc.reshape(8, 2, 16, 32)
    y = jnp.maximum(y[:, 0], y[:, 1])                                   # (8, 16, 32)
    poolA_ref[...] = y.reshape(128, 32)
    pooled = jnp.maximum(poolA_ref[pl.ds(0, 64, 2), :],
                         poolA_ref[pl.ds(1, 64, 2), :])                 # (64, 32)
    act3_ref[2:10, 2:10, :] = pooled.reshape(8, 8, 32)

    # -------- Stage 3: conv3 + bias + 2x2 max-pool ---------------------------
    for kh in range(5):
        for kw in range(5):
            t = kh * 5 + kw
            xs = act3_ref[kh:kh + 8, kw:kw + 8, :]                      # (8, 8, 32) f32
            patch_ref[0:64, t * 32:(t + 1) * 32] = xs.reshape(64, 32).astype(bf16)
    acc = jnp.dot(patch_ref[0:64, :], w3_ref[...],
                  preferred_element_type=f32) + b3_ref[...]             # (64, 64) f32
    y = acc.reshape(4, 2, 8, 64)
    y = jnp.maximum(y[:, 0], y[:, 1])                                   # (4, 8, 64)
    poolB_ref[...] = y.reshape(32, 64)
    feats = jnp.maximum(poolB_ref[pl.ds(0, 16, 2), :],
                        poolB_ref[pl.ds(1, 16, 2), :]).astype(bf16)     # (16, 64): (h*4+w, c)

    # -------- fc1 + fc2 (per image, fused epilogue) ---------------------------
    # Flatten the NHWC features into a (1, 1024) lane vector via a tiny VMEM slab.
    for p in range(16):
        feats_ref[:, p * 64:(p + 1) * 64] = feats[p:p + 1, :]
    h = jnp.dot(feats_ref[...], wf1_ref[...],
                preferred_element_type=f32) + bf1_ref[...]              # (1, 64) f32
    out = jnp.dot(h.astype(bf16), wf2_ref[...],
                  preferred_element_type=f32) + bf2_ref[...]            # (1, 10) f32
    o_ref[...] = out.reshape(1, 1, 10)


# ---------------------------------------------------------------------------
# pallas_call wrapper
# ---------------------------------------------------------------------------
def demo_fused(p1, packed):
    B = p1.shape[0]
    w1, b1 = packed["conv1"]
    w2, b2 = packed["conv2"]
    w3, b3 = packed["conv3"]
    wf1, bf1 = packed["fc1"]
    wf2, bf2 = packed["fc2"]

    def fixed(arr):  # grid-invariant full-array block
        nd = arr.ndim
        return pl.BlockSpec(arr.shape, lambda i, _nd=nd: (0,) * _nd)

    out = pl.pallas_call(
        _demo_kernel,
        out_shape=jax.ShapeDtypeStruct((B, 1, 10), jnp.float32),
        grid=(B,),
        in_specs=[
            pl.BlockSpec((1, 1024, 80), lambda i: (i, 0, 0)),           # conv1 im2col rows
            fixed(w1), fixed(b1),
            fixed(w2), fixed(b2),
            fixed(w3), fixed(b3),
            fixed(wf1), fixed(bf1),
            fixed(wf2), fixed(bf2),
        ],
        out_specs=pl.BlockSpec((1, 1, 10), lambda i: (i, 0, 0)),
        scratch_shapes=[
            pltpu.VMEM((20, 20, 32), jnp.float32),    # padded conv2 input (16+4)
            pltpu.VMEM((12, 12, 32), jnp.float32),    # padded conv3 input (8+4)
            pltpu.VMEM((256, 800), jnp.bfloat16),     # shared im2col slab (K = 25*32)
            pltpu.VMEM((128, 32), jnp.float32),       # W-pool slab, stages 1-2
            pltpu.VMEM((32, 64), jnp.float32),        # W-pool slab, stage 3
            pltpu.VMEM((1, 1024), jnp.bfloat16),      # flattened fc features
        ],
        compiler_params=pltpu.CompilerParams(
            dimension_semantics=("parallel",),        # images shard over v7x's 2 TCs
            vmem_limit_bytes=32 * 1024 * 1024,
        ),
    )(p1, w1, b1, w2, b2, w3, b3, wf1, bf1, wf2, bf2)
    return out.reshape(B, 10)


# ---------------------------------------------------------------------------
# Parameters
# ---------------------------------------------------------------------------
def init_params(key):
    def conv_init(k, cout, cin, ksz):
        k1, k2 = jax.random.split(k)
        bound = 1.0 / (cin * ksz * ksz) ** 0.5
        w = jax.random.uniform(k1, (cout, cin, ksz, ksz), jnp.float32, -bound, bound)
        b = jax.random.uniform(k2, (cout,), jnp.float32, -bound, bound)
        return w, b

    def linear_init(k, cout, cin):
        k1, k2 = jax.random.split(k)
        bound = 1.0 / cin ** 0.5
        w = jax.random.uniform(k1, (cout, cin), jnp.float32, -bound, bound)
        b = jax.random.uniform(k2, (cout,), jnp.float32, -bound, bound)
        return w, b

    keys = jax.random.split(key, 5)
    return dict(
        conv1=conv_init(keys[0], 32, 3, 5),
        conv2=conv_init(keys[1], 32, 32, 5),
        conv3=conv_init(keys[2], 64, 32, 5),
        fc1=linear_init(keys[3], 64, 64 * 4 * 4),
        fc2=linear_init(keys[4], 10, 64),
    )


def pack_params(params):
    """One-time packing: conv weights -> ((kh*5+kw)*Cin + cin, cout) bf16; fc1 absorbs
    the PyTorch (C,H,W) flatten permutation so the kernel consumes NHWC features."""
    bf16 = jnp.bfloat16
    packed = {}
    w, b = params["conv1"]                                          # (32, 3, 5, 5)
    w1 = jnp.transpose(w, (2, 3, 1, 0)).reshape(75, 32)             # [kh, kw, cin] x cout
    packed["conv1"] = (jnp.pad(w1, ((0, 5), (0, 0))).astype(bf16),  # K: 75 -> 80
                       b.reshape(1, 32))
    for name in ("conv2", "conv3"):
        w, b = params[name]                                         # (Cout, 32, 5, 5)
        Cout = w.shape[0]
        wp = jnp.transpose(w, (2, 3, 1, 0)).reshape(800, Cout).astype(bf16)
        packed[name] = (wp, b.reshape(1, Cout))
    w, b = params["fc1"]                                            # (64, 1024), in = c*16+h*4+w
    w1p = jnp.transpose(w.reshape(64, 64, 4, 4), (2, 3, 1, 0)).reshape(1024, 64).astype(bf16)
    packed["fc1"] = (w1p, b.reshape(1, 64))
    w, b = params["fc2"]                                            # (10, 64)
    packed["fc2"] = (jnp.transpose(w).astype(bf16), b.reshape(1, 10))
    return packed


# ---------------------------------------------------------------------------
# Model: Demo forward pass
# ---------------------------------------------------------------------------
def demo_forward(x_nchw, packed):
    B = x_nchw.shape[0]
    x = jnp.transpose(x_nchw, (0, 2, 3, 1))                         # NCHW -> NHWC (once)
    xp = jnp.pad(x, ((0, 0), (2, 2), (2, 2), (0, 0)))               # (B, 36, 36, 3)
    # Pre-im2col conv1 in XLA (fixes the Cin=3 lane-utilization problem in-kernel).
    taps = [xp[:, kh:kh + 32, kw:kw + 32, :] for kh in range(5) for kw in range(5)]
    p1 = jnp.concatenate(taps, axis=-1).reshape(B, 32 * 32, 75)
    p1 = jnp.pad(p1, ((0, 0), (0, 0), (0, 5))).astype(jnp.bfloat16)  # K: 75 -> 80
    return demo_fused(p1, packed)


# Pure-JAX reference (correctness check only), kept at HIGHEST precision.
def demo_reference(x_nchw, params):
    hi = jax.lax.Precision.HIGHEST

    def conv(x, w, b):
        y = jax.lax.conv_general_dilated(
            x, w, (1, 1), ((2, 2), (2, 2)),
            dimension_numbers=("NCHW", "OIHW", "NCHW"), precision=hi)
        return y + b[None, :, None, None]

    def pool(x):
        B, C, H, W = x.shape
        return x.reshape(B, C, H // 2, 2, W // 2, 2).max(axis=(3, 5))

    x = pool(conv(x_nchw, *params["conv1"]))
    x = pool(conv(x, *params["conv2"]))
    x = pool(conv(x, *params["conv3"]))
    x = x.reshape(x.shape[0], -1)
    w1, b1 = params["fc1"]
    w2, b2 = params["fc2"]
    x = jnp.dot(x, w1.T, precision=hi) + b1
    x = jnp.dot(x, w2.T, precision=hi) + b2
    return x


if __name__ == "__main__":
    key = jax.random.PRNGKey(0)
    kx, kp = jax.random.split(key)
    params = init_params(kp)
    # Architecture fixes the input to CIFAR10 geometry: 3 channels, 32x32 spatial.
    x = jax.random.normal(kx, (2, 3, 32, 32), jnp.float32)

    packed = pack_params(params)                                    # one-time weight packing
    fwd = jax.jit(demo_forward)
    out = jax.block_until_ready(fwd(x, packed))
    assert out.shape == (2, 10) and out.dtype == jnp.float32

    ref = demo_reference(x, params)
    max_err = float(jnp.max(jnp.abs(out - ref)))
    # bf16 MXU operands / bf16 patch slabs vs the HIGHEST-precision XLA reference.
    assert jnp.allclose(out, ref, rtol=5e-2, atol=5e-2), max_err

    print("KERNEL_OK")
</pallas_src>

<mosaic_0001>
module attributes {stable_mosaic.version = 11 : i64} {
  func.func @_demo_kernel(%arg0: i32, %arg1: memref<1x1024x80xbf16, #tpu.memory_space<vmem>>, %arg2: memref<80x32xbf16, #tpu.memory_space<vmem>>, %arg3: memref<1x32xf32, #tpu.memory_space<vmem>>, %arg4: memref<800x32xbf16, #tpu.memory_space<vmem>>, %arg5: memref<1x32xf32, #tpu.memory_space<vmem>>, %arg6: memref<800x64xbf16, #tpu.memory_space<vmem>>, %arg7: memref<1x64xf32, #tpu.memory_space<vmem>>, %arg8: memref<1024x64xbf16, #tpu.memory_space<vmem>>, %arg9: memref<1x64xf32, #tpu.memory_space<vmem>>, %arg10: memref<64x10xbf16, #tpu.memory_space<vmem>>, %arg11: memref<1x10xf32, #tpu.memory_space<vmem>>, %arg12: memref<1x1x10xf32, #tpu.memory_space<vmem>>, %arg13: memref<20x20x32xf32, #tpu.memory_space<vmem>>, %arg14: memref<12x12x32xf32, #tpu.memory_space<vmem>>, %arg15: memref<256x800xbf16, #tpu.memory_space<vmem>>, %arg16: memref<128x32xf32, #tpu.memory_space<vmem>>, %arg17: memref<32x64xf32, #tpu.memory_space<vmem>>, %arg18: memref<1x1024xbf16, #tpu.memory_space<vmem>>) attributes {dimension_semantics = [#tpu.dimension_semantics<parallel>], iteration_bounds = array<i64: 2>, scalar_prefetch = 0 : i64, scratch_operands = 6 : i64, tpu.core_type = #tpu.core_type<tc>, window_params = [{transform_indices = @transform_0, window_bounds = array<i64: 1, 1024, 80>}, {pipeline_mode = #tpu.pipeline_mode<synchronous>, transform_indices = @transform_1, window_bounds = array<i64: 80, 32>}, {pipeline_mode = #tpu.pipeline_mode<synchronous>, transform_indices = @transform_2, window_bounds = array<i64: 1, 32>}, {pipeline_mode = #tpu.pipeline_mode<synchronous>, transform_indices = @transform_3, window_bounds = array<i64: 800, 32>}, {pipeline_mode = #tpu.pipeline_mode<synchronous>, transform_indices = @transform_4, window_bounds = array<i64: 1, 32>}, {pipeline_mode = #tpu.pipeline_mode<synchronous>, transform_indices = @transform_5, window_bounds = array<i64: 800, 64>}, {pipeline_mode = #tpu.pipeline_mode<synchronous>, transform_indices = @transform_6, window_bounds = array<i64: 1, 64>}, {pipeline_mode = #tpu.pipeline_mode<synchronous>, transform_indices = @transform_7, window_bounds = array<i64: 1024, 64>}, {pipeline_mode = #tpu.pipeline_mode<synchronous>, transform_indices = @transform_8, window_bounds = array<i64: 1, 64>}, {pipeline_mode = #tpu.pipeline_mode<synchronous>, transform_indices = @transform_9, window_bounds = array<i64: 64, 10>}, {pipeline_mode = #tpu.pipeline_mode<synchronous>, transform_indices = @transform_10, window_bounds = array<i64: 1, 10>}, {transform_indices = @transform_11, window_bounds = array<i64: 1, 1, 10>}]} {
    %cst = arith.constant 0.000000e+00 : f32
    %0 = vector.broadcast %cst : f32 to vector<20x20x32xf32>
    %c0 = arith.constant 0 : index
    %c0_0 = arith.constant 0 : index
    %c0_1 = arith.constant 0 : index
    %1 = vector.load %arg13[%c0, %c0_0, %c0_1] : memref<20x20x32xf32, #tpu.memory_space<vmem>>, vector<20x20x32xf32>
    tpu.vector_store %arg13[%c0, %c0_0, %c0_1], %0 {strides = array<i32>} : memref<20x20x32xf32, #tpu.memory_space<vmem>>, vector<20x20x32xf32>,
    %cst_2 = arith.constant 0.000000e+00 : f32
    %2 = vector.broadcast %cst_2 : f32 to vector<12x12x32xf32>
    %c0_3 = arith.constant 0 : index
    %c0_4 = arith.constant 0 : index
    %c0_5 = arith.constant 0 : index
    %3 = vector.load %arg14[%c0_3, %c0_4, %c0_5] : memref<12x12x32xf32, #tpu.memory_space<vmem>>, vector<12x12x32xf32>
    tpu.vector_store %arg14[%c0_3, %c0_4, %c0_5], %2 {strides = array<i32>} : memref<12x12x32xf32, #tpu.memory_space<vmem>>, vector<12x12x32xf32>,
    %c0_6 = arith.constant 0 : index
    %c0_7 = arith.constant 0 : index
    %4 = vector.load %arg3[%c0_6, %c0_7] : memref<1x32xf32, #tpu.memory_space<vmem>>, vector<1x32xf32>
    %c0_8 = arith.constant 0 : index
    %c0_9 = arith.constant 0 : index
    %c0_10 = arith.constant 0 : index
    %5 = vector.load %arg1[%c0_8, %c0_9, %c0_10] : memref<1x1024x80xbf16, #tpu.memory_space<vmem>>, vector<1x256x80xbf16>
    %6 = vector.shape_cast %5 : vector<1x256x80xbf16> to vector<256x80xbf16>
    %c0_11 = arith.constant 0 : index
    %c0_12 = arith.constant 0 : index
    %7 = vector.load %arg2[%c0_11, %c0_12] : memref<80x32xbf16, #tpu.memory_space<vmem>>, vector<80x32xbf16>
    %cst_13 = arith.constant dense<0.000000e+00> : vector<256x32xf32>
    %8 = tpu.matmul %6, %7, %cst_13 {dimension_numbers = #tpu.dot_dimension_numbers<[1], [0], [0], [1], [0, 0, 1, 1], [], []>} : vector<256x80xbf16>, vector<80x32xbf16>, vector<256x32xf32> -> vector<256x32xf32>
    %9 = vector.broadcast %4 : vector<1x32xf32> to vector<256x32xf32>
    %10 = arith.addf %8, %9 : vector<256x32xf32>
    %11 = vector.shape_cast %10 : vector<256x32xf32> to vector<4x2x32x32xf32>
    %12 = vector.extract_strided_slice %11 {offsets = [0, 0, 0, 0], sizes = [4, 1, 32, 32], strides = [1, 1, 1, 1]} : vector<4x2x32x32xf32> to vector<4x1x32x32xf32>
    %13 = vector.shape_cast %12 : vector<4x1x32x32xf32> to vector<4x32x32xf32>
    %14 = vector.extract_strided_slice %11 {offsets = [0, 1, 0, 0], sizes = [4, 1, 32, 32], strides = [1, 1, 1, 1]} : vector<4x2x32x32xf32> to vector<4x1x32x32xf32>
    %15 = vector.shape_cast %14 : vector<4x1x32x32xf32> to vector<4x32x32xf32>
    %16 = arith.maximumf %13, %15 : vector<4x32x32xf32>
    %17 = vector.shape_cast %16 : vector<4x32x32xf32> to vector<128x32xf32>
    %c0_14 = arith.constant 0 : index
    %c0_15 = arith.constant 0 : index
    %18 = vector.load %arg16[%c0_14, %c0_15] : memref<128x32xf32, #tpu.memory_space<vmem>>, vector<128x32xf32>
    tpu.vector_store %arg16[%c0_14, %c0_15], %17 {strides = array<i32>} : memref<128x32xf32, #tpu.memory_space<vmem>>, vector<128x32xf32>,
    %c0_16 = arith.constant 0 : index
    %c0_17 = arith.constant 0 : index
    %19 = tpu.strided_load %arg16[%c0_16, %c0_17] {strides = array<i32: 2, 1>} : memref<128x32xf32, #tpu.memory_space<vmem>>, vector<64x32xf32>
    %c1 = arith.constant 1 : index
    %c0_18 = arith.constant 0 : index
    %20 = tpu.strided_load %arg16[%c1, %c0_18] {strides = array<i32: 2, 1>} : memref<128x32xf32, #tpu.memory_space<vmem>>, vector<64x32xf32>
    %21 = arith.maximumf %19, %20 : vector<64x32xf32>
    %22 = vector.shape_cast %21 : vector<64x32xf32> to vector<4x16x32xf32>
    %c2 = arith.constant 2 : index
    %c2_19 = arith.constant 2 : index
    %c0_20 = arith.constant 0 : index
    %23 = vector.load %arg13[%c2, %c2_19, %c0_20] : memref<20x20x32xf32, #tpu.memory_space<vmem>>, vector<4x16x32xf32>
    tpu.vector_store %arg13[%c2, %c2_19, %c0_20], %22 {strides = array<i32>} : memref<20x20x32xf32, #tpu.memory_space<vmem>>, vector<4x16x32xf32>,
    %c0_21 = arith.constant 0 : index
    %c256 = arith.constant 256 : index
    %c0_22 = arith.constant 0 : index
    %24 = vector.load %arg1[%c0_21, %c256, %c0_22] : memref<1x1024x80xbf16, #tpu.memory_space<vmem>>, vector<1x256x80xbf16>
    %25 = vector.shape_cast %24 : vector<1x256x80xbf16> to vector<256x80xbf16>
    %c0_23 = arith.constant 0 : index
    %c0_24 = arith.constant 0 : index
    %26 = vector.load %arg2[%c0_23, %c0_24] : memref<80x32xbf16, #tpu.memory_space<vmem>>, vector<80x32xbf16>
    %cst_25 = arith.constant dense<0.000000e+00> : vector<256x32xf32>
    %27 = tpu.matmul %25, %26, %cst_25 {dimension_numbers = #tpu.dot_dimension_numbers<[1], [0], [0], [1], [0, 0, 1, 1], [], []>} : vector<256x80xbf16>, vector<80x32xbf16>, vector<256x32xf32> -> vector<256x32xf32>
    %28 = vector.broadcast %4 : vector<1x32xf32> to vector<256x32xf32>
    %29 = arith.addf %27, %28 : vector<256x32xf32>
    %30 = vector.shape_cast %29 : vector<256x32xf32> to vector<4x2x32x32xf32>
    %31 = vector.extract_strided_slice %30 {offsets = [0, 0, 0, 0], sizes = [4, 1, 32, 32], strides = [1, 1, 1, 1]} : vector<4x2x32x32xf32> to vector<4x1x32x32xf32>
    %32 = vector.shape_cast %31 : vector<4x1x32x32xf32> to vector<4x32x32xf32>
    %33 = vector.extract_strided_slice %30 {offsets = [0, 1, 0, 0], sizes = [4, 1, 32, 32], strides = [1, 1, 1, 1]} : vector<4x2x32x32xf32> to vector<4x1x32x32xf32>
    %34 = vector.shape_cast %33 : vector<4x1x32x32xf32> to vector<4x32x32xf32>
    %35 = arith.maximumf %32, %34 : vector<4x32x32xf32>
    %36 = vector.shape_cast %35 : vector<4x32x32xf32> to vector<128x32xf32>
    %c0_26 = arith.constant 0 : index
    %c0_27 = arith.constant 0 : index
    %37 = vector.load %arg16[%c0_26, %c0_27] : memref<128x32xf32, #tpu.memory_space<vmem>>, vector<128x32xf32>
    tpu.vector_store %arg16[%c0_26, %c0_27], %36 {strides = array<i32>} : memref<128x32xf32, #tpu.memory_space<vmem>>, vector<128x32xf32>,
    %c0_28 = arith.constant 0 : index
    %c0_29 = arith.constant 0 : index
    %38 = tpu.strided_load %arg16[%c0_28, %c0_29] {strides = array<i32: 2, 1>} : memref<128x32xf32, #tpu.memory_space<vmem>>, vector<64x32xf32>
    %c1_30 = arith.constant 1 : index
    %c0_31 = arith.constant 0 : index
    %39 = tpu.strided_load %arg16[%c1_30, %c0_31] {strides = array<i32: 2, 1>} : memref<128x32xf32, #tpu.memory_space<vmem>>, vector<64x32xf32>
    %40 = arith.maximumf %38, %39 : vector<64x32xf32>
    %41 = vector.shape_cast %40 : vector<64x32xf32> to vector<4x16x32xf32>
    %c6 = arith.constant 6 : index
    %c2_32 = arith.constant 2 : index
    %c0_33 = arith.constant 0 : index
    %42 = vector.load %arg13[%c6, %c2_32, %c0_33] : memref<20x20x32xf32, #tpu.memory_space<vmem>>, vector<4x16x32xf32>
    tpu.vector_store %arg13[%c6, %c2_32, %c0_33], %41 {strides = array<i32>} : memref<20x20x32xf32, #tpu.memory_space<vmem>>, vector<4x16x32xf32>,
    %c0_34 = arith.constant 0 : index
    %c512 = arith.constant 512 : index
    %c0_35 = arith.constant 0 : index
    %43 = vector.load %arg1[%c0_34, %c512, %c0_35] : memref<1x1024x80xbf16, #tpu.memory_space<vmem>>, vector<1x256x80xbf16>
    %44 = vector.shape_cast %43 : vector<1x256x80xbf16> to vector<256x80xbf16>
    %c0_36 = arith.constant 0 : index
    %c0_37 = arith.constant 0 : index
    %45 = vector.load %arg2[%c0_36, %c0_37] : memref<80x32xbf16, #tpu.memory_space<vmem>>, vector<80x32xbf16>
    %cst_38 = arith.constant dense<0.000000e+00> : vector<256x32xf32>
    %46 = tpu.matmul %44, %45, %cst_38 {dimension_numbers = #tpu.dot_dimension_numbers<[1], [0], [0], [1], [0, 0, 1, 1], [], []>} : vector<256x80xbf16>, vector<80x32xbf16>, vector<256x32xf32> -> vector<256x32xf32>
    %47 = vector.broadcast %4 : vector<1x32xf32> to vector<256x32xf32>
    %48 = arith.addf %46, %47 : vector<256x32xf32>
    %49 = vector.shape_cast %48 : vector<256x32xf32> to vector<4x2x32x32xf32>
    %50 = vector.extract_strided_slice %49 {offsets = [0, 0, 0, 0], sizes = [4, 1, 32, 32], strides = [1, 1, 1, 1]} : vector<4x2x32x32xf32> to vector<4x1x32x32xf32>
    %51 = vector.shape_cast %50 : vector<4x1x32x32xf32> to vector<4x32x32xf32>
    %52 = vector.extract_strided_slice %49 {offsets = [0, 1, 0, 0], sizes = [4, 1, 32, 32], strides = [1, 1, 1, 1]} : vector<4x2x32x32xf32> to vector<4x1x32x32xf32>
    %53 = vector.shape_cast %52 : vector<4x1x32x32xf32> to vector<4x32x32xf32>
    %54 = arith.maximumf %51, %53 : vector<4x32x32xf32>
    %55 = vector.shape_cast %54 : vector<4x32x32xf32> to vector<128x32xf32>
    %c0_39 = arith.constant 0 : index
    %c0_40 = arith.constant 0 : index
    %56 = vector.load %arg16[%c0_39, %c0_40] : memref<128x32xf32, #tpu.memory_space<vmem>>, vector<128x32xf32>
    tpu.vector_store %arg16[%c0_39, %c0_40], %55 {strides = array<i32>} : memref<128x32xf32, #tpu.memory_space<vmem>>, vector<128x32xf32>,
    %c0_41 = arith.constant 0 : index
    %c0_42 = arith.constant 0 : index
    %57 = tpu.strided_load %arg16[%c0_41, %c0_42] {strides = array<i32: 2, 1>} : memref<128x32xf32, #tpu.memory_space<vmem>>, vector<64x32xf32>
    %c1_43 = arith.constant 1 : index
    %c0_44 = arith.constant 0 : index
    %58 = tpu.strided_load %arg16[%c1_43, %c0_44] {strides = array<i32: 2, 1>} : memref<128x32xf32, #tpu.memory_space<vmem>>, vector<64x32xf32>
    %59 = arith.maximumf %57, %58 : vector<64x32xf32>
    %60 = vector.shape_cast %59 : vector<64x32xf32> to vector<4x16x32xf32>
    %c10 = arith.constant 10 : index
    %c2_45 = arith.constant 2 : index
    %c0_46 = arith.constant 0 : index
    %61 = vector.load %arg13[%c10, %c2_45, %c0_46] : memref<20x20x32xf32, #tpu.memory_space<vmem>>, vector<4x16x32xf32>
    tpu.vector_store %arg13[%c10, %c2_45, %c0_46], %60 {strides = array<i32>} : memref<20x20x32xf32, #tpu.memory_space<vmem>>, vector<4x16x32xf32>,
    %c0_47 = arith.constant 0 : index
    %c768 = arith.constant 768 : index
    %c0_48 = arith.constant 0 : index
    %62 = vector.load %arg1[%c0_47, %c768, %c0_48] : memref<1x1024x80xbf16, #tpu.memory_space<vmem>>, vector<1x256x80xbf16>
    %63 = vector.shape_cast %62 : vector<1x256x80xbf16> to vector<256x80xbf16>
    %c0_49 = arith.constant 0 : index
    %c0_50 = arith.constant 0 : index
    %64 = vector.load %arg2[%c0_49, %c0_50] : memref<80x32xbf16, #tpu.memory_space<vmem>>, vector<80x32xbf16>
    %cst_51 = arith.constant dense<0.000000e+00> : vector<256x32xf32>
    %65 = tpu.matmul %63, %64, %cst_51 {dimension_numbers = #tpu.dot_dimension_numbers<[1], [0], [0], [1], [0, 0, 1, 1], [], []>} : vector<256x80xbf16>, vector<80x32xbf16>, vector<256x32xf32> -> vector<256x32xf32>
    %66 = vector.broadcast %4 : vector<1x32xf32> to vector<256x32xf32>
    %67 = arith.addf %65, %66 : vector<256x32xf32>
    %68 = vector.shape_cast %67 : vector<256x32xf32> to vector<4x2x32x32xf32>
    %69 = vector.extract_strided_slice %68 {offsets = [0, 0, 0, 0], sizes = [4, 1, 32, 32], strides = [1, 1, 1, 1]} : vector<4x2x32x32xf32> to vector<4x1x32x32xf32>
    %70 = vector.shape_cast %69 : vector<4x1x32x32xf32> to vector<4x32x32xf32>
    %71 = vector.extract_strided_slice %68 {offsets = [0, 1, 0, 0], sizes = [4, 1, 32, 32], strides = [1, 1, 1, 1]} : vector<4x2x32x32xf32> to vector<4x1x32x32xf32>
    %72 = vector.shape_cast %71 : vector<4x1x32x32xf32> to vector<4x32x32xf32>
    %73 = arith.maximumf %70, %72 : vector<4x32x32xf32>
    %74 = vector.shape_cast %73 : vector<4x32x32xf32> to vector<128x32xf32>
    %c0_52 = arith.constant 0 : index
    %c0_53 = arith.constant 0 : index
    %75 = vector.load %arg16[%c0_52, %c0_53] : memref<128x32xf32, #tpu.memory_space<vmem>>, vector<128x32xf32>
    tpu.vector_store %arg16[%c0_52, %c0_53], %74 {strides = array<i32>} : memref<128x32xf32, #tpu.memory_space<vmem>>, vector<128x32xf32>,
    %c0_54 = arith.constant 0 : index
    %c0_55 = arith.constant 0 : index
    %76 = tpu.strided_load %arg16[%c0_54, %c0_55] {strides = array<i32: 2, 1>} : memref<128x32xf32, #tpu.memory_space<vmem>>, vector<64x32xf32>
    %c1_56 = arith.constant 1 : index
    %c0_57 = arith.constant 0 : index
    %77 = tpu.strided_load %arg16[%c1_56, %c0_57] {strides = array<i32: 2, 1>} : memref<128x32xf32, #tpu.memory_space<vmem>>, vector<64x32xf32>
    %78 = arith.maximumf %76, %77 : vector<64x32xf32>
    %79 = vector.shape_cast %78 : vector<64x32xf32> to vector<4x16x32xf32>
    %c14 = arith.constant 14 : index
    %c2_58 = arith.constant 2 : index
    %c0_59 = arith.constant 0 : index
    %80 = vector.load %arg13[%c14, %c2_58, %c0_59] : memref<20x20x32xf32, #tpu.memory_space<vmem>>, vector<4x16x32xf32>
    tpu.vector_store %arg13[%c14, %c2_58, %c0_59], %79 {strides = array<i32>} : memref<20x20x32xf32, #tpu.memory_space<vmem>>, vector<4x16x32xf32>,
    %c0_60 = arith.constant 0 : index
    %c0_61 = arith.constant 0 : index
    %c0_62 = arith.constant 0 : index
    %81 = vector.load %arg13[%c0_60, %c0_61, %c0_62] : memref<20x20x32xf32, #tpu.memory_space<vmem>>, vector<16x16x32xf32>
    %82 = vector.shape_cast %81 : vector<16x16x32xf32> to vector<256x32xf32>
    %83 = arith.truncf %82 : vector<256x32xf32> to vector<256x32xbf16>
    %c0_63 = arith.constant 0 : index
    %c0_64 = arith.constant 0 : index
    %84 = vector.load %arg15[%c0_63, %c0_64] : memref<256x800xbf16, #tpu.memory_space<vmem>>, vector<256x32xbf16>
    tpu.vector_store %arg15[%c0_63, %c0_64], %83 {strides = array<i32>} : memref<256x800xbf16, #tpu.memory_space<vmem>>, vector<256x32xbf16>,
    %c0_65 = arith.constant 0 : index
    %c1_66 = arith.constant 1 : index
    %c0_67 = arith.constant 0 : index
    %85 = vector.load %arg13[%c0_65, %c1_66, %c0_67] : memref<20x20x32xf32, #tpu.memory_space<vmem>>, vector<16x16x32xf32>
    %86 = vector.shape_cast %85 : vector<16x16x32xf32> to vector<256x32xf32>
    %87 = arith.truncf %86 : vector<256x32xf32> to vector<256x32xbf16>
    %c0_68 = arith.constant 0 : index
    %c32 = arith.constant 32 : index
    %88 = vector.load %arg15[%c0_68, %c32] : memref<256x800xbf16, #tpu.memory_space<vmem>>, vector<256x32xbf16>
    tpu.vector_store %arg15[%c0_68, %c32], %87 {strides = array<i32>} : memref<256x800xbf16, #tpu.memory_space<vmem>>, vector<256x32xbf16>,
    %c0_69 = arith.constant 0 : index
    %c2_70 = arith.constant 2 : index
    %c0_71 = arith.constant 0 : index
    %89 = vector.load %arg13[%c0_69, %c2_70, %c0_71] : memref<20x20x32xf32, #tpu.memory_space<vmem>>, vector<16x16x32xf32>
    %90 = vector.shape_cast %89 : vector<16x16x32xf32> to vector<256x32xf32>
    %91 = arith.truncf %90 : vector<256x32xf32> to vector<256x32xbf16>
    %c0_72 = arith.constant 0 : index
    %c64 = arith.constant 64 : index
    %92 = vector.load %arg15[%c0_72, %c64] : memref<256x800xbf16, #tpu.memory_space<vmem>>, vector<256x32xbf16>
    tpu.vector_store %arg15[%c0_72, %c64], %91 {strides = array<i32>} : memref<256x800xbf16, #tpu.memory_space<vmem>>, vector<256x32xbf16>,
    %c0_73 = arith.constant 0 : index
    %c3 = arith.constant 3 : index
    %c0_74 = arith.constant 0 : index
    %93 = vector.load %arg13[%c0_73, %c3, %c0_74] : memref<20x20x32xf32, #tpu.memory_space<vmem>>, vector<16x16x32xf32>
    %94 = vector.shape_cast %93 : vector<16x16x32xf32> to vector<256x32xf32>
    %95 = arith.truncf %94 : vector<256x32xf32> to vector<256x32xbf16>
    %c0_75 = arith.constant 0 : index
    %c96 = arith.constant 96 : index
    %96 = vector.load %arg15[%c0_75, %c96] : memref<256x800xbf16, #tpu.memory_space<vmem>>, vector<256x32xbf16>
    tpu.vector_store %arg15[%c0_75, %c96], %95 {strides = array<i32>} : memref<256x800xbf16, #tpu.memory_space<vmem>>, vector<256x32xbf16>,
    %c0_76 = arith.constant 0 : index
    %c4 = arith.constant 4 : index
    %c0_77 = arith.constant 0 : index
    %97 = vector.load %arg13[%c0_76, %c4, %c0_77] : memref<20x20x32xf32, #tpu.memory_space<vmem>>, vector<16x16x32xf32>
    %98 = vector.shape_cast %97 : vector<16x16x32xf32> to vector<256x32xf32>
    %99 = arith.truncf %98 : vector<256x32xf32> to vector<256x32xbf16>
    %c0_78 = arith.constant 0 : index
    %c128 = arith.constant 128 : index
    %100 = vector.load %arg15[%c0_78, %c128] : memref<256x800xbf16, #tpu.memory_space<vmem>>, vector<256x32xbf16>
    tpu.vector_store %arg15[%c0_78, %c128], %99 {strides = array<i32>} : memref<256x800xbf16, #tpu.memory_space<vmem>>, vector<256x32xbf16>,
    %c1_79 = arith.constant 1 : index
    %c0_80 = arith.constant 0 : index
    %c0_81 = arith.constant 0 : index
    %101 = vector.load %arg13[%c1_79, %c0_80, %c0_81] : memref<20x20x32xf32, #tpu.memory_space<vmem>>, vector<16x16x32xf32>
    %102 = vector.shape_cast %101 : vector<16x16x32xf32> to vector<256x32xf32>
    %103 = arith.truncf %102 : vector<256x32xf32> to vector<256x32xbf16>
    %c0_82 = arith.constant 0 : index
    %c160 = arith.constant 160 : index
    %104 = vector.load %arg15[%c0_82, %c160] : memref<256x800xbf16, #tpu.memory_space<vmem>>, vector<256x32xbf16>
    tpu.vector_store %arg15[%c0_82, %c160], %103 {strides = array<i32>} : memref<256x800xbf16, #tpu.memory_space<vmem>>, vector<256x32xbf16>,
    %c1_83 = arith.constant 1 : index
    %c1_84 = arith.constant 1 : index
    %c0_85 = arith.constant 0 : index
    %105 = vector.load %arg13[%c1_83, %c1_84, %c0_85] : memref<20x20x32xf32, #tpu.memory_space<vmem>>, vector<16x16x32xf32>
    %106 = vector.shape_cast %105 : vector<16x16x32xf32> to vector<256x32xf32>
    %107 = arith.truncf %106 : vector<256x32xf32> to vector<256x32xbf16>
    %c0_86 = arith.constant 0 : index
    %c192 = arith.constant 192 : index
    %108 = vector.load %arg15[%c0_86, %c192] : memref<256x800xbf16, #tpu.memory_space<vmem>>, vector<256x32xbf16>
    tpu.vector_store %arg15[%c0_86, %c192], %107 {strides = array<i32>} : memref<256x800xbf16, #tpu.memory_space<vmem>>, vector<256x32xbf16>,
    %c1_87 = arith.constant 1 : index
    %c2_88 = arith.constant 2 : index
    %c0_89 = arith.constant 0 : index
    %109 = vector.load %arg13[%c1_87, %c2_88, %c0_89] : memref<20x20x32xf32, #tpu.memory_space<vmem>>, vector<16x16x32xf32>
    %110 = vector.shape_cast %109 : vector<16x16x32xf32> to vector<256x32xf32>
    %111 = arith.truncf %110 : vector<256x32xf32> to vector<256x32xbf16>
    %c0_90 = arith.constant 0 : index
    %c224 = arith.constant 224 : index
    %112 = vector.load %arg15[%c0_90, %c224] : memref<256x800xbf16, #tpu.memory_space<vmem>>, vector<256x32xbf16>
    tpu.vector_store %arg15[%c0_90, %c224], %111 {strides = array<i32>} : memref<256x800xbf16, #tpu.memory_space<vmem>>, vector<256x32xbf16>,
    %c1_91 = arith.constant 1 : index
    %c3_92 = arith.constant 3 : index
    %c0_93 = arith.constant 0 : index
    %113 = vector.load %arg13[%c1_91, %c3_92, %c0_93] : memref<20x20x32xf32, #tpu.memory_space<vmem>>, vector<16x16x32xf32>
    %114 = vector.shape_cast %113 : vector<16x16x32xf32> to vector<256x32xf32>
    %115 = arith.truncf %114 : vector<256x32xf32> to vector<256x32xbf16>
    %c0_94 = arith.constant 0 : index
    %c256_95 = arith.constant 256 : index
    %116 = vector.load %arg15[%c0_94, %c256_95] : memref<256x800xbf16, #tpu.memory_space<vmem>>, vector<256x32xbf16>
    tpu.vector_store %arg15[%c0_94, %c256_95], %115 {strides = array<i32>} : memref<256x800xbf16, #tpu.memory_space<vmem>>, vector<256x32xbf16>,
    %c1_96 = arith.constant 1 : index
    %c4_97 = arith.constant 4 : index
    %c0_98 = arith.constant 0 : index
    %117 = vector.load %arg13[%c1_96, %c4_97, %c0_98] : memref<20x20x32xf32, #tpu.memory_space<vmem>>, vector<16x16x32xf32>
    %118 = vector.shape_cast %117 : vector<16x16x32xf32> to vector<256x32xf32>
    %119 = arith.truncf %118 : vector<256x32xf32> to vector<256x32xbf16>
    %c0_99 = arith.constant 0 : index
    %c288 = arith.constant 288 : index
    %120 = vector.load %arg15[%c0_99, %c288] : memref<256x800xbf16, #tpu.memory_space<vmem>>, vector<256x32xbf16>
    tpu.vector_store %arg15[%c0_99, %c288], %119 {strides = array<i32>} : memref<256x800xbf16, #tpu.memory_space<vmem>>, vector<256x32xbf16>,
    %c2_100 = arith.constant 2 : index
    %c0_101 = arith.constant 0 : index
    %c0_102 = arith.constant 0 : index
    %121 = vector.load %arg13[%c2_100, %c0_101, %c0_102] : memref<20x20x32xf32, #tpu.memory_space<vmem>>, vector<16x16x32xf32>
    %122 = vector.shape_cast %121 : vector<16x16x32xf32> to vector<256x32xf32>
    %123 = arith.truncf %122 : vector<256x32xf32> to vector<256x32xbf16>
    %c0_103 = arith.constant 0 : index
    %c320 = arith.constant 320 : index
    %124 = vector.load %arg15[%c0_103, %c320] : memref<256x800xbf16, #tpu.memory_space<vmem>>, vector<256x32xbf16>
    tpu.vector_store %arg15[%c0_103, %c320], %123 {strides = array<i32>} : memref<256x800xbf16, #tpu.memory_space<vmem>>, vector<256x32xbf16>,
    %c2_104 = arith.constant 2 : index
    %c1_105 = arith.constant 1 : index
    %c0_106 = arith.constant 0 : index
    %125 = vector.load %arg13[%c2_104, %c1_105, %c0_106] : memref<20x20x32xf32, #tpu.memory_space<vmem>>, vector<16x16x32xf32>
    %126 = vector.shape_cast %125 : vector<16x16x32xf32> to vector<256x32xf32>
    %127 = arith.truncf %126 : vector<256x32xf32> to vector<256x32xbf16>
    %c0_107 = arith.constant 0 : index
    %c352 = arith.constant 352 : index
    %128 = vector.load %arg15[%c0_107, %c352] : memref<256x800xbf16, #tpu.memory_space<vmem>>, vector<256x32xbf16>
    tpu.vector_store %arg15[%c0_107, %c352], %127 {strides = array<i32>} : memref<256x800xbf16, #tpu.memory_space<vmem>>, vector<256x32xbf16>,
    %c2_108 = arith.constant 2 : index
    %c2_109 = arith.constant 2 : index
    %c0_110 = arith.constant 0 : index
    %129 = vector.load %arg13[%c2_108, %c2_109, %c0_110] : memref<20x20x32xf32, #tpu.memory_space<vmem>>, vector<16x16x32xf32>
    %130 = vector.shape_cast %129 : vector<16x16x32xf32> to vector<256x32xf32>
    %131 = arith.truncf %130 : vector<256x32xf32> to vector<256x32xbf16>
    %c0_111 = arith.constant 0 : index
    %c384 = arith.constant 384 : index
    %132 = vector.load %arg15[%c0_111, %c384] : memref<256x800xbf16, #tpu.memory_space<vmem>>, vector<256x32xbf16>
    tpu.vector_store %arg15[%c0_111, %c384], %131 {strides = array<i32>} : memref<256x800xbf16, #tpu.memory_space<vmem>>, vector<256x32xbf16>,
    %c2_112 = arith.constant 2 : index
    %c3_113 = arith.constant 3 : index
    %c0_114 = arith.constant 0 : index
    %133 = vector.load %arg13[%c2_112, %c3_113, %c0_114] : memref<20x20x32xf32, #tpu.memory_space<vmem>>, vector<16x16x32xf32>
    %134 = vector.shape_cast %133 : vector<16x16x32xf32> to vector<256x32xf32>
    %135 = arith.truncf %134 : vector<256x32xf32> to vector<256x32xbf16>
    %c0_115 = arith.constant 0 : index
    %c416 = arith.constant 416 : index
    %136 = vector.load %arg15[%c0_115, %c416] : memref<256x800xbf16, #tpu.memory_space<vmem>>, vector<256x32xbf16>
    tpu.vector_store %arg15[%c0_115, %c416], %135 {strides = array<i32>} : memref<256x800xbf16, #tpu.memory_space<vmem>>, vector<256x32xbf16>,
    %c2_116 = arith.constant 2 : index
    %c4_117 = arith.constant 4 : index
    %c0_118 = arith.constant 0 : index
    %137 = vector.load %arg13[%c2_116, %c4_117, %c0_118] : memref<20x20x32xf32, #tpu.memory_space<vmem>>, vector<16x16x32xf32>
    %138 = vector.shape_cast %137 : vector<16x16x32xf32> to vector<256x32xf32>
    %139 = arith.truncf %138 : vector<256x32xf32> to vector<256x32xbf16>
    %c0_119 = arith.constant 0 : index
    %c448 = arith.constant 448 : index
    %140 = vector.load %arg15[%c0_119, %c448] : memref<256x800xbf16, #tpu.memory_space<vmem>>, vector<256x32xbf16>
    tpu.vector_store %arg15[%c0_119, %c448], %139 {strides = array<i32>} : memref<256x800xbf16, #tpu.memory_space<vmem>>, vector<256x32xbf16>,
    %c3_120 = arith.constant 3 : index
    %c0_121 = arith.constant 0 : index
    %c0_122 = arith.constant 0 : index
    %141 = vector.load %arg13[%c3_120, %c0_121, %c0_122] : memref<20x20x32xf32, #tpu.memory_space<vmem>>, vector<16x16x32xf32>
    %142 = vector.shape_cast %141 : vector<16x16x32xf32> to vector<256x32xf32>
    %143 = arith.truncf %142 : vector<256x32xf32> to vector<256x32xbf16>
    %c0_123 = arith.constant 0 : index
    %c480 = arith.constant 480 : index
    %144 = vector.load %arg15[%c0_123, %c480] : memref<256x800xbf16, #tpu.memory_space<vmem>>, vector<256x32xbf16>
    tpu.vector_store %arg15[%c0_123, %c480], %143 {strides = array<i32>} : memref<256x800xbf16, #tpu.memory_space<vmem>>, vector<256x32xbf16>,
    %c3_124 = arith.constant 3 : index
    %c1_125 = arith.constant 1 : index
    %c0_126 = arith.constant 0 : index
    %145 = vector.load %arg13[%c3_124, %c1_125, %c0_126] : memref<20x20x32xf32, #tpu.memory_space<vmem>>, vector<16x16x32xf32>
    %146 = vector.shape_cast %145 : vector<16x16x32xf32> to vector<256x32xf32>
    %147 = arith.truncf %146 : vector<256x32xf32> to vector<256x32xbf16>
    %c0_127 = arith.constant 0 : index
    %c512_128 = arith.constant 512 : index
    %148 = vector.load %arg15[%c0_127, %c512_128] : memref<256x800xbf16, #tpu.memory_space<vmem>>, vector<256x32xbf16>
    tpu.vector_store %arg15[%c0_127, %c512_128], %147 {strides = array<i32>} : memref<256x800xbf16, #tpu.memory_space<vmem>>, vector<256x32xbf16>,
    %c3_129 = arith.constant 3 : index
    %c2_130 = arith.constant 2 : index
    %c0_131 = arith.constant 0 : index
    %149 = vector.load %arg13[%c3_129, %c2_130, %c0_131] : memref<20x20x32xf32, #tpu.memory_space<vmem>>, vector<16x16x32xf32>
    %150 = vector.shape_cast %149 : vector<16x16x32xf32> to vector<256x32xf32>
    %151 = arith.truncf %150 : vector<256x32xf32> to vector<256x32xbf16>
    %c0_132 = arith.constant 0 : index
    %c544 = arith.constant 544 : index
    %152 = vector.load %arg15[%c0_132, %c544] : memref<256x800xbf16, #tpu.memory_space<vmem>>, vector<256x32xbf16>
    tpu.vector_store %arg15[%c0_132, %c544], %151 {strides = array<i32>} : memref<256x800xbf16, #tpu.memory_space<vmem>>, vector<256x32xbf16>,
    %c3_133 = arith.constant 3 : index
    %c3_134 = arith.constant 3 : index
    %c0_135 = arith.constant 0 : index
    %153 = vector.load %arg13[%c3_133, %c3_134, %c0_135] : memref<20x20x32xf32, #tpu.memory_space<vmem>>, vector<16x16x32xf32>
    %154 = vector.shape_cast %153 : vector<16x16x32xf32> to vector<256x32xf32>
    %155 = arith.truncf %154 : vector<256x32xf32> to vector<256x32xbf16>
    %c0_136 = arith.constant 0 : index
    %c576 = arith.constant 576 : index
    %156 = vector.load %arg15[%c0_136, %c576] : memref<256x800xbf16, #tpu.memory_space<vmem>>, vector<256x32xbf16>
    tpu.vector_store %arg15[%c0_136, %c576], %155 {strides = array<i32>} : memref<256x800xbf16, #tpu.memory_space<vmem>>, vector<256x32xbf16>,
    %c3_137 = arith.constant 3 : index
    %c4_138 = arith.constant 4 : index
    %c0_139 = arith.constant 0 : index
    %157 = vector.load %arg13[%c3_137, %c4_138, %c0_139] : memref<20x20x32xf32, #tpu.memory_space<vmem>>, vector<16x16x32xf32>
    %158 = vector.shape_cast %157 : vector<16x16x32xf32> to vector<256x32xf32>
    %159 = arith.truncf %158 : vector<256x32xf32> to vector<256x32xbf16>
    %c0_140 = arith.constant 0 : index
    %c608 = arith.constant 608 : index
    %160 = vector.load %arg15[%c0_140, %c608] : memref<256x800xbf16, #tpu.memory_space<vmem>>, vector<256x32xbf16>
    tpu.vector_store %arg15[%c0_140, %c608], %159 {strides = array<i32>} : memref<256x800xbf16, #tpu.memory_space<vmem>>, vector<256x32xbf16>,
    %c4_141 = arith.constant 4 : index
    %c0_142 = arith.constant 0 : index
    %c0_143 = arith.constant 0 : index
    %161 = vector.load %arg13[%c4_141, %c0_142, %c0_143] : memref<20x20x32xf32, #tpu.memory_space<vmem>>, vector<16x16x32xf32>
    %162 = vector.shape_cast %161 : vector<16x16x32xf32> to vector<256x32xf32>
    %163 = arith.truncf %162 : vector<256x32xf32> to vector<256x32xbf16>
    %c0_144 = arith.constant 0 : index
    %c640 = arith.constant 640 : index
    %164 = vector.load %arg15[%c0_144, %c640] : memref<256x800xbf16, #tpu.memory_space<vmem>>, vector<256x32xbf16>
    tpu.vector_store %arg15[%c0_144, %c640], %163 {strides = array<i32>} : memref<256x800xbf16, #tpu.memory_space<vmem>>, vector<256x32xbf16>,
    %c4_145 = arith.constant 4 : index
    %c1_146 = arith.constant 1 : index
    %c0_147 = arith.constant 0 : index
    %165 = vector.load %arg13[%c4_145, %c1_146, %c0_147] : memref<20x20x32xf32, #tpu.memory_space<vmem>>, vector<16x16x32xf32>
    %166 = vector.shape_cast %165 : vector<16x16x32xf32> to vector<256x32xf32>
    %167 = arith.truncf %166 : vector<256x32xf32> to vector<256x32xbf16>
    %c0_148 = arith.constant 0 : index
    %c672 = arith.constant 672 : index
    %168 = vector.load %arg15[%c0_148, %c672] : memref<256x800xbf16, #tpu.memory_space<vmem>>, vector<256x32xbf16>
    tpu.vector_store %arg15[%c0_148, %c672], %167 {strides = array<i32>} : memref<256x800xbf16, #tpu.memory_space<vmem>>, vector<256x32xbf16>,
    %c4_149 = arith.constant 4 : index
    %c2_150 = arith.constant 2 : index
    %c0_151 = arith.constant 0 : index
    %169 = vector.load %arg13[%c4_149, %c2_150, %c0_151] : memref<20x20x32xf32, #tpu.memory_space<vmem>>, vector<16x16x32xf32>
    %170 = vector.shape_cast %169 : vector<16x16x32xf32> to vector<256x32xf32>
    %171 = arith.truncf %170 : vector<256x32xf32> to vector<256x32xbf16>
    %c0_152 = arith.constant 0 : index
    %c704 = arith.constant 704 : index
    %172 = vector.load %arg15[%c0_152, %c704] : memref<256x800xbf16, #tpu.memory_space<vmem>>, vector<256x32xbf16>
    tpu.vector_store %arg15[%c0_152, %c704], %171 {strides = array<i32>} : memref<256x800xbf16, #tpu.memory_space<vmem>>, vector<256x32xbf16>,
    %c4_153 = arith.constant 4 : index
    %c3_154 = arith.constant 3 : index
    %c0_155 = arith.constant 0 : index
    %173 = vector.load %arg13[%c4_153, %c3_154, %c0_155] : memref<20x20x32xf32, #tpu.memory_space<vmem>>, vector<16x16x32xf32>
    %174 = vector.shape_cast %173 : vector<16x16x32xf32> to vector<256x32xf32>
    %175 = arith.truncf %174 : vector<256x32xf32> to vector<256x32xbf16>
    %c0_156 = arith.constant 0 : index
    %c736 = arith.constant 736 : index
    %176 = vector.load %arg15[%c0_156, %c736] : memref<256x800xbf16, #tpu.memory_space<vmem>>, vector<256x32xbf16>
    tpu.vector_store %arg15[%c0_156, %c736], %175 {strides = array<i32>} : memref<256x800xbf16, #tpu.memory_space<vmem>>, vector<256x32xbf16>,
    %c4_157 = arith.constant 4 : index
    %c4_158 = arith.constant 4 : index
    %c0_159 = arith.constant 0 : index
    %177 = vector.load %arg13[%c4_157, %c4_158, %c0_159] : memref<20x20x32xf32, #tpu.memory_space<vmem>>, vector<16x16x32xf32>
    %178 = vector.shape_cast %177 : vector<16x16x32xf32> to vector<256x32xf32>
    %179 = arith.truncf %178 : vector<256x32xf32> to vector<256x32xbf16>
    %c0_160 = arith.constant 0 : index
    %c768_161 = arith.constant 768 : index
    %180 = vector.load %arg15[%c0_160, %c768_161] : memref<256x800xbf16, #tpu.memory_space<vmem>>, vector<256x32xbf16>
    tpu.vector_store %arg15[%c0_160, %c768_161], %179 {strides = array<i32>} : memref<256x800xbf16, #tpu.memory_space<vmem>>, vector<256x32xbf16>,
    %c0_162 = arith.constant 0 : index
    %c0_163 = arith.constant 0 : index
    %181 = vector.load %arg15[%c0_162, %c0_163] : memref<256x800xbf16, #tpu.memory_space<vmem>>, vector<256x800xbf16>
    %c0_164 = arith.constant 0 : index
    %c0_165 = arith.constant 0 : index
    %182 = vector.load %arg4[%c0_164, %c0_165] : memref<800x32xbf16, #tpu.memory_space<vmem>>, vector<800x32xbf16>
    %cst_166 = arith.constant dense<0.000000e+00> : vector<256x32xf32>
    %183 = tpu.matmul %181, %182, %cst_166 {dimension_numbers = #tpu.dot_dimension_numbers<[1], [0], [0], [1], [0, 0, 1, 1], [], []>} : vector<256x800xbf16>, vector<800x32xbf16>, vector<256x32xf32> -> vector<256x32xf32>
    %c0_167 = arith.constant 0 : index
    %c0_168 = arith.constant 0 : index
    %184 = vector.load %arg5[%c0_167, %c0_168] : memref<1x32xf32, #tpu.memory_space<vmem>>, vector<1x32xf32>
    %185 = vector.broadcast %184 : vector<1x32xf32> to vector<256x32xf32>
    %186 = arith.addf %183, %185 : vector<256x32xf32>
    %187 = vector.shape_cast %186 : vector<256x32xf32> to vector<8x2x16x32xf32>
    %188 = vector.extract_strided_slice %187 {offsets = [0, 0, 0, 0], sizes = [8, 1, 16, 32], strides = [1, 1, 1, 1]} : vector<8x2x16x32xf32> to vector<8x1x16x32xf32>
    %189 = vector.shape_cast %188 : vector<8x1x16x32xf32> to vector<8x16x32xf32>
    %190 = vector.extract_strided_slice %187 {offsets = [0, 1, 0, 0], sizes = [8, 1, 16, 32], strides = [1, 1, 1, 1]} : vector<8x2x16x32xf32> to vector<8x1x16x32xf32>
    %191 = vector.shape_cast %190 : vector<8x1x16x32xf32> to vector<8x16x32xf32>
    %192 = arith.maximumf %189, %191 : vector<8x16x32xf32>
    %193 = vector.shape_cast %192 : vector<8x16x32xf32> to vector<128x32xf32>
    %c0_169 = arith.constant 0 : index
    %c0_170 = arith.constant 0 : index
    %194 = vector.load %arg16[%c0_169, %c0_170] : memref<128x32xf32, #tpu.memory_space<vmem>>, vector<128x32xf32>
    tpu.vector_store %arg16[%c0_169, %c0_170], %193 {strides = array<i32>} : memref<128x32xf32, #tpu.memory_space<vmem>>, vector<128x32xf32>,
    %c0_171 = arith.constant 0 : index
    %c0_172 = arith.constant 0 : index
    %195 = tpu.strided_load %arg16[%c0_171, %c0_172] {strides = array<i32: 2, 1>} : memref<128x32xf32, #tpu.memory_space<vmem>>, vector<64x32xf32>
    %c1_173 = arith.constant 1 : index
    %c0_174 = arith.constant 0 : index
    %196 = tpu.strided_load %arg16[%c1_173, %c0_174] {strides = array<i32: 2, 1>} : memref<128x32xf32, #tpu.memory_space<vmem>>, vector<64x32xf32>
    %197 = arith.maximumf %195, %196 : vector<64x32xf32>
    %198 = vector.shape_cast %197 : vector<64x32xf32> to vector<8x8x32xf32>
    %c2_175 = arith.constant 2 : index
    %c2_176 = arith.constant 2 : index
    %c0_177 = arith.constant 0 : index
    %199 = vector.load %arg14[%c2_175, %c2_176, %c0_177] : memref<12x12x32xf32, #tpu.memory_space<vmem>>, vector<8x8x32xf32>
    tpu.vector_store %arg14[%c2_175, %c2_176, %c0_177], %198 {strides = array<i32>} : memref<12x12x32xf32, #tpu.memory_space<vmem>>, vector<8x8x32xf32>,
    %c0_178 = arith.constant 0 : index
    %c0_179 = arith.constant 0 : index
    %c0_180 = arith.constant 0 : index
    %200 = vector.load %arg14[%c0_178, %c0_179, %c0_180] : memref<12x12x32xf32, #tpu.memory_space<vmem>>, vector<8x8x32xf32>
    %201 = vector.shape_cast %200 : vector<8x8x32xf32> to vector<64x32xf32>
    %202 = arith.truncf %201 : vector<64x32xf32> to vector<64x32xbf16>
    %c0_181 = arith.constant 0 : index
    %c0_182 = arith.constant 0 : index
    %203 = vector.load %arg15[%c0_181, %c0_182] : memref<256x800xbf16, #tpu.memory_space<vmem>>, vector<64x32xbf16>
    tpu.vector_store %arg15[%c0_181, %c0_182], %202 {strides = array<i32>} : memref<256x800xbf16, #tpu.memory_space<vmem>>, vector<64x32xbf16>,
    %c0_183 = arith.constant 0 : index
    %c1_184 = arith.constant 1 : index
    %c0_185 = arith.constant 0 : index
    %204 = vector.load %arg14[%c0_183, %c1_184, %c0_185] : memref<12x12x32xf32, #tpu.memory_space<vmem>>, vector<8x8x32xf32>
    %205 = vector.shape_cast %204 : vector<8x8x32xf32> to vector<64x32xf32>
    %206 = arith.truncf %205 : vector<64x32xf32> to vector<64x32xbf16>
    %c0_186 = arith.constant 0 : index
    %c32_187 = arith.constant 32 : index
    %207 = vector.load %arg15[%c0_186, %c32_187] : memref<256x800xbf16, #tpu.memory_space<vmem>>, vector<64x32xbf16>
    tpu.vector_store %arg15[%c0_186, %c32_187], %206 {strides = array<i32>} : memref<256x800xbf16, #tpu.memory_space<vmem>>, vector<64x32xbf16>,
    %c0_188 = arith.constant 0 : index
    %c2_189 = arith.constant 2 : index
    %c0_190 = arith.constant 0 : index
    %208 = vector.load %arg14[%c0_188, %c2_189, %c0_190] : memref<12x12x32xf32, #tpu.memory_space<vmem>>, vector<8x8x32xf32>
    %209 = vector.shape_cast %208 : vector<8x8x32xf32> to vector<64x32xf32>
    %210 = arith.truncf %209 : vector<64x32xf32> to vector<64x32xbf16>
    %c0_191 = arith.constant 0 : index
    %c64_192 = arith.constant 64 : index
    %211 = vector.load %arg15[%c0_191, %c64_192] : memref<256x800xbf16, #tpu.memory_space<vmem>>, vector<64x32xbf16>
    tpu.vector_store %arg15[%c0_191, %c64_192], %210 {strides = array<i32>} : memref<256x800xbf16, #tpu.memory_space<vmem>>, vector<64x32xbf16>,
    %c0_193 = arith.constant 0 : index
    %c3_194 = arith.constant 3 : index
    %c0_195 = arith.constant 0 : index
    %212 = vector.load %arg14[%c0_193, %c3_194, %c0_195] : memref<12x12x32xf32, #tpu.memory_space<vmem>>, vector<8x8x32xf32>
    %213 = vector.shape_cast %212 : vector<8x8x32xf32> to vector<64x32xf32>
    %214 = arith.truncf %213 : vector<64x32xf32> to vector<64x32xbf16>
    %c0_196 = arith.constant 0 : index
    %c96_197 = arith.constant 96 : index
    %215 = vector.load %arg15[%c0_196, %c96_197] : memref<256x800xbf16, #tpu.memory_space<vmem>>, vector<64x32xbf16>
    tpu.vector_store %arg15[%c0_196, %c96_197], %214 {strides = array<i32>} : memref<256x800xbf16, #tpu.memory_space<vmem>>, vector<64x32xbf16>,
    %c0_198 = arith.constant 0 : index
    %c4_199 = arith.constant 4 : index
    %c0_200 = arith.constant 0 : index
    %216 = vector.load %arg14[%c0_198, %c4_199, %c0_200] : memref<12x12x32xf32, #tpu.memory_space<vmem>>, vector<8x8x32xf32>
    %217 = vector.shape_cast %216 : vector<8x8x32xf32> to vector<64x32xf32>
    %218 = arith.truncf %217 : vector<64x32xf32> to vector<64x32xbf16>
    %c0_201 = arith.constant 0 : index
    %c128_202 = arith.constant 128 : index
    %219 = vector.load %arg15[%c0_201, %c128_202] : memref<256x800xbf16, #tpu.memory_space<vmem>>, vector<64x32xbf16>
    tpu.vector_store %arg15[%c0_201, %c128_202], %218 {strides = array<i32>} : memref<256x800xbf16, #tpu.memory_space<vmem>>, vector<64x32xbf16>,
    %c1_203 = arith.constant 1 : index
    %c0_204 = arith.constant 0 : index
    %c0_205 = arith.constant 0 : index
    %220 = vector.load %arg14[%c1_203, %c0_204, %c0_205] : memref<12x12x32xf32, #tpu.memory_space<vmem>>, vector<8x8x32xf32>
    %221 = vector.shape_cast %220 : vector<8x8x32xf32> to vector<64x32xf32>
    %222 = arith.truncf %221 : vector<64x32xf32> to vector<64x32xbf16>
    %c0_206 = arith.constant 0 : index
    %c160_207 = arith.constant 160 : index
    %223 = vector.load %arg15[%c0_206, %c160_207] : memref<256x800xbf16, #tpu.memory_space<vmem>>, vector<64x32xbf16>
    tpu.vector_store %arg15[%c0_206, %c160_207], %222 {strides = array<i32>} : memref<256x800xbf16, #tpu.memory_space<vmem>>, vector<64x32xbf16>,
    %c1_208 = arith.constant 1 : index
    %c1_209 = arith.constant 1 : index
    %c0_210 = arith.constant 0 : index
    %224 = vector.load %arg14[%c1_208, %c1_209, %c0_210] : memref<12x12x32xf32, #tpu.memory_space<vmem>>, vector<8x8x32xf32>
    %225 = vector.shape_cast %224 : vector<8x8x32xf32> to vector<64x32xf32>
    %226 = arith.truncf %225 : vector<64x32xf32> to vector<64x32xbf16>
    %c0_211 = arith.constant 0 : index
    %c192_212 = arith.constant 192 : index
    %227 = vector.load %arg15[%c0_211, %c192_212] : memref<256x800xbf16, #tpu.memory_space<vmem>>, vector<64x32xbf16>
    tpu.vector_store %arg15[%c0_211, %c192_212], %226 {strides = array<i32>} : memref<256x800xbf16, #tpu.memory_space<vmem>>, vector<64x32xbf16>,
    %c1_213 = arith.constant 1 : index
    %c2_214 = arith.constant 2 : index
    %c0_215 = arith.constant 0 : index
    %228 = vector.load %arg14[%c1_213, %c2_214, %c0_215] : memref<12x12x32xf32, #tpu.memory_space<vmem>>, vector<8x8x32xf32>
    %229 = vector.shape_cast %228 : vector<8x8x32xf32> to vector<64x32xf32>
    %230 = arith.truncf %229 : vector<64x32xf32> to vector<64x32xbf16>
    %c0_216 = arith.constant 0 : index
    %c224_217 = arith.constant 224 : index
    %231 = vector.load %arg15[%c0_216, %c224_217] : memref<256x800xbf16, #tpu.memory_space<vmem>>, vector<64x32xbf16>
    tpu.vector_store %arg15[%c0_216, %c224_217], %230 {strides = array<i32>} : memref<256x800xbf16, #tpu.memory_space<vmem>>, vector<64x32xbf16>,
    %c1_218 = arith.constant 1 : index
    %c3_219 = arith.constant 3 : index
    %c0_220 = arith.constant 0 : index
    %232 = vector.load %arg14[%c1_218, %c3_219, %c0_220] : memref<12x12x32xf32, #tpu.memory_space<vmem>>, vector<8x8x32xf32>
    %233 = vector.shape_cast %232 : vector<8x8x32xf32> to vector<64x32xf32>
    %234 = arith.truncf %233 : vector<64x32xf32> to vector<64x32xbf16>
    %c0_221 = arith.constant 0 : index
    %c256_222 = arith.constant 256 : index
    %235 = vector.load %arg15[%c0_221, %c256_222] : memref<256x800xbf16, #tpu.memory_space<vmem>>, vector<64x32xbf16>
    tpu.vector_store %arg15[%c0_221, %c256_222], %234 {strides = array<i32>} : memref<256x800xbf16, #tpu.memory_space<vmem>>, vector<64x32xbf16>,
    %c1_223 = arith.constant 1 : index
    %c4_224 = arith.constant 4 : index
    %c0_225 = arith.constant 0 : index
    %236 = vector.load %arg14[%c1_223, %c4_224, %c0_225] : memref<12x12x32xf32, #tpu.memory_space<vmem>>, vector<8x8x32xf32>
    %237 = vector.shape_cast %236 : vector<8x8x32xf32> to vector<64x32xf32>
    %238 = arith.truncf %237 : vector<64x32xf32> to vector<64x32xbf16>
    %c0_226 = arith.constant 0 : index
    %c288_227 = arith.constant 288 : index
    %239 = vector.load %arg15[%c0_226, %c288_227] : memref<256x800xbf16, #tpu.memory_space<vmem>>, vector<64x32xbf16>
    tpu.vector_store %arg15[%c0_226, %c288_227], %238 {strides = array<i32>} : memref<256x800xbf16, #tpu.memory_space<vmem>>, vector<64x32xbf16>,
    %c2_228 = arith.constant 2 : index
    %c0_229 = arith.constant 0 : index
    %c0_230 = arith.constant 0 : index
    %240 = vector.load %arg14[%c2_228, %c0_229, %c0_230] : memref<12x12x32xf32, #tpu.memory_space<vmem>>, vector<8x8x32xf32>
    %241 = vector.shape_cast %240 : vector<8x8x32xf32> to vector<64x32xf32>
    %242 = arith.truncf %241 : vector<64x32xf32> to vector<64x32xbf16>
    %c0_231 = arith.constant 0 : index
    %c320_232 = arith.constant 320 : index
    %243 = vector.load %arg15[%c0_231, %c320_232] : memref<256x800xbf16, #tpu.memory_space<vmem>>, vector<64x32xbf16>
    tpu.vector_store %arg15[%c0_231, %c320_232], %242 {strides = array<i32>} : memref<256x800xbf16, #tpu.memory_space<vmem>>, vector<64x32xbf16>,
    %c2_233 = arith.constant 2 : index
    %c1_234 = arith.constant 1 : index
    %c0_235 = arith.constant 0 : index
    %244 = vector.load %arg14[%c2_233, %c1_234, %c0_235] : memref<12x12x32xf32, #tpu.memory_space<vmem>>, vector<8x8x32xf32>
    %245 = vector.shape_cast %244 : vector<8x8x32xf32> to vector<64x32xf32>
    %246 = arith.truncf %245 : vector<64x32xf32> to vector<64x32xbf16>
    %c0_236 = arith.constant 0 : index
    %c352_237 = arith.constant 352 : index
    %247 = vector.load %arg15[%c0_236, %c352_237] : memref<256x800xbf16, #tpu.memory_space<vmem>>, vector<64x32xbf16>
    tpu.vector_store %arg15[%c0_236, %c352_237], %246 {strides = array<i32>} : memref<256x800xbf16, #tpu.memory_space<vmem>>, vector<64x32xbf16>,
    %c2_238 = arith.constant 2 : index
    %c2_239 = arith.constant 2 : index
    %c0_240 = arith.constant 0 : index
    %248 = vector.load %arg14[%c2_238, %c2_239, %c0_240] : memref<12x12x32xf32, #tpu.memory_space<vmem>>, vector<8x8x32xf32>
    %249 = vector.shape_cast %248 : vector<8x8x32xf32> to vector<64x32xf32>
    %250 = arith.truncf %249 : vector<64x32xf32> to vector<64x32xbf16>
    %c0_241 = arith.constant 0 : index
    %c384_242 = arith.constant 384 : index
    %251 = vector.load %arg15[%c0_241, %c384_242] : memref<256x800xbf16, #tpu.memory_space<vmem>>, vector<64x32xbf16>
    tpu.vector_store %arg15[%c0_241, %c384_242], %250 {strides = array<i32>} : memref<256x800xbf16, #tpu.memory_space<vmem>>, vector<64x32xbf16>,
    %c2_243 = arith.constant 2 : index
    %c3_244 = arith.constant 3 : index
    %c0_245 = arith.constant 0 : index
    %252 = vector.load %arg14[%c2_243, %c3_244, %c0_245] : memref<12x12x32xf32, #tpu.memory_space<vmem>>, vector<8x8x32xf32>
    %253 = vector.shape_cast %252 : vector<8x8x32xf32> to vector<64x32xf32>
    %254 = arith.truncf %253 : vector<64x32xf32> to vector<64x32xbf16>
    %c0_246 = arith.constant 0 : index
    %c416_247 = arith.constant 416 : index
    %255 = vector.load %arg15[%c0_246, %c416_247] : memref<256x800xbf16, #tpu.memory_space<vmem>>, vector<64x32xbf16>
    tpu.vector_store %arg15[%c0_246, %c416_247], %254 {strides = array<i32>} : memref<256x800xbf16, #tpu.memory_space<vmem>>, vector<64x32xbf16>,
    %c2_248 = arith.constant 2 : index
    %c4_249 = arith.constant 4 : index
    %c0_250 = arith.constant 0 : index
    %256 = vector.load %arg14[%c2_248, %c4_249, %c0_250] : memref<12x12x32xf32, #tpu.memory_space<vmem>>, vector<8x8x32xf32>
    %257 = vector.shape_cast %256 : vector<8x8x32xf32> to vector<64x32xf32>
    %258 = arith.truncf %257 : vector<64x32xf32> to vector<64x32xbf16>
    %c0_251 = arith.constant 0 : index
    %c448_252 = arith.constant 448 : index
    %259 = vector.load %arg15[%c0_251, %c448_252] : memref<256x800xbf16, #tpu.memory_space<vmem>>, vector<64x32xbf16>
    tpu.vector_store %arg15[%c0_251, %c448_252], %258 {strides = array<i32>} : memref<256x800xbf16, #tpu.memory_space<vmem>>, vector<64x32xbf16>,
    %c3_253 = arith.constant 3 : index
    %c0_254 = arith.constant 0 : index
    %c0_255 = arith.constant 0 : index
    %260 = vector.load %arg14[%c3_253, %c0_254, %c0_255] : memref<12x12x32xf32, #tpu.memory_space<vmem>>, vector<8x8x32xf32>
    %261 = vector.shape_cast %260 : vector<8x8x32xf32> to vector<64x32xf32>
    %262 = arith.truncf %261 : vector<64x32xf32> to vector<64x32xbf16>
    %c0_256 = arith.constant 0 : index
    %c480_257 = arith.constant 480 : index
    %263 = vector.load %arg15[%c0_256, %c480_257] : memref<256x800xbf16, #tpu.memory_space<vmem>>, vector<64x32xbf16>
    tpu.vector_store %arg15[%c0_256, %c480_257], %262 {strides = array<i32>} : memref<256x800xbf16, #tpu.memory_space<vmem>>, vector<64x32xbf16>,
    %c3_258 = arith.constant 3 : index
    %c1_259 = arith.constant 1 : index
    %c0_260 = arith.constant 0 : index
    %264 = vector.load %arg14[%c3_258, %c1_259, %c0_260] : memref<12x12x32xf32, #tpu.memory_space<vmem>>, vector<8x8x32xf32>
    %265 = vector.shape_cast %264 : vector<8x8x32xf32> to vector<64x32xf32>
    %266 = arith.truncf %265 : vector<64x32xf32> to vector<64x32xbf16>
    %c0_261 = arith.constant 0 : index
    %c512_262 = arith.constant 512 : index
    %267 = vector.load %arg15[%c0_261, %c512_262] : memref<256x800xbf16, #tpu.memory_space<vmem>>, vector<64x32xbf16>
    tpu.vector_store %arg15[%c0_261, %c512_262], %266 {strides = array<i32>} : memref<256x800xbf16, #tpu.memory_space<vmem>>, vector<64x32xbf16>,
    %c3_263 = arith.constant 3 : index
    %c2_264 = arith.constant 2 : index
    %c0_265 = arith.constant 0 : index
    %268 = vector.load %arg14[%c3_263, %c2_264, %c0_265] : memref<12x12x32xf32, #tpu.memory_space<vmem>>, vector<8x8x32xf32>
    %269 = vector.shape_cast %268 : vector<8x8x32xf32> to vector<64x32xf32>
    %270 = arith.truncf %269 : vector<64x32xf32> to vector<64x32xbf16>
    %c0_266 = arith.constant 0 : index
    %c544_267 = arith.constant 544 : index
    %271 = vector.load %arg15[%c0_266, %c544_267] : memref<256x800xbf16, #tpu.memory_space<vmem>>, vector<64x32xbf16>
    tpu.vector_store %arg15[%c0_266, %c544_267], %270 {strides = array<i32>} : memref<256x800xbf16, #tpu.memory_space<vmem>>, vector<64x32xbf16>,
    %c3_268 = arith.constant 3 : index
    %c3_269 = arith.constant 3 : index
    %c0_270 = arith.constant 0 : index
    %272 = vector.load %arg14[%c3_268, %c3_269, %c0_270] : memref<12x12x32xf32, #tpu.memory_space<vmem>>, vector<8x8x32xf32>
    %273 = vector.shape_cast %272 : vector<8x8x32xf32> to vector<64x32xf32>
    %274 = arith.truncf %273 : vector<64x32xf32> to vector<64x32xbf16>
    %c0_271 = arith.constant 0 : index
    %c576_272 = arith.constant 576 : index
    %275 = vector.load %arg15[%c0_271, %c576_272] : memref<256x800xbf16, #tpu.memory_space<vmem>>, vector<64x32xbf16>
    tpu.vector_store %arg15[%c0_271, %c576_272], %274 {strides = array<i32>} : memref<256x800xbf16, #tpu.memory_space<vmem>>, vector<64x32xbf16>,
    %c3_273 = arith.constant 3 : index
    %c4_274 = arith.constant 4 : index
    %c0_275 = arith.constant 0 : index
    %276 = vector.load %arg14[%c3_273, %c4_274, %c0_275] : memref<12x12x32xf32, #tpu.memory_space<vmem>>, vector<8x8x32xf32>
    %277 = vector.shape_cast %276 : vector<8x8x32xf32> to vector<64x32xf32>
    %278 = arith.truncf %277 : vector<64x32xf32> to vector<64x32xbf16>
    %c0_276 = arith.constant 0 : index
    %c608_277 = arith.constant 608 : index
    %279 = vector.load %arg15[%c0_276, %c608_277] : memref<256x800xbf16, #tpu.memory_space<vmem>>, vector<64x32xbf16>
    tpu.vector_store %arg15[%c0_276, %c608_277], %278 {strides = array<i32>} : memref<256x800xbf16, #tpu.memory_space<vmem>>, vector<64x32xbf16>,
    %c4_278 = arith.constant 4 : index
    %c0_279 = arith.constant 0 : index
    %c0_280 = arith.constant 0 : index
    %280 = vector.load %arg14[%c4_278, %c0_279, %c0_280] : memref<12x12x32xf32, #tpu.memory_space<vmem>>, vector<8x8x32xf32>
    %281 = vector.shape_cast %280 : vector<8x8x32xf32> to vector<64x32xf32>
    %282 = arith.truncf %281 : vector<64x32xf32> to vector<64x32xbf16>
    %c0_281 = arith.constant 0 : index
    %c640_282 = arith.constant 640 : index
    %283 = vector.load %arg15[%c0_281, %c640_282] : memref<256x800xbf16, #tpu.memory_space<vmem>>, vector<64x32xbf16>
    tpu.vector_store %arg15[%c0_281, %c640_282], %282 {strides = array<i32>} : memref<256x800xbf16, #tpu.memory_space<vmem>>, vector<64x32xbf16>,
    %c4_283 = arith.constant 4 : index
    %c1_284 = arith.constant 1 : index
    %c0_285 = arith.constant 0 : index
    %284 = vector.load %arg14[%c4_283, %c1_284, %c0_285] : memref<12x12x32xf32, #tpu.memory_space<vmem>>, vector<8x8x32xf32>
    %285 = vector.shape_cast %284 : vector<8x8x32xf32> to vector<64x32xf32>
    %286 = arith.truncf %285 : vector<64x32xf32> to vector<64x32xbf16>
    %c0_286 = arith.constant 0 : index
    %c672_287 = arith.constant 672 : index
    %287 = vector.load %arg15[%c0_286, %c672_287] : memref<256x800xbf16, #tpu.memory_space<vmem>>, vector<64x32xbf16>
    tpu.vector_store %arg15[%c0_286, %c672_287], %286 {strides = array<i32>} : memref<256x800xbf16, #tpu.memory_space<vmem>>, vector<64x32xbf16>,
    %c4_288 = arith.constant 4 : index
    %c2_289 = arith.constant 2 : index
    %c0_290 = arith.constant 0 : index
    %288 = vector.load %arg14[%c4_288, %c2_289, %c0_290] : memref<12x12x32xf32, #tpu.memory_space<vmem>>, vector<8x8x32xf32>
    %289 = vector.shape_cast %288 : vector<8x8x32xf32> to vector<64x32xf32>
    %290 = arith.truncf %289 : vector<64x32xf32> to vector<64x32xbf16>
    %c0_291 = arith.constant 0 : index
    %c704_292 = arith.constant 704 : index
    %291 = vector.load %arg15[%c0_291, %c704_292] : memref<256x800xbf16, #tpu.memory_space<vmem>>, vector<64x32xbf16>
    tpu.vector_store %arg15[%c0_291, %c704_292], %290 {strides = array<i32>} : memref<256x800xbf16, #tpu.memory_space<vmem>>, vector<64x32xbf16>,
    %c4_293 = arith.constant 4 : index
    %c3_294 = arith.constant 3 : index
    %c0_295 = arith.constant 0 : index
    %292 = vector.load %arg14[%c4_293, %c3_294, %c0_295] : memref<12x12x32xf32, #tpu.memory_space<vmem>>, vector<8x8x32xf32>
    %293 = vector.shape_cast %292 : vector<8x8x32xf32> to vector<64x32xf32>
    %294 = arith.truncf %293 : vector<64x32xf32> to vector<64x32xbf16>
    %c0_296 = arith.constant 0 : index
    %c736_297 = arith.constant 736 : index
    %295 = vector.load %arg15[%c0_296, %c736_297] : memref<256x800xbf16, #tpu.memory_space<vmem>>, vector<64x32xbf16>
    tpu.vector_store %arg15[%c0_296, %c736_297], %294 {strides = array<i32>} : memref<256x800xbf16, #tpu.memory_space<vmem>>, vector<64x32xbf16>,
    %c4_298 = arith.constant 4 : index
    %c4_299 = arith.constant 4 : index
    %c0_300 = arith.constant 0 : index
    %296 = vector.load %arg14[%c4_298, %c4_299, %c0_300] : memref<12x12x32xf32, #tpu.memory_space<vmem>>, vector<8x8x32xf32>
    %297 = vector.shape_cast %296 : vector<8x8x32xf32> to vector<64x32xf32>
    %298 = arith.truncf %297 : vector<64x32xf32> to vector<64x32xbf16>
    %c0_301 = arith.constant 0 : index
    %c768_302 = arith.constant 768 : index
    %299 = vector.load %arg15[%c0_301, %c768_302] : memref<256x800xbf16, #tpu.memory_space<vmem>>, vector<64x32xbf16>
    tpu.vector_store %arg15[%c0_301, %c768_302], %298 {strides = array<i32>} : memref<256x800xbf16, #tpu.memory_space<vmem>>, vector<64x32xbf16>,
    %c0_303 = arith.constant 0 : index
    %c0_304 = arith.constant 0 : index
    %300 = vector.load %arg15[%c0_303, %c0_304] : memref<256x800xbf16, #tpu.memory_space<vmem>>, vector<64x800xbf16>
    %c0_305 = arith.constant 0 : index
    %c0_306 = arith.constant 0 : index
    %301 = vector.load %arg6[%c0_305, %c0_306] : memref<800x64xbf16, #tpu.memory_space<vmem>>, vector<800x64xbf16>
    %cst_307 = arith.constant dense<0.000000e+00> : vector<64x64xf32>
    %302 = tpu.matmul %300, %301, %cst_307 {dimension_numbers = #tpu.dot_dimension_numbers<[1], [0], [0], [1], [0, 0, 1, 1], [], []>} : vector<64x800xbf16>, vector<800x64xbf16>, vector<64x64xf32> -> vector<64x64xf32>
    %c0_308 = arith.constant 0 : index
    %c0_309 = arith.constant 0 : index
    %303 = vector.load %arg7[%c0_308, %c0_309] : memref<1x64xf32, #tpu.memory_space<vmem>>, vector<1x64xf32>
    %304 = vector.broadcast %303 : vector<1x64xf32> to vector<64x64xf32>
    %305 = arith.addf %302, %304 : vector<64x64xf32>
    %306 = vector.shape_cast %305 : vector<64x64xf32> to vector<4x2x8x64xf32>
    %307 = vector.extract_strided_slice %306 {offsets = [0, 0, 0, 0], sizes = [4, 1, 8, 64], strides = [1, 1, 1, 1]} : vector<4x2x8x64xf32> to vector<4x1x8x64xf32>
    %308 = vector.shape_cast %307 : vector<4x1x8x64xf32> to vector<4x8x64xf32>
    %309 = vector.extract_strided_slice %306 {offsets = [0, 1, 0, 0], sizes = [4, 1, 8, 64], strides = [1, 1, 1, 1]} : vector<4x2x8x64xf32> to vector<4x1x8x64xf32>
    %310 = vector.shape_cast %309 : vector<4x1x8x64xf32> to vector<4x8x64xf32>
    %311 = arith.maximumf %308, %310 : vector<4x8x64xf32>
    %312 = vector.shape_cast %311 : vector<4x8x64xf32> to vector<32x64xf32>
    %c0_310 = arith.constant 0 : index
    %c0_311 = arith.constant 0 : index
    %313 = vector.load %arg17[%c0_310, %c0_311] : memref<32x64xf32, #tpu.memory_space<vmem>>, vector<32x64xf32>
    tpu.vector_store %arg17[%c0_310, %c0_311], %312 {strides = array<i32>} : memref<32x64xf32, #tpu.memory_space<vmem>>, vector<32x64xf32>,
    %c0_312 = arith.constant 0 : index
    %c0_313 = arith.constant 0 : index
    %314 = tpu.strided_load %arg17[%c0_312, %c0_313] {strides = array<i32: 2, 1>} : memref<32x64xf32, #tpu.memory_space<vmem>>, vector<16x64xf32>
    %c1_314 = arith.constant 1 : index
    %c0_315 = arith.constant 0 : index
    %315 = tpu.strided_load %arg17[%c1_314, %c0_315] {strides = array<i32: 2, 1>} : memref<32x64xf32, #tpu.memory_space<vmem>>, vector<16x64xf32>
    %316 = arith.maximumf %314, %315 : vector<16x64xf32>
    %317 = arith.truncf %316 : vector<16x64xf32> to vector<16x64xbf16>
    %318 = vector.extract_strided_slice %317 {offsets = [0, 0], sizes = [1, 64], strides = [1, 1]} : vector<16x64xbf16> to vector<1x64xbf16>
    %c0_316 = arith.constant 0 : index
    %c0_317 = arith.constant 0 : index
    %319 = vector.load %arg18[%c0_316, %c0_317] : memref<1x1024xbf16, #tpu.memory_space<vmem>>, vector<1x64xbf16>
    tpu.vector_store %arg18[%c0_316, %c0_317], %318 {strides = array<i32>} : memref<1x1024xbf16, #tpu.memory_space<vmem>>, vector<1x64xbf16>,
    %320 = vector.extract_strided_slice %317 {offsets = [1, 0], sizes = [1, 64], strides = [1, 1]} : vector<16x64xbf16> to vector<1x64xbf16>
    %c0_318 = arith.constant 0 : index
    %c64_319 = arith.constant 64 : index
    %321 = vector.load %arg18[%c0_318, %c64_319] : memref<1x1024xbf16, #tpu.memory_space<vmem>>, vector<1x64xbf16>
    tpu.vector_store %arg18[%c0_318, %c64_319], %320 {strides = array<i32>} : memref<1x1024xbf16, #tpu.memory_space<vmem>>, vector<1x64xbf16>,
    %322 = vector.extract_strided_slice %317 {offsets = [2, 0], sizes = [1, 64], strides = [1, 1]} : vector<16x64xbf16> to vector<1x64xbf16>
    %c0_320 = arith.constant 0 : index
    %c128_321 = arith.constant 128 : index
    %323 = vector.load %arg18[%c0_320, %c128_321] : memref<1x1024xbf16, #tpu.memory_space<vmem>>, vector<1x64xbf16>
    tpu.vector_store %arg18[%c0_320, %c128_321], %322 {strides = array<i32>} : memref<1x1024xbf16, #tpu.memory_space<vmem>>, vector<1x64xbf16>,
    %324 = vector.extract_strided_slice %317 {offsets = [3, 0], sizes = [1, 64], strides = [1, 1]} : vector<16x64xbf16> to vector<1x64xbf16>
    %c0_322 = arith.constant 0 : index
    %c192_323 = arith.constant 192 : index
    %325 = vector.load %arg18[%c0_322, %c192_323] : memref<1x1024xbf16, #tpu.memory_space<vmem>>, vector<1x64xbf16>
    tpu.vector_store %arg18[%c0_322, %c192_323], %324 {strides = array<i32>} : memref<1x1024xbf16, #tpu.memory_space<vmem>>, vector<1x64xbf16>,
    %326 = vector.extract_strided_slice %317 {offsets = [4, 0], sizes = [1, 64], strides = [1, 1]} : vector<16x64xbf16> to vector<1x64xbf16>
    %c0_324 = arith.constant 0 : index
    %c256_325 = arith.constant 256 : index
    %327 = vector.load %arg18[%c0_324, %c256_325] : memref<1x1024xbf16, #tpu.memory_space<vmem>>, vector<1x64xbf16>
    tpu.vector_store %arg18[%c0_324, %c256_325], %326 {strides = array<i32>} : memref<1x1024xbf16, #tpu.memory_space<vmem>>, vector<1x64xbf16>,
    %328 = vector.extract_strided_slice %317 {offsets = [5, 0], sizes = [1, 64], strides = [1, 1]} : vector<16x64xbf16> to vector<1x64xbf16>
    %c0_326 = arith.constant 0 : index
    %c320_327 = arith.constant 320 : index
    %329 = vector.load %arg18[%c0_326, %c320_327] : memref<1x1024xbf16, #tpu.memory_space<vmem>>, vector<1x64xbf16>
    tpu.vector_store %arg18[%c0_326, %c320_327], %328 {strides = array<i32>} : memref<1x1024xbf16, #tpu.memory_space<vmem>>, vector<1x64xbf16>,
    %330 = vector.extract_strided_slice %317 {offsets = [6, 0], sizes = [1, 64], strides = [1, 1]} : vector<16x64xbf16> to vector<1x64xbf16>
    %c0_328 = arith.constant 0 : index
    %c384_329 = arith.constant 384 : index
    %331 = vector.load %arg18[%c0_328, %c384_329] : memref<1x1024xbf16, #tpu.memory_space<vmem>>, vector<1x64xbf16>
    tpu.vector_store %arg18[%c0_328, %c384_329], %330 {strides = array<i32>} : memref<1x1024xbf16, #tpu.memory_space<vmem>>, vector<1x64xbf16>,
    %332 = vector.extract_strided_slice %317 {offsets = [7, 0], sizes = [1, 64], strides = [1, 1]} : vector<16x64xbf16> to vector<1x64xbf16>
    %c0_330 = arith.constant 0 : index
    %c448_331 = arith.constant 448 : index
    %333 = vector.load %arg18[%c0_330, %c448_331] : memref<1x1024xbf16, #tpu.memory_space<vmem>>, vector<1x64xbf16>
    tpu.vector_store %arg18[%c0_330, %c448_331], %332 {strides = array<i32>} : memref<1x1024xbf16, #tpu.memory_space<vmem>>, vector<1x64xbf16>,
    %334 = vector.extract_strided_slice %317 {offsets = [8, 0], sizes = [1, 64], strides = [1, 1]} : vector<16x64xbf16> to vector<1x64xbf16>
    %c0_332 = arith.constant 0 : index
    %c512_333 = arith.constant 512 : index
    %335 = vector.load %arg18[%c0_332, %c512_333] : memref<1x1024xbf16, #tpu.memory_space<vmem>>, vector<1x64xbf16>
    tpu.vector_store %arg18[%c0_332, %c512_333], %334 {strides = array<i32>} : memref<1x1024xbf16, #tpu.memory_space<vmem>>, vector<1x64xbf16>,
    %336 = vector.extract_strided_slice %317 {offsets = [9, 0], sizes = [1, 64], strides = [1, 1]} : vector<16x64xbf16> to vector<1x64xbf16>
    %c0_334 = arith.constant 0 : index
    %c576_335 = arith.constant 576 : index
    %337 = vector.load %arg18[%c0_334, %c576_335] : memref<1x1024xbf16, #tpu.memory_space<vmem>>, vector<1x64xbf16>
    tpu.vector_store %arg18[%c0_334, %c576_335], %336 {strides = array<i32>} : memref<1x1024xbf16, #tpu.memory_space<vmem>>, vector<1x64xbf16>,
    %338 = vector.extract_strided_slice %317 {offsets = [10, 0], sizes = [1, 64], strides = [1, 1]} : vector<16x64xbf16> to vector<1x64xbf16>
    %c0_336 = arith.constant 0 : index
    %c640_337 = arith.constant 640 : index
    %339 = vector.load %arg18[%c0_336, %c640_337] : memref<1x1024xbf16, #tpu.memory_space<vmem>>, vector<1x64xbf16>
    tpu.vector_store %arg18[%c0_336, %c640_337], %338 {strides = array<i32>} : memref<1x1024xbf16, #tpu.memory_space<vmem>>, vector<1x64xbf16>,
    %340 = vector.extract_strided_slice %317 {offsets = [11, 0], sizes = [1, 64], strides = [1, 1]} : vector<16x64xbf16> to vector<1x64xbf16>
    %c0_338 = arith.constant 0 : index
    %c704_339 = arith.constant 704 : index
    %341 = vector.load %arg18[%c0_338, %c704_339] : memref<1x1024xbf16, #tpu.memory_space<vmem>>, vector<1x64xbf16>
    tpu.vector_store %arg18[%c0_338, %c704_339], %340 {strides = array<i32>} : memref<1x1024xbf16, #tpu.memory_space<vmem>>, vector<1x64xbf16>,
    %342 = vector.extract_strided_slice %317 {offsets = [12, 0], sizes = [1, 64], strides = [1, 1]} : vector<16x64xbf16> to vector<1x64xbf16>
    %c0_340 = arith.constant 0 : index
    %c768_341 = arith.constant 768 : index
    %343 = vector.load %arg18[%c0_340, %c768_341] : memref<1x1024xbf16, #tpu.memory_space<vmem>>, vector<1x64xbf16>
    tpu.vector_store %arg18[%c0_340, %c768_341], %342 {strides = array<i32>} : memref<1x1024xbf16, #tpu.memory_space<vmem>>, vector<1x64xbf16>,
    %344 = vector.extract_strided_slice %317 {offsets = [13, 0], sizes = [1, 64], strides = [1, 1]} : vector<16x64xbf16> to vector<1x64xbf16>
    %c0_342 = arith.constant 0 : index
    %c832 = arith.constant 832 : index
    %345 = vector.load %arg18[%c0_342, %c832] : memref<1x1024xbf16, #tpu.memory_space<vmem>>, vector<1x64xbf16>
    tpu.vector_store %arg18[%c0_342, %c832], %344 {strides = array<i32>} : memref<1x1024xbf16, #tpu.memory_space<vmem>>, vector<1x64xbf16>,
    %346 = vector.extract_strided_slice %317 {offsets = [14, 0], sizes = [1, 64], strides = [1, 1]} : vector<16x64xbf16> to vector<1x64xbf16>
    %c0_343 = arith.constant 0 : index
    %c896 = arith.constant 896 : index
    %347 = vector.load %arg18[%c0_343, %c896] : memref<1x1024xbf16, #tpu.memory_space<vmem>>, vector<1x64xbf16>
    tpu.vector_store %arg18[%c0_343, %c896], %346 {strides = array<i32>} : memref<1x1024xbf16, #tpu.memory_space<vmem>>, vector<1x64xbf16>,
    %348 = vector.extract_strided_slice %317 {offsets = [15, 0], sizes = [1, 64], strides = [1, 1]} : vector<16x64xbf16> to vector<1x64xbf16>
    %c0_344 = arith.constant 0 : index
    %c960 = arith.constant 960 : index
    %349 = vector.load %arg18[%c0_344, %c960] : memref<1x1024xbf16, #tpu.memory_space<vmem>>, vector<1x64xbf16>
    tpu.vector_store %arg18[%c0_344, %c960], %348 {strides = array<i32>} : memref<1x1024xbf16, #tpu.memory_space<vmem>>, vector<1x64xbf16>,
    %c0_345 = arith.constant 0 : index
    %c0_346 = arith.constant 0 : index
    %350 = vector.load %arg18[%c0_345, %c0_346] : memref<1x1024xbf16, #tpu.memory_space<vmem>>, vector<1x1024xbf16>
    %c0_347 = arith.constant 0 : index
    %c0_348 = arith.constant 0 : index
    %351 = vector.load %arg8[%c0_347, %c0_348] : memref<1024x64xbf16, #tpu.memory_space<vmem>>, vector<1024x64xbf16>
    %cst_349 = arith.constant dense<0.000000e+00> : vector<1x64xf32>
    %352 = tpu.matmul %350, %351, %cst_349 {dimension_numbers = #tpu.dot_dimension_numbers<[1], [0], [0], [1], [0, 0, 1, 1], [], []>} : vector<1x1024xbf16>, vector<1024x64xbf16>, vector<1x64xf32> -> vector<1x64xf32>
    %c0_350 = arith.constant 0 : index
    %c0_351 = arith.constant 0 : index
    %353 = vector.load %arg9[%c0_350, %c0_351] : memref<1x64xf32, #tpu.memory_space<vmem>>, vector<1x64xf32>
    %354 = arith.addf %352, %353 : vector<1x64xf32>
    %355 = arith.truncf %354 : vector<1x64xf32> to vector<1x64xbf16>
    %c0_352 = arith.constant 0 : index
    %c0_353 = arith.constant 0 : index
    %356 = vector.load %arg10[%c0_352, %c0_353] : memref<64x10xbf16, #tpu.memory_space<vmem>>, vector<64x10xbf16>
    %cst_354 = arith.constant dense<0.000000e+00> : vector<1x10xf32>
    %357 = tpu.matmul %355, %356, %cst_354 {dimension_numbers = #tpu.dot_dimension_numbers<[1], [0], [0], [1], [0, 0, 1, 1], [], []>} : vector<1x64xbf16>, vector<64x10xbf16>, vector<1x10xf32> -> vector<1x10xf32>
    %c0_355 = arith.constant 0 : index
    %c0_356 = arith.constant 0 : index
    %358 = vector.load %arg11[%c0_355, %c0_356] : memref<1x10xf32, #tpu.memory_space<vmem>>, vector<1x10xf32>
    %359 = arith.addf %357, %358 : vector<1x10xf32>
    %360 = vector.shape_cast %359 : vector<1x10xf32> to vector<1x1x10xf32>
    %c0_357 = arith.constant 0 : index
    %c0_358 = arith.constant 0 : index
    %c0_359 = arith.constant 0 : index
    %361 = vector.load %arg12[%c0_357, %c0_358, %c0_359] : memref<1x1x10xf32, #tpu.memory_space<vmem>>, vector<1x1x10xf32>
    tpu.vector_store %arg12[%c0_357, %c0_358, %c0_359], %360 {strides = array<i32>} : memref<1x1x10xf32, #tpu.memory_space<vmem>>, vector<1x1x10xf32>,
    return
  }
  func.func @transform_0(%arg0: i32) -> (i32, i32, i32) {
    %c0_i32 = arith.constant 0 : i32
    %c0_i32_0 = arith.constant 0 : i32
    %c0_i32_1 = arith.constant 0 : i32
    return %arg0, %c0_i32, %c0_i32_0 : i32, i32, i32
  }
  func.func @transform_1(%arg0: i32) -> (i32, i32) {
    %c0_i32 = arith.constant 0 : i32
    %c0_i32_0 = arith.constant 0 : i32
    %c0_i32_1 = arith.constant 0 : i32
    return %c0_i32, %c0_i32_0 : i32, i32
  }
  func.func @transform_2(%arg0: i32) -> (i32, i32) {
    %c0_i32 = arith.constant 0 : i32
    %c0_i32_0 = arith.constant 0 : i32
    %c0_i32_1 = arith.constant 0 : i32
    return %c0_i32, %c0_i32_0 : i32, i32
  }
  func.func @transform_3(%arg0: i32) -> (i32, i32) {
    %c0_i32 = arith.constant 0 : i32
    %c0_i32_0 = arith.constant 0 : i32
    %c0_i32_1 = arith.constant 0 : i32
    return %c0_i32, %c0_i32_0 : i32, i32
  }
  func.func @transform_4(%arg0: i32) -> (i32, i32) {
    %c0_i32 = arith.constant 0 : i32
    %c0_i32_0 = arith.constant 0 : i32
    %c0_i32_1 = arith.constant 0 : i32
    return %c0_i32, %c0_i32_0 : i32, i32
  }
  func.func @transform_5(%arg0: i32) -> (i32, i32) {
    %c0_i32 = arith.constant 0 : i32
    %c0_i32_0 = arith.constant 0 : i32
    %c0_i32_1 = arith.constant 0 : i32
    return %c0_i32, %c0_i32_0 : i32, i32
  }
  func.func @transform_6(%arg0: i32) -> (i32, i32) {
    %c0_i32 = arith.constant 0 : i32
    %c0_i32_0 = arith.constant 0 : i32
    %c0_i32_1 = arith.constant 0 : i32
    return %c0_i32, %c0_i32_0 : i32, i32
  }
  func.func @transform_7(%arg0: i32) -> (i32, i32) {
    %c0_i32 = arith.constant 0 : i32
    %c0_i32_0 = arith.constant 0 : i32
    %c0_i32_1 = arith.constant 0 : i32
    return %c0_i32, %c0_i32_0 : i32, i32
  }
  func.func @transform_8(%arg0: i32) -> (i32, i32) {
    %c0_i32 = arith.constant 0 : i32
    %c0_i32_0 = arith.constant 0 : i32
    %c0_i32_1 = arith.constant 0 : i32
    return %c0_i32, %c0_i32_0 : i32, i32
  }
  func.func @transform_9(%arg0: i32) -> (i32, i32) {
    %c0_i32 = arith.constant 0 : i32
    %c0_i32_0 = arith.constant 0 : i32
    %c0_i32_1 = arith.constant 0 : i32
    return %c0_i32, %c0_i32_0 : i32, i32
  }
  func.func @transform_10(%arg0: i32) -> (i32, i32) {
    %c0_i32 = arith.constant 0 : i32
    %c0_i32_0 = arith.constant 0 : i32
    %c0_i32_1 = arith.constant 0 : i32
    return %c0_i32, %c0_i32_0 : i32, i32
  }
  func.func @transform_11(%arg0: i32) -> (i32, i32, i32) {
    %c0_i32 = arith.constant 0 : i32
    %c0_i32_0 = arith.constant 0 : i32
    %c0_i32_1 = arith.constant 0 : i32
    return %arg0, %c0_i32, %c0_i32_0 : i32, i32, i32
  }
}

</mosaic_0001>

<bundles_post_ra>
// kernel: demo_forward.1
= control target key start
LH: loop header
LB: loop body
LE: loop exit
PB: predicated region body
PF: predicated region fallthrough
CT: control target
= control target key end

     0   :  { %16 = vsyncpa [#allocation9], 0  ;;  %s13454_s0 = inlined_call_operand.vmem [shape: bf16[2,1024,80], index: 0, kind: input, shape index: {}]   ;;  %s13455_s1 = inlined_call_operand.vmem [shape: bf16[80,32], index: 1, kind: input, shape index: {}]   ;;  %s13456_s2 = inlined_call_operand.vmem [shape: f32[1,32], index: 2, kind: input, shape index: {}]   ;;  %s13457_s3 = inlined_call_operand.vmem [shape: bf16[800,32], index: 3, kind: input, shape index: {}]   ;;  %s13458_s4 = inlined_call_operand.vmem [shape: f32[1,32], index: 4, kind: input, shape index: {}]   ;;  %s13459_s5 = inlined_call_operand.vmem [shape: bf16[800,64], index: 5, kind: input, shape index: {}]   ;;  %s13460_s6 = inlined_call_operand.vmem [shape: f32[1,64], index: 6, kind: input, shape index: {}]   ;;  %s13461_s7 = inlined_call_operand.vmem [shape: bf16[1024,64], index: 7, kind: input, shape index: {}]   ;;  %s13462_s8 = inlined_call_operand.vmem [shape: f32[1,64], index: 8, kind: input, shape index: {}]   ;;  %s13463_s9 = inlined_call_operand.vmem [shape: bf16[64,10], index: 9, kind: input, shape index: {}]   ;;  %s13464_s10 = inlined_call_operand.vmem [shape: f32[1,10], index: 10, kind: input, shape index: {}]   ;;  %s13465_s11 = inlined_call_operand.hbm [shape: f32[2,1,10], index: 11, kind: output, shape index: {}]  }
   0x1   :  { %18 = vsyncpa [#allocation9 + $0x1], 0  ;;  %s10394_s17 = smov 0   ;;  %s10396_s18 = smov 0  }
   0x2   :  { %s10398_s19 = smov 0   ;;  %s10400_s20 = smov 0  }
   0x3 LB: > { %s10415_s21 = sadd.s32 4294967295, %s10325_s20   ;;  %s8702_s22 = sadd.s32 4294967294, %s10325_s20   ;;  %s10325_s20 = sphi %s10400_s20, %s13477_s20   ;;  %s10321_s19 = sphi %s10398_s19, %s13476_s19   ;;  %s10317_s18 = sphi %s10396_s18, %s13475_s18   ;;  %s10313_s17 = sphi %s10394_s17, %s13474_s17  }
   0x4   : > { %s10419_s23 = sadd.s32 1, %s10325_s20   ;;  %s267_s24 = sadd.s32 1, %s10321_s19 }
   0x5   : > { %s264_s25 = ssub.s32 %s10325_s20, %s10419_s23  ;;  %p277_p0 = scmp.ne.s32.totalorder %s10321_s19, %s10317_s18 }
   0x6   : > { %p265_p1 = scmp.eq.s32.totalorder %s264_s25, 0  ;;  %p278_p2 = scmp.eq.s32.totalorder %s10415_s21, 1 }
   0x7   : > { %p283_p3 = scmp.ne.s32.totalorder %s10317_s18, %s10313_s17  ;;  %p284_p4 = scmp.eq.s32.totalorder %s8702_s22, 1 }
   0x8   : > { %s10430_s26 = scalar_select %p265_p1, %s10321_s19, %s267_s24  }
   0x9   : > { %p10432_p5 = por %p278_p2, %p277_p0  ;;  %p10436_p6 = por %p284_p4, %p283_p3 }
   0xa   : > { %13466 = sst [smem:[#allocation11_spill]] %s10430_s26  ;;  %p8705_p7 = scmp.ge.s32.totalorder %s10325_s20, 1 }
   0xb   : > { %p340_p8 = scmp.lt.s32.totalorder %s10325_s20, 3 }
   0xd   : > { %p341_p9 = pnand %p8705_p7, %p340_p8 }
   0xe   : > { %v10007_v0 = vld [vmem:[%s13455_s1] sm:$0xff] (!%p341_p9)   ;;  %p379_p10 = scmp.lt.s32.totalorder (!%p341_p9), %s10415_s21, 1  ;;  %v10008_v1 = vld [vmem:[%s13455_s1 + $0x8] sm:$0xff] (!%p341_p9)   ;;  %v10009_v3 = vld [vmem:[%s13455_s1 + $0x10] sm:$0xff] (!%p341_p9)   ;;  %vm630_vm0 = vcmask (!%p341_p9), 654336   ;;  %vm385_vm1 = vcmask (!%p341_p9), 261120  }
   0xf   : > { %344 = sbr.rel (%p341_p9) target bundleno = 2249 (0x8c9), region = 64  ;;  %9718 = vmatprep.subr.bf16.mxu0 (!%p341_p9), %v10007_v0  ;;  %v10010_v2 = vld [vmem:[%s13455_s1] sm:$0xff] (!%p341_p9)   ;;  %v10012_v4 = vld [vmem:[%s13455_s1 + $0x8] sm:$0xff] (!%p341_p9)   ;;  %v10011_v5 = vld [vmem:[%s13455_s1 + $0x18] sm:$0xff] (!%p341_p9)   ;;  %vm388_vm2 = vcmask (!%p341_p9), 257024   ;;  %v10327_v50 = vmov (!%p341_p9), 0.0  }
  0x10   : > { %9719 = vmatpush3.bf16.msra.mxu0 (!%p341_p9), %v10007_v0  ;;  %9760 = vmatprep.subr.bf16.mxu1 (!%p341_p9), %v10010_v2  ;;  %v10014_v6 = vld [vmem:[%s13455_s1 + $0x10] sm:$0xff] (!%p341_p9)   ;;  %v10017_v8 = vld [vmem:[%s13455_s1 + $0x18] sm:$0xff] (!%p341_p9)   ;;  %v10013_v9 = vld [vmem:[%s13455_s1 + $0x20] sm:$0xff] (!%p341_p9)   ;;  %390 = vst.msk [vmem:[#allocation2 + $0x18] sm:$0xff] (!%p341_p9), %vm385_vm1, %v10327_v50  ;;  %s10328_s29 = smov (!%p341_p9), 64   ;;  %s10329_s13 = smov (!%p341_p9), 96  }
  0x11   : > { %9720 = vmatprep.subr.bf16.mxu0 (!%p341_p9), %v10008_v1  ;;  %9761 = vmatpush3.bf16.msra.mxu1 (!%p341_p9), %v10010_v2  ;;  %v10018_v11 = vld [vmem:[%s13455_s1 + $0x20] sm:$0xff] (!%p341_p9)   ;;  %v10046_v25 = vld [vmem:[%s13455_s1 + $0x8] sm:$0xff] (!%p341_p9)   ;;  %v10048_v28 = vld [vmem:[%s13455_s1 + $0x10] sm:$0xff] (!%p341_p9)   ;;  %391 = vst.msk [vmem:[#allocation2 + $0x20] sm:$0xff] (!%p341_p9), %vm385_vm1, %v10327_v50  ;;  %s10330_s15 = smov (!%p341_p9), 32   ;;  %vm2374_vm3 = vcmask (!%p341_p9), 523520  }
  0x12   : > { %9762 = vmatprep.subr.bf16.mxu1 (!%p341_p9), %v10012_v4  ;;  %v10045_v24 = vld [vmem:[%s13455_s1] sm:$0xff] (!%p341_p9)   ;;  %v10052_v31 = vld [vmem:[%s13455_s1 + $0x8] sm:$0xff] (!%p341_p9)   ;;  %v10054_v33 = vld [vmem:[%s13455_s1 + $0x18] sm:$0xff] (!%p341_p9)   ;;  %392 = vst.msk [vmem:[#allocation2 + $0x28] sm:$0xf] (!%p341_p9), %vm388_vm2, %v10327_v50  ;;  %vm2503_vm4 = vcmask (!%p341_p9), 785920  }
  0x13   : > { %v10047_v26 = vld [vmem:[%s13455_s1] sm:$0xff] (!%p341_p9)   ;;  %v10056_v37 = vld [vmem:[%s13455_s1 + $0x10] sm:$0xff] (!%p341_p9)   ;;  %386 = vst.msk [vmem:[#allocation2] sm:$0xff] (!%p341_p9), %vm385_vm1, %v10327_v50  ;;  %387 = vst.msk [vmem:[#allocation2 + $0x8] sm:$0xff] (!%p341_p9), %vm385_vm1, %v10327_v50  ;;  %vm2632_vm5 = vcmask (!%p341_p9), 1048320   ;;  %vm7634_vm6 = vcmask (!%p341_p9), 523264  }
  0x14   : > { %9721 = vmatpush3.bf16.msra.mxu0 (!%p341_p9), %v10008_v1  ;;  %v10055_v35 = vld [vmem:[%s13455_s1 + $0x20] sm:$0xff] (!%p341_p9)   ;;  %389 = vst.msk [vmem:[#allocation2 + $0x10] sm:$0xf] (!%p341_p9), %vm388_vm2, %v10327_v50  ;;  %395 = vst.msk [vmem:[#allocation2 + $0x40] sm:$0xf] (!%p341_p9), %vm388_vm2, %v10327_v50  ;;  %v10061_v0 = vld [vmem:[%s13455_s1 + $0x18] sm:$0xff] (!%p341_p9)  }
  0x15   : > { %9722 = vmatprep.subr.bf16.mxu0 (!%p341_p9), %v10009_v3  ;;  %9763 = vmatpush3.bf16.msra.mxu1 (!%p341_p9), %v10012_v4  ;;  %393 = vst.msk [vmem:[#allocation2 + $0x30] sm:$0xff] (!%p341_p9), %vm385_vm1, %v10327_v50  ;;  %394 = vst.msk [vmem:[#allocation2 + $0x38] sm:$0xff] (!%p341_p9), %vm385_vm1, %v10327_v50  ;;  %v10062_v4 = vld [vmem:[%s13455_s1 + $0x20] sm:$0xff] (!%p341_p9)   ;;  %vm7649_vm7 = vcmask (!%p341_p9), 516096   ;;  %vm7650_vm8 = vsmask.f32 (!%p341_p9), 256 }
  0x16   : > { %s380_s14 = scalar_select %p379_p10, %s10415_s21, 1  ;;  %9764 = vmatprep.subr.bf16.mxu1 %v10014_v6  ;;  %396 = vst.msk [vmem:[#allocation2 + $0x48] sm:$0xff] %vm385_vm1, %v10327_v50  ;;  %397 = vst.msk [vmem:[#allocation2 + $0x50] sm:$0xff] %vm385_vm1, %v10327_v50  ;;  %vm7678_vm10 = vcmask 1040896   ;;  %vm10332_vm12 = vmmov 0   ;;  %vm8632_vm13 = vcmask 73728  }
  0x17   : > { %398 = vst.msk [vmem:[#allocation2 + $0x58] sm:$0xf] %vm388_vm2, %v10327_v50  ;;  %401 = vst.msk [vmem:[#allocation2 + $0x70] sm:$0xf] %vm388_vm2, %v10327_v50  ;;  %v2714_v1 = vld [vmem:[#allocation2 + $0x18] sm:$0xff]  ;;  %s377_s12 = sand.u32 1, %s10317_s18  }
  0x18   : > { %s9060_s25 = sshll.u32 %s380_s14, 9  ;;  %9723 = vmatpush3.bf16.msra.mxu0 %v10009_v3  ;;  %399 = vst.msk [vmem:[#allocation2 + $0x60] sm:$0xff] %vm385_vm1, %v10327_v50  ;;  %400 = vst.msk [vmem:[#allocation2 + $0x68] sm:$0xff] %vm385_vm1, %v10327_v50  ;;  %v2842_v53 = vld [vmem:[#allocation2 + $0x19] sm:$0xff]  ;;  %s9057_s14 = sshll.u32 %s10415_s21, 4 }
  0x19   : > { %s10462_s26 = scalar_lea.vmem %s13454_s0, %s9060_s25  ;;  %9724 = vmatprep.subr.bf16.mxu0 %v10011_v5  ;;  %9765 = vmatpush3.bf16.msra.mxu1 %v10014_v6  ;;  %402 = vst.msk [vmem:[#allocation2 + $0x78] sm:$0xff] %vm385_vm1, %v10327_v50  ;;  %403 = vst.msk [vmem:[#allocation2 + $0x80] sm:$0xff] %vm385_vm1, %v10327_v50  ;;  %v2843_v54 = vld [vmem:[#allocation2 + $0x21] sm:$0xff]  ;;  %s8635_s21 = scalar_lea.sflag [#allocation9], %s377_s12 }
  0x1a   : > { %v10015_v7 = vld [vmem:[%s10462_s26] sm:$0xff]   ;;  %9766 = vmatprep.subr.bf16.mxu1 %v10017_v8  ;;  %v10016_v12 = vld [vmem:[%s10462_s26 + $0x8] sm:$0xff]   ;;  %v10019_v13 = vld [vmem:[%s10462_s26 + $0x10] sm:$0xff]   ;;  %404 = vst.msk [vmem:[#allocation2 + $0x88] sm:$0xf] %vm388_vm2, %v10327_v50  ;;  %v2874_v55 = vpack.c.bf16 %v2843_v54, %v2842_v53  ;;  %s10333_s30 = smov [#allocation8]  }
  0x1b   : > { %9728 = vmatprep.mubr.msk.bf16.mxu0 %vm630_vm0, %v10015_v7  ;;  %v10021_v10 = vld [vmem:[%s10462_s26 + $0x80] sm:$0xff]   ;;  %v10022_v14 = vld [vmem:[%s10462_s26 + $0x88] sm:$0xff]   ;;  %v10023_v15 = vld [vmem:[%s10462_s26 + $0x90] sm:$0xff]   ;;  %405 = vst.msk [vmem:[#allocation2 + $0x90] sm:$0xff] %vm385_vm1, %v10327_v50 }
  0x1c   : > { %9725 = vmatpush3.bf16.msra.mxu0 %v10011_v5  ;;  %9770 = vmatprep.mubr.msk.bf16.mxu1 %vm630_vm0, %v10021_v10  ;;  %v10020_v16 = vld [vmem:[%s10462_s26 + $0x18] sm:$0xff]   ;;  %v10025_v17 = vld [vmem:[%s10462_s26 + $0x20] sm:$0xff]   ;;  %v10026_v20 = vld [vmem:[%s10462_s26 + $0x28] sm:$0xff]   ;;  %406 = vst.msk [vmem:[#allocation2 + $0x98] sm:$0xff] %vm385_vm1, %v10327_v50 }
  0x1d   : > { %9726 = vmatprep.subr.bf16.mxu0 %v10013_v9  ;;  %9767 = vmatpush3.bf16.msra.mxu1 %v10017_v8  ;;  %v10024_v18 = vld [vmem:[%s10462_s26 + $0x98] sm:$0xff]   ;;  %v10029_v19 = vld [vmem:[%s10462_s26 + $0xa0] sm:$0xff]   ;;  %v10027_v21 = vld [vmem:[%s10462_s26 + $0x30] sm:$0xff]   ;;  %407 = vst.msk [vmem:[#allocation2 + $0xa0] sm:$0xf] %vm388_vm2, %v10327_v50 }
  0x1e   : > { %9768 = vmatprep.subr.bf16.mxu1 %v10018_v11  ;;  %v10030_v22 = vld [vmem:[%s10462_s26 + $0xa8] sm:$0xff]   ;;  %v10031_v23 = vld [vmem:[%s10462_s26 + $0xb0] sm:$0xff]   ;;  %v10028_v27 = vld [vmem:[%s10462_s26 + $0x38] sm:$0xff]   ;;  %408 = vst.msk [vmem:[#allocation2 + $0xa8] sm:$0xff] %vm385_vm1, %v10327_v50  ;;  %2906 = vrot.lane.b32.xlu1 %v2874_v55, %s10328_s29 }
  0x1f   : > { %v10033_v29 = vld [vmem:[%s10462_s26 + $0x40] sm:$0xff]   ;;  %v10032_v30 = vld [vmem:[%s10462_s26 + $0xb8] sm:$0xff]   ;;  %v10034_v34 = vld [vmem:[%s10462_s26 + $0x48] sm:$0xff]   ;;  %409 = vst.msk [vmem:[#allocation2 + $0xb0] sm:$0xff] %vm385_vm1, %v10327_v50 }
  0x20   : > { %9727 = vmatpush3.bf16.msra.mxu0 %v10013_v9  ;;  %v10037_v32 = vld [vmem:[%s10462_s26 + $0xc0] sm:$0xff]   ;;  %v10035_v36 = vld [vmem:[%s10462_s26 + $0x50] sm:$0xff]   ;;  %v10038_v38 = vld [vmem:[%s10462_s26 + $0xc8] sm:$0xff]   ;;  %410 = vst.msk [vmem:[#allocation2 + $0xb8] sm:$0xf] %vm388_vm2, %v10327_v50 }
  0x21   : > { %9769 = vmatpush3.bf16.msra.mxu1 %v10018_v11  ;;  %9802 = vmatprep.subr.bf16.mxu0 %v10045_v24  ;;  %v10041_v39 = vld [vmem:[%s10462_s26 + $0xd0] sm:$0xff]   ;;  %v10036_v40 = vld [vmem:[%s10462_s26 + $0x58] sm:$0xff]   ;;  %v10039_v41 = vld [vmem:[%s10462_s26 + $0x60] sm:$0xff]   ;;  %411 = vst.msk [vmem:[#allocation2 + $0xc0] sm:$0xff] %vm385_vm1, %v10327_v50 }
  0x22   : > { %9844 = vmatprep.subr.bf16.mxu1 %v10047_v26  ;;  %v10042_v42 = vld [vmem:[%s10462_s26 + $0xd8] sm:$0xff]   ;;  %v10049_v43 = vld [vmem:[%s10462_s26 + $0xe0] sm:$0xff]   ;;  %v10040_v44 = vld [vmem:[%s10462_s26 + $0x68] sm:$0xff]   ;;  %412 = vst.msk [vmem:[#allocation2 + $0xc8] sm:$0xff] %vm385_vm1, %v10327_v50 }
  0x23   : > { %9729 = vmatmul.mubr.msk.bf16.vlgmr.msra.gmra.mrb[0].mxu0 %vm630_vm0, %v10016_v12  ;;  %v10043_v45 = vld [vmem:[%s10462_s26 + $0x70] sm:$0xff]   ;;  %v10050_v46 = vld [vmem:[%s10462_s26 + $0xe8] sm:$0xff]   ;;  %v10044_v48 = vld [vmem:[%s10462_s26 + $0x78] sm:$0xff]   ;;  %413 = vst.msk [vmem:[#allocation2 + $0xd0] sm:$0xf] %vm388_vm2, %v10327_v50 }
  0x24   : > { %9732 = vmatprep.mubr.msk.bf16.mxu0 %vm630_vm0, %v10019_v13  ;;  %9771 = vmatmul.mubr.msk.bf16.vlgmr.msra.gmra.mrb[0].mxu1 %vm630_vm0, %v10022_v14  ;;  %v10051_v47 = vld [vmem:[%s10462_s26 + $0xf0] sm:$0xff]   ;;  %v10053_v49 = vld [vmem:[%s10462_s26 + $0xf8] sm:$0xff]   ;;  %414 = vst.msk [vmem:[#allocation2 + $0xd8] sm:$0xff] %vm385_vm1, %v10327_v50  ;;  %415 = vst.msk [vmem:[#allocation2 + $0xe0] sm:$0xff] %vm385_vm1, %v10327_v50 }
  0x25   : > { %9774 = vmatprep.mubr.msk.bf16.mxu1 %vm630_vm0, %v10023_v15  ;;  %9803 = vmatpush3.bf16.msra.mxu0 %v10045_v24  ;;  %416 = vst.msk [vmem:[#allocation2 + $0xe8] sm:$0xf] %vm388_vm2, %v10327_v50  ;;  %419 = vst.msk [vmem:[#allocation2 + $0x100] sm:$0xf] %vm388_vm2, %v10327_v50  ;;  %v10057_v51 = vld [vmem:[%s10462_s26 + $0x100] sm:$0xff]   ;;  %v10058_v52 = vld [vmem:[%s10462_s26 + $0x108] sm:$0xff]  }
  0x26   : > { %9804 = vmatprep.subr.bf16.mxu0 %v10046_v25  ;;  %9845 = vmatpush3.bf16.msra.mxu1 %v10047_v26  ;;  %417 = vst.msk [vmem:[#allocation2 + $0xf0] sm:$0xff] %vm385_vm1, %v10327_v50  ;;  %418 = vst.msk [vmem:[#allocation2 + $0xf8] sm:$0xff] %vm385_vm1, %v10327_v50  ;;  %v10059_v56 = vld [vmem:[%s10462_s26 + $0x110] sm:$0xff]   ;;  %v10060_v57 = vld [vmem:[%s10462_s26 + $0x118] sm:$0xff]  }
  0x27   : > { %9846 = vmatprep.subr.bf16.mxu1 %v10052_v31  ;;  %420 = vst.msk [vmem:[#allocation2 + $0x108] sm:$0xff] %vm385_vm1, %v10327_v50  ;;  %421 = vst.msk [vmem:[#allocation2 + $0x110] sm:$0xff] %vm385_vm1, %v10327_v50  ;;  %v2391_v58 = vld [vmem:[#allocation2 + $0x2] sm:$0xff]  ;;  %v2392_v59 = vld [vmem:[#allocation2 + $0xa] sm:$0xff] }
  0x28   : > { %422 = vst.msk [vmem:[#allocation2 + $0x118] sm:$0xf] %vm388_vm2, %v10327_v50  ;;  %425 = vst.msk [vmem:[#allocation2 + $0x130] sm:$0xf] %vm388_vm2, %v10327_v50  ;;  %v2423_v60 = vpack.c.bf16 %v2392_v59, %v2391_v58  ;;  %v2520_v61 = vld [vmem:[#allocation2 + $0x3] sm:$0xff]  ;;  %v2521_v62 = vld [vmem:[#allocation2 + $0xb] sm:$0xff] }
  0x29   : > { %9805 = vmatpush3.bf16.msra.mxu0 %v10046_v25  ;;  %423 = vst.msk [vmem:[#allocation2 + $0x120] sm:$0xff] %vm385_vm1, %v10327_v50  ;;  %424 = vst.msk [vmem:[#allocation2 + $0x128] sm:$0xff] %vm385_vm1, %v10327_v50  ;;  %v2552_v63 = vpack.c.bf16 %v2521_v62, %v2520_v61  ;;  %v2715_v2 = vld [vmem:[#allocation2 + $0x20] sm:$0xff]  ;;  %v2263_v9 = vld [vmem:[#allocation2 + $0x9] sm:$0xff] }
  0x2a   : > { %9806 = vmatprep.subr.bf16.mxu0 %v10048_v28  ;;  %9847 = vmatpush3.bf16.msra.mxu1 %v10052_v31  ;;  %426 = vst.msk [vmem:[#allocation2 + $0x138] sm:$0xff] %vm385_vm1, %v10327_v50  ;;  %427 = vst.msk [vmem:[#allocation2 + $0x140] sm:$0xff] %vm385_vm1, %v10327_v50  ;;  %v2746_v3 = vpack.c.bf16 %v2715_v2, %v2714_v1  ;;  %v2393_v5 = vld [vmem:[#allocation2 + $0x1a] sm:$0xff]  ;;  %v2394_v6 = vld [vmem:[#allocation2 + $0x22] sm:$0xff] }
  0x2b   : > { %9733 = vmatmul.mubr.msk.bf16.gmra.mrb[4].mxu0 %vm630_vm0, %v10020_v16  ;;  %9848 = vmatprep.subr.bf16.mxu1 %v10056_v37  ;;  %428 = vst.msk [vmem:[#allocation2 + $0x148] sm:$0xf] %vm388_vm2, %v10327_v50  ;;  %431 = vst.msk [vmem:[#allocation2 + $0x160] sm:$0xf] %vm388_vm2, %v10327_v50  ;;  %v2424_v7 = vpack.c.bf16 %v2394_v6, %v2393_v5  ;;  %v2262_v8 = vld [vmem:[#allocation2 + $0x1] sm:$0xff]  ;;  %v10070_v24 = vld [vmem:[%s10462_s26 + $0x138] sm:$0xff]  }
  0x2c   : > { %9736 = vmatprep.mubr.msk.bf16.mxu0 %vm630_vm0, %v10025_v17  ;;  %9775 = vmatmul.mubr.msk.bf16.gmra.mrb[4].mxu1 %vm630_vm0, %v10024_v18  ;;  %429 = vst.msk [vmem:[#allocation2 + $0x150] sm:$0xff] %vm385_vm1, %v10327_v50  ;;  %430 = vst.msk [vmem:[#allocation2 + $0x158] sm:$0xff] %vm385_vm1, %v10327_v50  ;;  %v2294_v10 = vpack.c.bf16 %v2263_v9, %v2262_v8  ;;  %v10063_v11 = vld [vmem:[%s10462_s26 + $0x180] sm:$0xff]   ;;  %v10064_v12 = vld [vmem:[%s10462_s26 + $0x188] sm:$0xff]  }
  0x2d   : > { %9778 = vmatprep.mubr.msk.bf16.mxu1 %vm630_vm0, %v10029_v19  ;;  %9807 = vmatpush3.bf16.msra.mxu0 %v10048_v28  ;;  %432 = vst.msk [vmem:[#allocation2 + $0x168] sm:$0xff] %vm385_vm1, %v10327_v50  ;;  %433 = vst.msk [vmem:[#allocation2 + $0x170] sm:$0xff] %vm385_vm1, %v10327_v50  ;;  %v2522_v13 = vld [vmem:[#allocation2 + $0x1b] sm:$0xff]  ;;  %v2523_v14 = vld [vmem:[#allocation2 + $0x23] sm:$0xff] }
  0x2e   : > { %9808 = vmatprep.subr.bf16.mxu0 %v10054_v33  ;;  %9849 = vmatpush3.bf16.msra.mxu1 %v10056_v37  ;;  %434 = vst.msk [vmem:[#allocation2 + $0x178] sm:$0xf] %vm388_vm2, %v10327_v50  ;;  %437 = vst.msk [vmem:[#allocation2 + $0x190] sm:$0xf] %vm388_vm2, %v10327_v50  ;;  %v2553_v15 = vpack.c.bf16 %v2523_v14, %v2522_v13  ;;  %v3162_v16 = vld [vmem:[#allocation2 + $0x1c] sm:$0xff]  ;;  %v3163_v17 = vld [vmem:[#allocation2 + $0x24] sm:$0xff] }
  0x2f   : > { %435 = vst.msk [vmem:[#allocation2 + $0x180] sm:$0xff] %vm385_vm1, %v10327_v50  ;;  %436 = vst.msk [vmem:[#allocation2 + $0x188] sm:$0xff] %vm385_vm1, %v10327_v50  ;;  %2455 = vrot.lane.b32.xlu1 %v2423_v60, %s10328_s29  ;;  %9850 = vmatprep.subr.bf16.mxu1 %v10061_v0  ;;  %v3194_v18 = vpack.c.bf16 %v3163_v17, %v3162_v16  ;;  %v10065_v19 = vld [vmem:[%s10462_s26 + $0x190] sm:$0xff]   ;;  %v10071_v25 = vld [vmem:[%s10462_s26 + $0x1a0] sm:$0xff]  }
  0x30   : > { %438 = vst.msk [vmem:[#allocation2 + $0x198] sm:$0xff] %vm385_vm1, %v10327_v50  ;;  %439 = vst.msk [vmem:[#allocation2 + $0x1a0] sm:$0xff] %vm385_vm1, %v10327_v50  ;;  %2778 = vrot.lane.b32.xlu0 %v2746_v3, %s10330_s15  ;;  %v10072_v26 = vld [vmem:[%s10462_s26 + $0x1a8] sm:$0xff]   ;;  %v10074_v28 = vld [vmem:[%s10462_s26 + $0x1b8] sm:$0xff]  }
  0x31   : > { %9809 = vmatpush3.bf16.msra.mxu0 %v10054_v33  ;;  %440 = vst.msk [vmem:[#allocation2 + $0x1a8] sm:$0xf] %vm388_vm2, %v10327_v50  ;;  %443 = vst.msk [vmem:[#allocation2 + $0x1c0] sm:$0xf] %vm388_vm2, %v10327_v50  ;;  %v10077_v31 = vld [vmem:[%s10462_s26 + $0x150] sm:$0xff]   ;;  %v10079_v33 = vld [vmem:[%s10462_s26 + $0x1c0] sm:$0xff]  }
  0x32   : > { %9810 = vmatprep.subr.bf16.mxu0 %v10055_v35  ;;  %441 = vst.msk [vmem:[#allocation2 + $0x1b0] sm:$0xff] %vm385_vm1, %v10327_v50  ;;  %442 = vst.msk [vmem:[#allocation2 + $0x1b8] sm:$0xff] %vm385_vm1, %v10327_v50  ;;  %9851 = vmatpush3.bf16.msra.mxu1 %v10061_v0  ;;  %v10083_v37 = vld [vmem:[%s10462_s26 + $0x1d0] sm:$0xff]   ;;  %v10093_v58 = vld [vmem:[%s13457_s3 + $0x58] sm:$0xff]  }
  0x33   : > { %9737 = vmatmul.mubr.msk.bf16.gmra.mrb[8].mxu0 %vm630_vm0, %v10026_v20  ;;  %444 = vst.msk [vmem:[#allocation2 + $0x1c8] sm:$0xff] %vm385_vm1, %v10327_v50  ;;  %445 = vst.msk [vmem:[#allocation2 + $0x1d0] sm:$0xff] %vm385_vm1, %v10327_v50  ;;  %2584 = vrot.lane.b32.xlu1 %v2552_v63, %s10329_s13  ;;  %v10066_v20 = vld [vmem:[%s10462_s26 + $0x198] sm:$0xff]   ;;  %v2649_v60 = vld [vmem:[#allocation2 + $0x4] sm:$0xff] }
  0x34   : > { %9740 = vmatprep.mubr.msk.bf16.mxu0 %vm630_vm0, %v10027_v21  ;;  %9779 = vmatmul.mubr.msk.bf16.gmra.mrb[8].mxu1 %vm630_vm0, %v10030_v22  ;;  %446 = vst.msk [vmem:[#allocation2 + $0x1d8] sm:$0xf] %vm388_vm2, %v10327_v50  ;;  %448 = vst.msk [vmem:[#allocation3 + $0x8] sm:$0xf] %vm388_vm2, %v10327_v50  ;;  %v10067_v21 = vld [vmem:[%s10462_s26 + $0x120] sm:$0xff]   ;;  %v10068_v22 = vld [vmem:[%s10462_s26 + $0x128] sm:$0xff]  }
  0x35   : > { %9782 = vmatprep.mubr.msk.bf16.mxu1 %vm630_vm0, %v10031_v23  ;;  %9811 = vmatpush3.bf16.msra.mxu0 %v10055_v35  ;;  %447 = vst.msk [vmem:[#allocation3] sm:$0xff] %vm385_vm1, %v10327_v50  ;;  %449 = vst.msk [vmem:[#allocation3 + $0x10] sm:$0xff] %vm385_vm1, %v10327_v50  ;;  %v10069_v23 = vld [vmem:[%s10462_s26 + $0x130] sm:$0xff]   ;;  %v10081_v35 = vld [vmem:[%s10462_s26 + $0x160] sm:$0xff]  }
  0x36   : > { %450 = vst.msk [vmem:[#allocation3 + $0x18] sm:$0xf] %vm388_vm2, %v10327_v50  ;;  %452 = vst.msk [vmem:[#allocation3 + $0x28] sm:$0xf] %vm388_vm2, %v10327_v50  ;;  %9852 = vmatprep.subr.bf16.mxu1 %v10062_v4  ;;  %2326 = vrot.lane.b32.xlu0 %v2294_v10, %s10330_s15  ;;  %v10094_v59 = vld [vmem:[%s13457_s3 + $0x18] sm:$0xff]   ;;  %v2650_v0 = vld [vmem:[#allocation2 + $0xc] sm:$0xff] }
  0x37   : > { %451 = vst.msk [vmem:[#allocation3 + $0x20] sm:$0xff] %vm385_vm1, %v10327_v50  ;;  %453 = vst.msk [vmem:[#allocation3 + $0x30] sm:$0xff] %vm385_vm1, %v10327_v50  ;;  %2328 = vrot.lane.b32.xlu1 %v2874_v55, %s10330_s15  ;;  %9853 = vmatpush3.bf16.msra.mxu1 %v10062_v4  ;;  %v10841_v61 = vld [vmem:[%s13456_s2] ss:$0 sm:$0xff]  ;;  %v2681_v2 = vpack.c.bf16 %v2650_v0, %v2649_v60  ;;  %v2199_v10 = vld [vmem:[#allocation2 + $0x8] sm:$0xff] }
  0x38   : > { %454 = vst.msk [vmem:[#allocation3 + $0x38] sm:$0xf] %vm388_vm2, %v10327_v50  ;;  %456 = vst.msk [vmem:[#allocation3 + $0x48] sm:$0xf] %vm388_vm2, %v10327_v50  ;;  %v10095_v8 = vld [vmem:[%s13457_s3 + $0x60] sm:$0xff]   ;;  %v10101_v60 = vld [vmem:[%s13457_s3 + $0x78] sm:$0xff]  }
  0x39   : > { %455 = vst.msk [vmem:[#allocation3 + $0x40] sm:$0xff] %vm385_vm1, %v10327_v50  ;;  %457 = vst.msk [vmem:[#allocation3 + $0x50] sm:$0xff] %vm385_vm1, %v10327_v50  ;;  %v10096_v9 = vld [vmem:[%s13457_s3 + $0x20] sm:$0xff]  }
  0x3a   : > { %458 = vst.msk [vmem:[#allocation3 + $0x58] sm:$0xf] %vm388_vm2, %v10327_v50  ;;  %460 = vst.msk [vmem:[#allocation3 + $0x68] sm:$0xf] %vm388_vm2, %v10327_v50  ;;  %3034 = vrot.lane.b32.xlu0 %v2424_v7, %s10329_s13  ;;  %v2198_v17 = vld [vmem:[#allocation2] sm:$0xff] }
  0x3b   : > { %9741 = vmatmul.mubr.msk.bf16.gmra.mrb[12].mxu0 %vm630_vm0, %v10028_v27  ;;  %459 = vst.msk [vmem:[#allocation3 + $0x60] sm:$0xff] %vm385_vm1, %v10327_v50  ;;  %461 = vst.msk [vmem:[#allocation3 + $0x70] sm:$0xff] %vm385_vm1, %v10327_v50  ;;  %2457 = vrot.lane.b32.xlu1 %v2424_v7, %s10328_s29  ;;  %v10073_v27 = vld [vmem:[%s10462_s26 + $0x1b0] sm:$0xff]  }
  0x3c   : > { %9744 = vmatprep.mubr.msk.bf16.mxu0 %vm630_vm0, %v10033_v29  ;;  %9783 = vmatmul.mubr.msk.bf16.gmra.mrb[12].mxu1 %vm630_vm0, %v10032_v30  ;;  %462 = vst.msk [vmem:[#allocation3 + $0x78] sm:$0xf] %vm388_vm2, %v10327_v50  ;;  %464 = vst.msk [vmem:[#allocation3 + $0x88] sm:$0xf] %vm388_vm2, %v10327_v50  ;;  %v10075_v29 = vld [vmem:[%s10462_s26 + $0x140] sm:$0xff]   ;;  %v10076_v30 = vld [vmem:[%s10462_s26 + $0x148] sm:$0xff]  }
  0x3d   : > { %9786 = vmatprep.mubr.msk.bf16.mxu1 %vm630_vm0, %v10037_v32  ;;  %463 = vst.msk [vmem:[#allocation3 + $0x80] sm:$0xff] %vm385_vm1, %v10327_v50  ;;  %465 = vst.msk [vmem:[#allocation3 + $0x90] sm:$0xff] %vm385_vm1, %v10327_v50  ;;  %v10078_v32 = vld [vmem:[%s10462_s26 + $0x158] sm:$0xff]  }
  0x3e   : > { %466 = vst.msk [vmem:[#allocation3 + $0x98] sm:$0xf] %vm388_vm2, %v10327_v50  ;;  %468 = vst.msk [vmem:[#allocation3 + $0xa8] sm:$0xf] %vm388_vm2, %v10327_v50 }
  0x3f   : > { %467 = vst.msk [vmem:[#allocation3 + $0xa0] sm:$0xff] %vm385_vm1, %v10327_v50  ;;  %469 = vst.msk [vmem:[#allocation3 + $0xb0] sm:$0xff] %vm385_vm1, %v10327_v50  ;;  %2586 = vrot.lane.b32.xlu1 %v2553_v15, %s10329_s13 }
  0x40   : > { %470 = vst.msk [vmem:[#allocation3 + $0xb8] sm:$0xf] %vm388_vm2, %v10327_v50  ;;  %vm13146_vm9 = vmand %vm7649_vm7, %vm7650_vm8 }
  0x41   : > { %2247 = vst.msk [vmem:[#allocation4 + $0x38] sm:$0xff] %vm385_vm1, %v2746_v3  ;;  %2697 = vst.msk [vmem:[#allocation4 + $0x8] sm:$0xff] %vm385_vm1, %v2681_v2 }
  0x42   : > { %vm13262_vm11 = vmand %vm7678_vm10, %vm7650_vm8 }
  0x43   : > { %9745 = vmatmul.mubr.msk.bf16.gmra.mrb[16].mxu0 %vm630_vm0, %v10034_v34  ;;  %3226 = vrot.lane.b32.xlu1 %v3194_v18, %s10330_s15  ;;  %v10080_v34 = vld [vmem:[%s10462_s26 + $0x1c8] sm:$0xff]  }
  0x44   : > { %9748 = vmatprep.mubr.msk.bf16.mxu0 %vm630_vm0, %v10035_v36  ;;  %9787 = vmatmul.mubr.msk.bf16.gmra.mrb[16].mxu1 %vm630_vm0, %v10038_v38  ;;  %v10082_v36 = vld [vmem:[%s10462_s26 + $0x168] sm:$0xff]   ;;  %v10084_v38 = vld [vmem:[%s13457_s3 + $0x40] sm:$0xff]  }
  0x45   : > { %9790 = vmatprep.mubr.msk.bf16.mxu1 %vm630_vm0, %v10041_v39  ;;  %9145 = vmatprep.subr.bf16.mxu0 %v10084_v38 }
  0x4b   : > { %9749 = vmatmul.mubr.msk.bf16.gmra.mrb[20].mxu0 %vm630_vm0, %v10036_v40  ;;  %v10085_v40 = vld [vmem:[%s10462_s26 + $0x1d8] sm:$0xff]  }
  0x4c   : > { %9752 = vmatprep.mubr.msk.bf16.mxu0 %vm630_vm0, %v10039_v41  ;;  %9791 = vmatmul.mubr.msk.bf16.gmra.mrb[20].mxu1 %vm630_vm0, %v10042_v42  ;;  %v10086_v41 = vld [vmem:[%s13457_s3] sm:$0xff]   ;;  %v10087_v42 = vld [vmem:[%s13457_s3 + $0x48] sm:$0xff]  }
  0x4d   : > { %9794 = vmatprep.mubr.msk.bf16.mxu1 %vm630_vm0, %v10049_v43  ;;  %v10088_v43 = vld [vmem:[%s13457_s3 + $0x8] sm:$0xff]  }
  0x53   : > { %9753 = vmatmul.mubr.msk.bf16.gmra.mrb[24].mxu0 %vm630_vm0, %v10040_v44  ;;  %v10089_v44 = vld [vmem:[%s10462_s26 + $0x170] sm:$0xff]  }
  0x54   : > { %9756 = vmatprep.mubr.msk.bf16.mxu0 %vm630_vm0, %v10043_v45  ;;  %9795 = vmatmul.mubr.msk.bf16.gmra.mrb[24].mxu1 %vm630_vm0, %v10050_v46 }
  0x55   : > { %9798 = vmatprep.mubr.msk.bf16.mxu1 %vm630_vm0, %v10051_v47 }
  0x5b   : > { %9757 = vmatmul.mubr.msk.bf16.gmra.mrb[28].mxu0 %vm630_vm0, %v10044_v48  ;;  %v10090_v48 = vld [vmem:[%s10462_s26 + $0x178] sm:$0xff]  }
  0x5c   : > { %9799 = vmatmul.mubr.msk.bf16.gmra.mrb[28].mxu1 %vm630_vm0, %v10053_v49  ;;  %9812 = vmatprep.mubr.msk.bf16.mxu0 %vm630_vm0, %v10057_v51  ;;  %v10091_v49 = vld [vmem:[%s13457_s3 + $0x50] sm:$0xff]  }
  0x5d   : > { %9854 = vmatprep.mubr.msk.bf16.mxu1 %vm630_vm0, %v10063_v11  ;;  %v10092_v51 = vld [vmem:[%s13457_s3 + $0x10] sm:$0xff]  }
  0x63   : > { %9813 = vmatmul.mubr.msk.bf16.vlgmr.msra.gmra.mrb[32].mxu0 %vm630_vm0, %v10058_v52 }
  0x64   : > { %9816 = vmatprep.mubr.msk.bf16.mxu0 %vm630_vm0, %v10059_v56  ;;  %9855 = vmatmul.mubr.msk.bf16.vlgmr.msra.gmra.mrb[32].mxu1 %vm630_vm0, %v10064_v12 }
  0x65   : > { %9858 = vmatprep.mubr.msk.bf16.mxu1 %vm630_vm0, %v10065_v19  ;;  %9146 = vmatpush3.bf16.msra.mxu0 %v10086_v41 }
  0x66   : > { %9147 = vmatprep.subr.bf16.mxu0 %v10087_v42 }
  0x69   : > { %9148 = vmatpush3.bf16.msra.mxu0 %v10088_v43 }
  0x6a   : > { %9149 = vmatprep.subr.bf16.mxu0 %v10091_v49  ;;  %v3098_v49 = vld [vmem:[#allocation2 + $0x1b] sm:$0xff] }
  0x6b   : > { %9817 = vmatmul.mubr.msk.bf16.gmra.mrb[36].mxu0 %vm630_vm0, %v10060_v57 }
  0x6c   : > { %9859 = vmatmul.mubr.msk.bf16.gmra.mrb[36].mxu1 %vm630_vm0, %v10066_v20  ;;  %9820 = vmatprep.mubr.msk.bf16.mxu0 %vm630_vm0, %v10067_v21 }
  0x6d   : > { %9862 = vmatprep.mubr.msk.bf16.mxu1 %vm630_vm0, %v10071_v25  ;;  %9150 = vmatpush3.bf16.msra.mxu0 %v10092_v51  ;;  %v3099_v51 = vld [vmem:[#allocation2 + $0x23] sm:$0xff] }
  0x6e   : > { %9151 = vmatprep.subr.bf16.mxu0 %v10093_v58 }
  0x71   : > { %9152 = vmatpush3.bf16.msra.mxu0 %v10094_v59 }
  0x72   : > { %9153 = vmatprep.subr.bf16.mxu0 %v10095_v8 }
  0x73   : > { %9821 = vmatmul.mubr.msk.bf16.gmra.mrb[40].mxu0 %vm630_vm0, %v10068_v22 }
  0x74   : > { %9824 = vmatprep.mubr.msk.bf16.mxu0 %vm630_vm0, %v10069_v23  ;;  %9863 = vmatmul.mubr.msk.bf16.gmra.mrb[40].mxu1 %vm630_vm0, %v10072_v26  ;;  %v2230_v23 = vpack.c.bf16 %v2199_v10, %v2198_v17 }
  0x75   : > { %9866 = vmatprep.mubr.msk.bf16.mxu1 %vm630_vm0, %v10073_v27  ;;  %9154 = vmatpush3.bf16.msra.mxu0 %v10096_v9 }
  0x76   : > { %2246 = vst.msk [vmem:[#allocation4] sm:$0xff] %vm385_vm1, %v2230_v23 }
  0x7b   : > { %9825 = vmatmul.mubr.msk.bf16.gmra.mrb[44].mxu0 %vm630_vm0, %v10070_v24 }
  0x7c   : > { %9867 = vmatmul.mubr.msk.bf16.gmra.mrb[44].mxu1 %vm630_vm0, %v10074_v28  ;;  %9828 = vmatprep.mubr.msk.bf16.mxu0 %vm630_vm0, %v10075_v29 }
  0x7d   : > { %9870 = vmatprep.mubr.msk.bf16.mxu1 %vm630_vm0, %v10079_v33 }
  0x83   : > { %9829 = vmatmul.mubr.msk.bf16.gmra.mrb[48].mxu0 %vm630_vm0, %v10076_v30 }
  0x84   : > { %9832 = vmatprep.mubr.msk.bf16.mxu0 %vm630_vm0, %v10077_v31  ;;  %9871 = vmatmul.mubr.msk.bf16.gmra.mrb[48].mxu1 %vm630_vm0, %v10080_v34  ;;  %v10097_v34 = vld [vmem:[%s13457_s3 + $0x68] sm:$0xff]  }
  0x85   : > { %9874 = vmatprep.mubr.msk.bf16.mxu1 %vm630_vm0, %v10083_v37  ;;  %9155 = vmatprep.subr.bf16.mxu0 %v10097_v34 }
  0x8b   : > { %9833 = vmatmul.mubr.msk.bf16.gmra.mrb[52].mxu0 %vm630_vm0, %v10078_v32 }
  0x8c   : > { %9836 = vmatprep.mubr.msk.bf16.mxu0 %vm630_vm0, %v10081_v35  ;;  %9875 = vmatmul.mubr.msk.bf16.gmra.mrb[52].mxu1 %vm630_vm0, %v10085_v40  ;;  %v10098_v35 = vld [vmem:[%s13457_s3 + $0x28] sm:$0xff]  }
  0x8d   : > { %9156 = vmatpush3.bf16.msra.mxu0 %v10098_v35 }
  0x90   : > { %v10803_v39 = vpop.permute.xlu1 %2906 }
  0x93   : > { %9837 = vmatmul.mubr.msk.bf16.gmra.mrb[56].mxu0 %vm630_vm0, %v10082_v36 }
  0x94   : > { %9840 = vmatprep.mubr.msk.bf16.mxu0 %vm630_vm0, %v10089_v44 }
  0x9b   : > { %9841 = vmatmul.mubr.msk.bf16.gmra.mrb[60].mxu0 %vm630_vm0, %v10090_v48 }
  0xa1   : > { %v10819_v45 = vpop.permute.xlu1 %2455 }
  0xa2   : > { %v2779_v1 = vpop.permute.xlu0 %2778 }
  0xa3   : > { %2826 = vst.msk [vmem:[#allocation4 + $0x8] sm:$0xff] %vm2374_vm3, %v2779_v1 }
  0xa4   : > { %2954 = vst.msk [vmem:[#allocation4 + $0x8] sm:$0xff] %vm2503_vm4, %v10803_v39 }
  0xa5   : > { %v10829_v53 = vpop.permute.xlu1 %2584 }
  0xa8   : > { %v2327_v29 = vpop.permute.xlu0 %2326 }
  0xa9   : > { %v2329_v63 = vpop.permute.xlu1 %2328  ;;  %2375 = vst.msk [vmem:[#allocation4] sm:$0xff] %vm2374_vm3, %v2327_v29 }
  0xaa   : > { %2376 = vst.msk [vmem:[#allocation4 + $0x38] sm:$0xff] %vm2374_vm3, %v2329_v63  ;;  %v2651_v63 = vld [vmem:[#allocation2 + $0x1c] sm:$0xff] }
  0xab   : > { %2504 = vst.msk [vmem:[#allocation4] sm:$0xff] %vm2503_vm4, %v10819_v45  ;;  %v10099_v45 = vld [vmem:[%s13457_s3 + $0x70] sm:$0xff]  }
  0xac   : > { %2633 = vst.msk [vmem:[#allocation4] sm:$0xff] %vm2632_vm5, %v10829_v53  ;;  %9157 = vmatprep.subr.bf16.mxu0 %v10099_v45 }
  0xad   : > { %v2458_v16 = vpop.permute.xlu1 %2457 }
  0xae   : > { %2505 = vst.msk [vmem:[#allocation4 + $0x38] sm:$0xff] %vm2503_vm4, %v2458_v16 }
  0xb1   : > { %v2587_v40 = vpop.permute.xlu1 %2586 }
  0xb2   : > { %2634 = vst.msk [vmem:[#allocation4 + $0x38] sm:$0xff] %vm2632_vm5, %v2587_v40 }
  0xb3   : > { %v4956_v16 = vld [vmem:[#allocation4] sm:$0xff] }
  0xb5   : > { %v3227_v58 = vpop.permute.xlu1 %3226 }
  0xf6   : > { %v9730_v46 = vpop.f32.mrb[0].mxu0 }
  0xf7   : > { %v713_v47 = vpop.f32.mrb[1].mxu0  ;;  %v9772_v55 = vpop.f32.mrb[0].mxu1  ;;  %v722_v4 = vadd.f32 %v9730_v46, %v10841_v61 }
  0xf8   : > { %v9731_v52 = vpop.f32.mrb[2].mxu0  ;;  %v1154_v56 = vpop.f32.mrb[1].mxu1  ;;  %v714_v5 = vadd.f32 %v10841_v61, %v713_v47  ;;  %v10858_v15 = vadd.f32 %v9772_v55, %v10841_v61  ;;  %v10100_v55 = vld [vmem:[%s13457_s3 + $0x30] sm:$0xff]  }
  0xf9   : > { %v716_v54 = vpop.f32.mrb[3].mxu0  ;;  %v9773_v57 = vpop.f32.mrb[2].mxu1  ;;  %v725_v11 = vadd.f32 %v9731_v52, %v10841_v61  ;;  %v10863_v21 = vadd.f32 %v10841_v61, %v1154_v56  ;;  %9158 = vmatpush3.bf16.msra.mxu0 %v10100_v55 }
  0xfa   : > { %v1157_v62 = vpop.f32.mrb[3].mxu1  ;;  %v717_v12 = vadd.f32 %v10841_v61, %v716_v54  ;;  %v1166_v26 = vadd.f32 %v9773_v57, %v10841_v61  ;;  %v3035_v46 = vpop.permute.xlu0 %3034  ;;  %v3130_v54 = vpack.c.bf16 %v3099_v51, %v3098_v49  ;;  %9159 = vmatprep.subr.bf16.mxu0 %v10101_v60 }
  0xfb   : > { %v1158_v31 = vadd.f32 %v10841_v61, %v1157_v62  ;;  %3082 = vst.msk [vmem:[#allocation4 + $0x8] sm:$0xff] %vm2632_vm5, %v3035_v46  ;;  %v10102_v62 = vld [vmem:[%s13457_s3 + $0x38] sm:$0xff]  }
  0xfc   : > { %3146 = vst.msk [vmem:[#allocation4 + $0x10] sm:$0xff] %vm385_vm1, %v3130_v54 }
  0xfd   : > { %3274 = vst.msk [vmem:[#allocation4 + $0x10] sm:$0xff] %vm2374_vm3, %v3227_v58  ;;  %9160 = vmatpush3.bf16.msra.mxu0 %v10102_v62 }
  0xfe   : > { %v9734_v3 = vpop.f32.mrb[4].mxu0 }
  0xff   : > { %v738_v6 = vadd.f32 %v9734_v3, %v10841_v61  ;;  %v729_v7 = vpop.f32.mrb[5].mxu0  ;;  %v9776_v22 = vpop.f32.mrb[4].mxu1  ;;  %v2652_v3 = vld [vmem:[#allocation2 + $0x24] sm:$0xff] }
 0x100   : > { %v730_v13 = vadd.f32 %v10841_v61, %v729_v7  ;;  %v9735_v14 = vpop.f32.mrb[6].mxu0  ;;  %v1179_v27 = vadd.f32 %v9776_v22, %v10841_v61  ;;  %v1170_v28 = vpop.f32.mrb[5].mxu1  ;;  %v2682_v8 = vpack.c.bf16 %v2652_v3, %v2651_v63 }
 0x101   : > { %v842_v18 = vmax.f32 %v722_v4, %v738_v6  ;;  %v741_v19 = vadd.f32 %v9735_v14, %v10841_v61  ;;  %v732_v20 = vpop.f32.mrb[7].mxu0  ;;  %v1171_v32 = vadd.f32 %v10841_v61, %v1170_v28  ;;  %v9777_v33 = vpop.f32.mrb[6].mxu1 }
 0x102   : > { %v840_v24 = vmax.f32 %v714_v5, %v730_v13  ;;  %v733_v25 = vadd.f32 %v10841_v61, %v732_v20  ;;  %v1283_v37 = vmax.f32 %v10858_v15, %v1179_v27  ;;  %v1182_v38 = vadd.f32 %v9777_v33, %v10841_v61  ;;  %v1173_v39 = vpop.f32.mrb[7].mxu1  ;;  %2698 = vst.msk [vmem:[#allocation4 + $0x40] sm:$0xff] %vm385_vm1, %v2682_v8 }
 0x103   : > { %858 = vst.msk [vmem:[#allocation5 + $0x10] sm:$0xff] %vm385_vm1, %v842_v18  ;;  %v843_v30 = vmax.f32 %v725_v11, %v741_v19  ;;  %v1281_v41 = vmax.f32 %v10863_v21, %v1171_v32  ;;  %v1174_v42 = vadd.f32 %v10841_v61, %v1173_v39 }
 0x104   : > { %856 = vst.msk [vmem:[#allocation5] sm:$0xff] %vm385_vm1, %v840_v24  ;;  %v841_v36 = vmax.f32 %v717_v12, %v733_v25  ;;  %v1284_v43 = vmax.f32 %v1166_v26, %v1182_v38  ;;  %v4957_v12 = vld [vmem:[#allocation4 + $0x8] sm:$0xff] }
 0x105   : > { %859 = vst.msk [vmem:[#allocation5 + $0x18] sm:$0xff] %vm385_vm1, %v843_v30  ;;  %v1282_v47 = vmax.f32 %v1158_v31, %v1174_v42  ;;  %5555 = vmatprep.mubr.bf16.mxu0 %v4957_v12 }
 0x106   : > { %857 = vst.msk [vmem:[#allocation5 + $0x8] sm:$0xff] %vm385_vm1, %v841_v36  ;;  %v9738_v44 = vpop.f32.mrb[8].mxu0  ;;  %5556 = vmatmul.mubr.bf16.vlgmr.msra.gmra.mrb[64].mxu0 %v4956_v16 }
 0x107   : > { %v745_v48 = vpop.f32.mrb[9].mxu0  ;;  %v9780_v53 = vpop.f32.mrb[8].mxu1  ;;  %v754_v7 = vadd.f32 %v9738_v44, %v10841_v61 }
 0x108   : > { %v9739_v52 = vpop.f32.mrb[10].mxu0  ;;  %v1186_v57 = vpop.f32.mrb[9].mxu1  ;;  %v746_v10 = vadd.f32 %v10841_v61, %v745_v48  ;;  %v10923_v20 = vadd.f32 %v9780_v53, %v10841_v61 }
 0x109   : > { %v748_v56 = vpop.f32.mrb[11].mxu0  ;;  %v9781_v59 = vpop.f32.mrb[10].mxu1  ;;  %v757_v13 = vadd.f32 %v9739_v52, %v10841_v61  ;;  %v10927_v24 = vadd.f32 %v10841_v61, %v1186_v57 }
 0x10a   : > { %v1189_v2 = vpop.f32.mrb[11].mxu1  ;;  %v749_v17 = vadd.f32 %v10841_v61, %v748_v56  ;;  %v10931_v28 = vadd.f32 %v9781_v59, %v10841_v61 }
 0x10b   : > { %v10938_v32 = vadd.f32 %v10841_v61, %v1189_v2 }
 0x10c   : > { %v874_v0 = vld [vmem:[#allocation5 + $0x10] ss:$2 sm:$0xff]  ;;  %v890_v1 = vld [vmem:[#allocation5 + $0x11] ss:$2 sm:$0xff] }
 0x10d   : > { %1299 = vst.msk [vmem:[#allocation5 + $0x10] sm:$0xff] %vm385_vm1, %v1283_v37  ;;  %v872_v4 = vld [vmem:[#allocation5] ss:$2 sm:$0xff]  ;;  %v888_v5 = vld [vmem:[#allocation5 + $0x1] ss:$2 sm:$0xff]  ;;  %1300 = vst.msk [vmem:[#allocation5 + $0x18] sm:$0xff] %vm385_vm1, %v1284_v43  ;;  %v904_v6 = vmax.f32 %v874_v0, %v890_v1 }
 0x10e   : > { %1297 = vst.msk [vmem:[#allocation5] sm:$0xff] %vm385_vm1, %v1281_v41  ;;  %1298 = vst.msk [vmem:[#allocation5 + $0x8] sm:$0xff] %vm385_vm1, %v1282_v47  ;;  %v903_v9 = vmax.f32 %v872_v4, %v888_v5  ;;  %v9742_v11 = vpop.f32.mrb[12].mxu0 }
 0x10f   : > { %913 = vst.msk [vmem:[#allocation2 + $0x3a] sm:$0xff] %vm385_vm1, %v904_v6  ;;  %v770_v14 = vadd.f32 %v9742_v11, %v10841_v61  ;;  %v761_v15 = vpop.f32.mrb[13].mxu0  ;;  %v9784_v25 = vpop.f32.mrb[12].mxu1 }
 0x110   : > { %912 = vst.msk [vmem:[#allocation2 + $0x32] sm:$0xff] %vm385_vm1, %v903_v9  ;;  %v762_v18 = vadd.f32 %v10841_v61, %v761_v15  ;;  %v9743_v19 = vpop.f32.mrb[14].mxu0  ;;  %v10934_v29 = vadd.f32 %v9784_v25, %v10841_v61  ;;  %v1202_v30 = vpop.f32.mrb[13].mxu1 }
 0x111   : > { %v846_v21 = vmax.f32 %v754_v7, %v770_v14  ;;  %v773_v22 = vadd.f32 %v9743_v19, %v10841_v61  ;;  %v764_v23 = vpop.f32.mrb[15].mxu0  ;;  %v10941_v33 = vadd.f32 %v10841_v61, %v1202_v30  ;;  %v9785_v34 = vpop.f32.mrb[14].mxu1 }
 0x112   : > { %v844_v26 = vmax.f32 %v746_v10, %v762_v18  ;;  %v765_v27 = vadd.f32 %v10841_v61, %v764_v23  ;;  %v1287_v38 = vmax.f32 %v10923_v20, %v10934_v29  ;;  %v1214_v39 = vadd.f32 %v9785_v34, %v10841_v61  ;;  %v1205_v40 = vpop.f32.mrb[15].mxu1 }
 0x113   : > { %862 = vst.msk [vmem:[#allocation5 + $0x30] sm:$0xff] %vm385_vm1, %v846_v21  ;;  %v847_v31 = vmax.f32 %v757_v13, %v773_v22  ;;  %v1285_v44 = vmax.f32 %v10927_v24, %v10941_v33  ;;  %v1206_v46 = vadd.f32 %v10841_v61, %v1205_v40 }
 0x114   : > { %v1314_v35 = vld [vmem:[#allocation5 + $0x10] ss:$2 sm:$0xff]  ;;  %v1322_v36 = vld [vmem:[#allocation5 + $0x11] ss:$2 sm:$0xff]  ;;  %860 = vst.msk [vmem:[#allocation5 + $0x20] sm:$0xff] %vm385_vm1, %v844_v26  ;;  %v845_v37 = vmax.f32 %v749_v17, %v765_v27  ;;  %v1288_v48 = vmax.f32 %v10931_v28, %v1214_v39 }
 0x115   : > { %v1313_v41 = vld [vmem:[#allocation5] ss:$2 sm:$0xff]  ;;  %v1321_v42 = vld [vmem:[#allocation5 + $0x1] ss:$2 sm:$0xff]  ;;  %863 = vst.msk [vmem:[#allocation5 + $0x38] sm:$0xff] %vm385_vm1, %v847_v31  ;;  %v1330_v43 = vmax.f32 %v1314_v35, %v1322_v36  ;;  %v1286_v54 = vmax.f32 %v10938_v32, %v1206_v46 }
 0x116   : > { %861 = vst.msk [vmem:[#allocation5 + $0x28] sm:$0xff] %vm385_vm1, %v845_v37  ;;  %v1329_v47 = vmax.f32 %v1313_v41, %v1321_v42  ;;  %v9746_v45 = vpop.f32.mrb[16].mxu0  ;;  %v2396_v57 = vld [vmem:[#allocation2 + $0x3a] sm:$0xff] }
 0x117   : > { %v2716_v49 = vld [vmem:[#allocation2 + $0x30] sm:$0xff]  ;;  %v2717_v51 = vld [vmem:[#allocation2 + $0x38] sm:$0xff]  ;;  %1339 = vst.msk [vmem:[#allocation2 + $0x9a] sm:$0xff] %vm385_vm1, %v1330_v43  ;;  %v777_v55 = vpop.f32.mrb[17].mxu0  ;;  %v9788_v63 = vpop.f32.mrb[16].mxu1  ;;  %v786_v23 = vadd.f32 %v9746_v45, %v10841_v61 }
 0x118   : > { %v2266_v52 = vld [vmem:[#allocation2 + $0x31] sm:$0xff]  ;;  %v10955_v56 = vpack.c.bf16 %v2717_v51, %v2716_v49  ;;  %v2267_v53 = vld [vmem:[#allocation2 + $0x39] sm:$0xff]  ;;  %1338 = vst.msk [vmem:[#allocation2 + $0x92] sm:$0xff] %vm385_vm1, %v1329_v47  ;;  %v9747_v58 = vpop.f32.mrb[18].mxu0  ;;  %v1218_v2 = vpop.f32.mrb[17].mxu1  ;;  %v778_v25 = vadd.f32 %v10841_v61, %v777_v55  ;;  %v10984_v36 = vadd.f32 %v9788_v63, %v10841_v61 }
 0x119   : > { %v10958_v59 = vpack.c.bf16 %v2267_v53, %v2266_v52  ;;  %v2395_v60 = vld [vmem:[#allocation2 + $0x32] sm:$0xff]  ;;  %v780_v62 = vpop.f32.mrb[19].mxu0  ;;  %v3547_v5 = vld [vmem:[#allocation2 + $0x3a] sm:$0xff]  ;;  %v9789_v7 = vpop.f32.mrb[18].mxu1  ;;  %v789_v30 = vadd.f32 %v9747_v58, %v10841_v61  ;;  %v10987_v37 = vadd.f32 %v10841_v61, %v1218_v2 }
 0x11a   : > { %v2202_v0 = vld [vmem:[#allocation2 + $0x30] sm:$0xff]  ;;  %v2203_v1 = vld [vmem:[#allocation2 + $0x38] sm:$0xff]  ;;  %2780 = vrot.lane.b32.xlu0 %v10955_v56, %s10330_s15  ;;  %v1221_v15 = vpop.f32.mrb[19].mxu1  ;;  %v2425_v18 = vpack.c.bf16 %v2396_v57, %v2395_v60  ;;  %v781_v31 = vadd.f32 %v10841_v61, %v780_v62 }
 0x11b   : > { %v2232_v3 = vpack.c.bf16 %v2203_v1, %v2202_v0  ;;  %v3546_v4 = vld [vmem:[#allocation2 + $0x32] sm:$0xff]  ;;  %2330 = vrot.lane.b32.xlu1 %v10958_v59, %s10330_s15  ;;  %v3101_v9 = vld [vmem:[#allocation2 + $0x3b] sm:$0xff] }
 0x11c   : > { %v3100_v6 = vld [vmem:[#allocation2 + $0x33] sm:$0xff]  ;;  %v3578_v8 = vpack.c.bf16 %v3547_v5, %v3546_v4  ;;  %v2654_v10 = vld [vmem:[#allocation2 + $0x3c] sm:$0xff] }
 0x11d   : > { %v2653_v11 = vld [vmem:[#allocation2 + $0x34] sm:$0xff]  ;;  %2248 = vst.msk [vmem:[#allocation4 + $0x70] sm:$0xff] %vm385_vm1, %v2232_v3  ;;  %v3131_v16 = vpack.c.bf16 %v3101_v9, %v3100_v6  ;;  %v876_v20 = vld [vmem:[#allocation5 + $0x20] ss:$2 sm:$0xff]  ;;  %v892_v21 = vld [vmem:[#allocation5 + $0x21] ss:$2 sm:$0xff] }
 0x11e   : > { %v2525_v12 = vld [vmem:[#allocation2 + $0x3b] sm:$0xff]  ;;  %v2683_v17 = vpack.c.bf16 %v2654_v10, %v2653_v11  ;;  %v2524_v19 = vld [vmem:[#allocation2 + $0x33] sm:$0xff]  ;;  %3594 = vst.msk [vmem:[#allocation4 + $0x18] sm:$0xff] %vm385_vm1, %v3578_v8  ;;  %2908 = vrot.lane.b32.xlu0 %v10958_v59, %s10328_s29  ;;  %1301 = vst.msk [vmem:[#allocation5 + $0x20] sm:$0xff] %vm385_vm1, %v1285_v44  ;;  %v905_v24 = vmax.f32 %v876_v20, %v892_v21  ;;  %v9750_v26 = vpop.f32.mrb[20].mxu0  ;;  %v10996_v44 = vadd.f32 %v10841_v61, %v1221_v15 }
 0x11f   : > { %v878_v13 = vld [vmem:[#allocation5 + $0x30] ss:$2 sm:$0xff]  ;;  %v894_v14 = vld [vmem:[#allocation5 + $0x31] ss:$2 sm:$0xff]  ;;  %1302 = vst.msk [vmem:[#allocation5 + $0x28] sm:$0xff] %vm385_vm1, %v1286_v54  ;;  %3147 = vst.msk [vmem:[#allocation4 + $0x48] sm:$0xff] %vm385_vm1, %v3131_v16  ;;  %2459 = vrot.lane.b32.xlu1 %v2425_v18, %s10328_s29  ;;  %v802_v27 = vadd.f32 %v9750_v26, %v10841_v61  ;;  %v2554_v29 = vpack.c.bf16 %v2525_v12, %v2524_v19 }
 0x120   : > { %1303 = vst.msk [vmem:[#allocation5 + $0x30] sm:$0xff] %vm385_vm1, %v1287_v38  ;;  %1304 = vst.msk [vmem:[#allocation5 + $0x38] sm:$0xff] %vm385_vm1, %v1288_v48  ;;  %v906_v22 = vmax.f32 %v878_v13, %v894_v14  ;;  %v793_v28 = vpop.f32.mrb[21].mxu0  ;;  %v10990_v38 = vadd.f32 %v9789_v7, %v10841_v61  ;;  %v9792_v39 = vpop.f32.mrb[20].mxu1  ;;  %v2210_v40 = vld [vmem:[#allocation2 + $0x90] sm:$0xff]  ;;  %v2211_v47 = vld [vmem:[#allocation2 + $0x98] sm:$0xff] }
 0x121   : > { %2699 = vst.msk [vmem:[#allocation4 + $0x78] sm:$0xff] %vm385_vm1, %v2683_v17  ;;  %914 = vst.msk [vmem:[#allocation2 + $0x4a] sm:$0xff] %vm385_vm1, %v905_v24  ;;  %v794_v32 = vadd.f32 %v10841_v61, %v793_v28  ;;  %v9751_v33 = vpop.f32.mrb[22].mxu0  ;;  %v850_v34 = vmax.f32 %v786_v23, %v802_v27  ;;  %v1234_v46 = vpop.f32.mrb[21].mxu1  ;;  %v3554_v48 = vld [vmem:[#allocation2 + $0x92] sm:$0xff]  ;;  %v3555_v45 = vld [vmem:[#allocation2 + $0x9a] sm:$0xff]  ;;  %v11001_v51 = vadd.f32 %v9792_v39, %v10841_v61 }
 0x122   : > { %915 = vst.msk [vmem:[#allocation2 + $0x52] sm:$0xff] %vm385_vm1, %v906_v22  ;;  %v796_v35 = vpop.f32.mrb[23].mxu0  ;;  %3036 = vrot.lane.b32.xlu0 %v2425_v18, %s10329_s13  ;;  %v805_v42 = vadd.f32 %v9751_v33, %v10841_v61  ;;  %v3739_v49 = vld [vmem:[#allocation2 + $0x3c] sm:$0xff]  ;;  %v11004_v52 = vadd.f32 %v10841_v61, %v1234_v46  ;;  %v9793_v54 = vpop.f32.mrb[22].mxu1  ;;  %v2236_v55 = vpack.c.bf16 %v2211_v47, %v2210_v40  ;;  %v3108_v57 = vld [vmem:[#allocation2 + $0x93] sm:$0xff] }
 0x123   : > { %v848_v41 = vmax.f32 %v778_v25, %v794_v32  ;;  %v797_v43 = vadd.f32 %v10841_v61, %v796_v35  ;;  %2588 = vrot.lane.b32.xlu1 %v2554_v29, %s10329_s13  ;;  %866 = vst.msk [vmem:[#allocation5 + $0x50] sm:$0xff] %vm385_vm1, %v850_v34  ;;  %v3582_v53 = vpack.c.bf16 %v3555_v45, %v3554_v48  ;;  %v3109_v58 = vld [vmem:[#allocation2 + $0x9b] sm:$0xff]  ;;  %v1237_v3 = vpop.f32.mrb[23].mxu1  ;;  %v2724_v20 = vld [vmem:[#allocation2 + $0x90] sm:$0xff] }
 0x124   : > { %v2661_v60 = vld [vmem:[#allocation2 + $0x94] sm:$0xff]  ;;  %v851_v0 = vmax.f32 %v789_v30, %v805_v42  ;;  %v1246_v2 = vadd.f32 %v9793_v54, %v10841_v61  ;;  %v3135_v4 = vpack.c.bf16 %v3109_v58, %v3108_v57  ;;  %v2662_v5 = vld [vmem:[#allocation2 + $0x9c] sm:$0xff]  ;;  %v1291_v10 = vmax.f32 %v10984_v36, %v11001_v51  ;;  %2252 = vst.msk [vmem:[#allocation4 + $0x150] sm:$0xff] %vm385_vm1, %v2236_v55 }
 0x125   : > { %864 = vst.msk [vmem:[#allocation5 + $0x40] sm:$0xff] %vm385_vm1, %v848_v41  ;;  %v849_v1 = vmax.f32 %v781_v31, %v797_v43  ;;  %v3738_v6 = vld [vmem:[#allocation2 + $0x34] sm:$0xff]  ;;  %v1289_v11 = vmax.f32 %v10987_v37, %v11004_v52  ;;  %v11013_v12 = vadd.f32 %v10841_v61, %v1237_v3  ;;  %3598 = vst.msk [vmem:[#allocation4 + $0xf8] sm:$0xff] %vm385_vm1, %v3582_v53 }
 0x126   : > { %v1315_v7 = vld [vmem:[#allocation5 + $0x20] ss:$2 sm:$0xff]  ;;  %v1323_v8 = vld [vmem:[#allocation5 + $0x21] ss:$2 sm:$0xff]  ;;  %4494 = vst.msk [vmem:[#allocation4 + $0x98] sm:$0xff] %vm385_vm1, %v2236_v55  ;;  %3674 = vrot.lane.b32.xlu0 %v2554_v29, %s10330_s15  ;;  %867 = vst.msk [vmem:[#allocation5 + $0x58] sm:$0xff] %vm385_vm1, %v851_v0  ;;  %v1292_v15 = vmax.f32 %v10990_v38, %v1246_v2  ;;  %v2687_v16 = vpack.c.bf16 %v2662_v5, %v2661_v60  ;;  %v3770_v19 = vpack.c.bf16 %v3739_v49, %v3738_v6 }
 0x127   : > { %v1316_v62 = vld [vmem:[#allocation5 + $0x30] ss:$2 sm:$0xff]  ;;  %v1324_v63 = vld [vmem:[#allocation5 + $0x31] ss:$2 sm:$0xff]  ;;  %865 = vst.msk [vmem:[#allocation5 + $0x48] sm:$0xff] %vm385_vm1, %v849_v1  ;;  %v1331_v13 = vmax.f32 %v1315_v7, %v1323_v8  ;;  %v9754_v14 = vpop.f32.mrb[24].mxu0  ;;  %3354 = vrot.lane.b32.xlu1 %v10955_v56, %s10328_s29  ;;  %v1290_v18 = vmax.f32 %v10996_v44, %v11013_v12 }
 0x128   : > { %v1332_v9 = vmax.f32 %v1316_v62, %v1324_v63  ;;  %3151 = vst.msk [vmem:[#allocation4 + $0x128] sm:$0xff] %vm385_vm1, %v3135_v4  ;;  %v809_v17 = vpop.f32.mrb[25].mxu0  ;;  %2703 = vst.msk [vmem:[#allocation4 + $0x158] sm:$0xff] %vm385_vm1, %v2687_v16  ;;  %v2725_v22 = vld [vmem:[#allocation2 + $0x98] sm:$0xff]  ;;  %v2204_v24 = vld [vmem:[#allocation2 + $0x48] sm:$0xff]  ;;  %v818_v43 = vadd.f32 %v9754_v14, %v10841_v61 }
 0x129   : > { %1340 = vst.msk [vmem:[#allocation2 + $0xaa] sm:$0xff] %vm385_vm1, %v1331_v13  ;;  %v9755_v21 = vpop.f32.mrb[26].mxu0  ;;  %v2205_v25 = vld [vmem:[#allocation2 + $0x50] sm:$0xff]  ;;  %v11033_v33 = vpack.c.bf16 %v2725_v22, %v2724_v20  ;;  %v2853_v40 = vld [vmem:[#allocation2 + $0x99] sm:$0xff]  ;;  %v810_v44 = vadd.f32 %v10841_v61, %v809_v17 }
 0x12a   : > { %1341 = vst.msk [vmem:[#allocation2 + $0xb2] sm:$0xff] %vm385_vm1, %v1332_v9  ;;  %v812_v23 = vpop.f32.mrb[27].mxu0  ;;  %3802 = vrot.lane.b32.xlu0 %v3770_v19, %s10328_s29  ;;  %v2233_v56 = vpack.c.bf16 %v2205_v25, %v2204_v24  ;;  %v3102_v26 = vld [vmem:[#allocation2 + $0x4b] sm:$0xff]  ;;  %v3103_v27 = vld [vmem:[#allocation2 + $0x53] sm:$0xff]  ;;  %v821_v55 = vadd.f32 %v9755_v21, %v10841_v61  ;;  %v2533_v21 = vld [vmem:[#allocation2 + $0x9b] sm:$0xff] }
 0x12b   : > { %v3548_v28 = vld [vmem:[#allocation2 + $0x4a] sm:$0xff]  ;;  %3482 = vrot.lane.b32.xlu1 %v10958_v59, %s10329_s13  ;;  %v3132_v29 = vpack.c.bf16 %v3103_v27, %v3102_v26  ;;  %v3549_v30 = vld [vmem:[#allocation2 + $0x52] sm:$0xff]  ;;  %v2981_v54 = vld [vmem:[#allocation2 + $0x9a] sm:$0xff]  ;;  %v813_v62 = vadd.f32 %v10841_v61, %v812_v23  ;;  %v9796_v23 = vpop.f32.mrb[24].mxu1 }
 0x12c   : > { %v3995_v31 = vld [vmem:[#allocation2 + $0x49] sm:$0xff]  ;;  %v3996_v32 = vld [vmem:[#allocation2 + $0x51] sm:$0xff]  ;;  %2249 = vst.msk [vmem:[#allocation4 + $0xa8] sm:$0xff] %vm385_vm1, %v2233_v56  ;;  %v3579_v35 = vpack.c.bf16 %v3549_v30, %v3548_v28  ;;  %v10103_v24 = vld [vmem:[%s10462_s26 + $0x1e0] sm:$0xff]   ;;  %v1250_v25 = vpop.f32.mrb[25].mxu1 }
 0x12d   : > { %v2852_v34 = vld [vmem:[#allocation2 + $0x91] sm:$0xff]  ;;  %v4027_v36 = vpack.c.bf16 %v3996_v32, %v3995_v31  ;;  %3148 = vst.msk [vmem:[#allocation4 + $0x80] sm:$0xff] %vm385_vm1, %v3132_v29  ;;  %v10104_v56 = vld [vmem:[%s10462_s26 + $0x1e8] sm:$0xff]   ;;  %9878 = vmatprep.mubr.msk.bf16.mxu1 %vm630_vm0, %v10103_v24  ;;  %v9797_v30 = vpop.f32.mrb[26].mxu1  ;;  %v10105_v31 = vld [vmem:[%s13457_s3 + $0xc0] sm:$0xff]   ;;  %v1259_v32 = vadd.f32 %v9796_v23, %v10841_v61 }
 0x12e   : > { %v2655_v38 = vld [vmem:[#allocation2 + $0x4c] sm:$0xff]  ;;  %v2656_v39 = vld [vmem:[#allocation2 + $0x54] sm:$0xff]  ;;  %2788 = vrot.lane.b32.xlu0 %v11033_v33, %s10330_s15  ;;  %v9758_v47 = vpop.f32.mrb[28].mxu0  ;;  %3595 = vst.msk [vmem:[#allocation4 + $0x50] sm:$0xff] %vm385_vm1, %v3579_v35  ;;  %v11048_v51 = vpack.c.bf16 %v2853_v40, %v2852_v34  ;;  %9879 = vmatmul.mubr.msk.bf16.gmra.mrb[56].mxu1 %vm630_vm0, %v10104_v56  ;;  %v1253_v34 = vpop.f32.mrb[27].mxu1  ;;  %v3747_v35 = vld [vmem:[#allocation2 + $0x9c] sm:$0xff] }
 0x12f   : > { %v882_v41 = vld [vmem:[#allocation5 + $0x50] ss:$2 sm:$0xff]  ;;  %v898_v42 = vld [vmem:[#allocation5 + $0x51] ss:$2 sm:$0xff]  ;;  %v2684_v59 = vpack.c.bf16 %v2656_v39, %v2655_v38  ;;  %4043 = vst.msk [vmem:[#allocation4 + $0x20] sm:$0xff] %vm385_vm1, %v4027_v36  ;;  %3228 = vrot.lane.b32.xlu1 %v3770_v19, %s10330_s15  ;;  %v834_v45 = vadd.f32 %v9758_v47, %v10841_v61  ;;  %v825_v49 = vpop.f32.mrb[29].mxu0  ;;  %v1251_v36 = vadd.f32 %v10841_v61, %v1250_v25 }
 0x130   : > { %1307 = vst.msk [vmem:[#allocation5 + $0x50] sm:$0xff] %vm385_vm1, %v1291_v10  ;;  %1308 = vst.msk [vmem:[#allocation5 + $0x58] sm:$0xff] %vm385_vm1, %v1292_v15  ;;  %v908_v46 = vmax.f32 %v882_v41, %v898_v42  ;;  %v880_v48 = vld [vmem:[#allocation5 + $0x40] ss:$2 sm:$0xff]  ;;  %v826_v53 = vadd.f32 %v10841_v61, %v825_v49  ;;  %v9759_v57 = vpop.f32.mrb[30].mxu0  ;;  %v2980_v58 = vld [vmem:[#allocation2 + $0x92] sm:$0xff]  ;;  %9257 = vmatprep.subr.bf16.mxu1 %v10105_v31  ;;  %v1262_v42 = vadd.f32 %v9797_v30, %v10841_v61 }
 0x131   : > { %2700 = vst.msk [vmem:[#allocation4 + $0xb0] sm:$0xff] %vm385_vm1, %v2684_v59  ;;  %v896_v60 = vld [vmem:[#allocation5 + $0x41] ss:$2 sm:$0xff]  ;;  %v854_v63 = vmax.f32 %v818_v43, %v834_v45  ;;  %v828_v0 = vpop.f32.mrb[31].mxu0  ;;  %v837_v4 = vadd.f32 %v9759_v57, %v10841_v61  ;;  %v2213_v5 = vld [vmem:[#allocation2 + $0xb0] sm:$0xff]  ;;  %v11066_v12 = vpack.c.bf16 %v2981_v54, %v2980_v58  ;;  %v9800_v38 = vpop.f32.mrb[28].mxu1 }
 0x132   : > { %917 = vst.msk [vmem:[#allocation2 + $0x6a] sm:$0xff] %vm385_vm1, %v908_v46  ;;  %v2212_v1 = vld [vmem:[#allocation2 + $0xa8] sm:$0xff]  ;;  %2916 = vrot.lane.b32.xlu0 %v11048_v51, %s10328_s29  ;;  %1305 = vst.msk [vmem:[#allocation5 + $0x40] sm:$0xff] %vm385_vm1, %v1289_v11  ;;  %v907_v2 = vmax.f32 %v880_v48, %v896_v60  ;;  %v852_v3 = vmax.f32 %v810_v44, %v826_v53  ;;  %v3557_v7 = vld [vmem:[#allocation2 + $0xb2] sm:$0xff]  ;;  %v829_v8 = vadd.f32 %v10841_v61, %v828_v0  ;;  %v1266_v59 = vpop.f32.mrb[29].mxu1 }
 0x133   : > { %1306 = vst.msk [vmem:[#allocation5 + $0x48] sm:$0xff] %vm385_vm1, %v1290_v18  ;;  %v3556_v6 = vld [vmem:[#allocation2 + $0xaa] sm:$0xff]  ;;  %2338 = vrot.lane.b32.xlu1 %v11048_v51, %s10330_s15  ;;  %870 = vst.msk [vmem:[#allocation5 + $0x70] sm:$0xff] %vm385_vm1, %v854_v63  ;;  %v2237_v9 = vpack.c.bf16 %v2213_v5, %v2212_v1  ;;  %v3111_v10 = vld [vmem:[#allocation2 + $0xb3] sm:$0xff]  ;;  %v855_v13 = vmax.f32 %v821_v55, %v837_v4  ;;  %v1275_v43 = vadd.f32 %v9800_v38, %v10841_v61  ;;  %v9801_v54 = vpop.f32.mrb[30].mxu1 }
 0x134   : > { %v3583_v37 = vpack.c.bf16 %v3557_v7, %v3556_v6  ;;  %v3110_v52 = vld [vmem:[#allocation2 + $0xab] sm:$0xff]  ;;  %916 = vst.msk [vmem:[#allocation2 + $0x62] sm:$0xff] %vm385_vm1, %v907_v2  ;;  %868 = vst.msk [vmem:[#allocation5 + $0x60] sm:$0xff] %vm385_vm1, %v852_v3  ;;  %v2664_v15 = vld [vmem:[#allocation2 + $0xb4] sm:$0xff]  ;;  %v853_v18 = vmax.f32 %v813_v62, %v829_v8  ;;  %v1254_v48 = vadd.f32 %v10841_v61, %v1253_v34  ;;  %v1269_v58 = vpop.f32.mrb[31].mxu1 }
 0x135   : > { %v2663_v11 = vld [vmem:[#allocation2 + $0xac] sm:$0xff]  ;;  %v3136_v14 = vpack.c.bf16 %v3111_v10, %v3110_v52  ;;  %2253 = vst.msk [vmem:[#allocation4 + $0x188] sm:$0xff] %vm385_vm1, %v2237_v9  ;;  %871 = vst.msk [vmem:[#allocation5 + $0x78] sm:$0xff] %vm385_vm1, %v855_v13  ;;  %v3746_v39 = vld [vmem:[#allocation2 + $0x94] sm:$0xff]  ;;  %v1267_v49 = vadd.f32 %v10841_v61, %v1266_v59  ;;  %v1295_v53 = vmax.f32 %v1259_v32, %v1275_v43 }
 0x136   : > { %3599 = vst.msk [vmem:[#allocation4 + $0x130] sm:$0xff] %vm385_vm1, %v3583_v37  ;;  %v2688_v19 = vpack.c.bf16 %v2664_v15, %v2663_v11  ;;  %3044 = vrot.lane.b32.xlu0 %v11066_v12, %s10329_s13  ;;  %v2532_v20 = vld [vmem:[#allocation2 + $0x93] sm:$0xff]  ;;  %869 = vst.msk [vmem:[#allocation5 + $0x68] sm:$0xff] %vm385_vm1, %v853_v18  ;;  %v10106_v45 = vld [vmem:[%s13457_s3 + $0x80] sm:$0xff]   ;;  %v1278_v57 = vadd.f32 %v9801_v54, %v10841_v61  ;;  %v3774_v63 = vpack.c.bf16 %v3747_v35, %v3746_v39 }
 0x137   : > { %v1318_v16 = vld [vmem:[#allocation5 + $0x50] ss:$2 sm:$0xff]  ;;  %v1326_v17 = vld [vmem:[#allocation5 + $0x51] ss:$2 sm:$0xff]  ;;  %3152 = vst.msk [vmem:[#allocation4 + $0x160] sm:$0xff] %vm385_vm1, %v3136_v14  ;;  %2467 = vrot.lane.b32.xlu1 %v11066_v12, %s10328_s29  ;;  %v11083_v26 = vpack.c.bf16 %v2533_v21, %v2532_v20  ;;  %9258 = vmatpush3.bf16.msra.mxu1 %v10106_v45  ;;  %v1293_v0 = vmax.f32 %v1251_v36, %v1267_v49  ;;  %v10107_v2 = vld [vmem:[%s13457_s3 + $0xc8] sm:$0xff]  }
 0x138   : > { %v1334_v22 = vmax.f32 %v1318_v16, %v1326_v17  ;;  %2704 = vst.msk [vmem:[#allocation4 + $0x190] sm:$0xff] %vm385_vm1, %v2688_v19  ;;  %v1270_v1 = vadd.f32 %v10841_v61, %v1269_v58  ;;  %v10109_v3 = vld [vmem:[%s13457_s3 + $0x88] sm:$0xff]   ;;  %v1296_v4 = vmax.f32 %v1262_v42, %v1278_v57  ;;  %v10110_v5 = vld [vmem:[%s10462_s26 + $0x1f8] sm:$0xff]   ;;  %9259 = vmatprep.subr.bf16.mxu1 %v10107_v2  ;;  %v10111_v8 = vld [vmem:[%s13457_s3 + $0xd0] sm:$0xff]   ;;  %v9814_v49 = vpop.f32.mrb[32].mxu0 }
 0x139   : > { %v3551_v60 = vld [vmem:[#allocation2 + $0x6a] sm:$0xff]  ;;  %v10113_v17 = vld [vmem:[%s13457_s3 + $0xd8] sm:$0xff]   ;;  %v10115_v56 = vld [vmem:[%s13457_s3 + $0xe0] sm:$0xff]   ;;  %v1580_v58 = vpop.f32.mrb[33].mxu0 }
 0x13a   : > { %1343 = vst.msk [vmem:[#allocation2 + $0xca] sm:$0xff] %vm385_vm1, %v1334_v22  ;;  %v1317_v27 = vld [vmem:[#allocation5 + $0x40] ss:$2 sm:$0xff]  ;;  %v1325_v28 = vld [vmem:[#allocation5 + $0x41] ss:$2 sm:$0xff]  ;;  %3937 = vrot.lane.b32.xlu0 %v11033_v33, %s10329_s13  ;;  %v1294_v61 = vmax.f32 %v1254_v48, %v1270_v1  ;;  %v10112_v14 = vld [vmem:[%s13457_s3 + $0x90] sm:$0xff]  }
 0x13b   : > { %v1333_v29 = vmax.f32 %v1317_v27, %v1325_v28  ;;  %2596 = vrot.lane.b32.xlu1 %v11083_v26, %s10329_s13  ;;  %v3105_v62 = vld [vmem:[#allocation2 + $0x6b] sm:$0xff]  ;;  %v2206_v6 = vld [vmem:[#allocation2 + $0x60] sm:$0xff]  ;;  %9260 = vmatpush3.bf16.msra.mxu1 %v10109_v3  ;;  %v10114_v22 = vld [vmem:[%s13457_s3 + $0x98] sm:$0xff]  }
 0x13c   : > { %v886_v40 = vld [vmem:[#allocation5 + $0x70] ss:$2 sm:$0xff]  ;;  %v902_v41 = vld [vmem:[#allocation5 + $0x71] ss:$2 sm:$0xff]  ;;  %v2207_v7 = vld [vmem:[#allocation2 + $0x68] sm:$0xff]  ;;  %9261 = vmatprep.subr.bf16.mxu1 %v10111_v8 }
 0x13d   : > { %1342 = vst.msk [vmem:[#allocation2 + $0xc2] sm:$0xff] %vm385_vm1, %v1333_v29  ;;  %v884_v44 = vld [vmem:[#allocation5 + $0x60] ss:$2 sm:$0xff]  ;;  %v900_v46 = vld [vmem:[#allocation5 + $0x61] ss:$2 sm:$0xff]  ;;  %v910_v47 = vmax.f32 %v886_v40, %v902_v41  ;;  %1311 = vst.msk [vmem:[#allocation5 + $0x70] sm:$0xff] %vm385_vm1, %v1295_v53  ;;  %v2234_v9 = vpack.c.bf16 %v2207_v7, %v2206_v6 }
 0x13e   : > { %3682 = vrot.lane.b32.xlu0 %v11083_v26, %s10330_s15  ;;  %v909_v55 = vmax.f32 %v884_v44, %v900_v46  ;;  %1309 = vst.msk [vmem:[#allocation5 + $0x60] sm:$0xff] %vm385_vm1, %v1293_v0  ;;  %v3550_v37 = vld [vmem:[#allocation2 + $0x62] sm:$0xff]  ;;  %1312 = vst.msk [vmem:[#allocation5 + $0x78] sm:$0xff] %vm385_vm1, %v1296_v4  ;;  %v2269_v16 = vld [vmem:[#allocation2 + $0x51] sm:$0xff]  ;;  %v9815_v7 = vpop.f32.mrb[34].mxu0 }
 0x13f   : > { %3362 = vrot.lane.b32.xlu1 %v11033_v33, %s10328_s29  ;;  %919 = vst.msk [vmem:[#allocation2 + $0x82] sm:$0xff] %vm385_vm1, %v910_v47  ;;  %v10108_v33 = vld [vmem:[%s10462_s26 + $0x1f0] sm:$0xff]   ;;  %v3104_v52 = vld [vmem:[#allocation2 + $0x63] sm:$0xff]  ;;  %v3580_v10 = vpack.c.bf16 %v3551_v60, %v3550_v37  ;;  %1310 = vst.msk [vmem:[#allocation5 + $0x68] sm:$0xff] %vm385_vm1, %v1294_v61  ;;  %9262 = vmatpush3.bf16.msra.mxu1 %v10112_v14  ;;  %s13412_s26 = scalar_lea.hbm %s13465_s11, %s9057_s14 }
 0x140   : > { %918 = vst.msk [vmem:[#allocation2 + $0x7a] sm:$0xff] %vm385_vm1, %v909_v55  ;;  %9882 = vmatprep.mubr.msk.bf16.mxu1 %vm630_vm0, %v10108_v33  ;;  %v3133_v11 = vpack.c.bf16 %v3105_v62, %v3104_v52  ;;  %2250 = vst.msk [vmem:[#allocation4 + $0xe0] sm:$0xff] %vm385_vm1, %v2234_v9  ;;  %v2268_v13 = vld [vmem:[#allocation2 + $0x49] sm:$0xff]  ;;  %v3997_v15 = vld [vmem:[#allocation2 + $0x61] sm:$0xff]  ;;  %9263 = vmatprep.subr.bf16.mxu1 %v10113_v17 }
 0x141   : > { %4492 = vst.msk [vmem:[#allocation4 + $0x28] sm:$0xff] %vm385_vm1, %v2234_v9  ;;  %9883 = vmatmul.mubr.msk.bf16.gmra.mrb[60].mxu1 %vm630_vm0, %v10110_v5  ;;  %3596 = vst.msk [vmem:[#allocation4 + $0x88] sm:$0xff] %vm385_vm1, %v3580_v10  ;;  %v3998_v18 = vld [vmem:[#allocation2 + $0x69] sm:$0xff]  ;;  %v11148_v23 = vpack.c.bf16 %v2269_v16, %v2268_v13  ;;  %v2527_v36 = vld [vmem:[#allocation2 + $0x53] sm:$0xff]  ;;  %v1583_v13 = vpop.f32.mrb[35].mxu0 }
 0x142   : > { %3810 = vrot.lane.b32.xlu0 %v3774_v63, %s10328_s29  ;;  %3149 = vst.msk [vmem:[#allocation4 + $0xb8] sm:$0xff] %vm385_vm1, %v3133_v11  ;;  %v4028_v20 = vpack.c.bf16 %v3998_v18, %v3997_v15  ;;  %v2397_v24 = vld [vmem:[#allocation2 + $0x4a] sm:$0xff]  ;;  %v10116_v38 = vld [vmem:[%s13457_s3 + $0xa0] sm:$0xff]   ;;  %v9818_v16 = vpop.f32.mrb[36].mxu0 }
 0x143   : > { %3490 = vrot.lane.b32.xlu1 %v11048_v51, %s10329_s13  ;;  %v2658_v28 = vld [vmem:[#allocation2 + $0x6c] sm:$0xff]  ;;  %9264 = vmatpush3.bf16.msra.mxu1 %v10114_v22  ;;  %v2657_v59 = vld [vmem:[#allocation2 + $0x64] sm:$0xff]  ;;  %v11199_v10 = vld [vmem:[%s13456_s2] ss:$0 sm:$0xff] }
 0x144   : > { %4044 = vst.msk [vmem:[#allocation4 + $0x58] sm:$0xff] %vm385_vm1, %v4028_v20  ;;  %v2214_v27 = vld [vmem:[#allocation2 + $0xc0] sm:$0xff]  ;;  %v2718_v29 = vld [vmem:[#allocation2 + $0x48] sm:$0xff]  ;;  %v2719_v30 = vld [vmem:[#allocation2 + $0x50] sm:$0xff]  ;;  %9265 = vmatprep.subr.bf16.mxu1 %v10115_v56  ;;  %v2685_v47 = vpack.c.bf16 %v2658_v28, %v2657_v59  ;;  %v1589_v11 = vadd.f32 %v11199_v10, %v9814_v49  ;;  %v1581_v15 = vadd.f32 %v11199_v10, %v1580_v58  ;;  %v1596_v20 = vpop.f32.mrb[37].mxu0 }
 0x145   : > { %v1320_v31 = vld [vmem:[#allocation5 + $0x70] ss:$2 sm:$0xff]  ;;  %v1328_v32 = vld [vmem:[#allocation5 + $0x71] ss:$2 sm:$0xff]  ;;  %v2215_v39 = vld [vmem:[#allocation2 + $0xc8] sm:$0xff]  ;;  %v11178_v57 = vpack.c.bf16 %v2719_v30, %v2718_v29  ;;  %v1592_v18 = vadd.f32 %v11199_v10, %v9815_v7  ;;  %v1597_v22 = vadd.f32 %v11199_v10, %v1596_v20 }
 0x146   : > { %4576 = vrot.lane.b32.xlu0 %v11048_v51, %s10330_s15  ;;  %v2660_v19 = vld [vmem:[#allocation2 + $0x84] sm:$0xff]  ;;  %v2398_v51 = vld [vmem:[#allocation2 + $0x52] sm:$0xff]  ;;  %v2238_v41 = vpack.c.bf16 %v2215_v39, %v2214_v27  ;;  %v1336_v62 = vmax.f32 %v1320_v31, %v1328_v32  ;;  %2701 = vst.msk [vmem:[#allocation4 + $0xe8] sm:$0xff] %vm385_vm1, %v2685_v47 }
 0x147   : > { %3236 = vrot.lane.b32.xlu1 %v3774_v63, %s10330_s15  ;;  %v2659_v21 = vld [vmem:[#allocation2 + $0x7c] sm:$0xff]  ;;  %v2526_v35 = vld [vmem:[#allocation2 + $0x4b] sm:$0xff]  ;;  %v11165_v40 = vpack.c.bf16 %v2398_v51, %v2397_v24  ;;  %9266 = vmatpush3.bf16.msra.mxu1 %v10116_v38  ;;  %v9819_v24 = vpop.f32.mrb[38].mxu0  ;;  %v1707_v31 = vmax.f32 %v1581_v15, %v1597_v22  ;;  %v4896_v7 = vld [vmem:[#allocation2 + $0x94] sm:$0xff]  ;;  %v9856_v22 = vpop.f32.mrb[32].mxu1 }
 0x148   : > { %v11150_v25 = vpack.c.bf16 %v2660_v19, %v2659_v21  ;;  %v1319_v34 = vld [vmem:[#allocation5 + $0x60] ss:$2 sm:$0xff]  ;;  %2254 = vst.msk [vmem:[#allocation4 + $0x1c0] sm:$0xff] %vm385_vm1, %v2238_v41  ;;  %v11182_v33 = vpack.c.bf16 %v2527_v36, %v2526_v35  ;;  %v10119_v61 = vld [vmem:[%s13457_s3 + $0xf0] sm:$0xff]   ;;  %1345 = vst.msk [vmem:[#allocation2 + $0xe2] sm:$0xff] %vm385_vm1, %v1336_v62  ;;  %v1605_v19 = vadd.f32 %v11199_v10, %v9818_v16  ;;  %v1599_v28 = vpop.f32.mrb[39].mxu0 }
 0x149   : > { %v3558_v42 = vld [vmem:[#allocation2 + $0xc2] sm:$0xff]  ;;  %v3559_v43 = vld [vmem:[#allocation2 + $0xca] sm:$0xff]  ;;  %v3552_v0 = vld [vmem:[#allocation2 + $0x7a] sm:$0xff]  ;;  %v1584_v21 = vadd.f32 %v11199_v10, %v1583_v13  ;;  %v1608_v27 = vadd.f32 %v11199_v10, %v9819_v24  ;;  %v1600_v32 = vadd.f32 %v11199_v10, %v1599_v28  ;;  %1723 = vst.msk [vmem:[#allocation5] sm:$0xff] %vm385_vm1, %v1707_v31 }
 0x14a   : > { %4704 = vrot.lane.b32.xlu0 %v11066_v12, %s10328_s29  ;;  %2702 = vst.msk [vmem:[#allocation4 + $0x120] sm:$0xff] %vm385_vm1, %v11150_v25  ;;  %v1327_v12 = vld [vmem:[#allocation5 + $0x61] ss:$2 sm:$0xff]  ;;  %v3584_v46 = vpack.c.bf16 %v3559_v43, %v3558_v42  ;;  %v3999_v5 = vld [vmem:[#allocation2 + $0x79] sm:$0xff]  ;;  %v10120_v17 = vld [vmem:[%s13457_s3 + $0xb0] sm:$0xff]   ;;  %v1709_v56 = vmax.f32 %v1589_v11, %v1605_v19 }
 0x14b   : > { %2332 = vrot.lane.b32.xlu1 %v11148_v23, %s10330_s15  ;;  %v10117_v44 = vld [vmem:[%s13457_s3 + $0xe8] sm:$0xff]   ;;  %v2209_v53 = vld [vmem:[#allocation2 + $0x80] sm:$0xff]  ;;  %v1335_v60 = vmax.f32 %v1319_v34, %v1327_v12  ;;  %v10121_v51 = vld [vmem:[%s13457_s3 + $0xf8] sm:$0xff]   ;;  %v1710_v12 = vmax.f32 %v1592_v18, %v1608_v27  ;;  %v1708_v43 = vmax.f32 %v1584_v21, %v1600_v32 }
 0x14c   : > { %v3112_v48 = vld [vmem:[#allocation2 + $0xc3] sm:$0xff]  ;;  %v3113_v45 = vld [vmem:[#allocation2 + $0xcb] sm:$0xff]  ;;  %3600 = vst.msk [vmem:[#allocation4 + $0x168] sm:$0xff] %vm385_vm1, %v3584_v46  ;;  %v3106_v2 = vld [vmem:[#allocation2 + $0x7b] sm:$0xff]  ;;  %9267 = vmatprep.subr.bf16.mxu1 %v10117_v44 }
 0x14d   : > { %v10118_v54 = vld [vmem:[%s13457_s3 + $0xa8] sm:$0xff]   ;;  %v3137_v55 = vpack.c.bf16 %v3113_v45, %v3112_v48  ;;  %1344 = vst.msk [vmem:[#allocation2 + $0xda] sm:$0xff] %vm385_vm1, %v1335_v60  ;;  %v10122_v29 = vld [vmem:[%s13457_s3 + $0xb8] sm:$0xff]   ;;  %v4451_v36 = vld [vmem:[#allocation2 + $0xb0] sm:$0xff] }
 0x14e   : > { %4832 = vrot.lane.b32.xlu0 %v11083_v26, %s10329_s13  ;;  %v2208_v26 = vld [vmem:[#allocation2 + $0x78] sm:$0xff]  ;;  %v3553_v1 = vld [vmem:[#allocation2 + $0x82] sm:$0xff]  ;;  %v2666_v52 = vld [vmem:[#allocation2 + $0xcc] sm:$0xff]  ;;  %9268 = vmatpush3.bf16.msra.mxu1 %v10118_v54  ;;  %1725 = vst.msk [vmem:[#allocation5 + $0x10] sm:$0xff] %vm385_vm1, %v1709_v56 }
 0x14f   : > { %2461 = vrot.lane.b32.xlu1 %v11165_v40, %s10328_s29  ;;  %v2235_v63 = vpack.c.bf16 %v2209_v53, %v2208_v26  ;;  %3153 = vst.msk [vmem:[#allocation4 + $0x198] sm:$0xff] %vm385_vm1, %v3137_v55  ;;  %v3581_v3 = vpack.c.bf16 %v3553_v1, %v3552_v0  ;;  %v3107_v4 = vld [vmem:[#allocation2 + $0x83] sm:$0xff]  ;;  %9269 = vmatprep.subr.bf16.mxu1 %v10119_v61  ;;  %v4001_v30 = vld [vmem:[#allocation2 + $0x91] sm:$0xff]  ;;  %v4002_v34 = vld [vmem:[#allocation2 + $0x99] sm:$0xff] }
 0x150   : > { %v4000_v6 = vld [vmem:[#allocation2 + $0x81] sm:$0xff]  ;;  %v3134_v8 = vpack.c.bf16 %v3107_v4, %v3106_v2  ;;  %v4030_v38 = vpack.c.bf16 %v4002_v34, %v4001_v30  ;;  %v3166_v41 = vld [vmem:[#allocation2 + $0x4c] sm:$0xff]  ;;  %v3167_v42 = vld [vmem:[#allocation2 + $0x54] sm:$0xff]  ;;  %1726 = vst.msk [vmem:[#allocation5 + $0x18] sm:$0xff] %vm385_vm1, %v1710_v12 }
 0x151   : > { %2251 = vst.msk [vmem:[#allocation4 + $0x118] sm:$0xff] %vm385_vm1, %v2235_v63  ;;  %4493 = vst.msk [vmem:[#allocation4 + $0x60] sm:$0xff] %vm385_vm1, %v2235_v63  ;;  %v4029_v9 = vpack.c.bf16 %v4000_v6, %v3999_v5  ;;  %v2665_v37 = vld [vmem:[#allocation2 + $0xc4] sm:$0xff]  ;;  %v11239_v46 = vpack.c.bf16 %v3167_v42, %v3166_v41  ;;  %v4004_v62 = vld [vmem:[#allocation2 + $0xb1] sm:$0xff] }
 0x152   : > { %2782 = vrot.lane.b32.xlu0 %v11178_v57, %s10330_s15  ;;  %3597 = vst.msk [vmem:[#allocation4 + $0xc0] sm:$0xff] %vm385_vm1, %v3581_v3  ;;  %v11203_v14 = vpack.c.bf16 %v2666_v52, %v2665_v37  ;;  %3150 = vst.msk [vmem:[#allocation4 + $0xf0] sm:$0xff] %vm385_vm1, %v3134_v8  ;;  %9270 = vmatpush3.bf16.msra.mxu1 %v10120_v17  ;;  %v4450_v35 = vld [vmem:[#allocation2 + $0xa8] sm:$0xff]  ;;  %v4452_v63 = vld [vmem:[#allocation2 + $0xc0] sm:$0xff] }
 0x153   : > { %2590 = vrot.lane.b32.xlu1 %v11182_v33, %s10329_s13  ;;  %4045 = vst.msk [vmem:[#allocation4 + $0x90] sm:$0xff] %vm385_vm1, %v4029_v9  ;;  %9271 = vmatprep.subr.bf16.mxu1 %v10121_v51  ;;  %v4479_v39 = vpack.c.bf16 %v4451_v36, %v4450_v35  ;;  %4046 = vst.msk [vmem:[#allocation4 + $0xc8] sm:$0xff] %vm385_vm1, %v4030_v38  ;;  %v3561_v45 = vld [vmem:[#allocation2 + $0xe2] sm:$0xff]  ;;  %v4893_v6 = vld [vmem:[#allocation2 + $0x6c] sm:$0xff]  ;;  %v2006_v51 = vpop.f32.mrb[33].mxu1 }
 0x154   : > { %2705 = vst.msk [vmem:[#allocation4 + $0x1c8] sm:$0xff] %vm385_vm1, %v11203_v14  ;;  %1724 = vst.msk [vmem:[#allocation5 + $0x8] sm:$0xff] %vm385_vm1, %v1708_v43  ;;  %v2216_v59 = vld [vmem:[#allocation2 + $0xd8] sm:$0xff]  ;;  %v2217_v44 = vld [vmem:[#allocation2 + $0xe0] sm:$0xff]  ;;  %v9857_v34 = vpop.f32.mrb[34].mxu1  ;;  %v2007_v12 = vadd.f32 %v11199_v10, %v2006_v51 }
 0x155   : > { %4495 = vst.msk [vmem:[#allocation4 + $0xd0] sm:$0xff] %vm385_vm1, %v4479_v39  ;;  %v2239_v47 = vpack.c.bf16 %v2217_v44, %v2216_v59  ;;  %v3560_v48 = vld [vmem:[#allocation2 + $0xda] sm:$0xff]  ;;  %v2668_v54 = vld [vmem:[#allocation2 + $0xe4] sm:$0xff]  ;;  %v2727_v37 = vld [vmem:[#allocation2 + $0xb0] sm:$0xff]  ;;  %v2009_v35 = vpop.f32.mrb[35].mxu1  ;;  %v2018_v42 = vadd.f32 %v11199_v10, %v9857_v34 }
 0x156   : > { %2910 = vrot.lane.b32.xlu0 %v11148_v23, %s10328_s29  ;;  %9272 = vmatpush3.bf16.msra.mxu1 %v10122_v29  ;;  %v2667_v49 = vld [vmem:[#allocation2 + $0xdc] sm:$0xff]  ;;  %v4003_v60 = vld [vmem:[#allocation2 + $0xa9] sm:$0xff]  ;;  %v4899_v15 = vld [vmem:[#allocation2 + $0xb4] sm:$0xff]  ;;  %v9860_v38 = vpop.f32.mrb[36].mxu1  ;;  %v2010_v44 = vadd.f32 %v11199_v10, %v2009_v35 }
 0x157   : > { %3356 = vrot.lane.b32.xlu1 %v11178_v57, %s10328_s29  ;;  %v3114_v55 = vld [vmem:[#allocation2 + $0xdb] sm:$0xff]  ;;  %v3115_v26 = vld [vmem:[#allocation2 + $0xe3] sm:$0xff]  ;;  %2255 = vst.msk [vmem:[#allocation4 + $0x1f8] sm:$0xff] %vm385_vm1, %v2239_v47  ;;  %v11248_v53 = vpack.c.bf16 %v2668_v54, %v2667_v49  ;;  %v4898_v13 = vld [vmem:[#allocation2 + $0xac] sm:$0xff]  ;;  %v2031_v43 = vadd.f32 %v11199_v10, %v9860_v38  ;;  %v2022_v59 = vpop.f32.mrb[37].mxu1 }
 0x158   : > { %v11250_v58 = vpack.c.bf16 %v3115_v26, %v3114_v55  ;;  %v4453_v0 = vld [vmem:[#allocation2 + $0xc8] sm:$0xff]  ;;  %v4897_v8 = vld [vmem:[#allocation2 + $0x9c] sm:$0xff]  ;;  %v2855_v31 = vld [vmem:[#allocation2 + $0xb1] sm:$0xff]  ;;  %v9861_v47 = vpop.f32.mrb[38].mxu1 }
 0x159   : > { %v4005_v1 = vld [vmem:[#allocation2 + $0xc1] sm:$0xff]  ;;  %v4006_v2 = vld [vmem:[#allocation2 + $0xc9] sm:$0xff]  ;;  %2706 = vst.msk [vmem:[#allocation4 + $0x200] sm:$0xff] %vm385_vm1, %v11248_v53  ;;  %v4480_v3 = vpack.c.bf16 %v4453_v0, %v4452_v63  ;;  %v4926_v11 = vpack.c.bf16 %v4897_v8, %v4896_v7  ;;  %v1748_v18 = vld [vmem:[#allocation5 + $0x11] ss:$2 sm:$0xff]  ;;  %v2025_v49 = vpop.f32.mrb[39].mxu1 }
 0x15a   : > { %3038 = vrot.lane.b32.xlu0 %v11165_v40, %s10329_s13  ;;  %3154 = vst.msk [vmem:[#allocation4 + $0x1d0] sm:$0xff] %vm385_vm1, %v11250_v58  ;;  %v4032_v4 = vpack.c.bf16 %v4006_v2, %v4005_v1  ;;  %v4892_v5 = vld [vmem:[#allocation2 + $0x64] sm:$0xff]  ;;  %v1740_v52 = vld [vmem:[#allocation5 + $0x10] ss:$2 sm:$0xff]  ;;  %v2026_v26 = vadd.f32 %v11199_v10, %v2025_v49 }
 0x15b   : > { %3484 = vrot.lane.b32.xlu1 %v11148_v23, %s10329_s13  ;;  %v11243_v23 = vpack.c.bf16 %v3561_v45, %v3560_v48  ;;  %v4924_v61 = vpack.c.bf16 %v4893_v6, %v4892_v5  ;;  %v2726_v9 = vld [vmem:[#allocation2 + $0xa8] sm:$0xff]  ;;  %4496 = vst.msk [vmem:[#allocation4 + $0x108] sm:$0xff] %vm385_vm1, %v4480_v3  ;;  %4942 = vst.msk [vmem:[#allocation4 + $0xa0] sm:$0xff] %vm385_vm1, %v4926_v11  ;;  %v1756_v27 = vmax.f32 %v1740_v52, %v1748_v18  ;;  %v4894_v28 = vld [vmem:[#allocation2 + $0x7c] sm:$0xff]  ;;  %v9822_v52 = vpop.f32.mrb[40].mxu0 }
 0x15c   : > { %4048 = vst.msk [vmem:[#allocation4 + $0x138] sm:$0xff] %vm385_vm1, %v4032_v4  ;;  %v4900_v16 = vld [vmem:[#allocation2 + $0xc4] sm:$0xff]  ;;  %v4901_v17 = vld [vmem:[#allocation2 + $0xcc] sm:$0xff]  ;;  %v2752_v24 = vpack.c.bf16 %v2727_v37, %v2726_v9  ;;  %v2034_v45 = vadd.f32 %v11199_v10, %v9861_v47 }
 0x15d   : > { %3601 = vst.msk [vmem:[#allocation4 + $0x1a0] sm:$0xff] %vm385_vm1, %v11243_v23  ;;  %4940 = vst.msk [vmem:[#allocation4 + $0x30] sm:$0xff] %vm385_vm1, %v4924_v61  ;;  %v1739_v19 = vld [vmem:[#allocation5] ss:$2 sm:$0xff]  ;;  %v1747_v20 = vld [vmem:[#allocation5 + $0x1] ss:$2 sm:$0xff]  ;;  %v4928_v21 = vpack.c.bf16 %v4901_v17, %v4900_v16 }
 0x15e   : > { %3931 = vrot.lane.b32.xlu0 %v11178_v57, %s10329_s13  ;;  %v4031_v57 = vpack.c.bf16 %v4004_v62, %v4003_v60  ;;  %v1755_v56 = vmax.f32 %v1739_v19, %v1747_v20  ;;  %v4895_v29 = vld [vmem:[#allocation2 + $0x84] sm:$0xff]  ;;  %1765 = vst.msk [vmem:[#allocation2 + $0xfa] sm:$0xff] %vm385_vm1, %v1756_v27  ;;  %v2983_v41 = vld [vmem:[#allocation2 + $0xb2] sm:$0xff]  ;;  %v2136_v60 = vmax.f32 %v2018_v42, %v2034_v45  ;;  %v1612_v16 = vpop.f32.mrb[41].mxu0 }
 0x15f   : > { %3230 = vrot.lane.b32.xlu1 %v11239_v46, %s10330_s15  ;;  %4944 = vst.msk [vmem:[#allocation4 + $0x110] sm:$0xff] %vm385_vm1, %v4928_v21  ;;  %v2854_v30 = vld [vmem:[#allocation2 + $0xa9] sm:$0xff]  ;;  %v4925_v32 = vpack.c.bf16 %v4895_v29, %v4894_v28  ;;  %v2535_v63 = vld [vmem:[#allocation2 + $0xb3] sm:$0xff]  ;;  %v2720_v9 = vld [vmem:[#allocation2 + $0x60] sm:$0xff]  ;;  %v9823_v51 = vpop.f32.mrb[42].mxu0  ;;  %v1613_v35 = vadd.f32 %v11199_v10, %v1612_v16 }
 0x160   : > { %4047 = vst.msk [vmem:[#allocation4 + $0x100] sm:$0xff] %vm385_vm1, %v4031_v57  ;;  %1764 = vst.msk [vmem:[#allocation2 + $0xf2] sm:$0xff] %vm385_vm1, %v1755_v56  ;;  %v2880_v36 = vpack.c.bf16 %v2855_v31, %v2854_v30  ;;  %v2982_v39 = vld [vmem:[#allocation2 + $0xaa] sm:$0xff]  ;;  %v2134_v57 = vmax.f32 %v2010_v44, %v2026_v26  ;;  %v3749_v61 = vld [vmem:[#allocation2 + $0xb4] sm:$0xff]  ;;  %v1615_v29 = vpop.f32.mrb[43].mxu0 }
 0x161   : > { %4941 = vst.msk [vmem:[#allocation4 + $0x68] sm:$0xff] %vm385_vm1, %v4925_v32  ;;  %v3008_v54 = vpack.c.bf16 %v2983_v41, %v2982_v39  ;;  %v2534_v62 = vld [vmem:[#allocation2 + $0xab] sm:$0xff]  ;;  %2152 = vst.msk [vmem:[#allocation5 + $0x18] sm:$0xff] %vm385_vm1, %v2136_v60  ;;  %v2848_v20 = vld [vmem:[#allocation2 + $0x61] sm:$0xff]  ;;  %v1621_v32 = vadd.f32 %v11199_v10, %v9822_v52  ;;  %v1616_v41 = vadd.f32 %v11199_v10, %v1615_v29 }
 0x162   : > { %3676 = vrot.lane.b32.xlu0 %v11182_v33, %s10330_s15  ;;  %2150 = vst.msk [vmem:[#allocation5 + $0x8] sm:$0xff] %vm385_vm1, %v2134_v57  ;;  %v2559_v2 = vpack.c.bf16 %v2535_v63, %v2534_v62  ;;  %v3748_v7 = vld [vmem:[#allocation2 + $0xac] sm:$0xff]  ;;  %v2976_v34 = vld [vmem:[#allocation2 + $0x62] sm:$0xff]  ;;  %v4454_v57 = vld [vmem:[#allocation2 + $0xd8] sm:$0xff] }
 0x163   : > { %4123 = vrot.lane.b32.xlu1 %v11165_v40, %s10330_s15  ;;  %v4927_v40 = vpack.c.bf16 %v4899_v15, %v4898_v13  ;;  %v3775_v8 = vpack.c.bf16 %v3749_v61, %v3748_v7  ;;  %v2721_v37 = vld [vmem:[#allocation2 + $0x68] sm:$0xff] }
 0x164   : > { %v11306_v15 = vpack.c.bf16 %v2721_v37, %v2720_v9  ;;  %v2528_v49 = vld [vmem:[#allocation2 + $0x63] sm:$0xff] }
 0x165   : > { %4943 = vst.msk [vmem:[#allocation4 + $0xd8] sm:$0xff] %vm385_vm1, %v4927_v40  ;;  %v3563_v5 = vld [vmem:[#allocation2 + $0xfa] sm:$0xff]  ;;  %v2849_v40 = vld [vmem:[#allocation2 + $0x69] sm:$0xff] }
 0x166   : > { %3804 = vrot.lane.b32.xlu0 %v11239_v46, %s10328_s29  ;;  %v2670_v28 = vld [vmem:[#allocation2 + $0xfc] sm:$0xff]  ;;  %v11317_v31 = vpack.c.bf16 %v2849_v40, %v2848_v20  ;;  %v3742_v61 = vld [vmem:[#allocation2 + $0x64] sm:$0xff] }
 0x167   : > { %4251 = vrot.lane.b32.xlu1 %v11182_v33, %s10328_s29  ;;  %v2015_v33 = vadd.f32 %v11199_v10, %v9856_v22  ;;  %v2218_v0 = vld [vmem:[#allocation2 + $0xf0] sm:$0xff]  ;;  %v2219_v1 = vld [vmem:[#allocation2 + $0xf8] sm:$0xff] }
 0x168   : > { %v2240_v3 = vpack.c.bf16 %v2219_v1, %v2218_v0  ;;  %v3562_v4 = vld [vmem:[#allocation2 + $0xf2] sm:$0xff]  ;;  %v4455_v0 = vld [vmem:[#allocation2 + $0xe0] sm:$0xff] }
 0x169   : > { %v2135_v48 = vmax.f32 %v2015_v33, %v2031_v43  ;;  %v11296_v6 = vpack.c.bf16 %v3563_v5, %v3562_v4  ;;  %v3116_v19 = vld [vmem:[#allocation2 + $0xf3] sm:$0xff]  ;;  %v2977_v33 = vld [vmem:[#allocation2 + $0x6a] sm:$0xff]  ;;  %v4481_v1 = vpack.c.bf16 %v4455_v0, %v4454_v57 }
 0x16a   : > { %2790 = vrot.lane.b32.xlu0 %v2752_v24, %s10330_s15  ;;  %2256 = vst.msk [vmem:[#allocation4 + $0x230] sm:$0xff] %vm385_vm1, %v2240_v3  ;;  %v2669_v27 = vld [vmem:[#allocation2 + $0xf4] sm:$0xff]  ;;  %v4008_v3 = vld [vmem:[#allocation2 + $0xe1] sm:$0xff] }
 0x16b   : > { %4379 = vrot.lane.b32.xlu1 %v11239_v46, %s10329_s13  ;;  %v2023_v46 = vadd.f32 %v11199_v10, %v2022_v59  ;;  %2151 = vst.msk [vmem:[#allocation5 + $0x10] sm:$0xff] %vm385_vm1, %v2135_v48  ;;  %3602 = vst.msk [vmem:[#allocation4 + $0x1d8] sm:$0xff] %vm385_vm1, %v11296_v6  ;;  %v11315_v30 = vpack.c.bf16 %v2670_v28, %v2669_v27  ;;  %v11333_v59 = vpack.c.bf16 %v2977_v33, %v2976_v34  ;;  %v4963_v27 = vld [vmem:[#allocation4 + $0x38] sm:$0xff] }
 0x16c   : > { %4497 = vst.msk [vmem:[#allocation4 + $0x140] sm:$0xff] %vm385_vm1, %v4481_v1 }
 0x16d   : > { %v2133_v55 = vmax.f32 %v2007_v12, %v2023_v46  ;;  %2707 = vst.msk [vmem:[#allocation4 + $0x238] sm:$0xff] %vm385_vm1, %v11315_v30  ;;  %v1624_v12 = vadd.f32 %v11199_v10, %v9823_v51 }
 0x16e   : > { %2918 = vrot.lane.b32.xlu0 %v2880_v36, %s10328_s29 }
 0x16f   : > { %2340 = vrot.lane.b32.xlu1 %v2880_v36, %s10330_s15  ;;  %2149 = vst.msk [vmem:[#allocation5] sm:$0xff] %vm385_vm1, %v2133_v55 }
 0x172   : > { %3046 = vrot.lane.b32.xlu0 %v3008_v54, %s10329_s13  ;;  %v2166_v13 = vld [vmem:[#allocation5 + $0x10] ss:$2 sm:$0xff]  ;;  %v2174_v18 = vld [vmem:[#allocation5 + $0x11] ss:$2 sm:$0xff] }
 0x173   : > { %2469 = vrot.lane.b32.xlu1 %v3008_v54, %s10328_s29  ;;  %v2182_v22 = vmax.f32 %v2166_v13, %v2174_v18  ;;  %v2529_v54 = vld [vmem:[#allocation2 + $0x6b] sm:$0xff]  ;;  %v4902_v18 = vld [vmem:[#allocation2 + $0xdc] sm:$0xff] }
 0x174   : > { %v11345_v63 = vpack.c.bf16 %v2529_v54, %v2528_v49 }
 0x175   : > { %2191 = vst.msk [vmem:[#allocation2 + $0x15a] sm:$0xff] %vm385_vm1, %v2182_v22 }
 0x176   : > { %3939 = vrot.lane.b32.xlu0 %v2752_v24, %s10329_s13  ;;  %v2165_v11 = vld [vmem:[#allocation5] ss:$2 sm:$0xff]  ;;  %v2173_v17 = vld [vmem:[#allocation5 + $0x1] ss:$2 sm:$0xff] }
 0x177   : > { %2598 = vrot.lane.b32.xlu1 %v2559_v2, %s10329_s13  ;;  %v2181_v21 = vmax.f32 %v2165_v11, %v2173_v17 }
 0x179   : > { %2190 = vst.msk [vmem:[#allocation2 + $0x152] sm:$0xff] %vm385_vm1, %v2181_v21 }
 0x17a   : > { %3684 = vrot.lane.b32.xlu0 %v2559_v2, %s10330_s15  ;;  %v4007_v2 = vld [vmem:[#allocation2 + $0xd9] sm:$0xff] }
 0x17b   : > { %3364 = vrot.lane.b32.xlu1 %v2752_v24, %s10328_s29  ;;  %v3117_v24 = vld [vmem:[#allocation2 + $0xfb] sm:$0xff]  ;;  %v4033_v4 = vpack.c.bf16 %v4008_v3, %v4007_v2  ;;  %v2729_v3 = vld [vmem:[#allocation2 + $0xc8] sm:$0xff] }
 0x17c   : > { %v11310_v56 = vpack.c.bf16 %v3117_v24, %v3116_v19  ;;  %v4903_v19 = vld [vmem:[#allocation2 + $0xe4] sm:$0xff] }
 0x17d   : > { %4049 = vst.msk [vmem:[#allocation4 + $0x170] sm:$0xff] %vm385_vm1, %v4033_v4  ;;  %v4929_v20 = vpack.c.bf16 %v4903_v19, %v4902_v18  ;;  %v2728_v2 = vld [vmem:[#allocation2 + $0xc0] sm:$0xff]  ;;  %v4009_v18 = vld [vmem:[#allocation2 + $0xf1] sm:$0xff] }
 0x17e   : > { %3812 = vrot.lane.b32.xlu0 %v3775_v8, %s10328_s29  ;;  %3155 = vst.msk [vmem:[#allocation4 + $0x208] sm:$0xff] %vm385_vm1, %v11310_v56 }
 0x17f   : > { %3492 = vrot.lane.b32.xlu1 %v2880_v36, %s10329_s13  ;;  %v9826_v36 = vpop.f32.mrb[44].mxu0  ;;  %4945 = vst.msk [vmem:[#allocation4 + $0x148] sm:$0xff] %vm385_vm1, %v4929_v20 }
 0x180   : > { %v1637_v38 = vadd.f32 %v11199_v10, %v9826_v36  ;;  %v1628_v39 = vpop.f32.mrb[45].mxu0  ;;  %v2226_v29 = vld [vmem:[#allocation2 + $0x150] sm:$0xff]  ;;  %v3189_v36 = vld [vmem:[#allocation2 + $0x15c] sm:$0xff] }
 0x181   : > { %v1629_v42 = vadd.f32 %v11199_v10, %v1628_v39  ;;  %v9827_v43 = vpop.f32.mrb[46].mxu0  ;;  %v3188_v34 = vld [vmem:[#allocation2 + $0x154] sm:$0xff] }
 0x182   : > { %2784 = vrot.lane.b32.xlu0 %v11306_v15, %s10330_s15  ;;  %v1713_v44 = vmax.f32 %v1621_v32, %v1637_v38  ;;  %v1640_v46 = vadd.f32 %v11199_v10, %v9827_v43  ;;  %v1631_v47 = vpop.f32.mrb[47].mxu0  ;;  %v2227_v32 = vld [vmem:[#allocation2 + $0x158] sm:$0xff] }
 0x183   : > { %3238 = vrot.lane.b32.xlu1 %v3775_v8, %s10330_s15  ;;  %v1711_v48 = vmax.f32 %v1613_v35, %v1629_v42  ;;  %v1632_v45 = vadd.f32 %v11199_v10, %v1631_v47  ;;  %v3743_v8 = vld [vmem:[#allocation2 + $0x6c] sm:$0xff]  ;;  %v2244_v35 = vpack.c.bf16 %v2227_v32, %v2226_v29  ;;  %v3571_v38 = vld [vmem:[#allocation2 + $0x15a] sm:$0xff]  ;;  %v11379_v42 = vpack.c.bf16 %v3189_v36, %v3188_v34 }
 0x184   : > { %1729 = vst.msk [vmem:[#allocation5 + $0x30] sm:$0xff] %vm385_vm1, %v1713_v44  ;;  %v1714_v55 = vmax.f32 %v1624_v12, %v1640_v46  ;;  %v11361_v37 = vpack.c.bf16 %v3743_v8, %v3742_v61  ;;  %v3570_v12 = vld [vmem:[#allocation2 + $0x152] sm:$0xff]  ;;  %v11406_v8 = vpack.c.bf16 %v2729_v3, %v2728_v2 }
 0x185   : > { %1727 = vst.msk [vmem:[#allocation5 + $0x20] sm:$0xff] %vm385_vm1, %v1711_v48  ;;  %v1712_v26 = vmax.f32 %v1616_v41, %v1632_v45  ;;  %v3590_v43 = vpack.c.bf16 %v3571_v38, %v3570_v12  ;;  %2260 = vst.msk [vmem:[#allocation4 + $0x310] sm:$0xff] %vm385_vm1, %v2244_v35  ;;  %v2537_v35 = vld [vmem:[#allocation2 + $0xcb] sm:$0xff] }
 0x186   : > { %2912 = vrot.lane.b32.xlu0 %v11317_v31, %s10328_s29  ;;  %1730 = vst.msk [vmem:[#allocation5 + $0x38] sm:$0xff] %vm385_vm1, %v1714_v55  ;;  %2711 = vst.msk [vmem:[#allocation4 + $0x318] sm:$0xff] %vm385_vm1, %v11379_v42 }
 0x187   : > { %2334 = vrot.lane.b32.xlu1 %v11317_v31, %s10330_s15  ;;  %1728 = vst.msk [vmem:[#allocation5 + $0x28] sm:$0xff] %vm385_vm1, %v1712_v26  ;;  %3606 = vst.msk [vmem:[#allocation4 + $0x2b8] sm:$0xff] %vm385_vm1, %v3590_v43  ;;  %v4905_v43 = vld [vmem:[#allocation2 + $0xfc] sm:$0xff] }
 0x18a   : > { %3040 = vrot.lane.b32.xlu0 %v11333_v59, %s10329_s13 }
 0x18b   : > { %2463 = vrot.lane.b32.xlu1 %v11333_v59, %s10328_s29 }
 0x18c   : > { %v2781_v60 = vpop.permute.xlu0 %2780 }
 0x18d   : > { %2827 = vst.msk [vmem:[#allocation4 + $0x40] sm:$0xff] %vm2374_vm3, %v2781_v60  ;;  %v2331_v62 = vpop.permute.xlu1 %2330  ;;  %v1742_v52 = vld [vmem:[#allocation5 + $0x30] ss:$2 sm:$0xff]  ;;  %v1750_v13 = vld [vmem:[#allocation5 + $0x31] ss:$2 sm:$0xff] }
 0x18e   : > { %2377 = vst.msk [vmem:[#allocation4 + $0x70] sm:$0xff] %vm2374_vm3, %v2331_v62  ;;  %3933 = vrot.lane.b32.xlu0 %v11306_v15, %s10329_s13  ;;  %v1741_v16 = vld [vmem:[#allocation5 + $0x20] ss:$2 sm:$0xff]  ;;  %v1749_v17 = vld [vmem:[#allocation5 + $0x21] ss:$2 sm:$0xff]  ;;  %v1758_v24 = vmax.f32 %v1742_v52, %v1750_v13  ;;  %v4456_v52 = vld [vmem:[#allocation2 + $0xf0] sm:$0xff] }
 0x18f   : > { %2592 = vrot.lane.b32.xlu1 %v11345_v63, %s10329_s13  ;;  %v1757_v22 = vmax.f32 %v1741_v16, %v1749_v17  ;;  %v2857_v16 = vld [vmem:[#allocation2 + $0xc9] sm:$0xff] }
 0x190   : > { %v2909_v5 = vpop.permute.xlu0 %2908  ;;  %1767 = vst.msk [vmem:[#allocation2 + $0x112] sm:$0xff] %vm385_vm1, %v1758_v24  ;;  %v2984_v24 = vld [vmem:[#allocation2 + $0xc2] sm:$0xff] }
 0x191   : > { %2955 = vst.msk [vmem:[#allocation4 + $0x40] sm:$0xff] %vm2503_vm4, %v2909_v5  ;;  %v2460_v7 = vpop.permute.xlu1 %2459 }
 0x192   : > { %2506 = vst.msk [vmem:[#allocation4 + $0x70] sm:$0xff] %vm2503_vm4, %v2460_v7  ;;  %3678 = vrot.lane.b32.xlu0 %v11345_v63, %s10330_s15 }
 0x193   : > { %3358 = vrot.lane.b32.xlu1 %v11306_v15, %s10328_s29  ;;  %v9864_v15 = vpop.f32.mrb[40].mxu1  ;;  %1766 = vst.msk [vmem:[#allocation2 + $0x10a] sm:$0xff] %vm385_vm1, %v1757_v22 }
 0x194   : > { %v3037_v9 = vpop.permute.xlu0 %3036  ;;  %v2038_v21 = vpop.f32.mrb[41].mxu1 }
 0x195   : > { %3083 = vst.msk [vmem:[#allocation4 + $0x40] sm:$0xff] %vm2632_vm5, %v3037_v9  ;;  %v2589_v11 = vpop.permute.xlu1 %2588  ;;  %v9865_v28 = vpop.f32.mrb[42].mxu1  ;;  %v2039_v46 = vadd.f32 %v11199_v10, %v2038_v21  ;;  %v2856_v9 = vld [vmem:[#allocation2 + $0xc1] sm:$0xff] }
 0x196   : > { %2635 = vst.msk [vmem:[#allocation4 + $0x70] sm:$0xff] %vm2632_vm5, %v2589_v11  ;;  %3806 = vrot.lane.b32.xlu0 %v11361_v37, %s10328_s29  ;;  %v2041_v33 = vpop.f32.mrb[43].mxu1  ;;  %v2050_v48 = vadd.f32 %v11199_v10, %v9865_v28  ;;  %v4457_v11 = vld [vmem:[#allocation2 + $0xf8] sm:$0xff] }
 0x197   : > { %3486 = vrot.lane.b32.xlu1 %v11317_v31, %s10329_s13  ;;  %v9868_v47 = vpop.f32.mrb[44].mxu1  ;;  %v2042_v54 = vadd.f32 %v11199_v10, %v2041_v33  ;;  %v4482_v17 = vpack.c.bf16 %v4457_v11, %v4456_v52  ;;  %v2536_v33 = vld [vmem:[#allocation2 + $0xc3] sm:$0xff] }
 0x198   : > { %v3675_v40 = vpop.permute.xlu0 %3674  ;;  %v2063_v45 = vadd.f32 %v11199_v10, %v9868_v47  ;;  %v2054_v49 = vpop.f32.mrb[45].mxu1 }
 0x199   : > { %3722 = vst.msk [vmem:[#allocation4 + $0x18] sm:$0xff] %vm2374_vm3, %v3675_v40  ;;  %v3355_v51 = vpop.permute.xlu1 %3354  ;;  %v2055_v55 = vadd.f32 %v11199_v10, %v2054_v49  ;;  %v9869_v26 = vpop.f32.mrb[46].mxu1  ;;  %v11417_v40 = vpack.c.bf16 %v2857_v16, %v2856_v9 }
 0x19a   : > { %3402 = vst.msk [vmem:[#allocation4 + $0x10] sm:$0xff] %vm2503_vm4, %v3355_v51  ;;  %4572 = vrot.lane.b32.xlu0 %v11317_v31, %s10330_s15  ;;  %v2047_v31 = vadd.f32 %v11199_v10, %v9864_v15  ;;  %v2066_v57 = vadd.f32 %v11199_v10, %v9869_v26  ;;  %v2057_v0 = vpop.f32.mrb[47].mxu1  ;;  %v9830_v15 = vpop.f32.mrb[48].mxu0  ;;  %v2985_v51 = vld [vmem:[#allocation2 + $0xca] sm:$0xff] }
 0x19b   : > { %3232 = vrot.lane.b32.xlu1 %v11361_v37, %s10330_s15  ;;  %v2137_v4 = vmax.f32 %v2039_v46, %v2055_v55  ;;  %v2058_v5 = vadd.f32 %v11199_v10, %v2057_v0  ;;  %4498 = vst.msk [vmem:[#allocation4 + $0x178] sm:$0xff] %vm385_vm1, %v4482_v17  ;;  %v1644_v21 = vpop.f32.mrb[49].mxu0  ;;  %v3009_v29 = vpack.c.bf16 %v2985_v51, %v2984_v24  ;;  %v3564_v9 = vld [vmem:[#allocation2 + $0x10a] sm:$0xff]  ;;  %v3119_v17 = vld [vmem:[#allocation2 + $0x113] sm:$0xff] }
 0x19c   : > { %v3803_v39 = vpop.permute.xlu0 %3802  ;;  %v4964_v41 = vld [vmem:[#allocation4 + $0x40] sm:$0xff]  ;;  %v2139_v62 = vmax.f32 %v2047_v31, %v2063_v45  ;;  %v1653_v32 = vadd.f32 %v11199_v10, %v9830_v15  ;;  %v1645_v36 = vadd.f32 %v11199_v10, %v1644_v21  ;;  %v4904_v31 = vld [vmem:[#allocation2 + $0xf4] sm:$0xff]  ;;  %v2560_v55 = vpack.c.bf16 %v2537_v35, %v2536_v33  ;;  %v3118_v16 = vld [vmem:[#allocation2 + $0x10b] sm:$0xff] }
 0x19d   : > { %3850 = vst.msk [vmem:[#allocation4 + $0x18] sm:$0xff] %vm2503_vm4, %v3803_v39  ;;  %v3483_v44 = vpop.permute.xlu1 %3482  ;;  %5563 = vmatprep.mubr.bf16.mxu0 %v4964_v41  ;;  %v2138_v7 = vmax.f32 %v2042_v54, %v2058_v5  ;;  %v4930_v49 = vpack.c.bf16 %v4905_v43, %v4904_v31  ;;  %v2671_v15 = vld [vmem:[#allocation2 + $0x10c] sm:$0xff] }
 0x19e   : > { %3530 = vst.msk [vmem:[#allocation4 + $0x10] sm:$0xff] %vm2632_vm5, %v3483_v44  ;;  %4700 = vrot.lane.b32.xlu0 %v11333_v59, %s10328_s29  ;;  %5564 = vmatmul.mubr.bf16.gmra.mrb[68].mxu0 %v4963_v27  ;;  %v3751_v24 = vld [vmem:[#allocation2 + $0xcc] sm:$0xff] }
 0x19f   : > { %4125 = vrot.lane.b32.xlu1 %v11333_v59, %s10330_s15  ;;  %2155 = vst.msk [vmem:[#allocation5 + $0x30] sm:$0xff] %vm385_vm1, %v2139_v62  ;;  %v2140_v59 = vmax.f32 %v2050_v48, %v2066_v57  ;;  %2153 = vst.msk [vmem:[#allocation5 + $0x20] sm:$0xff] %vm385_vm1, %v2137_v4  ;;  %v3124_v43 = vld [vmem:[#allocation2 + $0x153] sm:$0xff] }
 0x1a0   : > { %v2789_v60 = vpop.permute.xlu0 %2788  ;;  %2154 = vst.msk [vmem:[#allocation5 + $0x28] sm:$0xff] %vm385_vm1, %v2138_v7  ;;  %4946 = vst.msk [vmem:[#allocation4 + $0x180] sm:$0xff] %vm385_vm1, %v4930_v49  ;;  %v2220_v7 = vld [vmem:[#allocation2 + $0x108] sm:$0xff] }
 0x1a1   : > { %2831 = vst.msk [vmem:[#allocation4 + $0x120] sm:$0xff] %vm2374_vm3, %v2789_v60  ;;  %v3229_v1 = vpop.permute.xlu1 %3228 }
 0x1a2   : > { %3275 = vst.msk [vmem:[#allocation4 + $0x48] sm:$0xff] %vm2374_vm3, %v3229_v1  ;;  %4828 = vrot.lane.b32.xlu0 %v11345_v63, %s10329_s13 }
 0x1a3   : > { %4253 = vrot.lane.b32.xlu1 %v11345_v63, %s10328_s29  ;;  %2156 = vst.msk [vmem:[#allocation5 + $0x38] sm:$0xff] %vm385_vm1, %v2140_v59  ;;  %v4010_v63 = vld [vmem:[#allocation2 + $0xf9] sm:$0xff] }
 0x1a4   : > { %v2917_v61 = vpop.permute.xlu0 %2916  ;;  %v4034_v19 = vpack.c.bf16 %v4010_v63, %v4009_v18 }
 0x1a5   : > { %2959 = vst.msk [vmem:[#allocation4 + $0x120] sm:$0xff] %vm2503_vm4, %v2917_v61  ;;  %v2339_v13 = vpop.permute.xlu1 %2338  ;;  %v2221_v61 = vld [vmem:[#allocation2 + $0x110] sm:$0xff] }
 0x1a6   : > { %2381 = vst.msk [vmem:[#allocation4 + $0x150] sm:$0xff] %vm2374_vm3, %v2339_v13  ;;  %2792 = vrot.lane.b32.xlu0 %v11406_v8, %s10330_s15  ;;  %v2241_v11 = vpack.c.bf16 %v2221_v61, %v2220_v7  ;;  %v3565_v13 = vld [vmem:[#allocation2 + $0x112] sm:$0xff] }
 0x1a7   : > { %4381 = vrot.lane.b32.xlu1 %v11361_v37, %s10329_s13  ;;  %4050 = vst.msk [vmem:[#allocation4 + $0x1a8] sm:$0xff] %vm385_vm1, %v4034_v19  ;;  %v9831_v37 = vpop.f32.mrb[50].mxu0  ;;  %v2167_v48 = vld [vmem:[#allocation5 + $0x20] ss:$2 sm:$0xff]  ;;  %v2175_v57 = vld [vmem:[#allocation5 + $0x21] ss:$2 sm:$0xff]  ;;  %v11451_v63 = vpack.c.bf16 %v3565_v13, %v3564_v9  ;;  %v11453_v19 = vpack.c.bf16 %v3119_v17, %v3118_v16 }
 0x1a8   : > { %v3045_v20 = vpop.permute.xlu0 %3044  ;;  %v1647_v27 = vpop.f32.mrb[51].mxu0  ;;  %v1656_v38 = vadd.f32 %v11199_v10, %v9831_v37  ;;  %v2183_v4 = vmax.f32 %v2167_v48, %v2175_v57  ;;  %2257 = vst.msk [vmem:[#allocation4 + $0x268] sm:$0xff] %vm385_vm1, %v2241_v11  ;;  %v4017_v16 = vld [vmem:[#allocation2 + $0x151] sm:$0xff]  ;;  %v4018_v17 = vld [vmem:[#allocation2 + $0x159] sm:$0xff] }
 0x1a9   : > { %3087 = vst.msk [vmem:[#allocation4 + $0x120] sm:$0xff] %vm2632_vm5, %v3045_v20  ;;  %v2468_v22 = vpop.permute.xlu1 %2467  ;;  %v9834_v12 = vpop.f32.mrb[52].mxu0  ;;  %v1648_v44 = vadd.f32 %v11199_v10, %v1647_v27  ;;  %v2672_v20 = vld [vmem:[#allocation2 + $0x114] sm:$0xff] }
 0x1aa   : > { %2510 = vst.msk [vmem:[#allocation4 + $0x150] sm:$0xff] %vm2503_vm4, %v2468_v22  ;;  %2920 = vrot.lane.b32.xlu0 %v11417_v40, %s10328_s29  ;;  %v1669_v39 = vadd.f32 %v11199_v10, %v9834_v12  ;;  %v1660_v41 = vpop.f32.mrb[53].mxu0  ;;  %v2168_v45 = vld [vmem:[#allocation5 + $0x30] ss:$2 sm:$0xff]  ;;  %v2176_v0 = vld [vmem:[#allocation5 + $0x31] ss:$2 sm:$0xff]  ;;  %v11460_v51 = vpack.c.bf16 %v2672_v20, %v2671_v15 }
 0x1ab   : > { %2342 = vrot.lane.b32.xlu1 %v11417_v40, %s10330_s15  ;;  %v1661_v46 = vadd.f32 %v11199_v10, %v1660_v41  ;;  %v9835_v47 = vpop.f32.mrb[54].mxu0  ;;  %v2184_v5 = vmax.f32 %v2168_v45, %v2176_v0  ;;  %2192 = vst.msk [vmem:[#allocation2 + $0x16a] sm:$0xff] %vm385_vm1, %v2183_v4  ;;  %v3750_v22 = vld [vmem:[#allocation2 + $0xc4] sm:$0xff]  ;;  %3603 = vst.msk [vmem:[#allocation4 + $0x210] sm:$0xff] %vm385_vm1, %v11451_v63 }
 0x1ac   : > { %v11426_v28 = vpop.permute.xlu0 %3937  ;;  %v1717_v26 = vmax.f32 %v1653_v32, %v1669_v39  ;;  %v1672_v60 = vadd.f32 %v11199_v10, %v9835_v47  ;;  %v1663_v62 = vpop.f32.mrb[55].mxu0  ;;  %3156 = vst.msk [vmem:[#allocation4 + $0x240] sm:$0xff] %vm385_vm1, %v11453_v19  ;;  %2708 = vst.msk [vmem:[#allocation4 + $0x270] sm:$0xff] %vm385_vm1, %v11460_v51  ;;  %v3776_v27 = vpack.c.bf16 %v3751_v24, %v3750_v22  ;;  %v2722_v32 = vld [vmem:[#allocation2 + $0x78] sm:$0xff] }
 0x1ad   : > { %v2597_v34 = vpop.permute.xlu1 %2596  ;;  %v1715_v2 = vmax.f32 %v1645_v36, %v1661_v46  ;;  %v1664_v3 = vadd.f32 %v11199_v10, %v1663_v62  ;;  %2193 = vst.msk [vmem:[#allocation2 + $0x172] sm:$0xff] %vm385_vm1, %v2184_v5  ;;  %v2851_v36 = vld [vmem:[#allocation2 + $0x81] sm:$0xff]  ;;  %v9838_v13 = vpop.f32.mrb[56].mxu0 }
 0x1ae   : > { %2639 = vst.msk [vmem:[#allocation4 + $0x150] sm:$0xff] %vm2632_vm5, %v2597_v34  ;;  %3048 = vrot.lane.b32.xlu0 %v3009_v29, %s10329_s13  ;;  %v1718_v59 = vmax.f32 %v1656_v38, %v1672_v60  ;;  %v2723_v34 = vld [vmem:[#allocation2 + $0x80] sm:$0xff]  ;;  %v1676_v24 = vpop.f32.mrb[57].mxu0 }
 0x1af   : > { %2471 = vrot.lane.b32.xlu1 %v3009_v29, %s10328_s29  ;;  %1733 = vst.msk [vmem:[#allocation5 + $0x50] sm:$0xff] %vm385_vm1, %v1717_v26  ;;  %1731 = vst.msk [vmem:[#allocation5 + $0x40] sm:$0xff] %vm385_vm1, %v1715_v2  ;;  %v1716_v52 = vmax.f32 %v1648_v44, %v1664_v3  ;;  %v11476_v35 = vpack.c.bf16 %v2723_v34, %v2722_v32  ;;  %v3125_v44 = vld [vmem:[#allocation2 + $0x15b] sm:$0xff] }
 0x1b0   : > { %v3683_v54 = vpop.permute.xlu0 %3682  ;;  %1734 = vst.msk [vmem:[#allocation5 + $0x58] sm:$0xff] %vm385_vm1, %v1718_v59  ;;  %v11483_v46 = vpack.c.bf16 %v3125_v44, %v3124_v43  ;;  %v2978_v26 = vld [vmem:[#allocation2 + $0x7a] sm:$0xff]  ;;  %v2979_v60 = vld [vmem:[#allocation2 + $0x82] sm:$0xff]  ;;  %v9839_v43 = vpop.f32.mrb[58].mxu0 }
 0x1b1   : > { %3726 = vst.msk [vmem:[#allocation4 + $0xf8] sm:$0xff] %vm2374_vm3, %v3683_v54  ;;  %v11439_v1 = vpop.permute.xlu1 %3362  ;;  %v11497_v2 = vpack.c.bf16 %v2979_v60, %v2978_v26  ;;  %v2530_v5 = vld [vmem:[#allocation2 + $0x7b] sm:$0xff]  ;;  %v2531_v59 = vld [vmem:[#allocation2 + $0x83] sm:$0xff] }
 0x1b2   : > { %3941 = vrot.lane.b32.xlu0 %v11406_v8, %s10329_s13  ;;  %1732 = vst.msk [vmem:[#allocation5 + $0x48] sm:$0xff] %vm385_vm1, %v1716_v52  ;;  %3159 = vst.msk [vmem:[#allocation4 + $0x2e8] sm:$0xff] %vm385_vm1, %v11483_v46  ;;  %v4913_v32 = vld [vmem:[#allocation2 + $0x15c] sm:$0xff] }
 0x1b3   : > { %2600 = vrot.lane.b32.xlu1 %v2560_v55, %s10329_s13 }
 0x1b4   : > { %v3811_v18 = vpop.permute.xlu0 %3810  ;;  %v3765_v26 = vld [vmem:[#allocation2 + $0x174] sm:$0xff] }
 0x1b5   : > { %3854 = vst.msk [vmem:[#allocation4 + $0xf8] sm:$0xff] %vm2503_vm4, %v3811_v18  ;;  %v11456_v21 = vpop.permute.xlu1 %3490  ;;  %v4464_v18 = vld [vmem:[#allocation2 + $0x150] sm:$0xff] }
 0x1b6   : > { %3686 = vrot.lane.b32.xlu0 %v2560_v55, %s10330_s15 }
 0x1b7   : > { %3366 = vrot.lane.b32.xlu1 %v11406_v8, %s10328_s29  ;;  %v2850_v8 = vld [vmem:[#allocation2 + $0x79] sm:$0xff] }
 0x1b8   : > { %v4577_v37 = vpop.permute.xlu0 %4576  ;;  %v1744_v12 = vld [vmem:[#allocation5 + $0x50] ss:$2 sm:$0xff]  ;;  %v1752_v39 = vld [vmem:[#allocation5 + $0x51] ss:$2 sm:$0xff]  ;;  %v11485_v48 = vpack.c.bf16 %v2851_v36, %v2850_v8 }
 0x1b9   : > { %4622 = vst.msk [vmem:[#allocation4 + $0x98] sm:$0xff] %vm2374_vm3, %v4577_v37  ;;  %v3237_v29 = vpop.permute.xlu1 %3236  ;;  %v1743_v41 = vld [vmem:[#allocation5 + $0x40] ss:$2 sm:$0xff]  ;;  %v1751_v31 = vld [vmem:[#allocation5 + $0x41] ss:$2 sm:$0xff]  ;;  %v1760_v54 = vmax.f32 %v1744_v12, %v1752_v39  ;;  %v4038_v37 = vpack.c.bf16 %v4018_v17, %v4017_v16  ;;  %v11513_v39 = vpack.c.bf16 %v2531_v59, %v2530_v5 }
 0x1ba   : > { %3279 = vst.msk [vmem:[#allocation4 + $0x128] sm:$0xff] %vm2374_vm3, %v3237_v29  ;;  %3814 = vrot.lane.b32.xlu0 %v3776_v27, %s10328_s29  ;;  %v1759_v49 = vmax.f32 %v1743_v41, %v1751_v31  ;;  %v4912_v29 = vld [vmem:[#allocation2 + $0x154] sm:$0xff] }
 0x1bb   : > { %3494 = vrot.lane.b32.xlu1 %v11417_v40, %s10329_s13  ;;  %v9872_v40 = vpop.f32.mrb[48].mxu1  ;;  %1769 = vst.msk [vmem:[#allocation2 + $0x12a] sm:$0xff] %vm385_vm1, %v1760_v54  ;;  %4054 = vst.msk [vmem:[#allocation4 + $0x288] sm:$0xff] %vm385_vm1, %v4038_v37  ;;  %v4934_v44 = vpack.c.bf16 %v4913_v32, %v4912_v29  ;;  %v1679_v54 = vpop.f32.mrb[59].mxu0  ;;  %v4011_v29 = vld [vmem:[#allocation2 + $0x109] sm:$0xff]  ;;  %v4012_v32 = vld [vmem:[#allocation2 + $0x111] sm:$0xff] }
 0x1bc   : > { %v4705_v33 = vpop.permute.xlu0 %4704  ;;  %v2070_v45 = vpop.f32.mrb[49].mxu1  ;;  %1768 = vst.msk [vmem:[#allocation2 + $0x122] sm:$0xff] %vm385_vm1, %v1759_v49  ;;  %v2079_v3 = vadd.f32 %v11199_v10, %v9872_v40 }
 0x1bd   : > { %4750 = vst.msk [vmem:[#allocation4 + $0x98] sm:$0xff] %vm2503_vm4, %v4705_v33  ;;  %v2333_v38 = vpop.permute.xlu1 %2332  ;;  %v9873_v62 = vpop.f32.mrb[50].mxu1  ;;  %v2071_v7 = vadd.f32 %v11199_v10, %v2070_v45  ;;  %v11530_v45 = vld [vmem:[%s13456_s2] ss:$0 sm:$0xff] }
 0x1be   : > { %2378 = vst.msk [vmem:[#allocation4 + $0xa8] sm:$0xff] %vm2374_vm3, %v2333_v38  ;;  %2786 = vrot.lane.b32.xlu0 %v11476_v35, %s10330_s15  ;;  %v2073_v57 = vpop.f32.mrb[51].mxu1  ;;  %v2082_v9 = vadd.f32 %v11199_v10, %v9873_v62  ;;  %v1685_v49 = vadd.f32 %v11530_v45, %v9838_v13  ;;  %v1677_v62 = vadd.f32 %v11530_v45, %v1676_v24 }
 0x1bf   : > { %3240 = vrot.lane.b32.xlu1 %v3776_v27, %s10330_s15  ;;  %v9876_v61 = vpop.f32.mrb[52].mxu1  ;;  %v2074_v15 = vadd.f32 %v11199_v10, %v2073_v57  ;;  %v4465_v27 = vld [vmem:[#allocation2 + $0x158] sm:$0xff]  ;;  %4950 = vst.msk [vmem:[#allocation4 + $0x260] sm:$0xff] %vm385_vm1, %v4934_v44  ;;  %v9842_v57 = vpop.f32.mrb[60].mxu0  ;;  %v1688_v5 = vadd.f32 %v11530_v45, %v9839_v43 }
 0x1c0   : > { %v4833_v47 = vpop.permute.xlu0 %4832  ;;  %v2095_v52 = vadd.f32 %v11199_v10, %v9876_v61  ;;  %v2086_v11 = vpop.f32.mrb[53].mxu1  ;;  %v4486_v12 = vpack.c.bf16 %v4465_v27, %v4464_v18  ;;  %v1701_v59 = vadd.f32 %v11530_v45, %v9842_v57 }
 0x1c1   : > { %4878 = vst.msk [vmem:[#allocation4 + $0x98] sm:$0xff] %vm2632_vm5, %v4833_v47  ;;  %v2462_v55 = vpop.permute.xlu1 %2461  ;;  %v2087_v20 = vadd.f32 %v11199_v10, %v2086_v11  ;;  %v9877_v22 = vpop.f32.mrb[54].mxu1 }
 0x1c2   : > { %2507 = vst.msk [vmem:[#allocation4 + $0xa8] sm:$0xff] %vm2503_vm4, %v2462_v55  ;;  %2914 = vrot.lane.b32.xlu0 %v11485_v48, %s10328_s29  ;;  %v2143_v33 = vmax.f32 %v2079_v3, %v2095_v52  ;;  %v2098_v8 = vadd.f32 %v11199_v10, %v9877_v22  ;;  %v2089_v36 = vpop.f32.mrb[55].mxu1  ;;  %v3764_v55 = vld [vmem:[#allocation2 + $0x16c] sm:$0xff]  ;;  %v1721_v16 = vmax.f32 %v1685_v49, %v1701_v59 }
 0x1c3   : > { %2336 = vrot.lane.b32.xlu1 %v11485_v48, %s10330_s15  ;;  %v2141_v41 = vmax.f32 %v2071_v7, %v2087_v20  ;;  %v2090_v31 = vadd.f32 %v11199_v10, %v2089_v36  ;;  %4502 = vst.msk [vmem:[#allocation4 + $0x258] sm:$0xff] %vm385_vm1, %v4486_v12  ;;  %v2228_v3 = vld [vmem:[#allocation2 + $0x168] sm:$0xff]  ;;  %v1692_v7 = vpop.f32.mrb[61].mxu0  ;;  %v4459_v12 = vld [vmem:[#allocation2 + $0x110] sm:$0xff] }
 0x1c4   : > { %v2783_v0 = vpop.permute.xlu0 %2782  ;;  %2159 = vst.msk [vmem:[#allocation5 + $0x50] sm:$0xff] %vm385_vm1, %v2143_v33  ;;  %v2144_v40 = vmax.f32 %v2082_v9, %v2098_v8  ;;  %v1680_v9 = vadd.f32 %v11530_v45, %v1679_v54  ;;  %v1693_v52 = vadd.f32 %v11530_v45, %v1692_v7  ;;  %v9843_v11 = vpop.f32.mrb[62].mxu0  ;;  %1737 = vst.msk [vmem:[#allocation5 + $0x70] sm:$0xff] %vm385_vm1, %v1721_v16  ;;  %v4970_v33 = vld [vmem:[#allocation4 + $0x70] sm:$0xff]  ;;  %v4458_v36 = vld [vmem:[#allocation2 + $0x108] sm:$0xff] }
 0x1c5   : > { %2828 = vst.msk [vmem:[#allocation4 + $0x78] sm:$0xff] %vm2374_vm3, %v2783_v0  ;;  %v2591_v4 = vpop.permute.xlu1 %2590  ;;  %v2142_v10 = vmax.f32 %v2074_v15, %v2090_v31  ;;  %v11536_v0 = vpack.c.bf16 %v3765_v26, %v3764_v55  ;;  %v1704_v17 = vadd.f32 %v11530_v45, %v9843_v11  ;;  %v1695_v18 = vpop.f32.mrb[63].mxu0  ;;  %v4035_v8 = vpack.c.bf16 %v4012_v32, %v4011_v29  ;;  %v2222_v55 = vld [vmem:[#allocation2 + $0x120] sm:$0xff]  ;;  %v2223_v26 = vld [vmem:[#allocation2 + $0x128] sm:$0xff]  ;;  %v2730_v11 = vld [vmem:[#allocation2 + $0xd8] sm:$0xff] }
 0x1c6   : > { %2636 = vst.msk [vmem:[#allocation4 + $0xa8] sm:$0xff] %vm2632_vm5, %v2591_v4  ;;  %3042 = vrot.lane.b32.xlu0 %v11497_v2, %s10329_s13  ;;  %v2229_v4 = vld [vmem:[#allocation2 + $0x170] sm:$0xff]  ;;  %v1719_v20 = vmax.f32 %v1677_v62, %v1693_v52  ;;  %v2242_v62 = vpack.c.bf16 %v2223_v26, %v2222_v55 }
 0x1c7   : > { %2465 = vrot.lane.b32.xlu1 %v11497_v2, %s10328_s29  ;;  %2157 = vst.msk [vmem:[#allocation5 + $0x40] sm:$0xff] %vm385_vm1, %v2141_v41  ;;  %2160 = vst.msk [vmem:[#allocation5 + $0x58] sm:$0xff] %vm385_vm1, %v2144_v40  ;;  %v2245_v61 = vpack.c.bf16 %v2229_v4, %v2228_v3  ;;  %v1722_v22 = vmax.f32 %v1688_v5, %v1704_v17  ;;  %v3567_v57 = vld [vmem:[#allocation2 + $0x12a] sm:$0xff] }
 0x1c8   : > { %v2911_v34 = vpop.permute.xlu0 %2910  ;;  %2158 = vst.msk [vmem:[#allocation5 + $0x48] sm:$0xff] %vm385_vm1, %v2142_v10  ;;  %2712 = vst.msk [vmem:[#allocation4 + $0x350] sm:$0xff] %vm385_vm1, %v11536_v0  ;;  %v3120_v3 = vld [vmem:[#allocation2 + $0x123] sm:$0xff]  ;;  %v3121_v4 = vld [vmem:[#allocation2 + $0x12b] sm:$0xff] }
 0x1c9   : > { %2956 = vst.msk [vmem:[#allocation4 + $0x78] sm:$0xff] %vm2503_vm4, %v2911_v34  ;;  %v3357_v38 = vpop.permute.xlu1 %3356  ;;  %v11580_v7 = vpack.c.bf16 %v3121_v4, %v3120_v3  ;;  %v3572_v26 = vld [vmem:[#allocation2 + $0x16a] sm:$0xff] }
 0x1ca   : > { %3403 = vst.msk [vmem:[#allocation4 + $0x48] sm:$0xff] %vm2503_vm4, %v3357_v38  ;;  %3935 = vrot.lane.b32.xlu0 %v11476_v35, %s10329_s13  ;;  %v4483_v38 = vpack.c.bf16 %v4459_v12, %v4458_v36  ;;  %v2986_v12 = vld [vmem:[#allocation2 + $0xda] sm:$0xff] }
 0x1cb   : > { %2594 = vrot.lane.b32.xlu1 %v11513_v39, %s10329_s13  ;;  %2261 = vst.msk [vmem:[#allocation4 + $0x348] sm:$0xff] %vm385_vm1, %v2245_v61  ;;  %1735 = vst.msk [vmem:[#allocation5 + $0x60] sm:$0xff] %vm385_vm1, %v1719_v20  ;;  %v2673_v61 = vld [vmem:[#allocation2 + $0x124] sm:$0xff] }
 0x1cc   : > { %v3039_v47 = vpop.permute.xlu0 %3038  ;;  %1738 = vst.msk [vmem:[#allocation5 + $0x78] sm:$0xff] %vm385_vm1, %v1722_v22  ;;  %4051 = vst.msk [vmem:[#allocation4 + $0x1e0] sm:$0xff] %vm385_vm1, %v4035_v8  ;;  %v4907_v22 = vld [vmem:[#allocation2 + $0x114] sm:$0xff] }
 0x1cd   : > { %3084 = vst.msk [vmem:[#allocation4 + $0x78] sm:$0xff] %vm2632_vm5, %v3039_v47  ;;  %v3485_v60 = vpop.permute.xlu1 %3484 }
 0x1ce   : > { %3531 = vst.msk [vmem:[#allocation4 + $0x48] sm:$0xff] %vm2632_vm5, %v3485_v60  ;;  %3680 = vrot.lane.b32.xlu0 %v11513_v39, %s10330_s15  ;;  %v2170_v31 = vld [vmem:[#allocation5 + $0x50] ss:$2 sm:$0xff]  ;;  %v2178_v10 = vld [vmem:[#allocation5 + $0x51] ss:$2 sm:$0xff]  ;;  %v3566_v60 = vld [vmem:[#allocation2 + $0x122] sm:$0xff] }
 0x1cf   : > { %3360 = vrot.lane.b32.xlu1 %v11476_v35, %s10328_s29  ;;  %v1696_v35 = vadd.f32 %v11530_v45, %v1695_v18  ;;  %v2169_v41 = vld [vmem:[#allocation5 + $0x40] ss:$2 sm:$0xff]  ;;  %v2177_v43 = vld [vmem:[#allocation5 + $0x41] ss:$2 sm:$0xff]  ;;  %4499 = vst.msk [vmem:[#allocation4 + $0x1b0] sm:$0xff] %vm385_vm1, %v4483_v38  ;;  %v2186_v54 = vmax.f32 %v2170_v31, %v2178_v10  ;;  %v11578_v59 = vpack.c.bf16 %v3567_v57, %v3566_v60  ;;  %2258 = vst.msk [vmem:[#allocation4 + $0x2a0] sm:$0xff] %vm385_vm1, %v2242_v62 }
 0x1d0   : > { %v3932_v13 = vpop.permute.xlu0 %3931  ;;  %v2185_v47 = vmax.f32 %v2169_v41, %v2177_v43  ;;  %3157 = vst.msk [vmem:[#allocation4 + $0x278] sm:$0xff] %vm385_vm1, %v11580_v7  ;;  %v2987_v38 = vld [vmem:[#allocation2 + $0xe2] sm:$0xff]  ;;  %v3573_v60 = vld [vmem:[#allocation2 + $0x172] sm:$0xff] }
 0x1d1   : > { %3979 = vst.msk [vmem:[#allocation4 + $0x18] sm:$0xff] %vm2632_vm5, %v3932_v13  ;;  %v3231_v15 = vpop.permute.xlu1 %3230  ;;  %v1720_v24 = vmax.f32 %v1680_v9, %v1696_v35  ;;  %v2674_v9 = vld [vmem:[#allocation2 + $0x12c] sm:$0xff]  ;;  %v2731_v13 = vld [vmem:[#allocation2 + $0xe0] sm:$0xff]  ;;  %v11625_v4 = vpack.c.bf16 %v3573_v60, %v3572_v26 }
 0x1d2   : > { %3276 = vst.msk [vmem:[#allocation4 + $0x80] sm:$0xff] %vm2374_vm3, %v3231_v15  ;;  %3808 = vrot.lane.b32.xlu0 %v11150_v25, %s10328_s29  ;;  %v4906_v35 = vld [vmem:[#allocation2 + $0x10c] sm:$0xff]  ;;  %v4013_v26 = vld [vmem:[#allocation2 + $0x121] sm:$0xff] }
 0x1d3   : > { %3488 = vrot.lane.b32.xlu1 %v11485_v48, %s10329_s13  ;;  %1736 = vst.msk [vmem:[#allocation5 + $0x68] sm:$0xff] %vm385_vm1, %v1720_v24  ;;  %2194 = vst.msk [vmem:[#allocation2 + $0x182] sm:$0xff] %vm385_vm1, %v2185_v47  ;;  %v1746_v17 = vld [vmem:[#allocation5 + $0x70] ss:$2 sm:$0xff]  ;;  %v1754_v15 = vld [vmem:[#allocation5 + $0x71] ss:$2 sm:$0xff]  ;;  %v4931_v29 = vpack.c.bf16 %v4907_v22, %v4906_v35 }
 0x1d4   : > { %v3677_v37 = vpop.permute.xlu0 %3676  ;;  %v4971_v27 = vld [vmem:[#allocation4 + $0x78] sm:$0xff]  ;;  %2195 = vst.msk [vmem:[#allocation2 + $0x18a] sm:$0xff] %vm385_vm1, %v2186_v54  ;;  %3604 = vst.msk [vmem:[#allocation4 + $0x248] sm:$0xff] %vm385_vm1, %v11578_v59  ;;  %v2539_v54 = vld [vmem:[#allocation2 + $0xe3] sm:$0xff] }
 0x1d5   : > { %3723 = vst.msk [vmem:[#allocation4 + $0x50] sm:$0xff] %vm2374_vm3, %v3677_v37  ;;  %v4124_v34 = vpop.permute.xlu1 %4123  ;;  %5571 = vmatprep.mubr.bf16.mxu0 %v4971_v27  ;;  %v11597_v37 = vpack.c.bf16 %v2731_v13, %v2730_v11  ;;  %v1762_v27 = vmax.f32 %v1746_v17, %v1754_v15  ;;  %v3126_v13 = vld [vmem:[#allocation2 + $0x16b] sm:$0xff] }
 0x1d6   : > { %4171 = vst.msk [vmem:[#allocation4 + $0x20] sm:$0xff] %vm2374_vm3, %v4124_v34  ;;  %4574 = vrot.lane.b32.xlu0 %v11485_v48, %s10330_s15  ;;  %5572 = vmatmul.mubr.bf16.gmra.mrb[72].mxu0 %v4970_v33  ;;  %v4958_v48 = vld [vmem:[#allocation4 + $0x10] sm:$0xff]  ;;  %v2858_v34 = vld [vmem:[#allocation2 + $0xd9] sm:$0xff]  ;;  %v2859_v33 = vld [vmem:[#allocation2 + $0xe1] sm:$0xff] }
 0x1d7   : > { %3234 = vrot.lane.b32.xlu1 %v11150_v25, %s10330_s15  ;;  %1771 = vst.msk [vmem:[#allocation2 + $0x142] sm:$0xff] %vm385_vm1, %v1762_v27  ;;  %4947 = vst.msk [vmem:[#allocation4 + $0x1b8] sm:$0xff] %vm385_vm1, %v4931_v29  ;;  %v11608_v8 = vpack.c.bf16 %v2859_v33, %v2858_v34  ;;  %v4530_v17 = vld [vmem:[#allocation2 + $0x169] sm:$0xff] }
 0x1d8   : > { %v3805_v44 = vpop.permute.xlu0 %3804  ;;  %v4959_v40 = vld [vmem:[#allocation4 + $0x18] sm:$0xff]  ;;  %3607 = vst.msk [vmem:[#allocation4 + $0x2f0] sm:$0xff] %vm385_vm1, %v11625_v4  ;;  %v4339_v35 = vld [vmem:[#allocation2 + $0x16c] sm:$0xff]  ;;  %v3753_v27 = vld [vmem:[#allocation2 + $0xe4] sm:$0xff] }
 0x1d9   : > { %3851 = vst.msk [vmem:[#allocation4 + $0x50] sm:$0xff] %vm2503_vm4, %v3805_v44  ;;  %v4252_v49 = vpop.permute.xlu1 %4251  ;;  %5716 = vmatprep.mubr.bf16.mxu1 %v4959_v40  ;;  %v9161_v41 = vpop.f32.mrb[64].mxu0  ;;  %v3010_v40 = vpack.c.bf16 %v2987_v38, %v2986_v12  ;;  %v2732_v12 = vld [vmem:[#allocation2 + $0xf0] sm:$0xff]  ;;  %v2733_v38 = vld [vmem:[#allocation2 + $0xf8] sm:$0xff] }
 0x1da   : > { %4299 = vst.msk [vmem:[#allocation4 + $0x20] sm:$0xff] %vm2503_vm4, %v4252_v49  ;;  %4702 = vrot.lane.b32.xlu0 %v11497_v2, %s10328_s29  ;;  %5717 = vmatmul.mubr.bf16.vlgmr.msra.gmra.mrb[64].mxu1 %v4958_v48  ;;  %v1745_v16 = vld [vmem:[#allocation5 + $0x60] ss:$2 sm:$0xff]  ;;  %v1753_v18 = vld [vmem:[#allocation5 + $0x61] ss:$2 sm:$0xff]  ;;  %v9162_v31 = vpop.f32.mrb[65].mxu0 }
 0x1db   : > { %4127 = vrot.lane.b32.xlu1 %v11497_v2, %s10330_s15  ;;  %v11584_v2 = vpack.c.bf16 %v2674_v9, %v2673_v61  ;;  %v1761_v20 = vmax.f32 %v1745_v16, %v1753_v18  ;;  %v11616_v43 = vadd.f32 %v9162_v31, %v9161_v41  ;;  %v2538_v48 = vld [vmem:[#allocation2 + $0xdb] sm:$0xff]  ;;  %v3127_v16 = vld [vmem:[#allocation2 + $0x173] sm:$0xff]  ;;  %v4466_v41 = vld [vmem:[#allocation2 + $0x168] sm:$0xff] }
 0x1dc   : > { %v2791_v5 = vpop.permute.xlu0 %2790  ;;  %v2561_v57 = vpack.c.bf16 %v2539_v54, %v2538_v48  ;;  %v11637_v15 = vpack.c.bf16 %v3127_v16, %v3126_v13  ;;  %v4467_v31 = vld [vmem:[#allocation2 + $0x170] sm:$0xff] }
 0x1dd   : > { %2832 = vst.msk [vmem:[#allocation4 + $0x158] sm:$0xff] %vm2374_vm3, %v2791_v5  ;;  %v4380_v52 = vpop.permute.xlu1 %4379  ;;  %v2988_v54 = vld [vmem:[#allocation2 + $0xf2] sm:$0xff] }
 0x1de   : > { %4427 = vst.msk [vmem:[#allocation4 + $0x20] sm:$0xff] %vm2632_vm5, %v4380_v52  ;;  %4830 = vrot.lane.b32.xlu0 %v11513_v39, %s10329_s13  ;;  %v3187_v9 = vld [vmem:[#allocation2 + $0x144] sm:$0xff] }
 0x1df   : > { %4255 = vrot.lane.b32.xlu1 %v11513_v39, %s10328_s29  ;;  %2709 = vst.msk [vmem:[#allocation4 + $0x2a8] sm:$0xff] %vm385_vm1, %v11584_v2  ;;  %1770 = vst.msk [vmem:[#allocation2 + $0x13a] sm:$0xff] %vm385_vm1, %v1761_v20  ;;  %v4531_v20 = vld [vmem:[#allocation2 + $0x171] sm:$0xff] }
 0x1e0   : > { %v2919_v24 = vpop.permute.xlu0 %2918  ;;  %v11644_v29 = vpack.c.bf16 %v4531_v20, %v4530_v17  ;;  %3160 = vst.msk [vmem:[#allocation4 + $0x320] sm:$0xff] %vm385_vm1, %v11637_v15 }
 0x1e1   : > { %2960 = vst.msk [vmem:[#allocation4 + $0x158] sm:$0xff] %vm2503_vm4, %v2919_v24  ;;  %v2341_v32 = vpop.permute.xlu1 %2340  ;;  %v3752_v24 = vld [vmem:[#allocation2 + $0xdc] sm:$0xff] }
 0x1e2   : > { %2382 = vst.msk [vmem:[#allocation4 + $0x188] sm:$0xff] %vm2374_vm3, %v2341_v32  ;;  %2794 = vrot.lane.b32.xlu0 %v11597_v37, %s10330_s15  ;;  %v4340_v32 = vld [vmem:[#allocation2 + $0x174] sm:$0xff] }
 0x1e3   : > { %4383 = vrot.lane.b32.xlu1 %v11150_v25, %s10329_s13  ;;  %v9164_v25 = vpop.f32.mrb[66].mxu0  ;;  %v11650_v34 = vpack.c.bf16 %v4340_v32, %v4339_v35  ;;  %4055 = vst.msk [vmem:[#allocation4 + $0x2c0] sm:$0xff] %vm385_vm1, %v11644_v29  ;;  %v2540_v35 = vld [vmem:[#allocation2 + $0xf3] sm:$0xff] }
 0x1e4   : > { %v3047_v39 = vpop.permute.xlu0 %3046  ;;  %v9165_v10 = vpop.f32.mrb[67].mxu0 }
 0x1e5   : > { %3088 = vst.msk [vmem:[#allocation4 + $0x158] sm:$0xff] %vm2632_vm5, %v3047_v39  ;;  %v2470_v36 = vpop.permute.xlu1 %2469  ;;  %v11619_v49 = vadd.f32 %v9165_v10, %v9164_v25  ;;  %v3777_v39 = vpack.c.bf16 %v3753_v27, %v3752_v24  ;;  %v2860_v10 = vld [vmem:[#allocation2 + $0xf1] sm:$0xff] }
 0x1e6   : > { %2511 = vst.msk [vmem:[#allocation4 + $0x188] sm:$0xff] %vm2503_vm4, %v2470_v36  ;;  %2922 = vrot.lane.b32.xlu0 %v11608_v8, %s10328_s29  ;;  %v3312_v3 = vld [vmem:[#allocation2 + $0x138] sm:$0xff]  ;;  %v3313_v5 = vld [vmem:[#allocation2 + $0x140] sm:$0xff] }
 0x1e7   : > { %2344 = vrot.lane.b32.xlu1 %v11608_v8, %s10330_s15  ;;  %v3186_v61 = vld [vmem:[#allocation2 + $0x13c] sm:$0xff]  ;;  %v11631_v52 = vpack.c.bf16 %v3313_v5, %v3312_v3  ;;  %4951 = vst.msk [vmem:[#allocation4 + $0x298] sm:$0xff] %vm385_vm1, %v11650_v34  ;;  %v4461_v3 = vld [vmem:[#allocation2 + $0x128] sm:$0xff] }
 0x1e8   : > { %v3940_v44 = vpop.permute.xlu0 %3939  ;;  %v11633_v11 = vpack.c.bf16 %v3187_v9, %v3186_v61  ;;  %v3122_v5 = vld [vmem:[#allocation2 + $0x13b] sm:$0xff]  ;;  %v3123_v61 = vld [vmem:[#allocation2 + $0x143] sm:$0xff] }
 0x1e9   : > { %3983 = vst.msk [vmem:[#allocation4 + $0xf8] sm:$0xff] %vm2632_vm5, %v3940_v44  ;;  %v2599_v47 = vpop.permute.xlu1 %2598  ;;  %v11663_v44 = vpack.c.bf16 %v2733_v38, %v2732_v12  ;;  %v11679_v16 = vpack.c.bf16 %v3123_v61, %v3122_v5  ;;  %v4909_v12 = vld [vmem:[#allocation2 + $0x12c] sm:$0xff]  ;;  %v2869_v61 = vld [vmem:[#allocation2 + $0x159] sm:$0xff] }
 0x1ea   : > { %2640 = vst.msk [vmem:[#allocation4 + $0x188] sm:$0xff] %vm2632_vm5, %v2599_v47  ;;  %3050 = vrot.lane.b32.xlu0 %v3010_v40, %s10329_s13  ;;  %v2861_v47 = vld [vmem:[#allocation2 + $0xf9] sm:$0xff]  ;;  %v2868_v5 = vld [vmem:[#allocation2 + $0x151] sm:$0xff] }
 0x1eb   : > { %2473 = vrot.lane.b32.xlu1 %v3010_v40, %s10328_s29  ;;  %2710 = vst.msk [vmem:[#allocation4 + $0x2e0] sm:$0xff] %vm385_vm1, %v11633_v11  ;;  %2259 = vst.msk [vmem:[#allocation4 + $0x2d8] sm:$0xff] %vm385_vm1, %v11631_v52 }
 0x1ec   : > { %v3685_v55 = vpop.permute.xlu0 %3684  ;;  %3158 = vst.msk [vmem:[#allocation4 + $0x2b0] sm:$0xff] %vm385_vm1, %v11679_v16 }
 0x1ed   : > { %3727 = vst.msk [vmem:[#allocation4 + $0x130] sm:$0xff] %vm2374_vm3, %v3685_v55  ;;  %v3365_v62 = vpop.permute.xlu1 %3364  ;;  %v2989_v55 = vld [vmem:[#allocation2 + $0xfa] sm:$0xff] }
 0x1ee   : > { %3407 = vst.msk [vmem:[#allocation4 + $0x128] sm:$0xff] %vm2503_vm4, %v3365_v62  ;;  %3943 = vrot.lane.b32.xlu0 %v11597_v37, %s10329_s13  ;;  %v4014_v62 = vld [vmem:[#allocation2 + $0x129] sm:$0xff] }
 0x1ef   : > { %2602 = vrot.lane.b32.xlu1 %v2561_v57, %s10329_s13  ;;  %v4036_v9 = vpack.c.bf16 %v4014_v62, %v4013_v26  ;;  %v2741_v26 = vld [vmem:[#allocation2 + $0x158] sm:$0xff] }
 0x1f0   : > { %v3813_v18 = vpop.permute.xlu0 %3812 }
 0x1f1   : > { %3855 = vst.msk [vmem:[#allocation4 + $0x130] sm:$0xff] %vm2503_vm4, %v3813_v18  ;;  %v3493_v22 = vpop.permute.xlu1 %3492  ;;  %v3011_v18 = vpack.c.bf16 %v2989_v55, %v2988_v54  ;;  %v2740_v55 = vld [vmem:[#allocation2 + $0x150] sm:$0xff] }
 0x1f2   : > { %3535 = vst.msk [vmem:[#allocation4 + $0x128] sm:$0xff] %vm2632_vm5, %v3493_v22  ;;  %3688 = vrot.lane.b32.xlu0 %v2561_v57, %s10330_s15  ;;  %v4460_v57 = vld [vmem:[#allocation2 + $0x120] sm:$0xff] }
 0x1f3   : > { %3368 = vrot.lane.b32.xlu1 %v11597_v37, %s10328_s29  ;;  %v4487_v37 = vpack.c.bf16 %v4467_v31, %v4466_v41  ;;  %v4484_v13 = vpack.c.bf16 %v4461_v3, %v4460_v57  ;;  %4052 = vst.msk [vmem:[#allocation4 + $0x218] sm:$0xff] %vm385_vm1, %v4036_v9  ;;  %v2541_v22 = vld [vmem:[#allocation2 + $0xfb] sm:$0xff]  ;;  %v11705_v57 = vpack.c.bf16 %v2741_v26, %v2740_v55 }
 0x1f4   : > { %v2785_v33 = vpop.permute.xlu0 %2784 }
 0x1f5   : > { %2829 = vst.msk [vmem:[#allocation4 + $0xb0] sm:$0xff] %vm2374_vm3, %v2785_v33  ;;  %v3239_v36 = vpop.permute.xlu1 %3238  ;;  %v2562_v33 = vpack.c.bf16 %v2541_v22, %v2540_v35  ;;  %v3574_v35 = vld [vmem:[#allocation2 + $0x182] sm:$0xff]  ;;  %v3575_v22 = vld [vmem:[#allocation2 + $0x18a] sm:$0xff] }
 0x1f6   : > { %3280 = vst.msk [vmem:[#allocation4 + $0x160] sm:$0xff] %vm2374_vm3, %v3239_v36  ;;  %3816 = vrot.lane.b32.xlu0 %v3777_v39, %s10328_s29  ;;  %v4908_v36 = vld [vmem:[#allocation2 + $0x124] sm:$0xff] }
 0x1f7   : > { %3496 = vrot.lane.b32.xlu1 %v11608_v8, %s10329_s13  ;;  %4503 = vst.msk [vmem:[#allocation4 + $0x290] sm:$0xff] %vm385_vm1, %v4487_v37  ;;  %v11671_v8 = vpack.c.bf16 %v2861_v47, %v2860_v10  ;;  %4500 = vst.msk [vmem:[#allocation4 + $0x1e8] sm:$0xff] %vm385_vm1, %v4484_v13  ;;  %v4932_v38 = vpack.c.bf16 %v4909_v12, %v4908_v36  ;;  %v3755_v10 = vld [vmem:[#allocation2 + $0xfc] sm:$0xff]  ;;  %v2996_v13 = vld [vmem:[#allocation2 + $0x152] sm:$0xff] }
 0x1f8   : > { %v2913_v25 = vpop.permute.xlu0 %2912  ;;  %v4214_v36 = vld [vmem:[#allocation2 + $0x18b] sm:$0xff] }
 0x1f9   : > { %2957 = vst.msk [vmem:[#allocation4 + $0xb0] sm:$0xff] %vm2503_vm4, %v2913_v25  ;;  %v2335_v40 = vpop.permute.xlu1 %2334  ;;  %v4965_v25 = vld [vmem:[#allocation4 + $0x48] sm:$0xff] }
 0x1fa   : > { %2379 = vst.msk [vmem:[#allocation4 + $0xe0] sm:$0xff] %vm2374_vm3, %v2335_v40  ;;  %2796 = vrot.lane.b32.xlu0 %v11663_v44, %s10330_s15  ;;  %v3754_v40 = vld [vmem:[#allocation2 + $0xf4] sm:$0xff] }
 0x1fb   : > { %3242 = vrot.lane.b32.xlu1 %v3777_v39, %s10330_s15  ;;  %v4977_v39 = vld [vmem:[#allocation4 + $0xa8] sm:$0xff]  ;;  %4948 = vst.msk [vmem:[#allocation4 + $0x1f0] sm:$0xff] %vm385_vm1, %v4932_v38 }
 0x1fc   : > { %v3041_v48 = vpop.permute.xlu0 %3040 }
 0x1fd   : > { %3085 = vst.msk [vmem:[#allocation4 + $0xb0] sm:$0xff] %vm2632_vm5, %v3041_v48  ;;  %v2464_v60 = vpop.permute.xlu1 %2463  ;;  %v3778_v48 = vpack.c.bf16 %v3755_v10, %v3754_v40 }
 0x1fe   : > { %2508 = vst.msk [vmem:[#allocation4 + $0xe0] sm:$0xff] %vm2503_vm4, %v2464_v60  ;;  %2924 = vrot.lane.b32.xlu0 %v11671_v8, %s10328_s29 }
 0x1ff   : > { %2346 = vrot.lane.b32.xlu1 %v11671_v8, %s10330_s15 }
 0x200   : > { %v3934_v17 = vpop.permute.xlu0 %3933 }
 0x201   : > { %3980 = vst.msk [vmem:[#allocation4 + $0x50] sm:$0xff] %vm2632_vm5, %v3934_v17  ;;  %v2593_v20 = vpop.permute.xlu1 %2592  ;;  %v9880_v60 = vpop.f32.mrb[56].mxu1 }
 0x202   : > { %2637 = vst.msk [vmem:[#allocation4 + $0xe0] sm:$0xff] %vm2632_vm5, %v2593_v20  ;;  %3052 = vrot.lane.b32.xlu0 %v3011_v18, %s10329_s13  ;;  %v2102_v3 = vpop.f32.mrb[57].mxu1  ;;  %v11712_v20 = vpack.c.bf16 %v2869_v61, %v2868_v5 }
 0x203   : > { %2475 = vrot.lane.b32.xlu1 %v3011_v18, %s10328_s29  ;;  %v9881_v9 = vpop.f32.mrb[58].mxu1 }
 0x204   : > { %v3679_v24 = vpop.permute.xlu0 %3678  ;;  %v4978_v27 = vld [vmem:[#allocation4 + $0xb0] sm:$0xff]  ;;  %v2105_v17 = vpop.f32.mrb[59].mxu1  ;;  %v2114_v55 = vadd.f32 %v11530_v45, %v9881_v9 }
 0x205   : > { %3724 = vst.msk [vmem:[#allocation4 + $0x88] sm:$0xff] %vm2374_vm3, %v3679_v24  ;;  %v3359_v32 = vpop.permute.xlu1 %3358  ;;  %5579 = vmatprep.mubr.bf16.mxu0 %v4978_v27  ;;  %v4532_v24 = vld [vmem:[#allocation2 + $0x181] sm:$0xff] }
 0x206   : > { %3404 = vst.msk [vmem:[#allocation4 + $0x80] sm:$0xff] %vm2503_vm4, %v3359_v32  ;;  %3945 = vrot.lane.b32.xlu0 %v11663_v44, %s10329_s13  ;;  %5580 = vmatmul.mubr.bf16.gmra.mrb[76].mxu0 %v4977_v39  ;;  %v11715_v32 = vpack.c.bf16 %v3575_v22, %v3574_v35  ;;  %v4213_v39 = vld [vmem:[#allocation2 + $0x183] sm:$0xff] }
 0x207   : > { %2604 = vrot.lane.b32.xlu1 %v2562_v33, %s10329_s13  ;;  %v11722_v38 = vpack.c.bf16 %v4214_v36, %v4213_v39  ;;  %v4468_v39 = vld [vmem:[#allocation2 + $0x180] sm:$0xff]  ;;  %v4469_v36 = vld [vmem:[#allocation2 + $0x188] sm:$0xff] }
 0x208   : > { %v3807_v41 = vpop.permute.xlu0 %3806  ;;  %v4966_v31 = vld [vmem:[#allocation4 + $0x50] sm:$0xff]  ;;  %3608 = vst.msk [vmem:[#allocation4 + $0x328] sm:$0xff] %vm385_vm1, %v11715_v32 }
 0x209   : > { %3852 = vst.msk [vmem:[#allocation4 + $0x88] sm:$0xff] %vm2503_vm4, %v3807_v41  ;;  %v3487_v37 = vpop.permute.xlu1 %3486  ;;  %5724 = vmatprep.mubr.bf16.mxu1 %v4966_v31  ;;  %v4341_v41 = vld [vmem:[#allocation2 + $0x184] sm:$0xff]  ;;  %v4342_v31 = vld [vmem:[#allocation2 + $0x18c] sm:$0xff] }
 0x20a   : > { %3532 = vst.msk [vmem:[#allocation4 + $0x80] sm:$0xff] %vm2632_vm5, %v3487_v37  ;;  %3690 = vrot.lane.b32.xlu0 %v2562_v33, %s10330_s15  ;;  %5725 = vmatmul.mubr.bf16.gmra.mrb[68].mxu1 %v4965_v25  ;;  %v4533_v33 = vld [vmem:[#allocation2 + $0x189] sm:$0xff]  ;;  %v2111_v37 = vadd.f32 %v11530_v45, %v9880_v60  ;;  %v11729_v25 = vpack.c.bf16 %v4342_v31, %v4341_v41  ;;  %v3568_v31 = vld [vmem:[#allocation2 + $0x13a] sm:$0xff] }
 0x20b   : > { %3370 = vrot.lane.b32.xlu1 %v11663_v44, %s10328_s29  ;;  %v11720_v12 = vpack.c.bf16 %v4533_v33, %v4532_v24  ;;  %3161 = vst.msk [vmem:[#allocation4 + $0x358] sm:$0xff] %vm385_vm1, %v11722_v38 }
 0x20c   : > { %v4573_v47 = vpop.permute.xlu0 %4572  ;;  %4952 = vst.msk [vmem:[#allocation4 + $0x2d0] sm:$0xff] %vm385_vm1, %v11729_v25 }
 0x20d   : > { %4620 = vst.msk [vmem:[#allocation4 + $0x28] sm:$0xff] %vm2374_vm3, %v4573_v47  ;;  %v3233_v54 = vpop.permute.xlu1 %3232  ;;  %v2103_v47 = vadd.f32 %v11530_v45, %v2102_v3  ;;  %v2549_v3 = vld [vmem:[#allocation2 + $0x15b] sm:$0xff] }
 0x20e   : > { %3277 = vst.msk [vmem:[#allocation4 + $0xb8] sm:$0xff] %vm2374_vm3, %v3233_v54  ;;  %3818 = vrot.lane.b32.xlu0 %v3778_v48, %s10328_s29 }
 0x20f   : > { %3498 = vrot.lane.b32.xlu1 %v11671_v8, %s10329_s13  ;;  %v2997_v8 = vld [vmem:[#allocation2 + $0x15a] sm:$0xff]  ;;  %4056 = vst.msk [vmem:[#allocation4 + $0x2f8] sm:$0xff] %vm385_vm1, %v11720_v12 }
 0x210   : > { %v4701_v62 = vpop.permute.xlu0 %4700  ;;  %v3015_v10 = vpack.c.bf16 %v2997_v8, %v2996_v13 }
 0x211   : > { %4748 = vst.msk [vmem:[#allocation4 + $0x28] sm:$0xff] %vm2503_vm4, %v4701_v62  ;;  %v4126_v44 = vpop.permute.xlu1 %4125  ;;  %v2548_v62 = vld [vmem:[#allocation2 + $0x153] sm:$0xff] }
 0x212   : > { %4172 = vst.msk [vmem:[#allocation4 + $0x58] sm:$0xff] %vm2374_vm3, %v4126_v44  ;;  %2804 = vrot.lane.b32.xlu0 %v11705_v57, %s10330_s15  ;;  %v2106_v44 = vadd.f32 %v11530_v45, %v2105_v17 }
 0x213   : > { %3244 = vrot.lane.b32.xlu1 %v3778_v48, %s10330_s15 }
 0x214   : > { %v4829_v18 = vpop.permute.xlu0 %4828  ;;  %v9884_v48 = vpop.f32.mrb[60].mxu1 }
 0x215   : > { %4876 = vst.msk [vmem:[#allocation4 + $0x28] sm:$0xff] %vm2632_vm5, %v4829_v18  ;;  %v4254_v27 = vpop.permute.xlu1 %4253  ;;  %v2127_v26 = vadd.f32 %v11530_v45, %v9884_v48  ;;  %v2118_v60 = vpop.f32.mrb[61].mxu1 }
 0x216   : > { %4300 = vst.msk [vmem:[#allocation4 + $0x58] sm:$0xff] %vm2503_vm4, %v4254_v27  ;;  %2932 = vrot.lane.b32.xlu0 %v11712_v20, %s10328_s29  ;;  %v2119_v5 = vadd.f32 %v11530_v45, %v2118_v60  ;;  %v9885_v61 = vpop.f32.mrb[62].mxu1  ;;  %v2566_v27 = vpack.c.bf16 %v2549_v3, %v2548_v62  ;;  %v2734_v60 = vld [vmem:[#allocation2 + $0x108] sm:$0xff]  ;;  %v2735_v62 = vld [vmem:[#allocation2 + $0x110] sm:$0xff] }
 0x217   : > { %2354 = vrot.lane.b32.xlu1 %v11712_v20, %s10330_s15  ;;  %v2147_v9 = vmax.f32 %v2111_v37, %v2127_v26  ;;  %v2130_v13 = vadd.f32 %v11530_v45, %v9885_v61  ;;  %v2121_v8 = vpop.f32.mrb[63].mxu1  ;;  %v3569_v37 = vld [vmem:[#allocation2 + $0x142] sm:$0xff] }
 0x218   : > { %v2793_v40 = vpop.permute.xlu0 %2792  ;;  %v2145_v35 = vmax.f32 %v2103_v47, %v2119_v5  ;;  %v2122_v22 = vadd.f32 %v11530_v45, %v2121_v8  ;;  %v4488_v45 = vpack.c.bf16 %v4469_v36, %v4468_v39  ;;  %v3763_v47 = vld [vmem:[#allocation2 + $0x15c] sm:$0xff]  ;;  %v11758_v48 = vpack.c.bf16 %v3569_v37, %v3568_v31  ;;  %v2284_v3 = vld [vmem:[#allocation2 + $0x109] sm:$0xff]  ;;  %v2414_v8 = vld [vmem:[#allocation2 + $0x112] sm:$0xff] }
 0x219   : > { %2833 = vst.msk [vmem:[#allocation4 + $0x190] sm:$0xff] %vm2374_vm3, %v2793_v40  ;;  %v4382_v54 = vpop.permute.xlu1 %4381  ;;  %v2148_v17 = vmax.f32 %v2114_v55, %v2130_v13  ;;  %v2756_v5 = vpack.c.bf16 %v2735_v62, %v2734_v60  ;;  %v2413_v13 = vld [vmem:[#allocation2 + $0x10a] sm:$0xff]  ;;  %v2543_v37 = vld [vmem:[#allocation2 + $0x113] sm:$0xff] }
 0x21a   : > { %4428 = vst.msk [vmem:[#allocation4 + $0x58] sm:$0xff] %vm2632_vm5, %v4382_v54  ;;  %3060 = vrot.lane.b32.xlu0 %v3015_v10, %s10329_s13  ;;  %v2146_v33 = vmax.f32 %v2106_v44, %v2122_v22  ;;  %v2285_v44 = vld [vmem:[#allocation2 + $0x111] sm:$0xff] }
 0x21b   : > { %2483 = vrot.lane.b32.xlu1 %v3015_v10, %s10328_s29  ;;  %2163 = vst.msk [vmem:[#allocation5 + $0x70] sm:$0xff] %vm385_vm1, %v2147_v9  ;;  %2161 = vst.msk [vmem:[#allocation5 + $0x60] sm:$0xff] %vm385_vm1, %v2145_v35  ;;  %v3762_v10 = vld [vmem:[#allocation2 + $0x154] sm:$0xff]  ;;  %v2305_v9 = vpack.c.bf16 %v2285_v44, %v2284_v3  ;;  %v4016_v35 = vld [vmem:[#allocation2 + $0x141] sm:$0xff] }
 0x21c   : > { %v2921_v18 = vpop.permute.xlu0 %2920  ;;  %2164 = vst.msk [vmem:[#allocation5 + $0x78] sm:$0xff] %vm385_vm1, %v2148_v17  ;;  %2162 = vst.msk [vmem:[#allocation5 + $0x68] sm:$0xff] %vm385_vm1, %v2146_v33  ;;  %v3782_v55 = vpack.c.bf16 %v3763_v47, %v3762_v10  ;;  %v4462_v22 = vld [vmem:[#allocation2 + $0x138] sm:$0xff]  ;;  %v4911_v17 = vld [vmem:[#allocation2 + $0x144] sm:$0xff] }
 0x21d   : > { %2961 = vst.msk [vmem:[#allocation4 + $0x190] sm:$0xff] %vm2503_vm4, %v2921_v18  ;;  %v2343_v24 = vpop.permute.xlu1 %2342  ;;  %v4015_v18 = vld [vmem:[#allocation2 + $0x139] sm:$0xff]  ;;  %v2542_v31 = vld [vmem:[#allocation2 + $0x10b] sm:$0xff] }
 0x21e   : > { %2383 = vst.msk [vmem:[#allocation4 + $0x1c0] sm:$0xff] %vm2374_vm3, %v2343_v24  ;;  %3953 = vrot.lane.b32.xlu0 %v11705_v57, %s10329_s13  ;;  %v4037_v24 = vpack.c.bf16 %v4016_v35, %v4015_v18  ;;  %v2563_v47 = vpack.c.bf16 %v2543_v37, %v2542_v31  ;;  %v4992_v31 = vld [vmem:[#allocation4 + $0x120] sm:$0xff]  ;;  %v2421_v37 = vld [vmem:[#allocation2 + $0x16a] sm:$0xff] }
 0x21f   : > { %2612 = vrot.lane.b32.xlu1 %v2566_v27, %s10329_s13  ;;  %4504 = vst.msk [vmem:[#allocation4 + $0x2c8] sm:$0xff] %vm385_vm1, %v4488_v45  ;;  %3605 = vst.msk [vmem:[#allocation4 + $0x280] sm:$0xff] %vm385_vm1, %v11758_v48 }
 0x220   : > { %v3049_v41 = vpop.permute.xlu0 %3048  ;;  %4053 = vst.msk [vmem:[#allocation4 + $0x250] sm:$0xff] %vm385_vm1, %v4037_v24  ;;  %v2742_v24 = vld [vmem:[#allocation2 + $0x168] sm:$0xff] }
 0x221   : > { %3089 = vst.msk [vmem:[#allocation4 + $0x190] sm:$0xff] %vm2632_vm5, %v3049_v41  ;;  %v2472_v40 = vpop.permute.xlu1 %2471  ;;  %v2434_v41 = vpack.c.bf16 %v2414_v8, %v2413_v13 }
 0x222   : > { %2512 = vst.msk [vmem:[#allocation4 + $0x1c0] sm:$0xff] %vm2503_vm4, %v2472_v40  ;;  %3698 = vrot.lane.b32.xlu0 %v2566_v27, %s10330_s15  ;;  %v4463_v27 = vld [vmem:[#allocation2 + $0x140] sm:$0xff] }
 0x223   : > { %3378 = vrot.lane.b32.xlu1 %v11705_v57, %s10328_s29  ;;  %v4485_v39 = vpack.c.bf16 %v4463_v27, %v4462_v22  ;;  %v2171_v60 = vld [vmem:[#allocation5 + $0x60] ss:$2 sm:$0xff]  ;;  %v2172_v62 = vld [vmem:[#allocation5 + $0x70] ss:$2 sm:$0xff]  ;;  %v2179_v3 = vld [vmem:[#allocation5 + $0x61] ss:$2 sm:$0xff] }
 0x224   : > { %v3942_v54 = vpop.permute.xlu0 %3941  ;;  %v2180_v13 = vld [vmem:[#allocation5 + $0x71] ss:$2 sm:$0xff]  ;;  %v2187_v8 = vmax.f32 %v2171_v60, %v2179_v3 }
 0x225   : > { %3984 = vst.msk [vmem:[#allocation4 + $0x130] sm:$0xff] %vm2632_vm5, %v3942_v54  ;;  %v2601_v26 = vpop.permute.xlu1 %2600  ;;  %v2188_v18 = vmax.f32 %v2172_v62, %v2180_v13  ;;  %v2743_v27 = vld [vmem:[#allocation2 + $0x170] sm:$0xff]  ;;  %v2286_v13 = vld [vmem:[#allocation2 + $0x121] sm:$0xff] }
 0x226   : > { %2641 = vst.msk [vmem:[#allocation4 + $0x1c0] sm:$0xff] %vm2632_vm5, %v2601_v26  ;;  %3826 = vrot.lane.b32.xlu0 %v3782_v55, %s10328_s29  ;;  %v2550_v60 = vld [vmem:[#allocation2 + $0x16b] sm:$0xff]  ;;  %v2551_v62 = vld [vmem:[#allocation2 + $0x173] sm:$0xff] }
 0x227   : > { %3506 = vrot.lane.b32.xlu1 %v11712_v20, %s10329_s13  ;;  %v4910_v20 = vld [vmem:[#allocation2 + $0x13c] sm:$0xff]  ;;  %4501 = vst.msk [vmem:[#allocation4 + $0x220] sm:$0xff] %vm385_vm1, %v4485_v39  ;;  %2196 = vst.msk [vmem:[#allocation2 + $0x19a] sm:$0xff] %vm385_vm1, %v2187_v8  ;;  %v11801_v39 = vpack.c.bf16 %v2743_v27, %v2742_v24  ;;  %v2287_v8 = vld [vmem:[#allocation2 + $0x129] sm:$0xff] }
 0x228   : > { %v3687_v57 = vpop.permute.xlu0 %3686  ;;  %v4933_v36 = vpack.c.bf16 %v4911_v17, %v4910_v20  ;;  %2197 = vst.msk [vmem:[#allocation2 + $0x1a2] sm:$0xff] %vm385_vm1, %v2188_v18  ;;  %v2292_v20 = vld [vmem:[#allocation2 + $0x169] sm:$0xff]  ;;  %v2293_v17 = vld [vmem:[#allocation2 + $0x171] sm:$0xff]  ;;  %v2736_v24 = vld [vmem:[#allocation2 + $0x120] sm:$0xff] }
 0x229   : > { %3728 = vst.msk [vmem:[#allocation4 + $0x168] sm:$0xff] %vm2374_vm3, %v3687_v57  ;;  %v3367_v61 = vpop.permute.xlu1 %3366  ;;  %v3756_v57 = vld [vmem:[#allocation2 + $0x10c] sm:$0xff] }
 0x22a   : > { %3408 = vst.msk [vmem:[#allocation4 + $0x160] sm:$0xff] %vm2503_vm4, %v3367_v61  ;;  %2798 = vrot.lane.b32.xlu0 %v2756_v5, %s10330_s15  ;;  %v3757_v61 = vld [vmem:[#allocation2 + $0x114] sm:$0xff]  ;;  %v2737_v27 = vld [vmem:[#allocation2 + $0x128] sm:$0xff] }
 0x22b   : > { %2348 = vrot.lane.b32.xlu1 %v2305_v9, %s10330_s15  ;;  %4949 = vst.msk [vmem:[#allocation4 + $0x228] sm:$0xff] %vm385_vm1, %v4933_v36  ;;  %v3779_v35 = vpack.c.bf16 %v3757_v61, %v3756_v57  ;;  %v11819_v57 = vpack.c.bf16 %v2551_v62, %v2550_v60  ;;  %v10123_v60 = vld [vmem:[%s13457_s3 + $0x140] sm:$0xff]  }
 0x22c   : > { %v3815_v33 = vpop.permute.xlu0 %3814  ;;  %v10124_v62 = vld [vmem:[%s13457_s3 + $0x100] sm:$0xff]   ;;  %9369 = vmatprep.subr.bf16.mxu0 %v10123_v60  ;;  %9946 = vmatprep.subr.bf16.mxu1 %v10123_v60  ;;  %v10125_v60 = vld [vmem:[%s13457_s3 + $0x148] sm:$0xff]  }
 0x22d   : > { %3856 = vst.msk [vmem:[#allocation4 + $0x168] sm:$0xff] %vm2503_vm4, %v3815_v33  ;;  %v3495_v45 = vpop.permute.xlu1 %3494  ;;  %9370 = vmatpush3.bf16.msra.mxu0 %v10124_v62  ;;  %9954 = vmatpush3.bf16.msra.mxu1 %v10124_v62  ;;  %v10126_v62 = vld [vmem:[%s13457_s3 + $0x108] sm:$0xff]  }
 0x22e   : > { %3536 = vst.msk [vmem:[#allocation4 + $0x160] sm:$0xff] %vm2632_vm5, %v3495_v45  ;;  %2926 = vrot.lane.b32.xlu0 %v2305_v9, %s10328_s29  ;;  %v11804_v45 = vpack.c.bf16 %v2293_v17, %v2292_v20  ;;  %v2415_v20 = vld [vmem:[#allocation2 + $0x122] sm:$0xff]  ;;  %v2416_v17 = vld [vmem:[#allocation2 + $0x12a] sm:$0xff]  ;;  %9371 = vmatprep.subr.bf16.mxu0 %v10125_v60 }
 0x22f   : > { %2477 = vrot.lane.b32.xlu1 %v2434_v41, %s10328_s29  ;;  %9947 = vmatprep.subr.bf16.mxu1 %v10125_v60 }
 0x230   : > { %v2787_v40 = vpop.permute.xlu0 %2786 }
 0x231   : > { %2830 = vst.msk [vmem:[#allocation4 + $0xe8] sm:$0xff] %vm2374_vm3, %v2787_v40  ;;  %v3241_v10 = vpop.permute.xlu1 %3240  ;;  %v2422_v40 = vld [vmem:[#allocation2 + $0x172] sm:$0xff]  ;;  %9372 = vmatpush3.bf16.msra.mxu0 %v10126_v62  ;;  %9955 = vmatpush3.bf16.msra.mxu1 %v10126_v62 }
 0x232   : > { %3281 = vst.msk [vmem:[#allocation4 + $0x198] sm:$0xff] %vm2374_vm3, %v3241_v10  ;;  %3054 = vrot.lane.b32.xlu0 %v2434_v41, %s10329_s13  ;;  %v4984_v41 = vld [vmem:[#allocation4 + $0xe0] sm:$0xff] }
 0x233   : > { %2606 = vrot.lane.b32.xlu1 %v2563_v47, %s10329_s13 }
 0x234   : > { %v2915_v54 = vpop.permute.xlu0 %2914 }
 0x235   : > { %2958 = vst.msk [vmem:[#allocation4 + $0xe8] sm:$0xff] %vm2503_vm4, %v2915_v54  ;;  %v2337_v55 = vpop.permute.xlu1 %2336 }
 0x236   : > { %2380 = vst.msk [vmem:[#allocation4 + $0x118] sm:$0xff] %vm2374_vm3, %v2337_v55  ;;  %3947 = vrot.lane.b32.xlu0 %v2756_v5, %s10329_s13  ;;  %v2438_v55 = vpack.c.bf16 %v2422_v40, %v2421_v37  ;;  %v5006_v37 = vld [vmem:[#allocation4 + $0x190] sm:$0xff]  ;;  %v2544_v40 = vld [vmem:[#allocation2 + $0x123] sm:$0xff] }
 0x237   : > { %3372 = vrot.lane.b32.xlu1 %v2756_v5, %s10328_s29 }
 0x238   : > { %v3043_v26 = vpop.permute.xlu0 %3042 }
 0x239   : > { %3086 = vst.msk [vmem:[#allocation4 + $0xe8] sm:$0xff] %vm2632_vm5, %v3043_v26  ;;  %v2466_v44 = vpop.permute.xlu1 %2465  ;;  %v4972_v26 = vld [vmem:[#allocation4 + $0x80] sm:$0xff] }
 0x23a   : > { %2509 = vst.msk [vmem:[#allocation4 + $0x118] sm:$0xff] %vm2503_vm4, %v2466_v44  ;;  %3692 = vrot.lane.b32.xlu0 %v2563_v47, %s10330_s15 }
 0x23b   : > { %3500 = vrot.lane.b32.xlu1 %v2305_v9, %s10329_s13 }
 0x23c   : > { %v3936_v5 = vpop.permute.xlu0 %3935 }
 0x23d   : > { %3981 = vst.msk [vmem:[#allocation4 + $0x88] sm:$0xff] %vm2632_vm5, %v3936_v5  ;;  %v2595_v22 = vpop.permute.xlu1 %2594 }
 0x23e   : > { %2638 = vst.msk [vmem:[#allocation4 + $0x118] sm:$0xff] %vm2632_vm5, %v2595_v22  ;;  %3820 = vrot.lane.b32.xlu0 %v3779_v35, %s10328_s29 }
 0x23f   : > { %3246 = vrot.lane.b32.xlu1 %v3779_v35, %s10330_s15  ;;  %v2306_v35 = vpack.c.bf16 %v2287_v8, %v2286_v13 }
 0x240   : > { %v3681_v9 = vpop.permute.xlu0 %3680  ;;  %v4985_v33 = vld [vmem:[#allocation4 + $0xe8] sm:$0xff] }
 0x241   : > { %3725 = vst.msk [vmem:[#allocation4 + $0xc0] sm:$0xff] %vm2374_vm3, %v3681_v9  ;;  %v3361_v36 = vpop.permute.xlu1 %3360  ;;  %5587 = vmatprep.mubr.bf16.mxu0 %v4985_v33  ;;  %v2757_v33 = vpack.c.bf16 %v2737_v27, %v2736_v24  ;;  %v2288_v27 = vld [vmem:[#allocation2 + $0x139] sm:$0xff] }
 0x242   : > { %3405 = vst.msk [vmem:[#allocation4 + $0xb8] sm:$0xff] %vm2503_vm4, %v3361_v36  ;;  %2806 = vrot.lane.b32.xlu0 %v11801_v39, %s10330_s15  ;;  %5588 = vmatmul.mubr.bf16.gmra.mrb[80].mxu0 %v4984_v41  ;;  %v2435_v41 = vpack.c.bf16 %v2416_v17, %v2415_v20 }
 0x243   : > { %2356 = vrot.lane.b32.xlu1 %v11804_v45, %s10330_s15  ;;  %5595 = vmatprep.mubr.bf16.mxu0 %v4992_v31  ;;  %v4998_v31 = vld [vmem:[#allocation4 + $0x150] sm:$0xff] }
 0x244   : > { %v3809_v10 = vpop.permute.xlu0 %3808  ;;  %v4973_v47 = vld [vmem:[#allocation4 + $0x88] sm:$0xff] }
 0x245   : > { %3853 = vst.msk [vmem:[#allocation4 + $0xc0] sm:$0xff] %vm2503_vm4, %v3809_v10  ;;  %v3489_v54 = vpop.permute.xlu1 %3488  ;;  %5732 = vmatprep.mubr.bf16.mxu1 %v4973_v47  ;;  %v4991_v61 = vld [vmem:[#allocation4 + $0x118] sm:$0xff]  ;;  %v2545_v10 = vld [vmem:[#allocation2 + $0x12b] sm:$0xff] }
 0x246   : > { %3982 = vst.msk [vmem:[#allocation4 + $0xc0] sm:$0xff] %vm2632_vm5, %v11426_v28  ;;  %3533 = vst.msk [vmem:[#allocation4 + $0xb8] sm:$0xff] %vm2632_vm5, %v3489_v54  ;;  %2934 = vrot.lane.b32.xlu0 %v11804_v45, %s10328_s29  ;;  %5733 = vmatmul.mubr.bf16.gmra.mrb[72].mxu1 %v4972_v26  ;;  %v4999_v28 = vld [vmem:[#allocation4 + $0x158] sm:$0xff] }
 0x247   : > { %2485 = vrot.lane.b32.xlu1 %v2438_v55, %s10328_s29 }
 0x248   : > { %v4575_v3 = vpop.permute.xlu0 %4574 }
 0x249   : > { %4621 = vst.msk [vmem:[#allocation4 + $0x60] sm:$0xff] %vm2374_vm3, %v4575_v3  ;;  %v3235_v44 = vpop.permute.xlu1 %3234  ;;  %v4994_v3 = vld [vmem:[#allocation4 + $0x130] sm:$0xff] }
 0x24a   : > { %3278 = vst.msk [vmem:[#allocation4 + $0xf0] sm:$0xff] %vm2374_vm3, %v3235_v44  ;;  %3062 = vrot.lane.b32.xlu0 %v2438_v55, %s10329_s13  ;;  %5596 = vmatmul.mubr.bf16.gmra.mrb[84].mxu0 %v4991_v61  ;;  %v2564_v55 = vpack.c.bf16 %v2545_v10, %v2544_v40  ;;  %v4088_v40 = vld [vmem:[#allocation2 + $0x1a2] sm:$0xff] }
 0x24b   : > { %3406 = vst.msk [vmem:[#allocation4 + $0xf0] sm:$0xff] %vm2503_vm4, %v11439_v1  ;;  %2614 = vrot.lane.b32.xlu1 %v11819_v57, %s10329_s13  ;;  %5603 = vmatprep.mubr.bf16.mxu0 %v4999_v28  ;;  %v5005_v28 = vld [vmem:[#allocation4 + $0x188] sm:$0xff] }
 0x24c   : > { %3534 = vst.msk [vmem:[#allocation4 + $0xf0] sm:$0xff] %vm2632_vm5, %v11456_v21  ;;  %v4703_v18 = vpop.permute.xlu0 %4702  ;;  %v4987_v21 = vld [vmem:[#allocation4 + $0xf8] sm:$0xff] }
 0x24d   : > { %4749 = vst.msk [vmem:[#allocation4 + $0x60] sm:$0xff] %vm2503_vm4, %v4703_v18  ;;  %v4128_v5 = vpop.permute.xlu1 %4127  ;;  %v4980_v22 = vld [vmem:[#allocation4 + $0xc0] sm:$0xff]  ;;  %v4979_v1 = vld [vmem:[#allocation4 + $0xb8] sm:$0xff]  ;;  %v4993_v18 = vld [vmem:[#allocation4 + $0x128] sm:$0xff] }
 0x24e   : > { %4173 = vst.msk [vmem:[#allocation4 + $0x90] sm:$0xff] %vm2374_vm3, %v4128_v5  ;;  %3955 = vrot.lane.b32.xlu0 %v11801_v39, %s10329_s13  ;;  %5740 = vmatprep.mubr.bf16.mxu1 %v4980_v22  ;;  %v3184_v5 = vld [vmem:[#allocation2 + $0x124] sm:$0xff]  ;;  %v3185_v22 = vld [vmem:[#allocation2 + $0x12c] sm:$0xff] }
 0x24f   : > { %2350 = vrot.lane.b32.xlu1 %v2306_v35, %s10330_s15  ;;  %5741 = vmatmul.mubr.bf16.gmra.mrb[76].mxu1 %v4979_v1  ;;  %v2289_v1 = vld [vmem:[#allocation2 + $0x141] sm:$0xff]  ;;  %v3205_v17 = vpack.c.bf16 %v3185_v22, %v3184_v5 }
 0x250   : > { %v4831_v9 = vpop.permute.xlu0 %4830  ;;  %5748 = vmatprep.mubr.bf16.mxu1 %v4987_v21  ;;  %v11860_v21 = vpack.c.bf16 %v2289_v1, %v2288_v27  ;;  %v5000_v22 = vld [vmem:[#allocation4 + $0x160] sm:$0xff]  ;;  %v2873_v27 = vld [vmem:[#allocation2 + $0x189] sm:$0xff] }
 0x251   : > { %4877 = vst.msk [vmem:[#allocation4 + $0x60] sm:$0xff] %vm2632_vm5, %v4831_v9  ;;  %v4256_v36 = vpop.permute.xlu1 %4255  ;;  %v2744_v9 = vld [vmem:[#allocation2 + $0x180] sm:$0xff] }
 0x252   : > { %4301 = vst.msk [vmem:[#allocation4 + $0x90] sm:$0xff] %vm2503_vm4, %v4256_v36  ;;  %2800 = vrot.lane.b32.xlu0 %v2757_v33, %s10330_s15  ;;  %5604 = vmatmul.mubr.bf16.gmra.mrb[88].mxu0 %v4998_v31  ;;  %v2417_v36 = vld [vmem:[#allocation2 + $0x13a] sm:$0xff] }
 0x253   : > { %2479 = vrot.lane.b32.xlu1 %v2435_v41, %s10328_s29  ;;  %5611 = vmatprep.mubr.bf16.mxu0 %v5006_v37  ;;  %v4986_v26 = vld [vmem:[#allocation4 + $0xf0] sm:$0xff]  ;;  %v4087_v37 = vld [vmem:[#allocation2 + $0x19a] sm:$0xff] }
 0x254   : > { %v2795_v47 = vpop.permute.xlu0 %2794 }
 0x255   : > { %2834 = vst.msk [vmem:[#allocation4 + $0x1c8] sm:$0xff] %vm2374_vm3, %v2795_v47  ;;  %v4384_v54 = vpop.permute.xlu1 %4383  ;;  %v5012_v47 = vld [vmem:[#allocation4 + $0x1c0] sm:$0xff] }
 0x256   : > { %4429 = vst.msk [vmem:[#allocation4 + $0x90] sm:$0xff] %vm2632_vm5, %v4384_v54  ;;  %2928 = vrot.lane.b32.xlu0 %v2306_v35, %s10328_s29  ;;  %v11863_v54 = vpack.c.bf16 %v4088_v40, %v4087_v37  ;;  %v4470_v37 = vld [vmem:[#allocation2 + $0x198] sm:$0xff]  ;;  %v4471_v40 = vld [vmem:[#allocation2 + $0x1a0] sm:$0xff] }
 0x257   : > { %2608 = vrot.lane.b32.xlu1 %v2564_v55, %s10329_s13  ;;  %5749 = vmatmul.mubr.bf16.gmra.mrb[80].mxu1 %v4986_v26  ;;  %v4535_v26 = vld [vmem:[#allocation2 + $0x1a1] sm:$0xff] }
 0x258   : > { %v2923_v44 = vpop.permute.xlu0 %2922  ;;  %5756 = vmatprep.mubr.bf16.mxu1 %v4994_v3  ;;  %3609 = vst.msk [vmem:[#allocation4 + $0x360] sm:$0xff] %vm385_vm1, %v11863_v54 }
 0x259   : > { %2962 = vst.msk [vmem:[#allocation4 + $0x1c8] sm:$0xff] %vm2503_vm4, %v2923_v44  ;;  %v2345_v61 = vpop.permute.xlu1 %2344 }
 0x25a   : > { %2384 = vst.msk [vmem:[#allocation4 + $0x1f8] sm:$0xff] %vm2374_vm3, %v2345_v61  ;;  %3056 = vrot.lane.b32.xlu0 %v2435_v41, %s10329_s13  ;;  %5612 = vmatmul.mubr.bf16.gmra.mrb[92].mxu0 %v5005_v28  ;;  %v4343_v61 = vld [vmem:[#allocation2 + $0x19c] sm:$0xff] }
 0x25b   : > { %3374 = vrot.lane.b32.xlu1 %v2757_v33, %s10328_s29 }
 0x25c   : > { %v3051_v13 = vpop.permute.xlu0 %3050 }
 0x25d   : > { %3090 = vst.msk [vmem:[#allocation4 + $0x1c8] sm:$0xff] %vm2632_vm5, %v3051_v13  ;;  %v2474_v8 = vpop.permute.xlu1 %2473 }
 0x25e   : > { %2513 = vst.msk [vmem:[#allocation4 + $0x1f8] sm:$0xff] %vm2503_vm4, %v2474_v8  ;;  %3949 = vrot.lane.b32.xlu0 %v2757_v33, %s10329_s13  ;;  %v2745_v33 = vld [vmem:[#allocation2 + $0x188] sm:$0xff] }
 0x25f   : > { %3502 = vrot.lane.b32.xlu1 %v2306_v35, %s10329_s13  ;;  %5757 = vmatmul.mubr.bf16.gmra.mrb[84].mxu1 %v4993_v18  ;;  %v2418_v35 = vld [vmem:[#allocation2 + $0x142] sm:$0xff]  ;;  %v11881_v8 = vpack.c.bf16 %v2745_v33, %v2744_v9 }
 0x260   : > { %v3944_v24 = vpop.permute.xlu0 %3943  ;;  %v11877_v44 = vpack.c.bf16 %v2418_v35, %v2417_v36  ;;  %v4344_v18 = vld [vmem:[#allocation2 + $0x1a4] sm:$0xff] }
 0x261   : > { %3985 = vst.msk [vmem:[#allocation4 + $0x168] sm:$0xff] %vm2632_vm5, %v3944_v24  ;;  %v2603_v20 = vpop.permute.xlu1 %2602  ;;  %v2872_v24 = vld [vmem:[#allocation2 + $0x181] sm:$0xff]  ;;  %v11886_v1 = vpack.c.bf16 %v4344_v18, %v4343_v61 }
 0x262   : > { %2642 = vst.msk [vmem:[#allocation4 + $0x1f8] sm:$0xff] %vm2632_vm5, %v2603_v20  ;;  %3694 = vrot.lane.b32.xlu0 %v2564_v55, %s10330_s15  ;;  %v4534_v55 = vld [vmem:[#allocation2 + $0x199] sm:$0xff]  ;;  %v11895_v33 = vpack.c.bf16 %v2873_v27, %v2872_v24  ;;  %v10127_v24 = vld [vmem:[%s13457_s3 + $0x150] sm:$0xff]  }
 0x263   : > { %3248 = vrot.lane.b32.xlu1 %v3205_v17, %s10330_s15  ;;  %v11873_v3 = vpack.c.bf16 %v4535_v26, %v4534_v55  ;;  %v2546_v20 = vld [vmem:[#allocation2 + $0x13b] sm:$0xff]  ;;  %4953 = vst.msk [vmem:[#allocation4 + $0x308] sm:$0xff] %vm385_vm1, %v11886_v1  ;;  %v10128_v27 = vld [vmem:[%s13457_s3 + $0x110] sm:$0xff]   ;;  %9373 = vmatprep.subr.bf16.mxu0 %v10127_v24 }
 0x264   : > { %v3689_v41 = vpop.permute.xlu0 %3688  ;;  %v5013_v31 = vld [vmem:[#allocation4 + $0x1c8] sm:$0xff]  ;;  %9948 = vmatprep.subr.bf16.mxu1 %v10127_v24  ;;  %9374 = vmatpush3.bf16.msra.mxu0 %v10128_v27 }
 0x265   : > { %3729 = vst.msk [vmem:[#allocation4 + $0x1a0] sm:$0xff] %vm2374_vm3, %v3689_v41  ;;  %v3369_v10 = vpop.permute.xlu1 %3368  ;;  %5619 = vmatprep.mubr.bf16.mxu0 %v5013_v31  ;;  %v3000_v41 = vld [vmem:[#allocation2 + $0x182] sm:$0xff]  ;;  %v3001_v31 = vld [vmem:[#allocation2 + $0x18a] sm:$0xff]  ;;  %9956 = vmatpush3.bf16.msra.mxu1 %v10128_v27  ;;  %v10129_v27 = vld [vmem:[%s13457_s3 + $0x158] sm:$0xff]  }
 0x266   : > { %3409 = vst.msk [vmem:[#allocation4 + $0x198] sm:$0xff] %vm2503_vm4, %v3369_v10  ;;  %3822 = vrot.lane.b32.xlu0 %v3205_v17, %s10328_s29  ;;  %5620 = vmatmul.mubr.bf16.gmra.mrb[96].mxu0 %v5012_v47  ;;  %v2547_v17 = vld [vmem:[#allocation2 + $0x143] sm:$0xff]  ;;  %v4489_v10 = vpack.c.bf16 %v4471_v40, %v4470_v37  ;;  %v3017_v55 = vpack.c.bf16 %v3001_v31, %v3000_v41 }
 0x267   : > { %2352 = vrot.lane.b32.xlu1 %v11860_v21, %s10330_s15  ;;  %4057 = vst.msk [vmem:[#allocation4 + $0x330] sm:$0xff] %vm385_vm1, %v11873_v3  ;;  %v11898_v35 = vpack.c.bf16 %v2547_v17, %v2546_v20  ;;  %9375 = vmatprep.subr.bf16.mxu0 %v10129_v27 }
 0x268   : > { %v3817_v28 = vpop.permute.xlu0 %3816  ;;  %v5001_v13 = vld [vmem:[#allocation4 + $0x168] sm:$0xff]  ;;  %4505 = vst.msk [vmem:[#allocation4 + $0x300] sm:$0xff] %vm385_vm1, %v4489_v10  ;;  %9949 = vmatprep.subr.bf16.mxu1 %v10129_v27  ;;  %v10138_v27 = vld [vmem:[%s13457_s3 + $0x138] sm:$0xff]  }
 0x269   : > { %3857 = vst.msk [vmem:[#allocation4 + $0x1a0] sm:$0xff] %vm2503_vm4, %v3817_v28  ;;  %v3497_v5 = vpop.permute.xlu1 %3496  ;;  %5764 = vmatprep.mubr.bf16.mxu1 %v5001_v13  ;;  %v5019_v10 = vld [vmem:[#allocation4 + $0x1f8] sm:$0xff] }
 0x26a   : > { %3537 = vst.msk [vmem:[#allocation4 + $0x198] sm:$0xff] %vm2632_vm5, %v3497_v5  ;;  %2808 = vrot.lane.b32.xlu0 %v11881_v8, %s10330_s15  ;;  %5765 = vmatmul.mubr.bf16.gmra.mrb[88].mxu1 %v5000_v22 }
 0x26b   : > { %2481 = vrot.lane.b32.xlu1 %v11877_v44, %s10328_s29 }
 0x26c   : > { %v2797_v9 = vpop.permute.xlu0 %2796 }
 0x26d   : > { %2835 = vst.msk [vmem:[#allocation4 + $0x200] sm:$0xff] %vm2374_vm3, %v2797_v9  ;;  %v3243_v36 = vpop.permute.xlu1 %3242  ;;  %v4065_v9 = vld [vmem:[#allocation2 + $0x92] sm:$0xff] }
 0x26e   : > { %3282 = vst.msk [vmem:[#allocation4 + $0x1d0] sm:$0xff] %vm2374_vm3, %v3243_v36  ;;  %2936 = vrot.lane.b32.xlu0 %v11895_v33, %s10328_s29  ;;  %v4066_v36 = vld [vmem:[#allocation2 + $0x9a] sm:$0xff] }
 0x26f   : > { %2610 = vrot.lane.b32.xlu1 %v11898_v35, %s10329_s13  ;;  %v4094_v40 = vpack.c.bf16 %v4066_v36, %v4065_v9  ;;  %v4514_v9 = vld [vmem:[#allocation2 + $0xa9] sm:$0xff]  ;;  %v4515_v36 = vld [vmem:[#allocation2 + $0xb1] sm:$0xff] }
 0x270   : > { %v2925_v47 = vpop.permute.xlu0 %2924 }
 0x271   : > { %2963 = vst.msk [vmem:[#allocation4 + $0x200] sm:$0xff] %vm2503_vm4, %v2925_v47  ;;  %v2347_v26 = vpop.permute.xlu1 %2346  ;;  %v9167_v60 = vpop.f32.mrb[68].mxu0  ;;  %v4194_v47 = vld [vmem:[#allocation2 + $0x9b] sm:$0xff] }
 0x272   : > { %2385 = vst.msk [vmem:[#allocation4 + $0x230] sm:$0xff] %vm2374_vm3, %v2347_v26  ;;  %v9168_v62 = vpop.f32.mrb[69].mxu0  ;;  %3064 = vrot.lane.b32.xlu0 %v3017_v55, %s10329_s13 }
 0x273   : > { %v11909_v61 = vadd.f32 %v9168_v62, %v9167_v60  ;;  %3376 = vrot.lane.b32.xlu1 %v11631_v52, %s10328_s29  ;;  %v9170_v28 = vpop.f32.mrb[70].mxu0 }
 0x274   : > { %v9171_v13 = vpop.f32.mrb[71].mxu0  ;;  %v3053_v18 = vpop.permute.xlu0 %3052 }
 0x275   : > { %v11913_v5 = vadd.f32 %v9171_v13, %v9170_v28  ;;  %3091 = vst.msk [vmem:[#allocation4 + $0x200] sm:$0xff] %vm2632_vm5, %v3053_v18  ;;  %v2476_v22 = vpop.permute.xlu1 %2475  ;;  %v5007_v28 = vld [vmem:[#allocation4 + $0x198] sm:$0xff] }
 0x276   : > { %2514 = vst.msk [vmem:[#allocation4 + $0x230] sm:$0xff] %vm2503_vm4, %v2476_v22  ;;  %2802 = vrot.lane.b32.xlu0 %v11631_v52, %s10330_s15  ;;  %v4322_v13 = vld [vmem:[#allocation2 + $0x9c] sm:$0xff] }
 0x277   : > { %3504 = vrot.lane.b32.xlu1 %v11860_v21, %s10329_s13 }
 0x278   : > { %v3946_v20 = vpop.permute.xlu0 %3945 }
 0x279   : > { %3986 = vst.msk [vmem:[#allocation4 + $0x1a0] sm:$0xff] %vm2632_vm5, %v3946_v20  ;;  %v2605_v17 = vpop.permute.xlu1 %2604 }
 0x27a   : > { %2643 = vst.msk [vmem:[#allocation4 + $0x230] sm:$0xff] %vm2632_vm5, %v2605_v17  ;;  %2930 = vrot.lane.b32.xlu0 %v11860_v21, %s10328_s29  ;;  %v4193_v21 = vld [vmem:[#allocation2 + $0x93] sm:$0xff] }
 0x27b   : > { %3250 = vrot.lane.b32.xlu1 %v11633_v11, %s10330_s15  ;;  %v4222_v62 = vpack.c.bf16 %v4194_v47, %v4193_v21  ;;  %v10134_v21 = vld [vmem:[%s13457_s3 + $0x128] sm:$0xff]  }
 0x27c   : > { %v3691_v41 = vpop.permute.xlu0 %3690  ;;  %v5020_v31 = vld [vmem:[#allocation4 + $0x200] sm:$0xff] }
 0x27d   : > { %3730 = vst.msk [vmem:[#allocation4 + $0x1d8] sm:$0xff] %vm2374_vm3, %v3691_v41  ;;  %v3371_v37 = vpop.permute.xlu1 %3370  ;;  %5627 = vmatprep.mubr.bf16.mxu0 %v5020_v31  ;;  %v10132_v41 = vld [vmem:[%s13457_s3 + $0x120] sm:$0xff]  }
 0x27e   : > { %3410 = vst.msk [vmem:[#allocation4 + $0x1d0] sm:$0xff] %vm2503_vm4, %v3371_v37  ;;  %3058 = vrot.lane.b32.xlu0 %v11877_v44, %s10329_s13  ;;  %5628 = vmatmul.mubr.bf16.gmra.mrb[100].mxu0 %v5019_v10  ;;  %v4321_v44 = vld [vmem:[#allocation2 + $0x94] sm:$0xff]  ;;  %v4543_v37 = vpack.c.bf16 %v4515_v36, %v4514_v9  ;;  %v4642_v10 = vld [vmem:[#allocation2 + $0xaa] sm:$0xff] }
 0x27f   : > { %4129 = vrot.lane.b32.xlu1 %v4094_v40, %s10330_s15  ;;  %v4350_v24 = vpack.c.bf16 %v4322_v13, %v4321_v44 }
 0x280   : > { %v3819_v55 = vpop.permute.xlu0 %3818  ;;  %v5008_v26 = vld [vmem:[#allocation4 + $0x1a0] sm:$0xff] }
 0x281   : > { %3858 = vst.msk [vmem:[#allocation4 + $0x1d8] sm:$0xff] %vm2503_vm4, %v3819_v55  ;;  %v3499_v60 = vpop.permute.xlu1 %3498  ;;  %5772 = vmatprep.mubr.bf16.mxu1 %v5008_v26 }
 0x282   : > { %3538 = vst.msk [vmem:[#allocation4 + $0x1d0] sm:$0xff] %vm2632_vm5, %v3499_v60  ;;  %3951 = vrot.lane.b32.xlu0 %v11631_v52, %s10329_s13  ;;  %5773 = vmatmul.mubr.bf16.gmra.mrb[92].mxu1 %v5007_v28  ;;  %v10130_v52 = vld [vmem:[%s13457_s3 + $0x118] sm:$0xff]   ;;  %v4770_v60 = vld [vmem:[#allocation2 + $0xab] sm:$0xff] }
 0x283   : > { %4257 = vrot.lane.b32.xlu1 %v4222_v62, %s10328_s29  ;;  %9376 = vmatpush3.bf16.msra.mxu0 %v10130_v52  ;;  %v4771_v62 = vld [vmem:[#allocation2 + $0xb3] sm:$0xff] }
 0x284   : > { %v2805_v18 = vpop.permute.xlu0 %2804  ;;  %9957 = vmatpush3.bf16.msra.mxu1 %v10130_v52  ;;  %v10136_v28 = vld [vmem:[%s13457_s3 + $0x130] sm:$0xff]   ;;  %v4799_v13 = vpack.c.bf16 %v4771_v62, %v4770_v60  ;;  %v4772_v60 = vld [vmem:[#allocation2 + $0xc3] sm:$0xff] }
 0x285   : > { %2839 = vst.msk [vmem:[#allocation4 + $0x2e0] sm:$0xff] %vm2374_vm3, %v2805_v18  ;;  %v3245_v22 = vpop.permute.xlu1 %3244  ;;  %v4323_v52 = vld [vmem:[#allocation2 + $0xac] sm:$0xff] }
 0x286   : > { %3283 = vst.msk [vmem:[#allocation4 + $0x208] sm:$0xff] %vm2374_vm3, %v3245_v22  ;;  %3696 = vrot.lane.b32.xlu0 %v11898_v35, %s10330_s15  ;;  %v10131_v35 = vld [vmem:[%s13457_s3 + $0x160] sm:$0xff]   ;;  %v4773_v62 = vld [vmem:[#allocation2 + $0xcb] sm:$0xff] }
 0x287   : > { %4385 = vrot.lane.b32.xlu1 %v4350_v24, %s10329_s13  ;;  %9377 = vmatprep.subr.bf16.mxu0 %v10131_v35 }
 0x288   : > { %v2933_v20 = vpop.permute.xlu0 %2932  ;;  %9950 = vmatprep.subr.bf16.mxu1 %v10131_v35  ;;  %9378 = vmatpush3.bf16.msra.mxu0 %v10132_v41 }
 0x289   : > { %2967 = vst.msk [vmem:[#allocation4 + $0x2e0] sm:$0xff] %vm2503_vm4, %v2933_v20  ;;  %v2355_v17 = vpop.permute.xlu1 %2354  ;;  %9958 = vmatpush3.bf16.msra.mxu1 %v10132_v41  ;;  %v4324_v20 = vld [vmem:[#allocation2 + $0xb4] sm:$0xff]  ;;  %v4516_v41 = vld [vmem:[#allocation2 + $0xc1] sm:$0xff] }
 0x28a   : > { %2389 = vst.msk [vmem:[#allocation4 + $0x310] sm:$0xff] %vm2374_vm3, %v2355_v17  ;;  %3824 = vrot.lane.b32.xlu0 %v11633_v11, %s10328_s29  ;;  %v4643_v11 = vld [vmem:[#allocation2 + $0xb2] sm:$0xff]  ;;  %v4351_v36 = vpack.c.bf16 %v4324_v20, %v4323_v52 }
 0x28b   : > { %3252 = vrot.lane.b32.xlu1 %v11379_v42, %s10330_s15  ;;  %v10133_v42 = vld [vmem:[%s13457_s3 + $0x168] sm:$0xff]   ;;  %v4671_v55 = vpack.c.bf16 %v4643_v11, %v4642_v10 }
 0x28c   : > { %v3061_v31 = vpop.permute.xlu0 %3060  ;;  %9379 = vmatprep.subr.bf16.mxu0 %v10133_v42  ;;  %9951 = vmatprep.subr.bf16.mxu1 %v10133_v42  ;;  %v4644_v11 = vld [vmem:[#allocation2 + $0xc2] sm:$0xff]  ;;  %v4645_v42 = vld [vmem:[#allocation2 + $0xca] sm:$0xff] }
 0x28d   : > { %3095 = vst.msk [vmem:[#allocation4 + $0x2e0] sm:$0xff] %vm2632_vm5, %v3061_v31  ;;  %v2484_v40 = vpop.permute.xlu1 %2483  ;;  %9380 = vmatpush3.bf16.msra.mxu0 %v10134_v21  ;;  %9959 = vmatpush3.bf16.msra.mxu1 %v10134_v21  ;;  %v4517_v31 = vld [vmem:[#allocation2 + $0xc9] sm:$0xff] }
 0x28e   : > { %2518 = vst.msk [vmem:[#allocation4 + $0x310] sm:$0xff] %vm2503_vm4, %v2484_v40  ;;  %4578 = vrot.lane.b32.xlu0 %v4543_v37, %s10330_s15  ;;  %v4544_v40 = vpack.c.bf16 %v4517_v31, %v4516_v41 }
 0x28f   : > { %3380 = vrot.lane.b32.xlu1 %v11801_v39, %s10328_s29  ;;  %v10135_v39 = vld [vmem:[%s13457_s3 + $0x170] sm:$0xff]  }
 0x290   : > { %v11977_v47 = vpop.permute.xlu0 %3953  ;;  %9381 = vmatprep.subr.bf16.mxu0 %v10135_v39  ;;  %9952 = vmatprep.subr.bf16.mxu1 %v10135_v39 }
 0x291   : > { %v2613_v26 = vpop.permute.xlu1 %2612  ;;  %9382 = vmatpush3.bf16.msra.mxu0 %v10136_v28  ;;  %9960 = vmatpush3.bf16.msra.mxu1 %v10136_v28 }
 0x292   : > { %2647 = vst.msk [vmem:[#allocation4 + $0x310] sm:$0xff] %vm2632_vm5, %v2613_v26  ;;  %4706 = vrot.lane.b32.xlu0 %v4671_v55, %s10328_s29 }
 0x293   : > { %3508 = vrot.lane.b32.xlu1 %v11804_v45, %s10329_s13  ;;  %v10137_v45 = vld [vmem:[%s13457_s3 + $0x178] sm:$0xff]  }
 0x294   : > { %v3699_v44 = vpop.permute.xlu0 %3698  ;;  %9383 = vmatprep.subr.bf16.mxu0 %v10137_v45  ;;  %9953 = vmatprep.subr.bf16.mxu1 %v10137_v45 }
 0x295   : > { %3734 = vst.msk [vmem:[#allocation4 + $0x2b8] sm:$0xff] %vm2374_vm3, %v3699_v44  ;;  %v11990_v18 = vpop.permute.xlu1 %3378  ;;  %9384 = vmatpush3.bf16.msra.mxu0 %v10138_v27  ;;  %9961 = vmatpush3.bf16.msra.mxu1 %v10138_v27  ;;  %v4800_v27 = vpack.c.bf16 %v4773_v62, %v4772_v60  ;;  %v5014_v60 = vld [vmem:[#allocation4 + $0x1d0] sm:$0xff] }
 0x296   : > { %4834 = vrot.lane.b32.xlu0 %v4799_v13, %s10329_s13  ;;  %v3767_v62 = vld [vmem:[#allocation2 + $0x18c] sm:$0xff] }
 0x297   : > { %4131 = vrot.lane.b32.xlu1 %v4671_v55, %s10330_s15  ;;  %v4672_v55 = vpack.c.bf16 %v4645_v42, %v4644_v11 }
 0x298   : > { %v3827_v22 = vpop.permute.xlu0 %3826 }
 0x299   : > { %3862 = vst.msk [vmem:[#allocation4 + $0x2b8] sm:$0xff] %vm2503_vm4, %v3827_v22  ;;  %v11998_v24 = vpop.permute.xlu1 %3506 }
 0x29a   : > { %3700 = vrot.lane.b32.xlu0 %v11819_v57, %s10330_s15 }
 0x29b   : > { %4259 = vrot.lane.b32.xlu1 %v4799_v13, %s10328_s29 }
 0x29c   : > { %v2799_v17 = vpop.permute.xlu0 %2798 }
 0x29d   : > { %2836 = vst.msk [vmem:[#allocation4 + $0x238] sm:$0xff] %vm2374_vm3, %v2799_v17  ;;  %v2349_v9 = vpop.permute.xlu1 %2348 }
 0x29e   : > { %2386 = vst.msk [vmem:[#allocation4 + $0x268] sm:$0xff] %vm2374_vm3, %v2349_v9  ;;  %3828 = vrot.lane.b32.xlu0 %v11536_v0, %s10328_s29  ;;  %v3638_v9 = vld [vmem:[#allocation2 + $0x183] sm:$0xff] }
 0x29f   : > { %4387 = vrot.lane.b32.xlu1 %v4351_v36, %s10329_s13  ;;  %v3639_v36 = vld [vmem:[#allocation2 + $0x18b] sm:$0xff] }
 0x2a0   : > { %v2927_v35 = vpop.permute.xlu0 %2926  ;;  %v3656_v11 = vpack.c.bf16 %v3639_v36, %v3638_v9 }
 0x2a1   : > { %2964 = vst.msk [vmem:[#allocation4 + $0x238] sm:$0xff] %vm2503_vm4, %v2927_v35  ;;  %v2478_v57 = vpop.permute.xlu1 %2477 }
 0x2a2   : > { %2515 = vst.msk [vmem:[#allocation4 + $0x268] sm:$0xff] %vm2503_vm4, %v2478_v57  ;;  %3957 = vrot.lane.b32.xlu0 %v11881_v8, %s10329_s13 }
 0x2a3   : > { %3254 = vrot.lane.b32.xlu1 %v11536_v0, %s10330_s15 }
 0x2a4   : > { %v3055_v37 = vpop.permute.xlu0 %3054 }
 0x2a5   : > { %3092 = vst.msk [vmem:[#allocation4 + $0x238] sm:$0xff] %vm2632_vm5, %v3055_v37  ;;  %v2607_v10 = vpop.permute.xlu1 %2606 }
 0x2a6   : > { %2644 = vst.msk [vmem:[#allocation4 + $0x268] sm:$0xff] %vm2632_vm5, %v2607_v10  ;;  %4580 = vrot.lane.b32.xlu0 %v4544_v40, %s10330_s15 }
 0x2a7   : > { %3382 = vrot.lane.b32.xlu1 %v11881_v8, %s10328_s29  ;;  %v12032_v8 = vld [vmem:[%s13458_s4] ss:$0 sm:$0xff] }
 0x2a8   : > { %v3948_v21 = vpop.permute.xlu0 %3947  ;;  %v5558_v57 = vadd.f32 %v11616_v43, %v12032_v8  ;;  %v5561_v42 = vadd.f32 %v11619_v49, %v12032_v8  ;;  %v3766_v43 = vld [vmem:[#allocation2 + $0x184] sm:$0xff] }
 0x2a9   : > { %3987 = vst.msk [vmem:[#allocation4 + $0x1d8] sm:$0xff] %vm2632_vm5, %v3948_v21  ;;  %v3373_v26 = vpop.permute.xlu1 %3372  ;;  %v9173_v0 = vpop.f32.mrb[72].mxu0 }
 0x2aa   : > { %3411 = vst.msk [vmem:[#allocation4 + $0x208] sm:$0xff] %vm2503_vm4, %v3373_v26  ;;  %4708 = vrot.lane.b32.xlu0 %v4672_v55, %s10328_s29  ;;  %v9174_v39 = vpop.f32.mrb[73].mxu0 }
 0x2ab   : > { %3510 = vrot.lane.b32.xlu1 %v11895_v33, %s10329_s13  ;;  %v12027_v28 = vadd.f32 %v9174_v39, %v9173_v0  ;;  %v9176_v44 = vpop.f32.mrb[74].mxu0  ;;  %v5026_v33 = vld [vmem:[#allocation4 + $0x230] sm:$0xff]  ;;  %v3784_v39 = vpack.c.bf16 %v3767_v62, %v3766_v43 }
 0x2ac   : > { %v3693_v13 = vpop.permute.xlu0 %3692  ;;  %v9177_v45 = vpop.f32.mrb[75].mxu0  ;;  %v5027_v22 = vld [vmem:[#allocation4 + $0x238] sm:$0xff] }
 0x2ad   : > { %3731 = vst.msk [vmem:[#allocation4 + $0x210] sm:$0xff] %vm2374_vm3, %v3693_v13  ;;  %v3501_v52 = vpop.permute.xlu1 %3500  ;;  %v12035_v20 = vadd.f32 %v9177_v45, %v9176_v44  ;;  %5635 = vmatprep.mubr.bf16.mxu0 %v5027_v22  ;;  %v9273_v17 = vpop.f32.mrb[64].mxu1  ;;  %v3895_v13 = vld [vmem:[#allocation2 + $0x198] sm:$0xff]  ;;  %v3896_v45 = vld [vmem:[#allocation2 + $0x1a0] sm:$0xff] }
 0x2ae   : > { %3539 = vst.msk [vmem:[#allocation4 + $0x208] sm:$0xff] %vm2632_vm5, %v3501_v52  ;;  %4836 = vrot.lane.b32.xlu0 %v4800_v27, %s10329_s13  ;;  %v9274_v35 = vpop.f32.mrb[65].mxu1  ;;  %5636 = vmatmul.mubr.bf16.gmra.mrb[104].mxu0 %v5026_v33  ;;  %v3913_v52 = vpack.c.bf16 %v3896_v45, %v3895_v13  ;;  %v4519_v33 = vld [vmem:[#allocation2 + $0xe1] sm:$0xff]  ;;  %v3897_v13 = vld [vmem:[#allocation2 + $0x1b0] sm:$0xff]  ;;  %v3898_v45 = vld [vmem:[#allocation2 + $0x1b8] sm:$0xff] }
 0x2af   : > { %v9275_v41 = vadd.f32 %v9274_v35, %v9273_v17  ;;  %4133 = vrot.lane.b32.xlu1 %v4672_v55, %s10330_s15  ;;  %v9276_v31 = vpop.f32.mrb[66].mxu1 }
 0x2b0   : > { %v3821_v37 = vpop.permute.xlu0 %3820  ;;  %v9277_v40 = vpop.f32.mrb[67].mxu1  ;;  %v5015_v10 = vld [vmem:[#allocation4 + $0x1d8] sm:$0xff] }
 0x2b1   : > { %v12044_v21 = vadd.f32 %v9275_v41, %v5558_v57  ;;  %3859 = vst.msk [vmem:[#allocation4 + $0x210] sm:$0xff] %vm2503_vm4, %v3821_v37  ;;  %v9278_v26 = vadd.f32 %v9277_v40, %v9276_v31  ;;  %v3247_v0 = vpop.permute.xlu1 %3246  ;;  %5780 = vmatprep.mubr.bf16.mxu1 %v5015_v10  ;;  %v3449_v57 = vld [vmem:[#allocation2 + $0x1a1] sm:$0xff]  ;;  %v4536_v40 = vld [vmem:[#allocation2 + $0x1b1] sm:$0xff]  ;;  %v4537_v10 = vld [vmem:[#allocation2 + $0x1b9] sm:$0xff] }
 0x2b2   : > { %3284 = vst.msk [vmem:[#allocation4 + $0x240] sm:$0xff] %vm2374_vm3, %v3247_v0  ;;  %3702 = vrot.lane.b32.xlu0 %v3656_v11, %s10330_s15  ;;  %5781 = vmatmul.mubr.bf16.gmra.mrb[96].mxu1 %v5014_v60  ;;  %v3640_v0 = vld [vmem:[#allocation2 + $0x19b] sm:$0xff]  ;;  %v3641_v60 = vld [vmem:[#allocation2 + $0x1a3] sm:$0xff] }
 0x2b3   : > { %v12049_v55 = vadd.f32 %v9278_v26, %v5561_v42  ;;  %4261 = vrot.lane.b32.xlu1 %v4800_v27, %s10328_s29  ;;  %v4518_v27 = vld [vmem:[#allocation2 + $0xd9] sm:$0xff]  ;;  %v12070_v42 = vpack.c.bf16 %v4537_v10, %v4536_v40  ;;  %v3657_v62 = vpack.c.bf16 %v3641_v60, %v3640_v0  ;;  %v5033_v0 = vld [vmem:[#allocation4 + $0x268] sm:$0xff] }
 0x2b4   : > { %v2807_v49 = vpop.permute.xlu0 %2806  ;;  %v4545_v36 = vpack.c.bf16 %v4519_v33, %v4518_v27  ;;  %v3914_v33 = vpack.c.bf16 %v3898_v45, %v3897_v13  ;;  %v4474_v60 = vld [vmem:[#allocation2 + $0x1c8] sm:$0xff] }
 0x2b5   : > { %2840 = vst.msk [vmem:[#allocation4 + $0x318] sm:$0xff] %vm2374_vm3, %v2807_v49  ;;  %v2357_v44 = vpop.permute.xlu1 %2356 }
 0x2b6   : > { %2390 = vst.msk [vmem:[#allocation4 + $0x348] sm:$0xff] %vm2374_vm3, %v2357_v44  ;;  %3830 = vrot.lane.b32.xlu0 %v3784_v39, %s10328_s29  ;;  %v3769_v44 = vld [vmem:[#allocation2 + $0x1a4] sm:$0xff] }
 0x2b7   : > { %4389 = vrot.lane.b32.xlu1 %v11203_v14, %s10329_s13  ;;  %v3448_v14 = vld [vmem:[#allocation2 + $0x199] sm:$0xff]  ;;  %4058 = vst.msk [vmem:[#allocation4 + $0x368] sm:$0xff] %vm385_vm1, %v12070_v42 }
 0x2b8   : > { %v2935_v22 = vpop.permute.xlu0 %2934  ;;  %v3465_v37 = vpack.c.bf16 %v3449_v57, %v3448_v14  ;;  %v4520_v57 = vld [vmem:[#allocation2 + $0xf1] sm:$0xff] }
 0x2b9   : > { %2968 = vst.msk [vmem:[#allocation4 + $0x318] sm:$0xff] %vm2503_vm4, %v2935_v22  ;;  %v2486_v17 = vpop.permute.xlu1 %2485 }
 0x2ba   : > { %2519 = vst.msk [vmem:[#allocation4 + $0x348] sm:$0xff] %vm2503_vm4, %v2486_v17  ;;  %3959 = vrot.lane.b32.xlu0 %v3913_v52, %s10329_s13  ;;  %v4089_v17 = vld [vmem:[#allocation2 + $0x1b2] sm:$0xff] }
 0x2bb   : > { %3256 = vrot.lane.b32.xlu1 %v3784_v39, %s10330_s15  ;;  %v3768_v39 = vld [vmem:[#allocation2 + $0x19c] sm:$0xff] }
 0x2bc   : > { %v3063_v9 = vpop.permute.xlu0 %3062 }
 0x2bd   : > { %3096 = vst.msk [vmem:[#allocation4 + $0x318] sm:$0xff] %vm2632_vm5, %v3063_v9  ;;  %v2615_v35 = vpop.permute.xlu1 %2614 }
 0x2be   : > { %2648 = vst.msk [vmem:[#allocation4 + $0x348] sm:$0xff] %vm2632_vm5, %v2615_v35  ;;  %4582 = vrot.lane.b32.xlu0 %v4545_v36, %s10330_s15  ;;  %v4218_v35 = vld [vmem:[#allocation2 + $0x1bb] sm:$0xff] }
 0x2bf   : > { %3384 = vrot.lane.b32.xlu1 %v3913_v52, %s10328_s29  ;;  %v3785_v52 = vpack.c.bf16 %v3769_v44, %v3768_v39 }
 0x2c0   : > { %v3956_v41 = vpop.permute.xlu0 %3955 }
 0x2c1   : > { %3991 = vst.msk [vmem:[#allocation4 + $0x2b8] sm:$0xff] %vm2632_vm5, %v3956_v41  ;;  %v2351_v31 = vpop.permute.xlu1 %2350  ;;  %v4521_v41 = vld [vmem:[#allocation2 + $0xf9] sm:$0xff] }
 0x2c2   : > { %2387 = vst.msk [vmem:[#allocation4 + $0x2a0] sm:$0xff] %vm2374_vm3, %v2351_v31  ;;  %4710 = vrot.lane.b32.xlu0 %v11243_v23, %s10328_s29  ;;  %v4546_v10 = vpack.c.bf16 %v4521_v41, %v4520_v57 }
 0x2c3   : > { %3512 = vrot.lane.b32.xlu1 %v3465_v37, %s10329_s13 }
 0x2c4   : > { %v2801_v11 = vpop.permute.xlu0 %2800 }
 0x2c5   : > { %2837 = vst.msk [vmem:[#allocation4 + $0x270] sm:$0xff] %vm2374_vm3, %v2801_v11  ;;  %v2480_v26 = vpop.permute.xlu1 %2479  ;;  %v4346_v11 = vld [vmem:[#allocation2 + $0x1bc] sm:$0xff] }
 0x2c6   : > { %2516 = vst.msk [vmem:[#allocation4 + $0x2a0] sm:$0xff] %vm2503_vm4, %v2480_v26  ;;  %4838 = vrot.lane.b32.xlu0 %v11250_v58, %s10329_s13 }
 0x2c7   : > { %4135 = vrot.lane.b32.xlu1 %v11243_v23, %s10330_s15  ;;  %v4090_v23 = vld [vmem:[#allocation2 + $0x1ba] sm:$0xff] }
 0x2c8   : > { %v2929_v43 = vpop.permute.xlu0 %2928  ;;  %v4106_v9 = vpack.c.bf16 %v4090_v23, %v4089_v17 }
 0x2c9   : > { %2965 = vst.msk [vmem:[#allocation4 + $0x270] sm:$0xff] %vm2503_vm4, %v2929_v43  ;;  %v2609_v49 = vpop.permute.xlu1 %2608  ;;  %v4475_v43 = vld [vmem:[#allocation2 + $0x1d0] sm:$0xff] }
 0x2ca   : > { %2645 = vst.msk [vmem:[#allocation4 + $0x2a0] sm:$0xff] %vm2632_vm5, %v2609_v49  ;;  %3704 = vrot.lane.b32.xlu0 %v3657_v62, %s10330_s15  ;;  %v4491_v62 = vpack.c.bf16 %v4475_v43, %v4474_v60 }
 0x2cb   : > { %4263 = vrot.lane.b32.xlu1 %v11250_v58, %s10328_s29  ;;  %v4217_v58 = vld [vmem:[#allocation2 + $0x1b3] sm:$0xff] }
 0x2cc   : > { %v3057_v22 = vpop.permute.xlu0 %3056  ;;  %v4234_v31 = vpack.c.bf16 %v4218_v35, %v4217_v58  ;;  %4507 = vst.msk [vmem:[#allocation4 + $0x370] sm:$0xff] %vm385_vm1, %v4491_v62 }
 0x2cd   : > { %3093 = vst.msk [vmem:[#allocation4 + $0x270] sm:$0xff] %vm2632_vm5, %v3057_v22  ;;  %v3375_v27 = vpop.permute.xlu1 %3374  ;;  %v5021_v22 = vld [vmem:[#allocation4 + $0x208] sm:$0xff] }
 0x2ce   : > { %3412 = vst.msk [vmem:[#allocation4 + $0x240] sm:$0xff] %vm2503_vm4, %v3375_v27  ;;  %3832 = vrot.lane.b32.xlu0 %v3785_v52, %s10328_s29  ;;  %v4538_v27 = vld [vmem:[#allocation2 + $0x1c9] sm:$0xff] }
 0x2cf   : > { %4391 = vrot.lane.b32.xlu1 %v11248_v53, %s10329_s13  ;;  %v4345_v53 = vld [vmem:[#allocation2 + $0x1b4] sm:$0xff] }
 0x2d0   : > { %v3950_v36 = vpop.permute.xlu0 %3949  ;;  %v4362_v49 = vpack.c.bf16 %v4346_v11, %v4345_v53  ;;  %v4667_v53 = vld [vmem:[#allocation2 + $0x1d2] sm:$0xff] }
 0x2d1   : > { %3988 = vst.msk [vmem:[#allocation4 + $0x210] sm:$0xff] %vm2632_vm5, %v3950_v36  ;;  %v3503_v14 = vpop.permute.xlu1 %3502 }
 0x2d2   : > { %3540 = vst.msk [vmem:[#allocation4 + $0x240] sm:$0xff] %vm2632_vm5, %v3503_v14  ;;  %3961 = vrot.lane.b32.xlu0 %v3914_v33, %s10329_s13  ;;  %v4539_v33 = vld [vmem:[#allocation2 + $0x1d1] sm:$0xff] }
 0x2d3   : > { %4153 = vrot.lane.b32.xlu1 %v4106_v9, %s10330_s15  ;;  %v4555_v41 = vpack.c.bf16 %v4539_v33, %v4538_v27 }
 0x2d4   : > { %v3695_v37 = vpop.permute.xlu0 %3694  ;;  %v5034_v40 = vld [vmem:[#allocation4 + $0x270] sm:$0xff] }
 0x2d5   : > { %3732 = vst.msk [vmem:[#allocation4 + $0x248] sm:$0xff] %vm2374_vm3, %v3695_v37  ;;  %v3249_v26 = vpop.permute.xlu1 %3248  ;;  %5643 = vmatprep.mubr.bf16.mxu0 %v5034_v40 }
 0x2d6   : > { %3285 = vst.msk [vmem:[#allocation4 + $0x278] sm:$0xff] %vm2374_vm3, %v3249_v26  ;;  %4584 = vrot.lane.b32.xlu0 %v4546_v10, %s10330_s15  ;;  %5644 = vmatmul.mubr.bf16.gmra.mrb[108].mxu0 %v5033_v0  ;;  %v4666_v10 = vld [vmem:[#allocation2 + $0x1ca] sm:$0xff]  ;;  %v5569_v0 = vadd.f32 %v11913_v5, %v12032_v8 }
 0x2d7   : > { %4281 = vrot.lane.b32.xlu1 %v4234_v31, %s10328_s29  ;;  %v5566_v31 = vadd.f32 %v11909_v61, %v12032_v8  ;;  %v4683_v61 = vpack.c.bf16 %v4667_v53, %v4666_v10  ;;  %v5040_v53 = vld [vmem:[#allocation4 + $0x2a0] sm:$0xff] }
 0x2d8   : > { %v3823_v39 = vpop.permute.xlu0 %3822  ;;  %v5022_v44 = vld [vmem:[#allocation4 + $0x210] sm:$0xff] }
 0x2d9   : > { %3860 = vst.msk [vmem:[#allocation4 + $0x248] sm:$0xff] %vm2503_vm4, %v3823_v39  ;;  %v2353_v13 = vpop.permute.xlu1 %2352  ;;  %v9179_v45 = vpop.f32.mrb[76].mxu0  ;;  %5788 = vmatprep.mubr.bf16.mxu1 %v5022_v44  ;;  %v4795_v39 = vld [vmem:[#allocation2 + $0x1d3] sm:$0xff] }
 0x2da   : > { %2388 = vst.msk [vmem:[#allocation4 + $0x2d8] sm:$0xff] %vm2374_vm3, %v2353_v13  ;;  %4712 = vrot.lane.b32.xlu0 %v11296_v6, %s10328_s29  ;;  %v9180_v52 = vpop.f32.mrb[77].mxu0  ;;  %5789 = vmatmul.mubr.bf16.gmra.mrb[100].mxu1 %v5021_v22 }
 0x2db   : > { %4409 = vrot.lane.b32.xlu1 %v4362_v49, %s10329_s13  ;;  %v12104_v17 = vadd.f32 %v9180_v52, %v9179_v45  ;;  %v9182_v23 = vpop.f32.mrb[78].mxu0  ;;  %v4794_v49 = vld [vmem:[#allocation2 + $0x1cb] sm:$0xff]  ;;  %v12133_v45 = vld [vmem:[%s13457_s3 + $0x180] sm:$0xff]  }
 0x2dc   : > { %v2809_v9 = vpop.permute.xlu0 %2808  ;;  %v9183_v36 = vpop.f32.mrb[79].mxu0  ;;  %v4811_v13 = vpack.c.bf16 %v4795_v39, %v4794_v49  ;;  %9886 = vmatprep.subr.bf16.mxu1 %v12133_v45  ;;  %v4522_v52 = vld [vmem:[#allocation2 + $0x109] sm:$0xff]  ;;  %v4526_v39 = vld [vmem:[#allocation2 + $0x139] sm:$0xff] }
 0x2dd   : > { %2841 = vst.msk [vmem:[#allocation4 + $0x350] sm:$0xff] %vm2374_vm3, %v2809_v9  ;;  %v2482_v58 = vpop.permute.xlu1 %2481  ;;  %v12107_v35 = vadd.f32 %v9183_v36, %v9182_v23  ;;  %v9279_v14 = vpop.f32.mrb[68].mxu1  ;;  %v4523_v23 = vld [vmem:[#allocation2 + $0x111] sm:$0xff] }
 0x2de   : > { %2517 = vst.msk [vmem:[#allocation4 + $0x2d8] sm:$0xff] %vm2503_vm4, %v2482_v58  ;;  %4840 = vrot.lane.b32.xlu0 %v11310_v56, %s10329_s13  ;;  %v9280_v57 = vpop.f32.mrb[69].mxu1  ;;  %v4547_v33 = vpack.c.bf16 %v4523_v23, %v4522_v52  ;;  %v5043_v52 = vld [vmem:[#allocation4 + $0x2b8] sm:$0xff] }
 0x2df   : > { %v9281_v37 = vadd.f32 %v9280_v57, %v9279_v14  ;;  %4137 = vrot.lane.b32.xlu1 %v11296_v6, %s10330_s15  ;;  %v9282_v40 = vpop.f32.mrb[70].mxu1  ;;  %v4524_v14 = vld [vmem:[#allocation2 + $0x121] sm:$0xff]  ;;  %v4525_v57 = vld [vmem:[#allocation2 + $0x129] sm:$0xff] }
 0x2e0   : > { %v2937_v11 = vpop.permute.xlu0 %2936  ;;  %v9283_v26 = vpop.f32.mrb[71].mxu1 }
 0x2e1   : > { %v12118_v60 = vadd.f32 %v9281_v37, %v5566_v31  ;;  %2969 = vst.msk [vmem:[#allocation4 + $0x350] sm:$0xff] %vm2503_vm4, %v2937_v11  ;;  %v9284_v43 = vadd.f32 %v9283_v26, %v9282_v40  ;;  %v2611_v62 = vpop.permute.xlu1 %2610  ;;  %v12164_v40 = vld [vmem:[#allocation4 + $0xd8] sm:$0xff] }
 0x2e2   : > { %2646 = vst.msk [vmem:[#allocation4 + $0x2d8] sm:$0xff] %vm2632_vm5, %v2611_v62  ;;  %4602 = vrot.lane.b32.xlu0 %v4555_v41, %s10330_s15  ;;  %v6914_v41 = vld [vmem:[#allocation3 + $0xb4] sm:$0xff] }
 0x2e3   : > { %v12123_v6 = vadd.f32 %v9284_v43, %v5569_v0  ;;  %4265 = vrot.lane.b32.xlu1 %v11310_v56, %s10328_s29  ;;  %v5028_v43 = vld [vmem:[#allocation4 + $0x240] sm:$0xff] }
 0x2e4   : > { %v3065_v44 = vpop.permute.xlu0 %3064 }
 0x2e5   : > { %3097 = vst.msk [vmem:[#allocation4 + $0x350] sm:$0xff] %vm2632_vm5, %v3065_v44  ;;  %v3377_v5 = vpop.permute.xlu1 %3376  ;;  %v4527_v44 = vld [vmem:[#allocation2 + $0x141] sm:$0xff] }
 0x2e6   : > { %3413 = vst.msk [vmem:[#allocation4 + $0x278] sm:$0xff] %vm2503_vm4, %v3377_v5  ;;  %4730 = vrot.lane.b32.xlu0 %v4683_v61, %s10328_s29 }
 0x2e7   : > { %4393 = vrot.lane.b32.xlu1 %v11315_v30, %s10329_s13 }
 0x2e8   : > { %v2803_v56 = vpop.permute.xlu0 %2802 }
 0x2e9   : > { %2838 = vst.msk [vmem:[#allocation4 + $0x2a8] sm:$0xff] %vm2374_vm3, %v2803_v56  ;;  %v3505_v22 = vpop.permute.xlu1 %3504  ;;  %v5047_v49 = vld [vmem:[#allocation4 + $0x2d8] sm:$0xff] }
 0x2ea   : > { %3541 = vst.msk [vmem:[#allocation4 + $0x278] sm:$0xff] %vm2632_vm5, %v3505_v22  ;;  %4858 = vrot.lane.b32.xlu0 %v4811_v13, %s10329_s13  ;;  %v4335_v22 = vld [vmem:[#allocation2 + $0x13c] sm:$0xff] }
 0x2eb   : > { %4139 = vrot.lane.b32.xlu1 %v11451_v63, %s10330_s15 }
 0x2ec   : > { %v2931_v27 = vpop.permute.xlu0 %2930 }
 0x2ed   : > { %2966 = vst.msk [vmem:[#allocation4 + $0x2a8] sm:$0xff] %vm2503_vm4, %v2931_v27  ;;  %v3251_v30 = vpop.permute.xlu1 %3250 }
 0x2ee   : > { %3286 = vst.msk [vmem:[#allocation4 + $0x2b0] sm:$0xff] %vm2374_vm3, %v3251_v30  ;;  %4586 = vrot.lane.b32.xlu0 %v4547_v33, %s10330_s15  ;;  %v5054_v30 = vld [vmem:[#allocation4 + $0x310] sm:$0xff] }
 0x2ef   : > { %3414 = vst.msk [vmem:[#allocation4 + $0x2b0] sm:$0xff] %vm2503_vm4, %v11990_v18  ;;  %4267 = vrot.lane.b32.xlu1 %v11453_v19, %s10328_s29 }
 0x2f0   : > { %3542 = vst.msk [vmem:[#allocation4 + $0x2b0] sm:$0xff] %vm2632_vm5, %v11998_v24  ;;  %v3059_v9 = vpop.permute.xlu0 %3058  ;;  %v6913_v24 = vld [vmem:[#allocation3 + $0xa4] sm:$0xff] }
 0x2f1   : > { %3094 = vst.msk [vmem:[#allocation4 + $0x2a8] sm:$0xff] %vm2632_vm5, %v3059_v9  ;;  %v4130_v36 = vpop.permute.xlu1 %4129  ;;  %v5035_v56 = vld [vmem:[#allocation4 + $0x278] sm:$0xff]  ;;  %v5062_v9 = vld [vmem:[#allocation4 + $0x350] sm:$0xff] }
 0x2f2   : > { %4174 = vst.msk [vmem:[#allocation4 + $0xc8] sm:$0xff] %vm2374_vm3, %v4130_v36  ;;  %4714 = vrot.lane.b32.xlu0 %v11451_v63, %s10328_s29  ;;  %v6918_v63 = vpack.c.bf16 %v6914_v41, %v6913_v24  ;;  %v4081_v36 = vld [vmem:[#allocation2 + $0x152] sm:$0xff] }
 0x2f3   : > { %4395 = vrot.lane.b32.xlu1 %v11460_v51, %s10329_s13  ;;  %v4548_v51 = vpack.c.bf16 %v4525_v57, %v4524_v14  ;;  %v4528_v24 = vld [vmem:[#allocation2 + $0x151] sm:$0xff]  ;;  %v4529_v41 = vld [vmem:[#allocation2 + $0x159] sm:$0xff] }
 0x2f4   : > { %v3952_v58 = vpop.permute.xlu0 %3951  ;;  %6922 = vst.msk [vmem:[#allocation4 + $0xd8] sm:$0xff] %vm385_vm1, %v6918_v63 }
 0x2f5   : > { %3989 = vst.msk [vmem:[#allocation4 + $0x248] sm:$0xff] %vm2632_vm5, %v3952_v58  ;;  %v4258_v18 = vpop.permute.xlu1 %4257  ;;  %v4082_v58 = vld [vmem:[#allocation2 + $0x15a] sm:$0xff] }
 0x2f6   : > { %4302 = vst.msk [vmem:[#allocation4 + $0xc8] sm:$0xff] %vm2503_vm4, %v4258_v18  ;;  %4842 = vrot.lane.b32.xlu0 %v11453_v19, %s10329_s13  ;;  %v5048_v19 = vld [vmem:[#allocation4 + $0x2e0] sm:$0xff]  ;;  %v4102_v57 = vpack.c.bf16 %v4082_v58, %v4081_v36 }
 0x2f7   : > { %4141 = vrot.lane.b32.xlu1 %v11578_v59, %s10330_s15 }
 0x2f8   : > { %v3697_v31 = vpop.permute.xlu0 %3696  ;;  %v5041_v37 = vld [vmem:[#allocation4 + $0x2a8] sm:$0xff] }
 0x2f9   : > { %3733 = vst.msk [vmem:[#allocation4 + $0x280] sm:$0xff] %vm2374_vm3, %v3697_v31  ;;  %v4386_v10 = vpop.permute.xlu1 %4385  ;;  %5651 = vmatprep.mubr.bf16.mxu0 %v5041_v37  ;;  %v4550_v31 = vpack.c.bf16 %v4529_v41, %v4528_v24 }
 0x2fa   : > { %4430 = vst.msk [vmem:[#allocation4 + $0xc8] sm:$0xff] %vm2632_vm5, %v4386_v10  ;;  %4588 = vrot.lane.b32.xlu0 %v4548_v51, %s10330_s15  ;;  %5652 = vmatmul.mubr.bf16.gmra.mrb[112].mxu0 %v5040_v53  ;;  %v5061_v51 = vld [vmem:[#allocation4 + $0x348] sm:$0xff]  ;;  %v4337_v53 = vld [vmem:[#allocation2 + $0x154] sm:$0xff] }
 0x2fb   : > { %4269 = vrot.lane.b32.xlu1 %v11580_v7, %s10328_s29  ;;  %5659 = vmatprep.mubr.bf16.mxu0 %v5048_v19  ;;  %v4961_v10 = vld [vmem:[#allocation4 + $0x28] sm:$0xff]  ;;  %v4338_v19 = vld [vmem:[#allocation2 + $0x15c] sm:$0xff] }
 0x2fc   : > { %v3825_v11 = vpop.permute.xlu0 %3824  ;;  %v5029_v26 = vld [vmem:[#allocation4 + $0x248] sm:$0xff] }
 0x2fd   : > { %3861 = vst.msk [vmem:[#allocation4 + $0x280] sm:$0xff] %vm2503_vm4, %v3825_v11  ;;  %v3253_v0 = vpop.permute.xlu1 %3252  ;;  %5796 = vmatprep.mubr.bf16.mxu1 %v5029_v26 }
 0x2fe   : > { %3990 = vst.msk [vmem:[#allocation4 + $0x280] sm:$0xff] %vm2632_vm5, %v11977_v47  ;;  %4716 = vrot.lane.b32.xlu0 %v11578_v59, %s10328_s29  ;;  %5797 = vmatmul.mubr.bf16.gmra.mrb[104].mxu1 %v5028_v43  ;;  %v5055_v47 = vld [vmem:[#allocation4 + $0x318] sm:$0xff] }
 0x2ff   : > { %3287 = vst.msk [vmem:[#allocation4 + $0x2e8] sm:$0xff] %vm2374_vm3, %v3253_v0  ;;  %4397 = vrot.lane.b32.xlu1 %v11584_v2, %s10329_s13  ;;  %v4549_v2 = vpack.c.bf16 %v4527_v44, %v4526_v39  ;;  %v4358_v0 = vpack.c.bf16 %v4338_v19, %v4337_v53 }
 0x300   : > { %v4579_v62 = vpop.permute.xlu0 %4578 }
 0x301   : > { %4623 = vst.msk [vmem:[#allocation4 + $0xd0] sm:$0xff] %vm2374_vm3, %v4579_v62  ;;  %v3381_v61 = vpop.permute.xlu1 %3380 }
 0x302   : > { %3415 = vst.msk [vmem:[#allocation4 + $0x2e8] sm:$0xff] %vm2503_vm4, %v3381_v61  ;;  %4844 = vrot.lane.b32.xlu0 %v11580_v7, %s10329_s13  ;;  %5660 = vmatmul.mubr.bf16.gmra.mrb[116].mxu0 %v5047_v49  ;;  %v4336_v7 = vld [vmem:[#allocation2 + $0x144] sm:$0xff] }
 0x303   : > { %4143 = vrot.lane.b32.xlu1 %v11758_v48, %s10330_s15  ;;  %5667 = vmatprep.mubr.bf16.mxu0 %v5055_v47  ;;  %v4357_v33 = vpack.c.bf16 %v4336_v7, %v4335_v22 }
 0x304   : > { %v4707_v59 = vpop.permute.xlu0 %4706 }
 0x305   : > { %4751 = vst.msk [vmem:[#allocation4 + $0xd0] sm:$0xff] %vm2503_vm4, %v4707_v59  ;;  %v3509_v5 = vpop.permute.xlu1 %3508  ;;  %v5036_v13 = vld [vmem:[#allocation4 + $0x280] sm:$0xff] }
 0x306   : > { %3543 = vst.msk [vmem:[#allocation4 + $0x2e8] sm:$0xff] %vm2632_vm5, %v3509_v5  ;;  %4590 = vrot.lane.b32.xlu0 %v4549_v2, %s10330_s15  ;;  %5804 = vmatprep.mubr.bf16.mxu1 %v5036_v13  ;;  %v4960_v2 = vld [vmem:[#allocation4 + $0x20] sm:$0xff] }
 0x307   : > { %4271 = vrot.lane.b32.xlu1 %v11679_v16, %s10328_s29  ;;  %5805 = vmatmul.mubr.bf16.gmra.mrb[108].mxu1 %v5035_v56  ;;  %v4968_v13 = vld [vmem:[#allocation4 + $0x60] sm:$0xff]  ;;  %v5574_v56 = vadd.f32 %v12027_v28, %v12032_v8 }
 0x308   : > { %v4835_v23 = vpop.permute.xlu0 %4834  ;;  %5812 = vmatprep.mubr.bf16.mxu1 %v5043_v52 }
 0x309   : > { %4879 = vst.msk [vmem:[#allocation4 + $0xd0] sm:$0xff] %vm2632_vm5, %v4835_v23  ;;  %v4132_v27 = vpop.permute.xlu1 %4131 }
 0x30a   : > { %4175 = vst.msk [vmem:[#allocation4 + $0x100] sm:$0xff] %vm2374_vm3, %v4132_v27  ;;  %4718 = vrot.lane.b32.xlu0 %v11758_v48, %s10328_s29  ;;  %5668 = vmatmul.mubr.bf16.gmra.mrb[120].mxu0 %v5054_v30  ;;  %v5042_v48 = vld [vmem:[#allocation4 + $0x2b0] sm:$0xff] }
 0x30b   : > { %4399 = vrot.lane.b32.xlu1 %v4357_v33, %s10329_s13  ;;  %5675 = vmatprep.mubr.bf16.mxu0 %v5062_v9  ;;  %v5577_v33 = vadd.f32 %v12035_v20, %v12032_v8 }
 0x30c   : > { %v3701_v18 = vpop.permute.xlu0 %3700 }
 0x30d   : > { %3735 = vst.msk [vmem:[#allocation4 + $0x2f0] sm:$0xff] %vm2374_vm3, %v3701_v18  ;;  %v4260_v14 = vpop.permute.xlu1 %4259  ;;  %v5049_v28 = vld [vmem:[#allocation4 + $0x2e8] sm:$0xff] }
 0x30e   : > { %4303 = vst.msk [vmem:[#allocation4 + $0x100] sm:$0xff] %vm2503_vm4, %v4260_v14  ;;  %4846 = vrot.lane.b32.xlu0 %v11679_v16, %s10329_s13 }
 0x30f   : > { %4145 = vrot.lane.b32.xlu1 %v4102_v57, %s10330_s15  ;;  %5813 = vmatmul.mubr.bf16.gmra.mrb[112].mxu1 %v5042_v48 }
 0x310   : > { %v3829_v63 = vpop.permute.xlu0 %3828 }
 0x311   : > { %3863 = vst.msk [vmem:[#allocation4 + $0x2f0] sm:$0xff] %vm2503_vm4, %v3829_v63  ;;  %v4388_v37 = vpop.permute.xlu1 %4387  ;;  %v4967_v63 = vld [vmem:[#allocation4 + $0x58] sm:$0xff] }
 0x312   : > { %4431 = vst.msk [vmem:[#allocation4 + $0x100] sm:$0xff] %vm2632_vm5, %v4388_v37  ;;  %4592 = vrot.lane.b32.xlu0 %v4550_v31, %s10330_s15  ;;  %5676 = vmatmul.mubr.bf16.gmra.mrb[124].mxu0 %v5061_v51  ;;  %v4975_v31 = vld [vmem:[#allocation4 + $0x98] sm:$0xff]  ;;  %v5582_v51 = vadd.f32 %v12104_v17, %v12032_v8  ;;  %v5585_v17 = vadd.f32 %v12107_v35, %v12032_v8  ;;  %v4974_v35 = vld [vmem:[#allocation4 + $0x90] sm:$0xff] }
 0x313   : > { %4273 = vrot.lane.b32.xlu1 %v11483_v46, %s10328_s29  ;;  %5877 = vmatprep.mubr.bf16.mxu0 %v4961_v10 }
 0x314   : > { %v3958_v16 = vpop.permute.xlu0 %3957 }
 0x315   : > { %3992 = vst.msk [vmem:[#allocation4 + $0x2f0] sm:$0xff] %vm2632_vm5, %v3958_v16  ;;  %v3255_v11 = vpop.permute.xlu1 %3254  ;;  %v9185_v26 = vpop.f32.mrb[80].mxu0 }
 0x316   : > { %3288 = vst.msk [vmem:[#allocation4 + $0x320] sm:$0xff] %vm2374_vm3, %v3255_v11  ;;  %4720 = vrot.lane.b32.xlu0 %v4102_v57, %s10328_s29  ;;  %v9186_v43 = vpop.f32.mrb[81].mxu0 }
 0x317   : > { %4401 = vrot.lane.b32.xlu1 %v4358_v0, %s10329_s13  ;;  %v12210_v62 = vadd.f32 %v9186_v43, %v9185_v26  ;;  %v9188_v61 = vpop.f32.mrb[82].mxu0  ;;  %v4920_v0 = vld [vmem:[#allocation2 + $0x1b4] sm:$0xff]  ;;  %v4921_v43 = vld [vmem:[#allocation2 + $0x1bc] sm:$0xff] }
 0x318   : > { %v4581_v49 = vpop.permute.xlu0 %4580  ;;  %v9189_v39 = vpop.f32.mrb[83].mxu0 }
 0x319   : > { %4624 = vst.msk [vmem:[#allocation4 + $0x108] sm:$0xff] %vm2374_vm3, %v4581_v49  ;;  %v3383_v44 = vpop.permute.xlu1 %3382  ;;  %v12213_v47 = vadd.f32 %v9189_v39, %v9188_v61  ;;  %v9285_v59 = vpop.f32.mrb[72].mxu1  ;;  %v4922_v61 = vld [vmem:[#allocation2 + $0x1cc] sm:$0xff] }
 0x31a   : > { %3416 = vst.msk [vmem:[#allocation4 + $0x320] sm:$0xff] %vm2503_vm4, %v3383_v44  ;;  %4848 = vrot.lane.b32.xlu0 %v11483_v46, %s10329_s13  ;;  %v9286_v5 = vpop.f32.mrb[73].mxu1  ;;  %5878 = vmatmul.mubr.bf16.vlgmr.msra.gmra.mrb[128].mxu0 %v4960_v2  ;;  %v4923_v2 = vld [vmem:[#allocation2 + $0x1d4] sm:$0xff] }
 0x31b   : > { %v9287_v22 = vadd.f32 %v9286_v5, %v9285_v59  ;;  %4147 = vrot.lane.b32.xlu1 %v11625_v4, %s10330_s15  ;;  %v9288_v7 = vpop.f32.mrb[74].mxu1  ;;  %5885 = vmatprep.mubr.bf16.mxu0 %v4968_v13  ;;  %v4938_v59 = vpack.c.bf16 %v4921_v43, %v4920_v0 }
 0x31c   : > { %v4709_v52 = vpop.permute.xlu0 %4708  ;;  %v9289_v23 = vpop.f32.mrb[75].mxu1  ;;  %v5050_v27 = vld [vmem:[#allocation4 + $0x2f0] sm:$0xff] }
 0x31d   : > { %v12224_v30 = vadd.f32 %v9287_v22, %v5574_v56  ;;  %4752 = vst.msk [vmem:[#allocation4 + $0x108] sm:$0xff] %vm2503_vm4, %v4709_v52  ;;  %v9290_v46 = vadd.f32 %v9289_v23, %v9288_v7  ;;  %v3511_v9 = vpop.permute.xlu1 %3510  ;;  %v9191_v36 = vpop.f32.mrb[84].mxu0  ;;  %5820 = vmatprep.mubr.bf16.mxu1 %v5050_v27  ;;  %v4939_v56 = vpack.c.bf16 %v4923_v2, %v4922_v61  ;;  %v4982_v23 = vld [vmem:[#allocation4 + $0xd0] sm:$0xff] }
 0x31e   : > { %3544 = vst.msk [vmem:[#allocation4 + $0x320] sm:$0xff] %vm2632_vm5, %v3511_v9  ;;  %4594 = vrot.lane.b32.xlu0 %v11644_v29, %s10330_s15  ;;  %v9192_v58 = vpop.f32.mrb[85].mxu0  ;;  %5821 = vmatmul.mubr.bf16.gmra.mrb[116].mxu1 %v5049_v28 }
 0x31f   : > { %v12230_v18 = vadd.f32 %v9290_v46, %v5577_v33  ;;  %4275 = vrot.lane.b32.xlu1 %v11637_v15, %s10328_s29  ;;  %v12234_v20 = vadd.f32 %v9192_v58, %v9191_v36  ;;  %v9194_v14 = vpop.f32.mrb[86].mxu0  ;;  %4954 = vst.msk [vmem:[#allocation4 + $0x340] sm:$0xff] %vm385_vm1, %v4938_v59  ;;  %4955 = vst.msk [vmem:[#allocation4 + $0x378] sm:$0xff] %vm385_vm1, %v4939_v56  ;;  %v5590_v33 = vadd.f32 %v12210_v62, %v12032_v8 }
 0x320   : > { %v4837_v57 = vpop.permute.xlu0 %4836  ;;  %v9195_v24 = vpop.f32.mrb[87].mxu0 }
 0x321   : > { %4880 = vst.msk [vmem:[#allocation4 + $0x108] sm:$0xff] %vm2632_vm5, %v4837_v57  ;;  %v4134_v41 = vpop.permute.xlu1 %4133  ;;  %v12237_v48 = vadd.f32 %v9195_v24, %v9194_v14  ;;  %v5593_v24 = vadd.f32 %v12213_v47, %v12032_v8 }
 0x322   : > { %4176 = vst.msk [vmem:[#allocation4 + $0x138] sm:$0xff] %vm2374_vm3, %v4134_v41  ;;  %4722 = vrot.lane.b32.xlu0 %v11625_v4, %s10328_s29  ;;  %v9291_v29 = vpop.f32.mrb[76].mxu1  ;;  %5886 = vmatmul.mubr.bf16.gmra.mrb[132].mxu0 %v4967_v63 }
 0x323   : > { %4403 = vrot.lane.b32.xlu1 %v11650_v34, %s10329_s13  ;;  %v9292_v37 = vpop.f32.mrb[77].mxu1  ;;  %5893 = vmatprep.mubr.bf16.mxu0 %v4975_v31 }
 0x324   : > { %v9293_v10 = vadd.f32 %v9292_v37, %v9291_v29  ;;  %v3703_v53 = vpop.permute.xlu0 %3702  ;;  %v9294_v19 = vpop.f32.mrb[78].mxu1 }
 0x325   : > { %3736 = vst.msk [vmem:[#allocation4 + $0x328] sm:$0xff] %vm2374_vm3, %v3703_v53  ;;  %v4262_v16 = vpop.permute.xlu1 %4261  ;;  %v9197_v11 = vpop.f32.mrb[88].mxu0  ;;  %v4215_v53 = vld [vmem:[#allocation2 + $0x19b] sm:$0xff] }
 0x326   : > { %v12247_v26 = vadd.f32 %v9293_v10, %v5582_v51  ;;  %4304 = vst.msk [vmem:[#allocation4 + $0x138] sm:$0xff] %vm2503_vm4, %v4262_v16  ;;  %v9295_v4 = vpop.f32.mrb[79].mxu1  ;;  %4850 = vrot.lane.b32.xlu0 %v11637_v15, %s10329_s13  ;;  %v9198_v34 = vpop.f32.mrb[89].mxu0  ;;  %v5056_v2 = vld [vmem:[#allocation4 + $0x320] sm:$0xff] }
 0x327   : > { %v9296_v49 = vadd.f32 %v9295_v4, %v9294_v19  ;;  %4149 = vrot.lane.b32.xlu1 %v11715_v32, %s10330_s15  ;;  %v12256_v39 = vadd.f32 %v9198_v34, %v9197_v11  ;;  %v9200_v44 = vpop.f32.mrb[90].mxu0  ;;  %v4216_v19 = vld [vmem:[#allocation2 + $0x1a3] sm:$0xff]  ;;  %v4472_v11 = vld [vmem:[#allocation2 + $0x1b0] sm:$0xff]  ;;  %v4473_v4 = vld [vmem:[#allocation2 + $0x1b8] sm:$0xff]  ;;  %v5598_v34 = vadd.f32 %v12234_v20, %v12032_v8 }
 0x328   : > { %v3831_v5 = vpop.permute.xlu0 %3830  ;;  %v9201_v13 = vpop.f32.mrb[91].mxu0  ;;  %v4233_v59 = vpack.c.bf16 %v4216_v19, %v4215_v53  ;;  %v4792_v19 = vld [vmem:[#allocation2 + $0x1b3] sm:$0xff] }
 0x329   : > { %v12258_v15 = vadd.f32 %v9296_v49, %v5585_v17  ;;  %3864 = vst.msk [vmem:[#allocation4 + $0x328] sm:$0xff] %vm2503_vm4, %v3831_v5  ;;  %v4390_v22 = vpop.permute.xlu1 %4389  ;;  %v12261_v7 = vadd.f32 %v9201_v13, %v9200_v44  ;;  %v5601_v5 = vadd.f32 %v12237_v48, %v12032_v8 }
 0x32a   : > { %4432 = vst.msk [vmem:[#allocation4 + $0x138] sm:$0xff] %vm2632_vm5, %v4390_v22  ;;  %4596 = vrot.lane.b32.xlu0 %v11720_v12, %s10330_s15  ;;  %v9297_v52 = vpop.f32.mrb[80].mxu1  ;;  %5894 = vmatmul.mubr.bf16.gmra.mrb[136].mxu0 %v4974_v35 }
 0x32b   : > { %4277 = vrot.lane.b32.xlu1 %v11722_v38, %s10328_s29  ;;  %v9298_v27 = vpop.f32.mrb[81].mxu1  ;;  %5901 = vmatprep.mubr.bf16.mxu0 %v4982_v23 }
 0x32c   : > { %v9299_v46 = vadd.f32 %v9298_v27, %v9297_v52  ;;  %v3960_v9 = vpop.permute.xlu0 %3959  ;;  %v9300_v36 = vpop.f32.mrb[82].mxu1  ;;  %v4988_v52 = vld [vmem:[#allocation4 + $0x100] sm:$0xff] }
 0x32d   : > { %3993 = vst.msk [vmem:[#allocation4 + $0x328] sm:$0xff] %vm2632_vm5, %v3960_v9  ;;  %v3257_v28 = vpop.permute.xlu1 %3256  ;;  %v9203_v12 = vpop.f32.mrb[92].mxu0 }
 0x32e   : > { %v12273_v58 = vadd.f32 %v9299_v46, %v5590_v33  ;;  %3289 = vst.msk [vmem:[#allocation4 + $0x358] sm:$0xff] %vm2374_vm3, %v3257_v28  ;;  %v9301_v14 = vpop.f32.mrb[83].mxu1  ;;  %4724 = vrot.lane.b32.xlu0 %v11715_v32, %s10328_s29  ;;  %v9204_v57 = vpop.f32.mrb[93].mxu0  ;;  %v4981_v32 = vld [vmem:[#allocation4 + $0xc8] sm:$0xff] }
 0x32f   : > { %v9302_v62 = vadd.f32 %v9301_v14, %v9300_v36  ;;  %4405 = vrot.lane.b32.xlu1 %v11729_v25, %s10329_s13  ;;  %v12282_v41 = vadd.f32 %v9204_v57, %v9203_v12  ;;  %v9206_v63 = vpop.f32.mrb[94].mxu0  ;;  %v4989_v25 = vld [vmem:[#allocation4 + $0x108] sm:$0xff]  ;;  %v5606_v12 = vadd.f32 %v12256_v39, %v12032_v8  ;;  %v4664_v57 = vld [vmem:[#allocation2 + $0x1b2] sm:$0xff] }
 0x330   : > { %v4583_v29 = vpop.permute.xlu0 %4582  ;;  %v9207_v31 = vpop.f32.mrb[95].mxu0 }
 0x331   : > { %v12284_v37 = vadd.f32 %v9302_v62, %v5593_v24  ;;  %4625 = vst.msk [vmem:[#allocation4 + $0x140] sm:$0xff] %vm2374_vm3, %v4583_v29  ;;  %v3385_v51 = vpop.permute.xlu1 %3384  ;;  %v12287_v10 = vadd.f32 %v9207_v31, %v9206_v63  ;;  %v4665_v24 = vld [vmem:[#allocation2 + $0x1ba] sm:$0xff]  ;;  %v5609_v31 = vadd.f32 %v12261_v7, %v12032_v8 }
 0x332   : > { %3417 = vst.msk [vmem:[#allocation4 + $0x358] sm:$0xff] %vm2503_vm4, %v3385_v51  ;;  %4852 = vrot.lane.b32.xlu0 %v11722_v38, %s10329_s13  ;;  %v9303_v47 = vpop.f32.mrb[84].mxu1  ;;  %5902 = vmatmul.mubr.bf16.gmra.mrb[140].mxu0 %v4981_v32  ;;  %v4490_v38 = vpack.c.bf16 %v4473_v4, %v4472_v11  ;;  %v4682_v39 = vpack.c.bf16 %v4665_v24, %v4664_v57 }
 0x333   : > { %4151 = vrot.lane.b32.xlu1 %v11863_v54, %s10330_s15  ;;  %v9304_v16 = vpop.f32.mrb[85].mxu1  ;;  %5909 = vmatprep.mubr.bf16.mxu0 %v4989_v25  ;;  %v4995_v25 = vld [vmem:[#allocation4 + $0x138] sm:$0xff] }
 0x334   : > { %v9305_v0 = vadd.f32 %v9304_v16, %v9303_v47  ;;  %v4711_v43 = vpop.permute.xlu0 %4710  ;;  %v9306_v61 = vpop.f32.mrb[86].mxu1  ;;  %v5057_v17 = vld [vmem:[#allocation4 + $0x328] sm:$0xff]  ;;  %4506 = vst.msk [vmem:[#allocation4 + $0x338] sm:$0xff] %vm385_vm1, %v4490_v38  ;;  %v4793_v16 = vld [vmem:[#allocation2 + $0x1bb] sm:$0xff] }
 0x335   : > { %4753 = vst.msk [vmem:[#allocation4 + $0x140] sm:$0xff] %vm2503_vm4, %v4711_v43  ;;  %v3513_v49 = vpop.permute.xlu1 %3512  ;;  %v9307_v44 = vpop.f32.mrb[87].mxu1  ;;  %5828 = vmatprep.mubr.bf16.mxu1 %v5057_v17  ;;  %v4810_v11 = vpack.c.bf16 %v4793_v16, %v4792_v19  ;;  %v4962_v19 = vld [vmem:[#allocation4 + $0x30] sm:$0xff] }
 0x336   : > { %v12299_v13 = vadd.f32 %v9305_v0, %v5598_v34  ;;  %3545 = vst.msk [vmem:[#allocation4 + $0x358] sm:$0xff] %vm2632_vm5, %v3513_v49  ;;  %v9308_v20 = vadd.f32 %v9307_v44, %v9306_v61  ;;  %4598 = vrot.lane.b32.xlu0 %v11873_v3, %s10330_s15  ;;  %5829 = vmatmul.mubr.bf16.gmra.mrb[120].mxu1 %v5056_v2 }
 0x337   : > { %4279 = vrot.lane.b32.xlu1 %v4233_v59, %s10328_s29 }
 0x338   : > { %v12306_v56 = vadd.f32 %v9308_v20, %v5601_v5  ;;  %v4839_v22 = vpop.permute.xlu0 %4838 }
 0x339   : > { %4881 = vst.msk [vmem:[#allocation4 + $0x140] sm:$0xff] %vm2632_vm5, %v4839_v22  ;;  %v4136_v35 = vpop.permute.xlu1 %4135  ;;  %v9209_v48 = vpop.f32.mrb[96].mxu0 }
 0x33a   : > { %4177 = vst.msk [vmem:[#allocation4 + $0x170] sm:$0xff] %vm2374_vm3, %v4136_v35  ;;  %4726 = vrot.lane.b32.xlu0 %v11863_v54, %s10328_s29  ;;  %v9210_v23 = vpop.f32.mrb[97].mxu0  ;;  %5910 = vmatmul.mubr.bf16.gmra.mrb[144].mxu0 %v4988_v52 }
 0x33b   : > { %4407 = vrot.lane.b32.xlu1 %v11886_v1, %s10329_s13  ;;  %v12314_v3 = vadd.f32 %v9210_v23, %v9209_v48  ;;  %v9212_v27 = vpop.f32.mrb[98].mxu0  ;;  %v12352_v23 = vld [vmem:[%s13458_s4] ss:$0 sm:$0xff] }
 0x33c   : > { %v3705_v33 = vpop.permute.xlu0 %3704  ;;  %v9213_v46 = vpop.f32.mrb[99].mxu0 }
 0x33d   : > { %3737 = vst.msk [vmem:[#allocation4 + $0x360] sm:$0xff] %vm2374_vm3, %v3705_v33  ;;  %v4264_v9 = vpop.permute.xlu1 %4263  ;;  %v12317_v36 = vadd.f32 %v9213_v46, %v9212_v27  ;;  %v9309_v28 = vpop.f32.mrb[88].mxu1  ;;  %v5063_v61 = vld [vmem:[#allocation4 + $0x358] sm:$0xff]  ;;  %v5614_v27 = vadd.f32 %v12352_v23, %v12282_v41 }
 0x33e   : > { %4305 = vst.msk [vmem:[#allocation4 + $0x170] sm:$0xff] %vm2503_vm4, %v4264_v9  ;;  %4854 = vrot.lane.b32.xlu0 %v4233_v59, %s10329_s13  ;;  %v9310_v54 = vpop.f32.mrb[89].mxu1 }
 0x33f   : > { %v9311_v1 = vadd.f32 %v9310_v54, %v9309_v28  ;;  %v9312_v14 = vpop.f32.mrb[90].mxu1 }
 0x340   : > { %v3833_v62 = vpop.permute.xlu0 %3832  ;;  %v9313_v63 = vpop.f32.mrb[91].mxu1  ;;  %v4996_v29 = vld [vmem:[#allocation4 + $0x140] sm:$0xff] }
 0x341   : > { %v12325_v51 = vadd.f32 %v9311_v1, %v5606_v12  ;;  %3865 = vst.msk [vmem:[#allocation4 + $0x360] sm:$0xff] %vm2503_vm4, %v3833_v62  ;;  %v9314_v32 = vadd.f32 %v9313_v63, %v9312_v14  ;;  %v4392_v47 = vpop.permute.xlu1 %4391  ;;  %5917 = vmatprep.mubr.bf16.mxu0 %v4996_v29  ;;  %v5617_v12 = vadd.f32 %v12352_v23, %v12287_v10 }
 0x342   : > { %4433 = vst.msk [vmem:[#allocation4 + $0x170] sm:$0xff] %vm2632_vm5, %v4392_v47  ;;  %4600 = vrot.lane.b32.xlu0 %v12070_v42, %s10330_s15  ;;  %5918 = vmatmul.mubr.bf16.gmra.mrb[148].mxu0 %v4995_v25  ;;  %v10140_v25 = vld [vmem:[%s13457_s3 + $0x188] sm:$0xff]  }
 0x343   : > { %v12331_v53 = vadd.f32 %v9314_v32, %v5609_v31 }
 0x344   : > { %v3962_v8 = vpop.permute.xlu0 %3961 }
 0x345   : > { %3994 = vst.msk [vmem:[#allocation4 + $0x360] sm:$0xff] %vm2632_vm5, %v3962_v8  ;;  %v4154_v7 = vpop.permute.xlu1 %4153 }
 0x346   : > { %4186 = vst.msk [vmem:[#allocation4 + $0x368] sm:$0xff] %vm2374_vm3, %v4154_v7  ;;  %4728 = vrot.lane.b32.xlu0 %v4682_v39, %s10328_s29 }
 0x348   : > { %v4585_v4 = vpop.permute.xlu0 %4584 }
 0x349   : > { %4626 = vst.msk [vmem:[#allocation4 + $0x178] sm:$0xff] %vm2374_vm3, %v4585_v4  ;;  %v4282_v34 = vpop.permute.xlu1 %4281  ;;  %v5002_v24 = vld [vmem:[#allocation4 + $0x170] sm:$0xff]  ;;  %v4969_v4 = vld [vmem:[#allocation4 + $0x68] sm:$0xff] }
 0x34a   : > { %4314 = vst.msk [vmem:[#allocation4 + $0x368] sm:$0xff] %vm2503_vm4, %v4282_v34  ;;  %4856 = vrot.lane.b32.xlu0 %v4810_v11, %s10329_s13 }
 0x34c   : > { %v4713_v42 = vpop.permute.xlu0 %4712  ;;  %v5064_v0 = vld [vmem:[#allocation4 + $0x360] sm:$0xff] }
 0x34d   : > { %4754 = vst.msk [vmem:[#allocation4 + $0x178] sm:$0xff] %vm2503_vm4, %v4713_v42  ;;  %v4410_v43 = vpop.permute.xlu1 %4409  ;;  %5836 = vmatprep.mubr.bf16.mxu1 %v5064_v0 }
 0x34e   : > { %4442 = vst.msk [vmem:[#allocation4 + $0x368] sm:$0xff] %vm2632_vm5, %v4410_v43  ;;  %5837 = vmatmul.mubr.bf16.gmra.mrb[124].mxu1 %v5063_v61 }
 0x350   : > { %v4841_v17 = vpop.permute.xlu0 %4840 }
 0x351   : > { %4882 = vst.msk [vmem:[#allocation4 + $0x178] sm:$0xff] %vm2632_vm5, %v4841_v17  ;;  %v4138_v38 = vpop.permute.xlu1 %4137  ;;  %v9215_v49 = vpop.f32.mrb[100].mxu0 }
 0x352   : > { %4178 = vst.msk [vmem:[#allocation4 + $0x1a8] sm:$0xff] %vm2374_vm3, %v4138_v38  ;;  %v9216_v44 = vpop.f32.mrb[101].mxu0  ;;  %v4990_v38 = vld [vmem:[#allocation4 + $0x110] sm:$0xff] }
 0x353   : > { %v12343_v59 = vadd.f32 %v9216_v44, %v9215_v49  ;;  %v9218_v2 = vpop.f32.mrb[102].mxu0 }
 0x354   : > { %v4603_v5 = vpop.permute.xlu0 %4602  ;;  %v9219_v20 = vpop.f32.mrb[103].mxu0 }
 0x355   : > { %4635 = vst.msk [vmem:[#allocation4 + $0x370] sm:$0xff] %vm2374_vm3, %v4603_v5  ;;  %v4266_v22 = vpop.permute.xlu1 %4265  ;;  %v12346_v35 = vadd.f32 %v9219_v20, %v9218_v2  ;;  %v9315_v48 = vpop.f32.mrb[92].mxu1  ;;  %v5065_v31 = vld [vmem:[#allocation4 + $0x368] sm:$0xff] }
 0x356   : > { %4306 = vst.msk [vmem:[#allocation4 + $0x1a8] sm:$0xff] %vm2503_vm4, %v4266_v22  ;;  %v9316_v52 = vpop.f32.mrb[93].mxu1 }
 0x357   : > { %v9317_v33 = vadd.f32 %v9316_v52, %v9315_v48  ;;  %v9318_v46 = vpop.f32.mrb[94].mxu1  ;;  %v4997_v48 = vld [vmem:[#allocation4 + $0x148] sm:$0xff] }
 0x358   : > { %v4731_v9 = vpop.permute.xlu0 %4730  ;;  %v9319_v28 = vpop.f32.mrb[95].mxu1  ;;  %v5003_v54 = vld [vmem:[#allocation4 + $0x178] sm:$0xff] }
 0x359   : > { %v12358_v1 = vadd.f32 %v9317_v33, %v5614_v27  ;;  %4763 = vst.msk [vmem:[#allocation4 + $0x370] sm:$0xff] %vm2503_vm4, %v4731_v9  ;;  %v9320_v14 = vadd.f32 %v9319_v28, %v9318_v46  ;;  %v4394_v57 = vpop.permute.xlu1 %4393  ;;  %5925 = vmatprep.mubr.bf16.mxu0 %v5003_v54 }
 0x35a   : > { %4434 = vst.msk [vmem:[#allocation4 + $0x1a8] sm:$0xff] %vm2632_vm5, %v4394_v57  ;;  %5926 = vmatmul.mubr.bf16.gmra.mrb[152].mxu0 %v5002_v24 }
 0x35b   : > { %v12362_v41 = vadd.f32 %v9320_v14, %v5617_v12 }
 0x35c   : > { %v4859_v62 = vpop.permute.xlu0 %4858 }
 0x35d   : > { %4891 = vst.msk [vmem:[#allocation4 + $0x370] sm:$0xff] %vm2632_vm5, %v4859_v62  ;;  %v4140_v63 = vpop.permute.xlu1 %4139  ;;  %v5011_v62 = vld [vmem:[#allocation4 + $0x1b8] sm:$0xff] }
 0x35e   : > { %4179 = vst.msk [vmem:[#allocation4 + $0x1e0] sm:$0xff] %vm2374_vm3, %v4140_v63 }
 0x360   : > { %v4587_v10 = vpop.permute.xlu0 %4586 }
 0x361   : > { %4627 = vst.msk [vmem:[#allocation4 + $0x1b0] sm:$0xff] %vm2374_vm3, %v4587_v10  ;;  %v4268_v29 = vpop.permute.xlu1 %4267  ;;  %v5009_v43 = vld [vmem:[#allocation4 + $0x1a8] sm:$0xff]  ;;  %v5018_v10 = vld [vmem:[#allocation4 + $0x1f0] sm:$0xff] }
 0x362   : > { %4307 = vst.msk [vmem:[#allocation4 + $0x1e0] sm:$0xff] %vm2503_vm4, %v4268_v29  ;;  %v5622_v29 = vadd.f32 %v12352_v23, %v12314_v3 }
 0x364   : > { %v4715_v32 = vpop.permute.xlu0 %4714  ;;  %v5066_v47 = vld [vmem:[#allocation4 + $0x370] sm:$0xff] }
 0x365   : > { %4755 = vst.msk [vmem:[#allocation4 + $0x1b0] sm:$0xff] %vm2503_vm4, %v4715_v32  ;;  %v4396_v39 = vpop.permute.xlu1 %4395  ;;  %5997 = vmatprep.mubr.bf16.mxu1 %v5066_v47 }
 0x366   : > { %4435 = vst.msk [vmem:[#allocation4 + $0x1e0] sm:$0xff] %vm2632_vm5, %v4396_v39  ;;  %5998 = vmatmul.mubr.bf16.vlgmr.msra.gmra.mrb[128].mxu1 %v5065_v31 }
 0x367   : > { %9887 = vmatpush3.bf16.msra.mxu1 %v12133_v45  ;;  %9890 = vmatprep.mubr.msk.bf16.mxu1 %vm385_vm1, %v4962_v19  ;;  %v4976_v45 = vld [vmem:[#allocation4 + $0xa0] sm:$0xff]  ;;  %v5625_v19 = vadd.f32 %v12352_v23, %v12317_v36 }
 0x368   : > { %v4843_v16 = vpop.permute.xlu0 %4842  ;;  %9888 = vmatprep.subr.bf16.mxu1 %v10140_v25  ;;  %v5032_v36 = vld [vmem:[#allocation4 + $0x260] sm:$0xff] }
 0x369   : > { %4883 = vst.msk [vmem:[#allocation4 + $0x1b0] sm:$0xff] %vm2632_vm5, %v4843_v16  ;;  %v4142_v8 = vpop.permute.xlu1 %4141 }
 0x36a   : > { %4180 = vst.msk [vmem:[#allocation4 + $0x218] sm:$0xff] %vm2374_vm3, %v4142_v8 }
 0x36b   : > { %9889 = vmatpush3.bf16.msra.mxu1 %v10140_v25 }
 0x36c   : > { %v4589_v7 = vpop.permute.xlu0 %4588 }
 0x36d   : > { %4628 = vst.msk [vmem:[#allocation4 + $0x1e8] sm:$0xff] %vm2374_vm3, %v4589_v7  ;;  %v4270_v11 = vpop.permute.xlu1 %4269  ;;  %v5016_v22 = vld [vmem:[#allocation4 + $0x1e0] sm:$0xff] }
 0x36e   : > { %4308 = vst.msk [vmem:[#allocation4 + $0x218] sm:$0xff] %vm2503_vm4, %v4270_v11  ;;  %9891 = vmatmul.mubr.msk.bf16.vlgmr.msra.gmra.mrb[132].mxu1 %vm385_vm1, %v4969_v4 }
 0x36f   : > { %9894 = vmatprep.mubr.msk.bf16.mxu1 %vm385_vm1, %v4976_v45 }
 0x370   : > { %v4717_v34 = vpop.permute.xlu0 %4716  ;;  %v5010_v42 = vld [vmem:[#allocation4 + $0x1b0] sm:$0xff] }
 0x371   : > { %4756 = vst.msk [vmem:[#allocation4 + $0x1e8] sm:$0xff] %vm2503_vm4, %v4717_v34  ;;  %v4398_v0 = vpop.permute.xlu1 %4397  ;;  %5933 = vmatprep.mubr.bf16.mxu0 %v5010_v42  ;;  %v5025_v34 = vld [vmem:[#allocation4 + $0x228] sm:$0xff] }
 0x372   : > { %4436 = vst.msk [vmem:[#allocation4 + $0x218] sm:$0xff] %vm2632_vm5, %v4398_v0  ;;  %5934 = vmatmul.mubr.bf16.gmra.mrb[156].mxu0 %v5009_v43 }
 0x374   : > { %v4845_v61 = vpop.permute.xlu0 %4844 }
 0x375   : > { %4884 = vst.msk [vmem:[#allocation4 + $0x1e8] sm:$0xff] %vm2632_vm5, %v4845_v61  ;;  %v4144_v17 = vpop.permute.xlu1 %4143 }
 0x376   : > { %4181 = vst.msk [vmem:[#allocation4 + $0x250] sm:$0xff] %vm2374_vm3, %v4144_v17  ;;  %9895 = vmatmul.mubr.msk.bf16.gmra.mrb[136].mxu1 %vm385_vm1, %v12164_v40  ;;  %v5004_v40 = vld [vmem:[#allocation4 + $0x180] sm:$0xff] }
 0x377   : > { %9898 = vmatprep.mubr.msk.bf16.mxu1 %vm385_vm1, %v4990_v38 }
 0x378   : > { %v4591_v49 = vpop.permute.xlu0 %4590 }
 0x379   : > { %4629 = vst.msk [vmem:[#allocation4 + $0x220] sm:$0xff] %vm2374_vm3, %v4591_v49  ;;  %v4272_v44 = vpop.permute.xlu1 %4271  ;;  %v5023_v11 = vld [vmem:[#allocation4 + $0x218] sm:$0xff] }
 0x37a   : > { %4309 = vst.msk [vmem:[#allocation4 + $0x250] sm:$0xff] %vm2503_vm4, %v4272_v44  ;;  %v5039_v49 = vld [vmem:[#allocation4 + $0x298] sm:$0xff]  ;;  %v5046_v44 = vld [vmem:[#allocation4 + $0x2d0] sm:$0xff] }
 0x37c   : > { %v4719_v2 = vpop.permute.xlu0 %4718  ;;  %v5017_v5 = vld [vmem:[#allocation4 + $0x1e8] sm:$0xff] }
 0x37d   : > { %4757 = vst.msk [vmem:[#allocation4 + $0x220] sm:$0xff] %vm2503_vm4, %v4719_v2  ;;  %v4400_v20 = vpop.permute.xlu1 %4399  ;;  %5941 = vmatprep.mubr.bf16.mxu0 %v5017_v5 }
 0x37e   : > { %4437 = vst.msk [vmem:[#allocation4 + $0x250] sm:$0xff] %vm2632_vm5, %v4400_v20  ;;  %5942 = vmatmul.mubr.bf16.gmra.mrb[160].mxu0 %v5016_v22  ;;  %9899 = vmatmul.mubr.msk.bf16.gmra.mrb[140].mxu1 %vm385_vm1, %v4997_v48  ;;  %v5060_v22 = vld [vmem:[#allocation4 + $0x340] sm:$0xff] }
 0x37f   : > { %9902 = vmatprep.mubr.msk.bf16.mxu1 %vm385_vm1, %v5004_v40  ;;  %v5053_v40 = vld [vmem:[#allocation4 + $0x308] sm:$0xff] }
 0x380   : > { %v4847_v52 = vpop.permute.xlu0 %4846 }
 0x381   : > { %4885 = vst.msk [vmem:[#allocation4 + $0x220] sm:$0xff] %vm2632_vm5, %v4847_v52  ;;  %v4146_v27 = vpop.permute.xlu1 %4145  ;;  %v9221_v33 = vpop.f32.mrb[104].mxu0 }
 0x382   : > { %4182 = vst.msk [vmem:[#allocation4 + $0x288] sm:$0xff] %vm2374_vm3, %v4146_v27  ;;  %v9222_v46 = vpop.f32.mrb[105].mxu0 }
 0x383   : > { %v12396_v9 = vadd.f32 %v9222_v46, %v9221_v33  ;;  %v9224_v28 = vpop.f32.mrb[106].mxu0 }
 0x384   : > { %v4593_v54 = vpop.permute.xlu0 %4592  ;;  %v9225_v12 = vpop.f32.mrb[107].mxu0 }
 0x385   : > { %4630 = vst.msk [vmem:[#allocation4 + $0x258] sm:$0xff] %vm2374_vm3, %v4593_v54  ;;  %v4274_v14 = vpop.permute.xlu1 %4273  ;;  %v12399_v57 = vadd.f32 %v9225_v12, %v9224_v28  ;;  %v9321_v24 = vpop.f32.mrb[96].mxu1  ;;  %v5030_v38 = vld [vmem:[#allocation4 + $0x250] sm:$0xff]  ;;  %v5067_v28 = vld [vmem:[#allocation4 + $0x378] sm:$0xff] }
 0x386   : > { %4310 = vst.msk [vmem:[#allocation4 + $0x288] sm:$0xff] %vm2503_vm4, %v4274_v14  ;;  %v9322_v63 = vpop.f32.mrb[97].mxu1  ;;  %9903 = vmatmul.mubr.msk.bf16.gmra.mrb[144].mxu1 %vm385_vm1, %v5011_v62 }
 0x387   : > { %v9323_v31 = vadd.f32 %v9322_v63, %v9321_v24  ;;  %v9324_v32 = vpop.f32.mrb[98].mxu1  ;;  %9906 = vmatprep.mubr.msk.bf16.mxu1 %vm385_vm1, %v5018_v10 }
 0x388   : > { %v4721_v47 = vpop.permute.xlu0 %4720  ;;  %v9325_v25 = vpop.f32.mrb[99].mxu1  ;;  %v5024_v39 = vld [vmem:[#allocation4 + $0x220] sm:$0xff] }
 0x389   : > { %v12408_v16 = vadd.f32 %v9323_v31, %v5622_v29  ;;  %4758 = vst.msk [vmem:[#allocation4 + $0x258] sm:$0xff] %vm2503_vm4, %v4721_v47  ;;  %v9326_v8 = vadd.f32 %v9325_v25, %v9324_v32  ;;  %v4402_v7 = vpop.permute.xlu1 %4401  ;;  %5949 = vmatprep.mubr.bf16.mxu0 %v5024_v39 }
 0x38a   : > { %4438 = vst.msk [vmem:[#allocation4 + $0x288] sm:$0xff] %vm2632_vm5, %v4402_v7  ;;  %5950 = vmatmul.mubr.bf16.gmra.mrb[164].mxu0 %v5023_v11  ;;  %v5630_v11 = vadd.f32 %v12352_v23, %v12343_v59 }
 0x38b   : > { %v12412_v3 = vadd.f32 %v9326_v8, %v5625_v19 }
 0x38c   : > { %v4849_v4 = vpop.permute.xlu0 %4848 }
 0x38d   : > { %4886 = vst.msk [vmem:[#allocation4 + $0x258] sm:$0xff] %vm2632_vm5, %v4849_v4  ;;  %v4148_v45 = vpop.permute.xlu1 %4147 }
 0x38e   : > { %4183 = vst.msk [vmem:[#allocation4 + $0x2c0] sm:$0xff] %vm2374_vm3, %v4148_v45  ;;  %9907 = vmatmul.mubr.msk.bf16.gmra.mrb[148].mxu1 %vm385_vm1, %v5025_v34 }
 0x38f   : > { %9910 = vmatprep.mubr.msk.bf16.mxu1 %vm385_vm1, %v5032_v36 }
 0x390   : > { %v4595_v42 = vpop.permute.xlu0 %4594 }
 0x391   : > { %4631 = vst.msk [vmem:[#allocation4 + $0x290] sm:$0xff] %vm2374_vm3, %v4595_v42  ;;  %v4276_v0 = vpop.permute.xlu1 %4275  ;;  %v5037_v46 = vld [vmem:[#allocation4 + $0x288] sm:$0xff]  ;;  %v5633_v42 = vadd.f32 %v12352_v23, %v12346_v35 }
 0x392   : > { %4311 = vst.msk [vmem:[#allocation4 + $0x2c0] sm:$0xff] %vm2503_vm4, %v4276_v0 }
 0x394   : > { %v4723_v43 = vpop.permute.xlu0 %4722  ;;  %v5031_v61 = vld [vmem:[#allocation4 + $0x258] sm:$0xff] }
 0x395   : > { %4759 = vst.msk [vmem:[#allocation4 + $0x290] sm:$0xff] %vm2503_vm4, %v4723_v43  ;;  %v4404_v17 = vpop.permute.xlu1 %4403  ;;  %5957 = vmatprep.mubr.bf16.mxu0 %v5031_v61 }
 0x396   : > { %4439 = vst.msk [vmem:[#allocation4 + $0x2c0] sm:$0xff] %vm2632_vm5, %v4404_v17  ;;  %5958 = vmatmul.mubr.bf16.gmra.mrb[168].mxu0 %v5030_v38  ;;  %9911 = vmatmul.mubr.msk.bf16.gmra.mrb[152].mxu1 %vm385_vm1, %v5039_v49 }
 0x397   : > { %9914 = vmatprep.mubr.msk.bf16.mxu1 %vm385_vm1, %v5046_v44 }
 0x398   : > { %v4851_v2 = vpop.permute.xlu0 %4850 }
 0x399   : > { %4887 = vst.msk [vmem:[#allocation4 + $0x290] sm:$0xff] %vm2632_vm5, %v4851_v2  ;;  %v4150_v5 = vpop.permute.xlu1 %4149 }
 0x39a   : > { %4184 = vst.msk [vmem:[#allocation4 + $0x2f8] sm:$0xff] %vm2374_vm3, %v4150_v5 }
 0x39c   : > { %v4597_v20 = vpop.permute.xlu0 %4596 }
 0x39d   : > { %4632 = vst.msk [vmem:[#allocation4 + $0x2c8] sm:$0xff] %vm2374_vm3, %v4597_v20  ;;  %v4278_v48 = vpop.permute.xlu1 %4277  ;;  %v5044_v8 = vld [vmem:[#allocation4 + $0x2c0] sm:$0xff] }
 0x39e   : > { %4312 = vst.msk [vmem:[#allocation4 + $0x2f8] sm:$0xff] %vm2503_vm4, %v4278_v48  ;;  %9915 = vmatmul.mubr.msk.bf16.gmra.mrb[156].mxu1 %vm385_vm1, %v5053_v40 }
 0x39f   : > { %9918 = vmatprep.mubr.msk.bf16.mxu1 %vm385_vm1, %v5060_v22 }
 0x3a0   : > { %v4725_v52 = vpop.permute.xlu0 %4724  ;;  %v5038_v27 = vld [vmem:[#allocation4 + $0x290] sm:$0xff] }
 0x3a1   : > { %4760 = vst.msk [vmem:[#allocation4 + $0x2c8] sm:$0xff] %vm2503_vm4, %v4725_v52  ;;  %v4406_v33 = vpop.permute.xlu1 %4405  ;;  %5965 = vmatprep.mubr.bf16.mxu0 %v5038_v27 }
 0x3a2   : > { %4440 = vst.msk [vmem:[#allocation4 + $0x2f8] sm:$0xff] %vm2632_vm5, %v4406_v33  ;;  %5966 = vmatmul.mubr.bf16.gmra.mrb[172].mxu0 %v5037_v46  ;;  %v6248_v33 = vld [vmem:[#allocation3 + $0x1] sm:$0xff]  ;;  %v12455_v46 = vld [vmem:[#allocation3 + $0x11] sm:$0xff] }
 0x3a4   : > { %v4853_v54 = vpop.permute.xlu0 %4852 }
 0x3a5   : > { %4888 = vst.msk [vmem:[#allocation4 + $0x2c8] sm:$0xff] %vm2632_vm5, %v4853_v54  ;;  %v4152_v12 = vpop.permute.xlu1 %4151  ;;  %v6256_v54 = vpack.c.bf16 %v12455_v46, %v6248_v33 }
 0x3a6   : > { %4185 = vst.msk [vmem:[#allocation4 + $0x330] sm:$0xff] %vm2374_vm3, %v4152_v12  ;;  %9919 = vmatmul.mubr.msk.bf16.gmra.mrb[160].mxu1 %vm385_vm1, %v5067_v28  ;;  %v5638_v12 = vadd.f32 %v12352_v23, %v12396_v9  ;;  %v6280_v9 = vld [vmem:[#allocation3 + $0x2] sm:$0xff] }
 0x3a7   : > { %6264 = vrot.lane.b32.xlu1 %v6256_v54, %s10330_s15 }
 0x3a8   : > { %v4599_v14 = vpop.permute.xlu0 %4598 }
 0x3a9   : > { %4633 = vst.msk [vmem:[#allocation4 + $0x300] sm:$0xff] %vm2374_vm3, %v4599_v14  ;;  %v4280_v24 = vpop.permute.xlu1 %4279  ;;  %v9227_v62 = vpop.f32.mrb[108].mxu0  ;;  %v5051_v59 = vld [vmem:[#allocation4 + $0x2f8] sm:$0xff] }
 0x3aa   : > { %4313 = vst.msk [vmem:[#allocation4 + $0x330] sm:$0xff] %vm2503_vm4, %v4280_v24  ;;  %v9228_v63 = vpop.f32.mrb[109].mxu0 }
 0x3ab   : > { %v12437_v10 = vadd.f32 %v9228_v63, %v9227_v62  ;;  %v9230_v29 = vpop.f32.mrb[110].mxu0  ;;  %v5641_v63 = vadd.f32 %v12352_v23, %v12399_v57 }
 0x3ac   : > { %v4727_v31 = vpop.permute.xlu0 %4726  ;;  %v9231_v32 = vpop.f32.mrb[111].mxu0  ;;  %v5045_v47 = vld [vmem:[#allocation4 + $0x2c8] sm:$0xff] }
 0x3ad   : > { %4761 = vst.msk [vmem:[#allocation4 + $0x300] sm:$0xff] %vm2503_vm4, %v4727_v31  ;;  %v4408_v25 = vpop.permute.xlu1 %4407  ;;  %v12440_v39 = vadd.f32 %v9231_v32, %v9230_v29  ;;  %v9327_v19 = vpop.f32.mrb[100].mxu1  ;;  %5973 = vmatprep.mubr.bf16.mxu0 %v5045_v47 }
 0x3ae   : > { %4441 = vst.msk [vmem:[#allocation4 + $0x330] sm:$0xff] %vm2632_vm5, %v4408_v25  ;;  %v9328_v7 = vpop.f32.mrb[101].mxu1  ;;  %5974 = vmatmul.mubr.bf16.gmra.mrb[176].mxu0 %v5044_v8 }
 0x3af   : > { %v9329_v4 = vadd.f32 %v9328_v7, %v9327_v19  ;;  %v9330_v45 = vpop.f32.mrb[102].mxu1 }
 0x3b0   : > { %v4855_v34 = vpop.permute.xlu0 %4854  ;;  %v9331_v36 = vpop.f32.mrb[103].mxu1 }
 0x3b1   : > { %v12447_v0 = vadd.f32 %v9329_v4, %v5630_v11  ;;  %4889 = vst.msk [vmem:[#allocation4 + $0x300] sm:$0xff] %vm2632_vm5, %v4855_v34  ;;  %v9332_v43 = vadd.f32 %v9331_v36, %v9330_v45  ;;  %v12467_v4 = vld [vmem:[#allocation3 + $0x12] sm:$0xff]  ;;  %v6312_v45 = vld [vmem:[#allocation3 + $0x3] sm:$0xff] }
 0x3b2   : > { %v6288_v36 = vpack.c.bf16 %v12467_v4, %v6280_v9 }
 0x3b3   : > { %v12450_v61 = vadd.f32 %v9332_v43, %v5633_v42  ;;  %v12470_v42 = vld [vmem:[#allocation3 + $0x13] sm:$0xff]  ;;  %v5646_v43 = vadd.f32 %v12352_v23, %v12437_v10 }
 0x3b4   : > { %v4601_v17 = vpop.permute.xlu0 %4600  ;;  %6296 = vrot.lane.b32.xlu1 %v6288_v36, %s10328_s29 }
 0x3b5   : > { %4634 = vst.msk [vmem:[#allocation4 + $0x338] sm:$0xff] %vm2374_vm3, %v4601_v17  ;;  %v5058_v2 = vld [vmem:[#allocation4 + $0x330] sm:$0xff] }
 0x3b8   : > { %v4729_v38 = vpop.permute.xlu0 %4728  ;;  %v5052_v49 = vld [vmem:[#allocation4 + $0x300] sm:$0xff] }
 0x3b9   : > { %4762 = vst.msk [vmem:[#allocation4 + $0x338] sm:$0xff] %vm2503_vm4, %v4729_v38  ;;  %5981 = vmatprep.mubr.bf16.mxu0 %v5052_v49  ;;  %v6320_v49 = vpack.c.bf16 %v12470_v42, %v6312_v45 }
 0x3ba   : > { %5982 = vmatmul.mubr.bf16.gmra.mrb[180].mxu0 %v5051_v59 }
 0x3bb   : > { %6328 = vrot.lane.b32.xlu1 %v6320_v49, %s10329_s13 }
 0x3bc   : > { %v4857_v44 = vpop.permute.xlu0 %4856 }
 0x3bd   : > { %4890 = vst.msk [vmem:[#allocation4 + $0x338] sm:$0xff] %vm2632_vm5, %v4857_v44 }
 0x3c4   : > { %v5059_v35 = vld [vmem:[#allocation4 + $0x338] sm:$0xff] }
 0x3c5   : > { %5989 = vmatprep.mubr.bf16.mxu0 %v5059_v35  ;;  %v5649_v35 = vadd.f32 %v12352_v23, %v12440_v39 }
 0x3c6   : > { %5990 = vmatmul.mubr.bf16.gmra.mrb[184].mxu0 %v5058_v2 }
 0x3cd   : > { %v9233_v5 = vpop.f32.mrb[112].mxu0 }
 0x3ce   : > { %v9234_v20 = vpop.f32.mrb[113].mxu0 }
 0x3cf   : > { %v9235_v22 = vadd.f32 %v9234_v20, %v9233_v5  ;;  %v9236_v48 = vpop.f32.mrb[114].mxu0 }
 0x3d0   : > { %v9237_v40 = vpop.f32.mrb[115].mxu0 }
 0x3d1   : > { %v9238_v52 = vadd.f32 %v9237_v40, %v9236_v48  ;;  %v9333_v27 = vpop.f32.mrb[104].mxu1 }
 0x3d2   : > { %v9334_v28 = vpop.f32.mrb[105].mxu1 }
 0x3d3   : > { %v9335_v14 = vadd.f32 %v9334_v28, %v9333_v27  ;;  %v9336_v24 = vpop.f32.mrb[106].mxu1 }
 0x3d4   : > { %v9337_v62 = vpop.f32.mrb[107].mxu1 }
 0x3d5   : > { %v12463_v29 = vadd.f32 %v9335_v14, %v5638_v12  ;;  %v9338_v31 = vadd.f32 %v9337_v62, %v9336_v24  ;;  %v9239_v32 = vpop.f32.mrb[116].mxu0  ;;  %v5654_v12 = vadd.f32 %v12352_v23, %v9235_v22 }
 0x3d6   : > { %v9240_v47 = vpop.f32.mrb[117].mxu0 }
 0x3d7   : > { %v12465_v25 = vadd.f32 %v9338_v31, %v5641_v63  ;;  %v9241_v19 = vadd.f32 %v9240_v47, %v9239_v32  ;;  %v9242_v8 = vpop.f32.mrb[118].mxu0  ;;  %v5657_v63 = vadd.f32 %v12352_v23, %v9238_v52 }
 0x3d8   : > { %v9243_v7 = vpop.f32.mrb[119].mxu0 }
 0x3d9   : > { %v9244_v11 = vadd.f32 %v9243_v7, %v9242_v8 }
 0x3da   : > { %v9339_v34 = vpop.f32.mrb[108].mxu1 }
 0x3db   : > { %v9340_v57 = vpop.f32.mrb[109].mxu1 }
 0x3dc   : > { %v9341_v17 = vadd.f32 %v9340_v57, %v9339_v34  ;;  %v9342_v38 = vpop.f32.mrb[110].mxu1 }
 0x3dd   : > { %v9245_v59 = vpop.f32.mrb[120].mxu0  ;;  %v9343_v44 = vpop.f32.mrb[111].mxu1 }
 0x3de   : > { %v12478_v2 = vadd.f32 %v9341_v17, %v5646_v43  ;;  %v9344_v5 = vadd.f32 %v9343_v44, %v9342_v38  ;;  %v9246_v20 = vpop.f32.mrb[121].mxu0  ;;  %v5662_v44 = vadd.f32 %v12352_v23, %v9241_v19 }
 0x3df   : > { %v12480_v48 = vadd.f32 %v9246_v20, %v9245_v59  ;;  %v9248_v40 = vpop.f32.mrb[122].mxu0 }
 0x3e0   : > { %v12482_v27 = vadd.f32 %v9344_v5, %v5649_v35  ;;  %v9249_v10 = vpop.f32.mrb[123].mxu0 }
 0x3e1   : > { %v12485_v33 = vadd.f32 %v9249_v10, %v9248_v40  ;;  %v5665_v10 = vadd.f32 %v12352_v23, %v9244_v11 }
 0x3e2   : > { %v9345_v28 = vpop.f32.mrb[112].mxu1 }
 0x3e3   : > { %v9346_v54 = vpop.f32.mrb[113].mxu1 }
 0x3e4   : > { %v9347_v14 = vadd.f32 %v9346_v54, %v9345_v28  ;;  %v9348_v39 = vpop.f32.mrb[114].mxu1 }
 0x3e5   : > { %v9251_v24 = vpop.f32.mrb[124].mxu0  ;;  %v9349_v62 = vpop.f32.mrb[115].mxu1 }
 0x3e6   : > { %v12489_v31 = vadd.f32 %v9347_v14, %v5654_v12  ;;  %v9350_v32 = vadd.f32 %v9349_v62, %v9348_v39  ;;  %v9252_v47 = vpop.f32.mrb[125].mxu0 }
 0x3e7   : > { %v12491_v8 = vadd.f32 %v9252_v47, %v9251_v24  ;;  %v9254_v7 = vpop.f32.mrb[126].mxu0 }
 0x3e8   : > { %v12493_v9 = vadd.f32 %v9350_v32, %v5657_v63  ;;  %v9255_v45 = vpop.f32.mrb[127].mxu0 }
 0x3e9   : > { %v12495_v34 = vadd.f32 %v9255_v45, %v9254_v7 }
 0x3ed   : > { %v9385_v36 = vpop.f32.mrb[128].mxu0 }
 0x3ee   : > { %v9386_v22 = vpop.f32.mrb[129].mxu0 }
 0x3ef   : > { %v9387_v57 = vadd.f32 %v9386_v22, %v9385_v36  ;;  %v9388_v43 = vpop.f32.mrb[130].mxu0 }
 0x3f0   : > { %v9389_v17 = vpop.f32.mrb[131].mxu0 }
 0x3f1   : > { %v9390_v38 = vadd.f32 %v9389_v17, %v9388_v43  ;;  %v9351_v49 = vpop.f32.mrb[116].mxu1  ;;  %v12498_v52 = vadd.f32 %v9387_v57, %v12044_v21 }
 0x3f2   : > { %v9352_v59 = vpop.f32.mrb[117].mxu1 }
 0x3f3   : > { %v9353_v35 = vadd.f32 %v9352_v59, %v9351_v49  ;;  %v9354_v5 = vpop.f32.mrb[118].mxu1  ;;  %v12502_v20 = vadd.f32 %v9390_v38, %v12049_v55 }
 0x3f4   : > { %v9355_v40 = vpop.f32.mrb[119].mxu1 }
 0x3f5   : > { %v12505_v28 = vadd.f32 %v9353_v35, %v5662_v44  ;;  %v9356_v54 = vadd.f32 %v9355_v40, %v9354_v5  ;;  %v9391_v12 = vpop.f32.mrb[132].mxu0  ;;  %v5670_v5 = vadd.f32 %v12352_v23, %v12480_v48 }
 0x3f6   : > { %v9392_v14 = vpop.f32.mrb[133].mxu0 }
 0x3f7   : > { %v12507_v39 = vadd.f32 %v9356_v54, %v5665_v10  ;;  %v9393_v21 = vadd.f32 %v9392_v14, %v9391_v12  ;;  %v9394_v24 = vpop.f32.mrb[134].mxu0  ;;  %v5673_v54 = vadd.f32 %v12352_v23, %v12485_v33 }
 0x3f8   : > { %v9395_v62 = vpop.f32.mrb[135].mxu0 }
 0x3f9   : > { %v9396_v63 = vadd.f32 %v9395_v62, %v9394_v24  ;;  %v12510_v19 = vadd.f32 %v9393_v21, %v12118_v60 }
 0x3fb   : > { %v12513_v55 = vadd.f32 %v9396_v63, %v12123_v6 }
 0x3fd   : > { %v9397_v32 = vpop.f32.mrb[136].mxu0 }
 0x3fe   : > { %v9398_v47 = vpop.f32.mrb[137].mxu0 }
 0x3ff   : > { %v9399_v11 = vadd.f32 %v9398_v47, %v9397_v32  ;;  %v9400_v7 = vpop.f32.mrb[138].mxu0 }
 0x400   : > { %v9401_v45 = vpop.f32.mrb[139].mxu0 }
 0x401   : > { %v9402_v36 = vadd.f32 %v9401_v45, %v9400_v7  ;;  %v12516_v22 = vadd.f32 %v9399_v11, %v12224_v30 }
 0x403   : > { %v12519_v57 = vadd.f32 %v9402_v36, %v12230_v18 }
 0x405   : > { %v9403_v43 = vpop.f32.mrb[140].mxu0 }
 0x406   : > { %v9404_v17 = vpop.f32.mrb[141].mxu0 }
 0x407   : > { %v9405_v38 = vadd.f32 %v9404_v17, %v9403_v43  ;;  %v9406_v60 = vpop.f32.mrb[142].mxu0 }
 0x408   : > { %v9407_v49 = vpop.f32.mrb[143].mxu0 }
 0x409   : > { %v9408_v59 = vadd.f32 %v9407_v49, %v9406_v60  ;;  %v9357_v6 = vpop.f32.mrb[120].mxu1  ;;  %v12522_v44 = vadd.f32 %v9405_v38, %v12247_v26 }
 0x40a   : > { %v9358_v35 = vpop.f32.mrb[121].mxu1 }
 0x40b   : > { %v9359_v40 = vadd.f32 %v9358_v35, %v9357_v6  ;;  %v9360_v30 = vpop.f32.mrb[122].mxu1  ;;  %v12527_v10 = vadd.f32 %v9408_v59, %v12258_v15  ;;  %v5681_v35 = vadd.f32 %v12352_v23, %v12495_v34 }
 0x40c   : > { %v9361_v18 = vpop.f32.mrb[123].mxu1 }
 0x40d   : > { %v12531_v12 = vadd.f32 %v9359_v40, %v5670_v5  ;;  %v9362_v14 = vadd.f32 %v9361_v18, %v9360_v30  ;;  %v9409_v21 = vpop.f32.mrb[144].mxu0 }
 0x40e   : > { %v9410_v24 = vpop.f32.mrb[145].mxu0 }
 0x40f   : > { %v12533_v26 = vadd.f32 %v9362_v14, %v5673_v54  ;;  %v9411_v62 = vadd.f32 %v9410_v24, %v9409_v21  ;;  %v9412_v63 = vpop.f32.mrb[146].mxu0 }
 0x410   : > { %v9413_v32 = vpop.f32.mrb[147].mxu0 }
 0x411   : > { %v9414_v48 = vadd.f32 %v9413_v32, %v9412_v63  ;;  %v12536_v47 = vadd.f32 %v9411_v62, %v12273_v58  ;;  %v5678_v58 = vadd.f32 %v12352_v23, %v12491_v8 }
 0x413   : > { %v12539_v15 = vadd.f32 %v9414_v48, %v12284_v37 }
 0x415   : > { %v9415_v11 = vpop.f32.mrb[148].mxu0 }
 0x416   : > { %v9416_v7 = vpop.f32.mrb[149].mxu0 }
 0x417   : > { %v9417_v33 = vadd.f32 %v9416_v7, %v9415_v11  ;;  %v9418_v45 = vpop.f32.mrb[150].mxu0  ;;  %v10141_v7 = vld [vmem:[%s13459_s5 + $0x40] sm:$0xff]  }
 0x418   : > { %v9419_v36 = vpop.f32.mrb[151].mxu0  ;;  %9499 = vmatprep.subr.bf16.mxu1 %v10141_v7 }
 0x419   : > { %v9420_v43 = vadd.f32 %v9419_v36, %v9418_v45  ;;  %v12542_v17 = vadd.f32 %v9417_v33, %v12299_v13  ;;  %v6232_v36 = vld [vmem:[#allocation3] sm:$0xff] }
 0x41b   : > { %v12545_v38 = vadd.f32 %v9420_v43, %v12306_v56  ;;  %v10143_v43 = vld [vmem:[%s13459_s5 + $0x48] sm:$0xff]  }
 0x421   : > { %v9363_v60 = vpop.f32.mrb[124].mxu1 }
 0x422   : > { %v9364_v49 = vpop.f32.mrb[125].mxu1 }
 0x423   : > { %v9365_v59 = vadd.f32 %v9364_v49, %v9363_v60  ;;  %v9366_v37 = vpop.f32.mrb[126].mxu1 }
 0x424   : > { %v9367_v6 = vpop.f32.mrb[127].mxu1 }
 0x425   : > { %v5839_v5 = vadd.f32 %v9365_v59, %v5678_v58  ;;  %v9368_v40 = vadd.f32 %v9367_v6, %v9366_v37 }
 0x427   : > { %v5842_v30 = vadd.f32 %v9368_v40, %v5681_v35 }
 0x42d   : > { %v9421_v18 = vpop.f32.mrb[152].mxu0 }
 0x42e   : > { %v9422_v13 = vpop.f32.mrb[153].mxu0 }
 0x42f   : > { %v9423_v54 = vadd.f32 %v9422_v13, %v9421_v18  ;;  %v9424_v14 = vpop.f32.mrb[154].mxu0  ;;  %v6265_v13 = vpop.permute.xlu1 %6264 }
 0x430   : > { %v9425_v56 = vpop.f32.mrb[155].mxu0 }
 0x431   : > { %v9426_v21 = vadd.f32 %v9425_v56, %v9424_v14  ;;  %v12552_v24 = vadd.f32 %v9423_v54, %v12325_v51  ;;  %v12564_v51 = vld [vmem:[#allocation3 + $0x10] sm:$0xff] }
 0x432   : > { %v6240_v58 = vpack.c.bf16 %v12564_v51, %v6232_v36 }
 0x433   : > { %v12555_v8 = vadd.f32 %v9426_v21, %v12331_v53  ;;  %v10142_v53 = vld [vmem:[%s13459_s5] sm:$0xff]  }
 0x434   : > { %9500 = vmatpush3.bf16.msra.mxu1 %v10142_v53  ;;  %6244 = vst.msk [vmem:[#allocation4] sm:$0xff] %vm385_vm1, %v6240_v58  ;;  %v6344_v58 = vld [vmem:[#allocation3 + $0x4] sm:$0xff] }
 0x435   : > { %9501 = vmatprep.subr.bf16.mxu1 %v10143_v43  ;;  %6276 = vst.msk [vmem:[#allocation4] sm:$0xff] %vm2374_vm3, %v6265_v13 }
 0x439   : > { %v9475_v62 = vpop.f32.mrb[128].mxu1 }
 0x43a   : > { %v9476_v63 = vpop.f32.mrb[129].mxu1 }
 0x43b   : > { %v9477_v32 = vadd.f32 %v9476_v63, %v9475_v62  ;;  %v9478_v48 = vpop.f32.mrb[130].mxu1  ;;  %v10146_v63 = vld [vmem:[%s13459_s5 + $0x10] sm:$0xff]  }
 0x43c   : > { %v9479_v23 = vpop.f32.mrb[131].mxu1 }
 0x43d   : > { %v9480_v34 = vadd.f32 %v9479_v23, %v9478_v48  ;;  %v12557_v11 = vadd.f32 %v9477_v32, %v5839_v5  ;;  %v10147_v32 = vld [vmem:[%s13459_s5 + $0x58] sm:$0xff]  }
 0x43f   : > { %v12562_v33 = vadd.f32 %v9480_v34, %v5842_v30 }
 0x441   : > { %v9892_v45 = vpop.f32.mrb[132].mxu1 }
 0x442   : > { %v6049_v60 = vadd.f32 %v9892_v45, %v12510_v19  ;;  %v6040_v49 = vpop.f32.mrb[133].mxu1  ;;  %v10144_v19 = vld [vmem:[%s13459_s5 + $0x8] sm:$0xff]  }
 0x443   : > { %v6041_v59 = vadd.f32 %v6040_v49, %v12498_v52  ;;  %v9893_v37 = vpop.f32.mrb[134].mxu1  ;;  %v10145_v52 = vld [vmem:[%s13459_s5 + $0x50] sm:$0xff]   ;;  %9502 = vmatpush3.bf16.msra.mxu1 %v10144_v19 }
 0x444   : > { %v6052_v6 = vadd.f32 %v9893_v37, %v12513_v55  ;;  %v6043_v35 = vpop.f32.mrb[135].mxu1  ;;  %9503 = vmatprep.subr.bf16.mxu1 %v10145_v52  ;;  %v12607_v49 = vld [vmem:[#allocation3 + $0x14] sm:$0xff] }
 0x445   : > { %v6167_v5 = vmax.f32 %v6041_v59, %v6049_v60  ;;  %v6044_v40 = vadd.f32 %v6043_v35, %v12502_v20  ;;  %v9427_v30 = vpop.f32.mrb[156].mxu0  ;;  %v10148_v60 = vld [vmem:[%s13459_s5 + $0x18] sm:$0xff]   ;;  %v10149_v35 = vld [vmem:[%s13459_s5 + $0x60] sm:$0xff]  }
 0x446   : > { %v9428_v18 = vpop.f32.mrb[157].mxu0 }
 0x447   : > { %6183 = vst.msk [vmem:[#allocation5] sm:$0xff] %vm385_vm1, %v6167_v5  ;;  %v6168_v55 = vmax.f32 %v6044_v40, %v6052_v6  ;;  %v9429_v54 = vadd.f32 %v9428_v18, %v9427_v30  ;;  %v9430_v14 = vpop.f32.mrb[158].mxu0  ;;  %9504 = vmatpush3.bf16.msra.mxu1 %v10146_v63  ;;  %v6352_v6 = vpack.c.bf16 %v12607_v49, %v6344_v58  ;;  %v10150_v5 = vld [vmem:[%s13459_s5 + $0x20] sm:$0xff]  }
 0x448   : > { %v9431_v20 = vpop.f32.mrb[159].mxu0  ;;  %9505 = vmatprep.subr.bf16.mxu1 %v10147_v32 }
 0x449   : > { %6184 = vst.msk [vmem:[#allocation5 + $0x8] sm:$0xff] %vm385_vm1, %v6168_v55  ;;  %v9432_v56 = vadd.f32 %v9431_v20, %v9430_v14  ;;  %v9896_v21 = vpop.f32.mrb[136].mxu1  ;;  %v12588_v62 = vadd.f32 %v9429_v54, %v12358_v1  ;;  %6356 = vst.msk [vmem:[#allocation4 + $0x8] sm:$0xff] %vm385_vm1, %v6352_v6 }
 0x44a   : > { %v6065_v48 = vadd.f32 %v9896_v21, %v12522_v44  ;;  %v6056_v23 = vpop.f32.mrb[137].mxu1  ;;  %v6297_v44 = vpop.permute.xlu1 %6296 }
 0x44b   : > { %v6057_v34 = vadd.f32 %v6056_v23, %v12516_v22  ;;  %v9897_v7 = vpop.f32.mrb[138].mxu1  ;;  %v12599_v45 = vadd.f32 %v9432_v56, %v12362_v41  ;;  %6308 = vst.msk [vmem:[#allocation4] sm:$0xff] %vm2503_vm4, %v6297_v44  ;;  %9506 = vmatpush3.bf16.msra.mxu1 %v10148_v60  ;;  %v10153_v56 = vld [vmem:[%s13459_s5 + $0x100] sm:$0xff]   ;;  %v10154_v23 = vld [vmem:[%s13459_s5 + $0x28] sm:$0xff]  }
 0x44c   : > { %v6068_v1 = vadd.f32 %v9897_v7, %v12527_v10  ;;  %v6059_v53 = vpop.f32.mrb[139].mxu1  ;;  %9507 = vmatprep.subr.bf16.mxu1 %v10149_v35 }
 0x44d   : > { %v6169_v36 = vmax.f32 %v6057_v34, %v6065_v48  ;;  %v6060_v43 = vadd.f32 %v6059_v53, %v12519_v57 }
 0x44e   : > { %v6329_v48 = vpop.permute.xlu1 %6328 }
 0x44f   : > { %6185 = vst.msk [vmem:[#allocation5 + $0x10] sm:$0xff] %vm385_vm1, %v6169_v36  ;;  %v6170_v22 = vmax.f32 %v6060_v43, %v6068_v1  ;;  %9508 = vmatpush3.bf16.msra.mxu1 %v10150_v5  ;;  %v10156_v43 = vld [vmem:[%s13459_s5 + $0x30] sm:$0xff]  }
 0x450   : > { %v6199_v41 = vld [vmem:[#allocation5] ss:$2 sm:$0xff]  ;;  %v6207_v10 = vld [vmem:[#allocation5 + $0x1] ss:$2 sm:$0xff]  ;;  %6340 = vst.msk [vmem:[#allocation4] sm:$0xff] %vm2632_vm5, %v6329_v48 }
 0x451   : > { %6186 = vst.msk [vmem:[#allocation5 + $0x18] sm:$0xff] %vm385_vm1, %v6170_v22  ;;  %v9433_v59 = vpop.f32.mrb[160].mxu0  ;;  %v9900_v57 = vpop.f32.mrb[140].mxu1  ;;  %v6215_v37 = vmax.f32 %v6199_v41, %v6207_v10 }
 0x452   : > { %v6081_v40 = vadd.f32 %v9900_v57, %v12542_v17  ;;  %v9434_v30 = vpop.f32.mrb[161].mxu0  ;;  %v6072_v19 = vpop.f32.mrb[141].mxu1  ;;  %v10151_v17 = vld [vmem:[%s13459_s5 + $0x140] sm:$0xff]  }
 0x453   : > { %v9435_v52 = vadd.f32 %v9434_v30, %v9433_v59  ;;  %v6073_v18 = vadd.f32 %v6072_v19, %v12536_v47  ;;  %v9436_v13 = vpop.f32.mrb[162].mxu0  ;;  %v9901_v55 = vpop.f32.mrb[142].mxu1  ;;  %6224 = vst.msk [vmem:[#allocation3 + $0x22] sm:$0xff] %vm385_vm1, %v6215_v37  ;;  %v10152_v47 = vld [vmem:[%s13459_s5 + $0x68] sm:$0xff]   ;;  %9579 = vmatprep.subr.bf16.mxu0 %v10151_v17 }
 0x454   : > { %v6084_v54 = vadd.f32 %v9901_v55, %v12545_v38  ;;  %v9437_v14 = vpop.f32.mrb[163].mxu0  ;;  %v6075_v20 = vpop.f32.mrb[143].mxu1  ;;  %9509 = vmatprep.subr.bf16.mxu1 %v10152_v47  ;;  %9580 = vmatpush3.bf16.msra.mxu0 %v10153_v56 }
 0x455   : > { %v6171_v21 = vmax.f32 %v6073_v18, %v6081_v40  ;;  %v9438_v63 = vadd.f32 %v9437_v14, %v9436_v13  ;;  %v6076_v32 = vadd.f32 %v6075_v20, %v12539_v15  ;;  %v12634_v38 = vadd.f32 %v9435_v52, %v12408_v16  ;;  %9510 = vmatpush3.bf16.msra.mxu1 %v10154_v23  ;;  %v10155_v16 = vld [vmem:[%s13459_s5 + $0x70] sm:$0xff]  }
 0x456   : > { %9511 = vmatprep.subr.bf16.mxu1 %v10155_v16 }
 0x457   : > { %6187 = vst.msk [vmem:[#allocation5 + $0x20] sm:$0xff] %vm385_vm1, %v6171_v21  ;;  %v6172_v34 = vmax.f32 %v6076_v32, %v6084_v54  ;;  %v12642_v7 = vadd.f32 %v9438_v63, %v12412_v3 }
 0x458   : > { %v6200_v15 = vld [vmem:[#allocation5 + $0x10] ss:$2 sm:$0xff]  ;;  %v6208_v1 = vld [vmem:[#allocation5 + $0x11] ss:$2 sm:$0xff] }
 0x459   : > { %6188 = vst.msk [vmem:[#allocation5 + $0x28] sm:$0xff] %vm385_vm1, %v6172_v34  ;;  %v9904_v53 = vpop.f32.mrb[144].mxu1  ;;  %v6216_v36 = vmax.f32 %v6200_v15, %v6208_v1  ;;  %9512 = vmatpush3.bf16.msra.mxu1 %v10156_v43 }
 0x45a   : > { %v6097_v60 = vadd.f32 %v9904_v53, %v12588_v62  ;;  %v6088_v3 = vpop.f32.mrb[145].mxu1  ;;  %v12652_v44 = vld [vmem:[#allocation3 + $0x24] sm:$0xff] }
 0x45b   : > { %v6362_v22 = vld [vmem:[#allocation3 + $0x20] sm:$0xff]  ;;  %v6089_v41 = vadd.f32 %v6088_v3, %v12552_v24  ;;  %v9905_v10 = vpop.f32.mrb[146].mxu1  ;;  %v6481_v58 = vpack.c.bf16 %v12652_v44, %v12607_v49  ;;  %6225 = vst.msk [vmem:[#allocation3 + $0x32] sm:$0xff] %vm385_vm1, %v6216_v36  ;;  %v10157_v24 = vld [vmem:[%s13459_s5 + $0x78] sm:$0xff]  }
 0x45c   : > { %v6369_v59 = vpack.c.bf16 %v6362_v22, %v12564_v51  ;;  %v6585_v57 = vld [vmem:[#allocation3 + $0x23] sm:$0xff]  ;;  %v6100_v37 = vadd.f32 %v9905_v10, %v12599_v45  ;;  %v6091_v6 = vpop.f32.mrb[147].mxu1  ;;  %v10158_v51 = vld [vmem:[%s13459_s5 + $0x38] sm:$0xff]   ;;  %9513 = vmatprep.subr.bf16.mxu1 %v10157_v24 }
 0x45d   : > { %v6394_v62 = vld [vmem:[#allocation3 + $0x21] sm:$0xff]  ;;  %v6465_v35 = vpack.c.bf16 %v6585_v57, %v12470_v42  ;;  %v6173_v5 = vmax.f32 %v6089_v41, %v6097_v60  ;;  %v6092_v40 = vadd.f32 %v6091_v6, %v12555_v8  ;;  %v9439_v49 = vpop.f32.mrb[164].mxu0  ;;  %6489 = vrot.lane.b32.xlu1 %v6481_v58, %s10330_s15  ;;  %9514 = vmatpush3.bf16.msra.mxu1 %v10158_v51 }
 0x45e   : > { %6377 = vrot.lane.b32.xlu0 %v6369_v59, %s10330_s15  ;;  %v9440_v45 = vpop.f32.mrb[165].mxu0  ;;  %v6401_v8 = vpack.c.bf16 %v6394_v62, %v12455_v46  ;;  %v6426_v52 = vld [vmem:[#allocation3 + $0x22] sm:$0xff] }
 0x45f   : > { %6469 = vst.msk [vmem:[#allocation4 + $0x10] sm:$0xff] %vm385_vm1, %v6465_v35  ;;  %6189 = vst.msk [vmem:[#allocation5 + $0x30] sm:$0xff] %vm385_vm1, %v6173_v5  ;;  %v6174_v42 = vmax.f32 %v6092_v40, %v6100_v37  ;;  %v9441_v30 = vadd.f32 %v9440_v45, %v9439_v49  ;;  %v9442_v19 = vpop.f32.mrb[166].mxu0  ;;  %v6433_v56 = vpack.c.bf16 %v6426_v52, %v12467_v4  ;;  %v10159_v4 = vld [vmem:[%s13459_s5 + $0x148] sm:$0xff]  }
 0x460   : > { %v9443_v18 = vpop.f32.mrb[167].mxu0  ;;  %v6201_v13 = vld [vmem:[#allocation5 + $0x20] ss:$2 sm:$0xff]  ;;  %v6209_v55 = vld [vmem:[#allocation5 + $0x21] ss:$2 sm:$0xff]  ;;  %9581 = vmatprep.subr.bf16.mxu0 %v10159_v4 }
 0x461   : > { %6190 = vst.msk [vmem:[#allocation5 + $0x38] sm:$0xff] %vm385_vm1, %v6174_v42  ;;  %v9444_v54 = vadd.f32 %v9443_v18, %v9442_v19  ;;  %v5952_v14 = vadd.f32 %v9441_v30, %v12447_v0  ;;  %v9908_v20 = vpop.f32.mrb[148].mxu1  ;;  %v6217_v17 = vmax.f32 %v6201_v13, %v6209_v55  ;;  %v6346_v3 = vld [vmem:[#allocation3 + $0x24] sm:$0xff] }
 0x462   : > { %6409 = vrot.lane.b32.xlu0 %v6401_v8, %s10328_s29  ;;  %v6104_v47 = vpop.f32.mrb[149].mxu1  ;;  %v6251_v21 = vld [vmem:[#allocation3 + $0x31] sm:$0xff] }
 0x463   : > { %v12677_v63 = vld [vmem:[#allocation3 + $0x32] sm:$0xff]  ;;  %v6113_v46 = vadd.f32 %v9908_v20, %v5952_v14  ;;  %v6105_v32 = vadd.f32 %v6104_v47, %v12634_v38  ;;  %v5955_v48 = vadd.f32 %v9444_v54, %v12450_v61  ;;  %v9909_v23 = vpop.f32.mrb[150].mxu1  ;;  %v12681_v34 = vpack.c.bf16 %v6251_v21, %v6394_v62  ;;  %6226 = vst.msk [vmem:[#allocation3 + $0x42] sm:$0xff] %vm385_vm1, %v6217_v17  ;;  %v10160_v61 = vld [vmem:[%s13459_s5 + $0x108] sm:$0xff]  }
 0x464   : > { %v12683_v15 = vld [vmem:[#allocation3 + $0x34] sm:$0xff]  ;;  %v6107_v1 = vpop.f32.mrb[151].mxu1  ;;  %v6289_v53 = vpack.c.bf16 %v12677_v63, %v6426_v52  ;;  %9582 = vmatpush3.bf16.msra.mxu0 %v10160_v61 }
 0x465   : > { %v6363_v0 = vld [vmem:[#allocation3 + $0x30] sm:$0xff]  ;;  %v6175_v38 = vmax.f32 %v6105_v32, %v6113_v46  ;;  %v6116_v43 = vadd.f32 %v9909_v23, %v5955_v48  ;;  %v6108_v60 = vadd.f32 %v6107_v1, %v12642_v7  ;;  %6266 = vrot.lane.b32.xlu1 %v12681_v34, %s10330_s15  ;;  %v6625_v49 = vpack.c.bf16 %v12683_v15, %v12652_v44 }
 0x466   : > { %v6586_v16 = vld [vmem:[#allocation3 + $0x33] sm:$0xff]  ;;  %v6513_v36 = vpack.c.bf16 %v6363_v0, %v6362_v22  ;;  %6441 = vrot.lane.b32.xlu0 %v6433_v56, %s10329_s13  ;;  %6581 = vst.msk [vmem:[#allocation4 + $0x18] sm:$0xff] %vm385_vm1, %v6289_v53  ;;  %v6353_v22 = vpack.c.bf16 %v12683_v15, %v6346_v3 }
 0x467   : > { %6191 = vst.msk [vmem:[#allocation5 + $0x40] sm:$0xff] %vm385_vm1, %v6175_v38  ;;  %v6176_v41 = vmax.f32 %v6108_v60, %v6116_v43  ;;  %v6593_v10 = vpack.c.bf16 %v6586_v16, %v6585_v57 }
 0x468   : > { %6245 = vst.msk [vmem:[#allocation4 + $0x38] sm:$0xff] %vm385_vm1, %v6513_v36  ;;  %v6202_v58 = vld [vmem:[#allocation5 + $0x30] ss:$2 sm:$0xff]  ;;  %v6210_v7 = vld [vmem:[#allocation5 + $0x31] ss:$2 sm:$0xff]  ;;  %6357 = vst.msk [vmem:[#allocation4 + $0x40] sm:$0xff] %vm385_vm1, %v6353_v22 }
 0x469   : > { %6192 = vst.msk [vmem:[#allocation5 + $0x48] sm:$0xff] %vm385_vm1, %v6176_v41  ;;  %v9445_v59 = vpop.f32.mrb[168].mxu0  ;;  %v12703_v37 = vpop.f32.mrb[152].mxu1  ;;  %6298 = vrot.lane.b32.xlu1 %v6289_v53, %s10328_s29  ;;  %v6218_v6 = vmax.f32 %v6202_v58, %v6210_v7 }
 0x46a   : > { %6601 = vrot.lane.b32.xlu0 %v6593_v10, %s10330_s15  ;;  %v9446_v62 = vpop.f32.mrb[169].mxu0  ;;  %v6120_v35 = vpop.f32.mrb[153].mxu1  ;;  %v12707_v24 = vld [vmem:[#allocation3 + $0x41] sm:$0xff] }
 0x46b   : > { %v9447_v57 = vadd.f32 %v9446_v62, %v9445_v59  ;;  %v9448_v5 = vpop.f32.mrb[170].mxu0  ;;  %v12709_v40 = vpop.f32.mrb[154].mxu1  ;;  %v6402_v51 = vpack.c.bf16 %v12707_v24, %v6251_v21  ;;  %6227 = vst.msk [vmem:[#allocation3 + $0x52] sm:$0xff] %vm385_vm1, %v6218_v6  ;;  %v12715_v45 = vld [vmem:[#allocation3 + $0x43] sm:$0xff]  ;;  %v10163_v59 = vld [vmem:[%s13459_s5 + $0x158] sm:$0xff]  }
 0x46c   : > { %v9449_v42 = vpop.f32.mrb[171].mxu0  ;;  %v6123_v30 = vpop.f32.mrb[155].mxu1  ;;  %v6364_v19 = vld [vmem:[#allocation3 + $0x40] sm:$0xff]  ;;  %v12718_v8 = vpack.c.bf16 %v12715_v45, %v6586_v16  ;;  %v10164_v6 = vld [vmem:[%s13459_s5 + $0x118] sm:$0xff]  }
 0x46d   : > { %v5960_v52 = vadd.f32 %v9447_v57, %v12463_v29  ;;  %v9450_v18 = vadd.f32 %v9449_v42, %v9448_v5  ;;  %6330 = vrot.lane.b32.xlu1 %v6593_v10, %s10329_s13  ;;  %6694 = vst.msk [vmem:[#allocation4 + $0x20] sm:$0xff] %vm385_vm1, %v6402_v51  ;;  %v12729_v55 = vpack.c.bf16 %v6364_v19, %v6363_v0  ;;  %v10161_v29 = vld [vmem:[%s13459_s5 + $0x150] sm:$0xff]   ;;  %v6428_v21 = vld [vmem:[#allocation3 + $0x42] sm:$0xff] }
 0x46e   : > { %6633 = vrot.lane.b32.xlu0 %v6625_v49, %s10328_s29  ;;  %6470 = vst.msk [vmem:[#allocation4 + $0x48] sm:$0xff] %vm385_vm1, %v12718_v8  ;;  %9583 = vmatprep.subr.bf16.mxu0 %v10161_v29  ;;  %v6348_v32 = vld [vmem:[#allocation3 + $0x44] sm:$0xff]  ;;  %v6434_v58 = vpack.c.bf16 %v6428_v21, %v12677_v63 }
 0x46f   : > { %v12726_v44 = vadd.f32 %v6120_v35, %v5960_v52  ;;  %v5963_v13 = vadd.f32 %v9450_v18, %v12465_v25  ;;  %v10162_v25 = vld [vmem:[%s13459_s5 + $0x110] sm:$0xff]   ;;  %v6236_v4 = vld [vmem:[#allocation3 + $0x40] sm:$0xff] }
 0x470   : > { %v6203_v54 = vld [vmem:[#allocation5 + $0x40] ss:$2 sm:$0xff]  ;;  %v6211_v14 = vld [vmem:[#allocation5 + $0x41] ss:$2 sm:$0xff]  ;;  %9584 = vmatpush3.bf16.msra.mxu0 %v10162_v25 }
 0x471   : > { %v12734_v20 = vadd.f32 %v6123_v30, %v5963_v13  ;;  %v12736_v17 = vpop.f32.mrb[156].mxu1  ;;  %6521 = vrot.lane.b32.xlu1 %v6513_v36, %s10328_s29  ;;  %v6219_v47 = vmax.f32 %v6203_v54, %v6211_v14  ;;  %v12758_v53 = vld [vmem:[#allocation3 + $0x44] sm:$0xff]  ;;  %9585 = vmatprep.subr.bf16.mxu0 %v10163_v59 }
 0x472   : > { %6379 = vrot.lane.b32.xlu0 %v12729_v55, %s10330_s15  ;;  %v12744_v56 = vpop.f32.mrb[157].mxu1  ;;  %v12746_v46 = vld [vmem:[#allocation3 + $0x54] sm:$0xff]  ;;  %v6482_v7 = vpack.c.bf16 %v12758_v53, %v12683_v15 }
 0x473   : > { %v12748_v48 = vpop.f32.mrb[158].mxu1  ;;  %v12750_v23 = vld [vmem:[#allocation3 + $0x52] sm:$0xff]  ;;  %6228 = vst.msk [vmem:[#allocation3 + $0x62] sm:$0xff] %vm385_vm1, %v6219_v47  ;;  %v6354_v1 = vpack.c.bf16 %v12746_v46, %v6348_v32 }
 0x474   : > { %v12753_v0 = vld [vmem:[#allocation3 + $0x50] sm:$0xff]  ;;  %v12756_v16 = vpop.f32.mrb[159].mxu1  ;;  %v12761_v36 = vpack.c.bf16 %v12750_v23, %v6428_v21  ;;  %9586 = vmatpush3.bf16.msra.mxu0 %v10164_v6  ;;  %v6626_v21 = vpack.c.bf16 %v12746_v46, %v12758_v53 }
 0x475   : > { %v12764_v61 = vpack.c.bf16 %v12753_v0, %v6364_v19  ;;  %v6242_v38 = vpack.c.bf16 %v12753_v0, %v6236_v4  ;;  %v6908_v43 = vld [vmem:[#allocation3 + $0x54] sm:$0xff]  ;;  %v9451_v60 = vpop.f32.mrb[172].mxu0  ;;  %6553 = vrot.lane.b32.xlu1 %v12681_v34, %s10329_s13  ;;  %6358 = vst.msk [vmem:[#allocation4 + $0x78] sm:$0xff] %vm385_vm1, %v6354_v1 }
 0x476   : > { %6411 = vrot.lane.b32.xlu0 %v6402_v51, %s10328_s29  ;;  %v6915_v3 = vpack.c.bf16 %v6908_v43, %v6348_v32  ;;  %v9452_v22 = vpop.f32.mrb[173].mxu0  ;;  %6582 = vst.msk [vmem:[#allocation4 + $0x50] sm:$0xff] %vm385_vm1, %v12761_v36  ;;  %v6812_v5 = vld [vmem:[#allocation3 + $0x51] sm:$0xff] }
 0x477   : > { %6807 = vst.msk [vmem:[#allocation4 + $0x28] sm:$0xff] %vm385_vm1, %v12764_v61  ;;  %6246 = vst.msk [vmem:[#allocation4 + $0x70] sm:$0xff] %vm385_vm1, %v6242_v38  ;;  %v9453_v41 = vadd.f32 %v9452_v22, %v9451_v60  ;;  %v9454_v10 = vpop.f32.mrb[174].mxu0  ;;  %v12798_v30 = vld [vmem:[#allocation3 + $0x53] sm:$0xff]  ;;  %v6819_v60 = vpack.c.bf16 %v6812_v5, %v12707_v24 }
 0x478   : > { %6919 = vst.msk [vmem:[#allocation4 + $0x30] sm:$0xff] %vm385_vm1, %v6915_v3  ;;  %v9455_v34 = vpop.f32.mrb[175].mxu0  ;;  %v6461_v13 = vld [vmem:[#allocation3 + $0x53] sm:$0xff] }
 0x479   : > { %v5968_v62 = vadd.f32 %v9453_v41, %v12478_v2  ;;  %v9456_v35 = vadd.f32 %v9455_v34, %v9454_v10  ;;  %v9920_v57 = vpop.f32.mrb[160].mxu1  ;;  %6491 = vrot.lane.b32.xlu1 %v6482_v7, %s10330_s15  ;;  %v10169_v4 = vld [vmem:[%s13459_s5 + $0x170] sm:$0xff]   ;;  %v10171_v41 = vld [vmem:[%s13459_s5 + $0x178] sm:$0xff]  }
 0x47a   : > { %6443 = vrot.lane.b32.xlu0 %v6434_v58, %s10329_s13  ;;  %v12790_v63 = vadd.f32 %v9920_v57, %v12557_v11  ;;  %v12792_v15 = vpop.f32.mrb[161].mxu1  ;;  %v12794_v49 = vld [vmem:[#allocation3 + $0x61] sm:$0xff]  ;;  %v10170_v1 = vld [vmem:[%s13459_s5 + $0x130] sm:$0xff]  }
 0x47b   : > { %v6129_v51 = vadd.f32 %v12703_v37, %v5968_v62  ;;  %v5971_v42 = vadd.f32 %v9456_v35, %v12482_v27  ;;  %v9921_v2 = vpop.f32.mrb[162].mxu1  ;;  %v12801_v19 = vpack.c.bf16 %v12794_v49, %v6812_v5  ;;  %v12803_v52 = vld [vmem:[#allocation3 + $0x63] sm:$0xff] }
 0x47c   : > { %v12806_v11 = vadd.f32 %v9921_v2, %v12562_v33  ;;  %v12808_v18 = vpop.f32.mrb[163].mxu1  ;;  %v10165_v37 = vld [vmem:[%s13459_s5 + $0x160] sm:$0xff]   ;;  %v6467_v33 = vpack.c.bf16 %v12803_v52, %v6461_v13 }
 0x47d   : > { %v10166_v27 = vld [vmem:[%s13459_s5 + $0x120] sm:$0xff]   ;;  %v6177_v54 = vmax.f32 %v12726_v44, %v6129_v51  ;;  %v6132_v14 = vadd.f32 %v12709_v40, %v5971_v42  ;;  %6714 = vrot.lane.b32.xlu1 %v6434_v58, %s10330_s15  ;;  %6695 = vst.msk [vmem:[#allocation4 + $0x58] sm:$0xff] %vm385_vm1, %v12801_v19  ;;  %9587 = vmatprep.subr.bf16.mxu0 %v10165_v37  ;;  %v10167_v40 = vld [vmem:[%s13459_s5 + $0x168] sm:$0xff]  }
 0x47e   : > { %6666 = vrot.lane.b32.xlu0 %v12729_v55, %s10329_s13  ;;  %v6594_v44 = vpack.c.bf16 %v12798_v30, %v12715_v45  ;;  %9588 = vmatpush3.bf16.msra.mxu0 %v10166_v27  ;;  %6471 = vst.msk [vmem:[#allocation4 + $0x80] sm:$0xff] %vm385_vm1, %v6467_v33  ;;  %v10168_v55 = vld [vmem:[%s13459_s5 + $0x128] sm:$0xff]   ;;  %v6366_v34 = vld [vmem:[#allocation3 + $0x60] sm:$0xff] }
 0x47f   : > { %6193 = vst.msk [vmem:[#allocation5 + $0x50] sm:$0xff] %vm385_vm1, %v6177_v54  ;;  %v6178_v29 = vmax.f32 %v12734_v20, %v6132_v14  ;;  %9589 = vmatprep.subr.bf16.mxu0 %v10167_v40  ;;  %v6478_v62 = vld [vmem:[#allocation3 + $0x64] sm:$0xff] }
 0x480   : > { %v6430_v51 = vld [vmem:[#allocation3 + $0x62] sm:$0xff]  ;;  %v12905_v40 = vpack.c.bf16 %v6478_v62, %v12746_v46 }
 0x481   : > { %6194 = vst.msk [vmem:[#allocation5 + $0x58] sm:$0xff] %vm385_vm1, %v6178_v29  ;;  %v9457_v47 = vpop.f32.mrb[176].mxu0  ;;  %6746 = vrot.lane.b32.xlu1 %v12718_v8, %s10328_s29  ;;  %v6909_v13 = vld [vmem:[#allocation3 + $0x64] sm:$0xff] }
 0x482   : > { %6603 = vrot.lane.b32.xlu0 %v6594_v44, %s10330_s15  ;;  %v9458_v45 = vpop.f32.mrb[177].mxu0  ;;  %9590 = vmatpush3.bf16.msra.mxu0 %v10168_v55  ;;  %v10173_v46 = vld [vmem:[%s13459_s5 + $0xc0] sm:$0xff]  }
 0x483   : > { %v9459_v20 = vadd.f32 %v9458_v45, %v9457_v47  ;;  %v9460_v25 = vpop.f32.mrb[178].mxu0  ;;  %9591 = vmatprep.subr.bf16.mxu0 %v10169_v4  ;;  %9539 = vmatprep.subr.bf16.mxu1 %v10173_v46 }
 0x484   : > { %v9461_v32 = vpop.f32.mrb[179].mxu0 }
 0x485   : > { %v5976_v38 = vadd.f32 %v9459_v20, %v12489_v31  ;;  %v9462_v8 = vadd.f32 %v9461_v32, %v9460_v25  ;;  %6778 = vrot.lane.b32.xlu1 %v6482_v7, %s10329_s13 }
 0x486   : > { %6635 = vrot.lane.b32.xlu0 %v6626_v21, %s10328_s29  ;;  %9592 = vmatpush3.bf16.msra.mxu0 %v10170_v1  ;;  %v6739_v1 = vpack.c.bf16 %v12803_v52, %v12798_v30 }
 0x487   : > { %v6137_v53 = vadd.f32 %v12744_v56, %v5976_v38  ;;  %v5979_v43 = vadd.f32 %v9462_v8, %v12493_v9  ;;  %v10172_v9 = vld [vmem:[%s13459_s5 + $0x138] sm:$0xff]   ;;  %9593 = vmatprep.subr.bf16.mxu0 %v10171_v41  ;;  %v6802_v41 = vld [vmem:[#allocation3 + $0xb0] sm:$0xff] }
 0x488   : > { %v6204_v3 = vld [vmem:[#allocation5 + $0x50] ss:$2 sm:$0xff]  ;;  %v6212_v22 = vld [vmem:[#allocation5 + $0x51] ss:$2 sm:$0xff] }
 0x489   : > { %v6140_v31 = vadd.f32 %v12756_v16, %v5979_v43  ;;  %6268 = vrot.lane.b32.xlu1 %v6819_v60, %s10330_s15  ;;  %v6220_v10 = vmax.f32 %v6204_v3, %v6212_v22  ;;  %v6657_v22 = vld [vmem:[#allocation3 + $0xa0] sm:$0xff] }
 0x48a   : > { %6827 = vrot.lane.b32.xlu0 %v6819_v60, %s10330_s15  ;;  %9594 = vmatpush3.bf16.msra.mxu0 %v10172_v9  ;;  %v6817_v9 = vld [vmem:[#allocation3 + $0xa1] sm:$0xff] }
 0x48b   : > { %6229 = vst.msk [vmem:[#allocation3 + $0x72] sm:$0xff] %vm385_vm1, %v6220_v10 }
 0x48d   : > { %v9463_v24 = vpop.f32.mrb[180].mxu0  ;;  %6300 = vrot.lane.b32.xlu1 %v12761_v36, %s10328_s29 }
 0x48e   : > { %6859 = vrot.lane.b32.xlu0 %v12761_v36, %s10328_s29  ;;  %v9464_v56 = vpop.f32.mrb[181].mxu0  ;;  %v6371_v36 = vpack.c.bf16 %v6366_v34, %v12753_v0 }
 0x48f   : > { %v9465_v16 = vadd.f32 %v9464_v56, %v9463_v24  ;;  %v9466_v58 = vpop.f32.mrb[182].mxu0 }
 0x490   : > { %v9467_v7 = vpop.f32.mrb[183].mxu0 }
 0x491   : > { %v5984_v59 = vadd.f32 %v9465_v16, %v12505_v28  ;;  %v9468_v6 = vadd.f32 %v9467_v7, %v9466_v58  ;;  %6332 = vrot.lane.b32.xlu1 %v6594_v44, %s10329_s13 }
 0x492   : > { %6891 = vrot.lane.b32.xlu0 %v6594_v44, %s10329_s13  ;;  %v12870_v35 = vld [vmem:[#allocation3 + $0x74] sm:$0xff]  ;;  %v6435_v44 = vpack.c.bf16 %v6430_v51, %v12750_v23 }
 0x493   : > { %v6145_v57 = vadd.f32 %v12736_v17, %v5984_v59  ;;  %v5987_v5 = vadd.f32 %v9468_v6, %v12507_v39  ;;  %v6627_v42 = vpack.c.bf16 %v12870_v35, %v6478_v62  ;;  %v12876_v2 = vld [vmem:[#allocation3 + $0x72] sm:$0xff] }
 0x494   : > { %v12878_v28 = vld [vmem:[#allocation3 + $0x70] sm:$0xff]  ;;  %v12881_v37 = vpack.c.bf16 %v12876_v2, %v6430_v51 }
 0x495   : > { %v12884_v27 = vpack.c.bf16 %v12878_v28, %v6366_v34  ;;  %v6910_v54 = vld [vmem:[#allocation3 + $0x74] sm:$0xff]  ;;  %v6179_v17 = vmax.f32 %v6137_v53, %v6145_v57  ;;  %v6148_v39 = vadd.f32 %v12748_v48, %v5987_v5  ;;  %6523 = vrot.lane.b32.xlu1 %v12764_v61, %s10328_s29  ;;  %6359 = vst.msk [vmem:[#allocation4 + $0xb0] sm:$0xff] %vm385_vm1, %v6627_v42 }
 0x496   : > { %6381 = vrot.lane.b32.xlu0 %v6371_v36, %s10330_s15  ;;  %v6916_v0 = vpack.c.bf16 %v6910_v54, %v6909_v13  ;;  %6583 = vst.msk [vmem:[#allocation4 + $0x88] sm:$0xff] %vm385_vm1, %v12881_v37  ;;  %v6590_v25 = vld [vmem:[#allocation3 + $0x73] sm:$0xff] }
 0x497   : > { %6247 = vst.msk [vmem:[#allocation4 + $0xa8] sm:$0xff] %vm385_vm1, %v12884_v27  ;;  %6808 = vst.msk [vmem:[#allocation4 + $0x60] sm:$0xff] %vm385_vm1, %v12884_v27  ;;  %v6180_v48 = vmax.f32 %v6140_v31, %v6148_v39  ;;  %v6686_v38 = vld [vmem:[#allocation3 + $0x71] sm:$0xff]  ;;  %v6806_v31 = vpack.c.bf16 %v6802_v41, %v6657_v22 }
 0x498   : > { %6195 = vst.msk [vmem:[#allocation5 + $0x60] sm:$0xff] %vm385_vm1, %v6179_v17  ;;  %6920 = vst.msk [vmem:[#allocation4 + $0x68] sm:$0xff] %vm385_vm1, %v6916_v0 }
 0x499   : > { %6196 = vst.msk [vmem:[#allocation5 + $0x68] sm:$0xff] %vm385_vm1, %v6180_v48  ;;  %v9469_v61 = vpop.f32.mrb[184].mxu0  ;;  %6555 = vrot.lane.b32.xlu1 %v6819_v60, %s10329_s13  ;;  %6810 = vst.msk [vmem:[#allocation4 + $0xd0] sm:$0xff] %vm385_vm1, %v6806_v31  ;;  %v10183_v31 = vld [vmem:[%s13459_s5 + $0xe8] sm:$0xff]  }
 0x49a   : > { %6413 = vrot.lane.b32.xlu0 %v12801_v19, %s10328_s29  ;;  %v9470_v14 = vpop.f32.mrb[185].mxu0 }
 0x49b   : > { %v9471_v33 = vadd.f32 %v9470_v14, %v9469_v61  ;;  %v9472_v29 = vpop.f32.mrb[186].mxu0  ;;  %v6705_v61 = vld [vmem:[#allocation3 + $0xa2] sm:$0xff] }
 0x49c   : > { %v9473_v55 = vpop.f32.mrb[187].mxu0 }
 0x49d   : > { %v5992_v47 = vadd.f32 %v9471_v33, %v12531_v12  ;;  %v9474_v45 = vadd.f32 %v9473_v55, %v9472_v29  ;;  %6493 = vrot.lane.b32.xlu1 %v12905_v40, %s10330_s15 }
 0x49e   : > { %6445 = vrot.lane.b32.xlu0 %v6435_v44, %s10329_s13 }
 0x49f   : > { %v6153_v19 = vadd.f32 %v12792_v15, %v5992_v47  ;;  %v5995_v20 = vadd.f32 %v9474_v45, %v12533_v26  ;;  %v6595_v15 = vpack.c.bf16 %v6590_v25, %v12803_v52  ;;  %v6769_v45 = vld [vmem:[#allocation3 + $0xa4] sm:$0xff] }
 0x4a0   : > { %v6205_v21 = vld [vmem:[#allocation5 + $0x60] ss:$2 sm:$0xff]  ;;  %v6213_v32 = vld [vmem:[#allocation5 + $0x61] ss:$2 sm:$0xff] }
 0x4a1   : > { %v6181_v23 = vmax.f32 %v6153_v19, %v12790_v63  ;;  %v6156_v12 = vadd.f32 %v12808_v18, %v5995_v20  ;;  %6716 = vrot.lane.b32.xlu1 %v6435_v44, %s10330_s15  ;;  %v6221_v4 = vmax.f32 %v6205_v21, %v6213_v32  ;;  %v6255_v63 = vld [vmem:[#allocation3 + $0x71] sm:$0xff]  ;;  %v6737_v44 = vld [vmem:[#allocation3 + $0xa3] sm:$0xff] }
 0x4a2   : > { %6668 = vrot.lane.b32.xlu0 %v6371_v36, %s10329_s13  ;;  %v6259_v18 = vpack.c.bf16 %v6255_v63, %v12794_v49  ;;  %v6923_v19 = vld [vmem:[#allocation4] sm:$0xff]  ;;  %v6850_v20 = vld [vmem:[#allocation3 + $0xb2] sm:$0xff] }
 0x4a3   : > { %6197 = vst.msk [vmem:[#allocation5 + $0x70] sm:$0xff] %vm385_vm1, %v6181_v23  ;;  %v6182_v26 = vmax.f32 %v6156_v12, %v12806_v11  ;;  %6230 = vst.msk [vmem:[#allocation3 + $0x82] sm:$0xff] %vm385_vm1, %v6221_v4  ;;  %v10175_v23 = vld [vmem:[%s13459_s5 + $0xc8] sm:$0xff]   ;;  %v6854_v4 = vpack.c.bf16 %v6850_v20, %v6705_v61 }
 0x4a5   : > { %6198 = vst.msk [vmem:[#allocation5 + $0x78] sm:$0xff] %vm385_vm1, %v6182_v26  ;;  %6748 = vrot.lane.b32.xlu1 %v6739_v1, %s10328_s29  ;;  %v6882_v26 = vld [vmem:[#allocation3 + $0xb3] sm:$0xff] }
 0x4a6   : > { %6605 = vrot.lane.b32.xlu0 %v6595_v15, %s10330_s15 }
 0x4a9   : > { %6270 = vrot.lane.b32.xlu1 %v6259_v18, %s10330_s15 }
 0x4aa   : > { %6637 = vrot.lane.b32.xlu0 %v6627_v42, %s10328_s29  ;;  %v12932_v11 = vld [vmem:[#allocation3 + $0x81] sm:$0xff]  ;;  %v6818_v42 = vld [vmem:[#allocation3 + $0xb1] sm:$0xff] }
 0x4ab   : > { %v6735_v8 = vld [vmem:[#allocation3 + $0x83] sm:$0xff]  ;;  %v6692_v30 = vpack.c.bf16 %v12932_v11, %v6686_v38  ;;  %v6404_v56 = vpack.c.bf16 %v12932_v11, %v6255_v63  ;;  %v10178_v38 = vld [vmem:[%s13459_s5 + $0x90] sm:$0xff]  }
 0x4ac   : > { %v6740_v52 = vpack.c.bf16 %v6735_v8, %v6590_v25  ;;  %v6206_v53 = vld [vmem:[#allocation5 + $0x70] ss:$2 sm:$0xff]  ;;  %v6214_v43 = vld [vmem:[#allocation5 + $0x71] ss:$2 sm:$0xff]  ;;  %v6368_v49 = vld [vmem:[#allocation3 + $0x80] sm:$0xff] }
 0x4ad   : > { %6302 = vrot.lane.b32.xlu1 %v12881_v37, %s10328_s29  ;;  %v6222_v60 = vmax.f32 %v6206_v53, %v6214_v43  ;;  %6696 = vst.msk [vmem:[#allocation4 + $0x90] sm:$0xff] %vm385_vm1, %v6692_v30  ;;  %v6372_v3 = vpack.c.bf16 %v6368_v49, %v12878_v28  ;;  %v6432_v10 = vld [vmem:[#allocation3 + $0x82] sm:$0xff]  ;;  %v10180_v53 = vld [vmem:[%s13459_s5 + $0x98] sm:$0xff]  }
 0x4ae   : > { %6829 = vrot.lane.b32.xlu0 %v6259_v18, %s10330_s15  ;;  %6472 = vst.msk [vmem:[#allocation4 + $0xb8] sm:$0xff] %vm385_vm1, %v6740_v52  ;;  %v6799_v59 = vld [vmem:[#allocation3 + $0x80] sm:$0xff]  ;;  %v6436_v36 = vpack.c.bf16 %v6432_v10, %v12876_v2  ;;  %v6822_v2 = vpack.c.bf16 %v6818_v42, %v6817_v9 }
 0x4af   : > { %6231 = vst.msk [vmem:[#allocation3 + $0x92] sm:$0xff] %vm385_vm1, %v6222_v60  ;;  %v6911_v57 = vld [vmem:[#allocation3 + $0x84] sm:$0xff] }
 0x4b0   : > { %v6480_v51 = vld [vmem:[#allocation3 + $0x84] sm:$0xff] }
 0x4b1   : > { %6334 = vrot.lane.b32.xlu1 %v6595_v15, %s10329_s13  ;;  %v6484_v28 = vpack.c.bf16 %v6480_v51, %v12870_v35  ;;  %v10174_v25 = vld [vmem:[%s13459_s5 + $0x80] sm:$0xff]  }
 0x4b2   : > { %6861 = vrot.lane.b32.xlu0 %v12881_v37, %s10328_s29 }
 0x4b5   : > { %6525 = vrot.lane.b32.xlu1 %v12884_v27, %s10328_s29 }
 0x4b6   : > { %6383 = vrot.lane.b32.xlu0 %v6372_v3, %s10330_s15  ;;  %v6512_v24 = vld [vmem:[#allocation3 + $0x90] sm:$0xff] }
 0x4b7   : > { %v12949_v16 = vld [vmem:[#allocation3 + $0x94] sm:$0xff]  ;;  %v6805_v6 = vpack.c.bf16 %v6512_v24, %v6799_v59  ;;  %v6516_v17 = vpack.c.bf16 %v6512_v24, %v6368_v49  ;;  %v6661_v0 = vpack.c.bf16 %v6657_v22, %v6512_v24  ;;  %v10181_v49 = vld [vmem:[%s13459_s5 + $0xe0] sm:$0xff]  }
 0x4b8   : > { %v6544_v58 = vld [vmem:[#allocation3 + $0x91] sm:$0xff]  ;;  %v6917_v5 = vpack.c.bf16 %v12949_v16, %v6911_v57  ;;  %v6628_v54 = vpack.c.bf16 %v12949_v16, %v6480_v51  ;;  %v6773_v12 = vpack.c.bf16 %v6769_v45, %v12949_v16 }
 0x4b9   : > { %v6704_v7 = vld [vmem:[#allocation3 + $0x92] sm:$0xff]  ;;  %6557 = vrot.lane.b32.xlu1 %v6259_v18, %s10329_s13  ;;  %v6693_v62 = vpack.c.bf16 %v6817_v9, %v6544_v58  ;;  %6809 = vst.msk [vmem:[#allocation4 + $0x98] sm:$0xff] %vm385_vm1, %v6805_v6  ;;  %v6548_v48 = vpack.c.bf16 %v6544_v58, %v12932_v11  ;;  %v6886_v11 = vpack.c.bf16 %v6882_v26, %v6737_v44 }
 0x4ba   : > { %v6853_v34 = vpack.c.bf16 %v6704_v7, %v6432_v10  ;;  %6415 = vrot.lane.b32.xlu0 %v6404_v56, %s10328_s29  ;;  %6921 = vst.msk [vmem:[#allocation4 + $0xa0] sm:$0xff] %vm385_vm1, %v6917_v5  ;;  %v6592_v37 = vld [vmem:[#allocation3 + $0x93] sm:$0xff]  ;;  %v6709_v29 = vpack.c.bf16 %v6705_v61, %v6704_v7  ;;  %v10184_v10 = vld [vmem:[%s13459_s5 + $0xa8] sm:$0xff]  }
 0x4bb   : > { %6697 = vst.msk [vmem:[#allocation4 + $0xc8] sm:$0xff] %vm385_vm1, %v6693_v62  ;;  %v6596_v27 = vpack.c.bf16 %v6592_v37, %v6735_v8  ;;  %v6741_v47 = vpack.c.bf16 %v6737_v44, %v6592_v37  ;;  %v10177_v18 = vld [vmem:[%s13459_s5 + $0xd0] sm:$0xff]   ;;  %v10187_v6 = vld [vmem:[%s13459_s5 + $0xf8] sm:$0xff]  }
 0x4bc   : > { %6584 = vst.msk [vmem:[#allocation4 + $0xc0] sm:$0xff] %vm385_vm1, %v6853_v34  ;;  %v10185_v16 = vld [vmem:[%s13459_s5 + $0xf0] sm:$0xff]   ;;  %v10188_v62 = vld [vmem:[%s13459_s5 + $0xb8] sm:$0xff]  }
 0x4bd   : > { %6780 = vrot.lane.b32.xlu1 %v12905_v40, %s10329_s13  ;;  %v10186_v7 = vld [vmem:[%s13459_s5 + $0xb0] sm:$0xff]  }
 0x4be   : > { %6447 = vrot.lane.b32.xlu0 %v6436_v36, %s10329_s13 }
 0x4c1   : > { %6495 = vrot.lane.b32.xlu1 %v6484_v28, %s10330_s15 }
 0x4c2   : > { %6893 = vrot.lane.b32.xlu0 %v6595_v15, %s10329_s13  ;;  %v10176_v15 = vld [vmem:[%s13459_s5 + $0x88] sm:$0xff]  }
 0x4c5   : > { %6718 = vrot.lane.b32.xlu1 %v6436_v36, %s10330_s15  ;;  %v13056_v36 = vld [vmem:[%s13459_s5 + $0x180] sm:$0xff]  }
 0x4c6   : > { %6833 = vrot.lane.b32.xlu0 %v6822_v2, %s10330_s15 }
 0x4c9   : > { %6750 = vrot.lane.b32.xlu1 %v6740_v52, %s10328_s29  ;;  %v10179_v52 = vld [vmem:[%s13459_s5 + $0xd8] sm:$0xff]  }
 0x4ca   : > { %6670 = vrot.lane.b32.xlu0 %v6372_v3, %s10329_s13  ;;  %v10182_v3 = vld [vmem:[%s13459_s5 + $0xa0] sm:$0xff]  }
 0x4cd   : > { %6782 = vrot.lane.b32.xlu1 %v6484_v28, %s10329_s13 }
 0x4ce   : > { %6607 = vrot.lane.b32.xlu0 %v6596_v27, %s10330_s15 }
 0x4cf   : > { %v6490_v35 = vpop.permute.xlu1 %6489 }
 0x4d0   : > { %v6378_v13 = vpop.permute.xlu0 %6377  ;;  %6501 = vst.msk [vmem:[#allocation4 + $0x10] sm:$0xff] %vm2374_vm3, %v6490_v35 }
 0x4d1   : > { %6389 = vst.msk [vmem:[#allocation4 + $0x8] sm:$0xff] %vm2374_vm3, %v6378_v13  ;;  %6527 = vrot.lane.b32.xlu1 %v6516_v17, %s10328_s29 }
 0x4d2   : > { %6639 = vrot.lane.b32.xlu0 %v6628_v54, %s10328_s29 }
 0x4d4   : > { %v6410_v39 = vpop.permute.xlu0 %6409 }
 0x4d5   : > { %6421 = vst.msk [vmem:[#allocation4 + $0x8] sm:$0xff] %vm2503_vm4, %v6410_v39  ;;  %6559 = vrot.lane.b32.xlu1 %v6548_v48, %s10329_s13 }
 0x4d6   : > { %6672 = vrot.lane.b32.xlu0 %v6661_v0, %s10329_s13 }
 0x4d7   : > { %v6267_v33 = vpop.permute.xlu1 %6266 }
 0x4d8   : > { %v6442_v14 = vpop.permute.xlu0 %6441  ;;  %6277 = vst.msk [vmem:[#allocation4 + $0x38] sm:$0xff] %vm2374_vm3, %v6267_v33 }
 0x4d9   : > { %6453 = vst.msk [vmem:[#allocation4 + $0x8] sm:$0xff] %vm2632_vm5, %v6442_v14  ;;  %6720 = vrot.lane.b32.xlu1 %v6709_v29, %s10330_s15 }
 0x4da   : > { %6831 = vrot.lane.b32.xlu0 %v6548_v48, %s10330_s15  ;;  %s378_s15 = scalar_lea.vmem [#allocation8], %s377_s12 }
 0x4db   : > { %v6299_v55 = vpop.permute.xlu1 %6298  ;;  %s8647_s22 = sshll.u32 %s378_s15, 4  ;;  %s13414_s22 = int_to_ptr.vmem [resolvable:$true] %s8647_s22 }
 0x4dc   : > { %v6602_v40 = vpop.permute.xlu0 %6601  ;;  %6309 = vst.msk [vmem:[#allocation4 + $0x38] sm:$0xff] %vm2503_vm4, %v6299_v55  ;;  %s10263_s25 = scalar_lea.vmem %s13414_s22, 16 }
 0x4dd   : > { %6613 = vst.msk [vmem:[#allocation4 + $0x18] sm:$0xff] %vm2374_vm3, %v6602_v40  ;;  %6752 = vrot.lane.b32.xlu1 %v6741_v47, %s10328_s29  ;;  %p10264_p11 = scmp.ne.s32.totalorder %s13414_s22, %s10263_s25 }
 0x4de   : > { %6863 = vrot.lane.b32.xlu0 %v6853_v34, %s10328_s29 }
 0x4df   : > { %v6331_v32 = vpop.permute.xlu1 %6330  ;;  %p10265_p12 = pnand %p10264_p11, %p10432_p5 }
 0x4e0   : > { %v6634_v21 = vpop.permute.xlu0 %6633  ;;  %v6924_v46 = vld [vmem:[#allocation4 + $0x8] sm:$0xff]  ;;  %6341 = vst.msk [vmem:[#allocation4 + $0x38] sm:$0xff] %vm2632_vm5, %v6331_v32 }
 0x4e1   : > { %6645 = vst.msk [vmem:[#allocation4 + $0x18] sm:$0xff] %vm2503_vm4, %v6634_v21  ;;  %7402 = vmatprep.mubr.bf16.mxu1 %v6924_v46  ;;  %6784 = vrot.lane.b32.xlu1 %v6773_v12, %s10329_s13  ;;  %p10266_p13 = pneg %p10265_p12 }
 0x4e2   : > { %7403 = vmatmul.mubr.bf16.vlgmr.msra.gmra.mrb[164].mxu1 %v6923_v19  ;;  %6895 = vrot.lane.b32.xlu0 %v6596_v27, %s10329_s13 }
 0x4e3   : > { %9540 = vmatpush3.bf16.msra.mxu1 %v10174_v25  ;;  %v6522_v63 = vpop.permute.xlu1 %6521 }
 0x4e4   : > { %v6380_v1 = vpop.permute.xlu0 %6379  ;;  %9541 = vmatprep.subr.bf16.mxu1 %v10175_v23  ;;  %6533 = vst.msk [vmem:[#allocation4 + $0x10] sm:$0xff] %vm2503_vm4, %v6522_v63 }
 0x4e5   : > { %6390 = vst.msk [vmem:[#allocation4 + $0x40] sm:$0xff] %vm2374_vm3, %v6380_v1 }
 0x4e6   : > { %6865 = vrot.lane.b32.xlu0 %v6854_v4, %s10328_s29 }
 0x4e7   : > { %9542 = vmatpush3.bf16.msra.mxu1 %v10176_v15  ;;  %v6554_v30 = vpop.permute.xlu1 %6553  ;;  %v6930_v58 = vld [vmem:[#allocation4 + $0x38] sm:$0xff] }
 0x4e8   : > { %v6412_v8 = vpop.permute.xlu0 %6411  ;;  %9543 = vmatprep.subr.bf16.mxu1 %v10177_v18  ;;  %6565 = vst.msk [vmem:[#allocation4 + $0x10] sm:$0xff] %vm2632_vm5, %v6554_v30 }
 0x4e9   : > { %6422 = vst.msk [vmem:[#allocation4 + $0x40] sm:$0xff] %vm2503_vm4, %v6412_v8 }
 0x4ea   : > { %6897 = vrot.lane.b32.xlu0 %v6886_v11, %s10329_s13  ;;  %s10267_s13 = sshll.u32 %s10333_s30, 4  ;;  %s10268_s13 = int_to_ptr.vmem [resolvable:$false] %s10267_s13 }
 0x4eb   : > { %9544 = vmatpush3.bf16.msra.mxu1 %v10178_v38  ;;  %v6492_v60 = vpop.permute.xlu1 %6491  ;;  %s10269_s16 = scalar_lea.vmem %s10268_s13, 32  ;;  %p10270_p0 = scmp.lt.s32.totalorder %s13414_s22, %s10268_s13 }
 0x4ec   : > { %v6444_v43 = vpop.permute.xlu0 %6443  ;;  %9545 = vmatprep.subr.bf16.mxu1 %v10179_v52  ;;  %6502 = vst.msk [vmem:[#allocation4 + $0x48] sm:$0xff] %vm2374_vm3, %v6492_v60  ;;  %v10190_v60 = vld [vmem:[%s13459_s5 + $0x188] sm:$0xff]   ;;  %p10271_p1 = scmp.lt.s32.totalorder %s10269_s16, %s10263_s25 }
 0x4ed   : > { %6454 = vst.msk [vmem:[#allocation4 + $0x40] sm:$0xff] %vm2632_vm5, %v6444_v43 }
 0x4ee   : > { %p10272_p2 = por %p10271_p1, %p10270_p0 }
 0x4ef   : > { %9546 = vmatpush3.bf16.msra.mxu1 %v10180_v53  ;;  %v6715_v41 = vpop.permute.xlu1 %6714 }
 0x4f0   : > { %v6667_v22 = vpop.permute.xlu0 %6666  ;;  %9547 = vmatprep.subr.bf16.mxu1 %v10181_v49  ;;  %6726 = vst.msk [vmem:[#allocation4 + $0x20] sm:$0xff] %vm2374_vm3, %v6715_v41  ;;  %v6925_v49 = vld [vmem:[#allocation4 + $0x10] sm:$0xff]  ;;  %p10273_p3 = pnand %p10272_p2, %p10266_p13 }
 0x4f1   : > { %6678 = vst.msk [vmem:[#allocation4 + $0x18] sm:$0xff] %vm2632_vm5, %v6667_v22 }
 0x4f3   : > { %9548 = vmatpush3.bf16.msra.mxu1 %v10182_v3  ;;  %v6747_v24 = vpop.permute.xlu1 %6746 }
 0x4f4   : > { %v6604_v9 = vpop.permute.xlu0 %6603  ;;  %v6931_v56 = vld [vmem:[#allocation4 + $0x40] sm:$0xff]  ;;  %9549 = vmatprep.subr.bf16.mxu1 %v10183_v31  ;;  %6758 = vst.msk [vmem:[#allocation4 + $0x20] sm:$0xff] %vm2503_vm4, %v6747_v24 }
 0x4f5   : > { %6614 = vst.msk [vmem:[#allocation4 + $0x50] sm:$0xff] %vm2374_vm3, %v6604_v9  ;;  %7410 = vmatprep.mubr.bf16.mxu1 %v6931_v56 }
 0x4f6   : > { %7411 = vmatmul.mubr.bf16.gmra.mrb[168].mxu1 %v6930_v58 }
 0x4f7   : > { %9550 = vmatpush3.bf16.msra.mxu1 %v10184_v10  ;;  %v6779_v59 = vpop.permute.xlu1 %6778 }
 0x4f8   : > { %v6636_v34 = vpop.permute.xlu0 %6635  ;;  %9551 = vmatprep.subr.bf16.mxu1 %v10185_v16  ;;  %6790 = vst.msk [vmem:[#allocation4 + $0x20] sm:$0xff] %vm2632_vm5, %v6779_v59  ;;  %v6926_v11 = vld [vmem:[#allocation4 + $0x18] sm:$0xff] }
 0x4f9   : > { %6646 = vst.msk [vmem:[#allocation4 + $0x50] sm:$0xff] %vm2503_vm4, %v6636_v34 }
 0x4fb   : > { %9552 = vmatpush3.bf16.msra.mxu1 %v10186_v7  ;;  %v6269_v5 = vpop.permute.xlu1 %6268 }
 0x4fc   : > { %v6828_v57 = vpop.permute.xlu0 %6827  ;;  %9553 = vmatprep.subr.bf16.mxu1 %v10187_v6  ;;  %6278 = vst.msk [vmem:[#allocation4 + $0x70] sm:$0xff] %vm2374_vm3, %v6269_v5 }
 0x4fd   : > { %6839 = vst.msk [vmem:[#allocation4 + $0x28] sm:$0xff] %vm2374_vm3, %v6828_v57 }
 0x4ff   : > { %9554 = vmatpush3.bf16.msra.mxu1 %v10188_v62  ;;  %v6301_v42 = vpop.permute.xlu1 %6300  ;;  %v6927_v17 = vld [vmem:[#allocation4 + $0x20] sm:$0xff] }
 0x500   : > { %v6860_v51 = vpop.permute.xlu0 %6859  ;;  %9922 = vmatprep.subr.bf16.mxu1 %v13056_v36  ;;  %6310 = vst.msk [vmem:[#allocation4 + $0x70] sm:$0xff] %vm2503_vm4, %v6301_v42 }
 0x501   : > { %6871 = vst.msk [vmem:[#allocation4 + $0x28] sm:$0xff] %vm2503_vm4, %v6860_v51 }
 0x503   : > { %v6333_v2 = vpop.permute.xlu1 %6332 }
 0x504   : > { %v6892_v28 = vpop.permute.xlu0 %6891  ;;  %6342 = vst.msk [vmem:[#allocation4 + $0x70] sm:$0xff] %vm2632_vm5, %v6333_v2  ;;  %v6936_v2 = vld [vmem:[#allocation4 + $0x68] sm:$0xff] }
 0x505   : > { %6903 = vst.msk [vmem:[#allocation4 + $0x28] sm:$0xff] %vm2632_vm5, %v6892_v28 }
 0x507   : > { %v6524_v27 = vpop.permute.xlu1 %6523 }
 0x508   : > { %v6382_v37 = vpop.permute.xlu0 %6381  ;;  %6534 = vst.msk [vmem:[#allocation4 + $0x48] sm:$0xff] %vm2503_vm4, %v6524_v27 }
 0x509   : > { %6391 = vst.msk [vmem:[#allocation4 + $0x78] sm:$0xff] %vm2374_vm3, %v6382_v37  ;;  %v6943_v37 = vld [vmem:[#allocation4 + $0xa0] sm:$0xff] }
 0x50b   : > { %v6556_v13 = vpop.permute.xlu1 %6555  ;;  %v6937_v44 = vld [vmem:[#allocation4 + $0x70] sm:$0xff] }
 0x50c   : > { %v6414_v35 = vpop.permute.xlu0 %6413  ;;  %v6928_v54 = vld [vmem:[#allocation4 + $0x28] sm:$0xff]  ;;  %6566 = vst.msk [vmem:[#allocation4 + $0x48] sm:$0xff] %vm2632_vm5, %v6556_v13  ;;  %v6950_v13 = vld [vmem:[#allocation4 + $0xd8] sm:$0xff] }
 0x50d   : > { %6423 = vst.msk [vmem:[#allocation4 + $0x78] sm:$0xff] %vm2503_vm4, %v6414_v35  ;;  %7532 = vmatprep.mubr.bf16.mxu0 %v6928_v54 }
 0x50e   : > { %7533 = vmatmul.mubr.bf16.vlgmr.msra.gmra.mrb[188].mxu0 %v6927_v17 }
 0x50f   : > { %v6494_v0 = vpop.permute.xlu1 %6493 }
 0x510   : > { %v6446_v39 = vpop.permute.xlu0 %6445  ;;  %6503 = vst.msk [vmem:[#allocation4 + $0x80] sm:$0xff] %vm2374_vm3, %v6494_v0 }
 0x511   : > { %6455 = vst.msk [vmem:[#allocation4 + $0x78] sm:$0xff] %vm2632_vm5, %v6446_v39 }
 0x513   : > { %v6717_v61 = vpop.permute.xlu1 %6716  ;;  %v6932_v9 = vld [vmem:[#allocation4 + $0x48] sm:$0xff] }
 0x514   : > { %v6669_v48 = vpop.permute.xlu0 %6668  ;;  %6727 = vst.msk [vmem:[#allocation4 + $0x58] sm:$0xff] %vm2374_vm3, %v6717_v61 }
 0x515   : > { %6679 = vst.msk [vmem:[#allocation4 + $0x50] sm:$0xff] %vm2632_vm5, %v6669_v48 }
 0x517   : > { %v6749_v33 = vpop.permute.xlu1 %6748 }
 0x518   : > { %v6606_v14 = vpop.permute.xlu0 %6605  ;;  %v6938_v29 = vld [vmem:[#allocation4 + $0x78] sm:$0xff]  ;;  %6759 = vst.msk [vmem:[#allocation4 + $0x58] sm:$0xff] %vm2503_vm4, %v6749_v33 }
 0x519   : > { %6615 = vst.msk [vmem:[#allocation4 + $0x88] sm:$0xff] %vm2374_vm3, %v6606_v14  ;;  %7418 = vmatprep.mubr.bf16.mxu1 %v6938_v29 }
 0x51a   : > { %7419 = vmatmul.mubr.bf16.gmra.mrb[172].mxu1 %v6937_v44 }
 0x51b   : > { %v6271_v55 = vpop.permute.xlu1 %6270 }
 0x51c   : > { %v6638_v40 = vpop.permute.xlu0 %6637  ;;  %6279 = vst.msk [vmem:[#allocation4 + $0xa8] sm:$0xff] %vm2374_vm3, %v6271_v55  ;;  %v6933_v3 = vld [vmem:[#allocation4 + $0x50] sm:$0xff] }
 0x51d   : > { %6647 = vst.msk [vmem:[#allocation4 + $0x88] sm:$0xff] %vm2503_vm4, %v6638_v40 }
 0x51f   : > { %v6303_v45 = vpop.permute.xlu1 %6302 }
 0x520   : > { %v6830_v47 = vpop.permute.xlu0 %6829  ;;  %6311 = vst.msk [vmem:[#allocation4 + $0xa8] sm:$0xff] %vm2503_vm4, %v6303_v45 }
 0x521   : > { %6840 = vst.msk [vmem:[#allocation4 + $0x60] sm:$0xff] %vm2374_vm3, %v6830_v47 }
 0x523   : > { %v6335_v20 = vpop.permute.xlu1 %6334 }
 0x524   : > { %v6862_v19 = vpop.permute.xlu0 %6861  ;;  %6343 = vst.msk [vmem:[#allocation4 + $0xa8] sm:$0xff] %vm2632_vm5, %v6335_v20 }
 0x525   : > { %6872 = vst.msk [vmem:[#allocation4 + $0x60] sm:$0xff] %vm2503_vm4, %v6862_v19 }
 0x527   : > { %v6526_v21 = vpop.permute.xlu1 %6525 }
 0x528   : > { %v6384_v25 = vpop.permute.xlu0 %6383  ;;  %6535 = vst.msk [vmem:[#allocation4 + $0x80] sm:$0xff] %vm2503_vm4, %v6526_v21 }
 0x529   : > { %6392 = vst.msk [vmem:[#allocation4 + $0xb0] sm:$0xff] %vm2374_vm3, %v6384_v25 }
 0x52b   : > { %v6558_v46 = vpop.permute.xlu1 %6557  ;;  %v6944_v18 = vld [vmem:[#allocation4 + $0xa8] sm:$0xff] }
 0x52c   : > { %v6416_v32 = vpop.permute.xlu0 %6415  ;;  %6567 = vst.msk [vmem:[#allocation4 + $0x80] sm:$0xff] %vm2632_vm5, %v6558_v46  ;;  %v10192_v46 = vld [vmem:[%s13461_s7] sm:$0xff]  }
 0x52d   : > { %6424 = vst.msk [vmem:[#allocation4 + $0xb0] sm:$0xff] %vm2503_vm4, %v6416_v32  ;;  %v10191_v32 = vld [vmem:[%s13461_s7 + $0x40] sm:$0xff]  }
 0x52e   : > { %9625 = vmatprep.subr.bf16.mxu0 %v10191_v32 }
 0x52f   : > { %v6781_v12 = vpop.permute.xlu1 %6780  ;;  %9626 = vmatpush3.bf16.msra.mxu0 %v10192_v46 }
 0x530   : > { %v6448_v23 = vpop.permute.xlu0 %6447  ;;  %6791 = vst.msk [vmem:[#allocation4 + $0x58] sm:$0xff] %vm2632_vm5, %v6781_v12 }
 0x531   : > { %6456 = vst.msk [vmem:[#allocation4 + $0xb0] sm:$0xff] %vm2632_vm5, %v6448_v23  ;;  %v10193_v23 = vld [vmem:[%s13461_s7 + $0xc0] sm:$0xff]  }
 0x533   : > { %v6496_v26 = vpop.permute.xlu1 %6495  ;;  %v6939_v34 = vld [vmem:[#allocation4 + $0x80] sm:$0xff] }
 0x534   : > { %v6894_v4 = vpop.permute.xlu0 %6893  ;;  %6504 = vst.msk [vmem:[#allocation4 + $0xb8] sm:$0xff] %vm2374_vm3, %v6496_v26 }
 0x535   : > { %6904 = vst.msk [vmem:[#allocation4 + $0x60] sm:$0xff] %vm2632_vm5, %v6894_v4 }
 0x537   : > { %v6719_v1 = vpop.permute.xlu1 %6718  ;;  %v6934_v52 = vld [vmem:[#allocation4 + $0x58] sm:$0xff] }
 0x538   : > { %v6834_v15 = vpop.permute.xlu0 %6833  ;;  %v6945_v63 = vld [vmem:[#allocation4 + $0xb0] sm:$0xff]  ;;  %6728 = vst.msk [vmem:[#allocation4 + $0x90] sm:$0xff] %vm2374_vm3, %v6719_v1 }
 0x539   : > { %6842 = vst.msk [vmem:[#allocation4 + $0xd0] sm:$0xff] %vm2374_vm3, %v6834_v15  ;;  %7426 = vmatprep.mubr.bf16.mxu1 %v6945_v63 }
 0x53a   : > { %7427 = vmatmul.mubr.bf16.gmra.mrb[176].mxu1 %v6944_v18 }
 0x53b   : > { %7467 = vmatprep.mubr.bf16.mxu1 %v6926_v11  ;;  %v6751_v8 = vpop.permute.xlu1 %6750 }
 0x53c   : > { %v6671_v38 = vpop.permute.xlu0 %6670  ;;  %v6935_v30 = vld [vmem:[#allocation4 + $0x60] sm:$0xff]  ;;  %6760 = vst.msk [vmem:[#allocation4 + $0x90] sm:$0xff] %vm2503_vm4, %v6751_v8 }
 0x53d   : > { %6680 = vst.msk [vmem:[#allocation4 + $0x88] sm:$0xff] %vm2632_vm5, %v6671_v38  ;;  %7540 = vmatprep.mubr.bf16.mxu0 %v6935_v30 }
 0x53e   : > { %7541 = vmatmul.mubr.bf16.gmra.mrb[192].mxu0 %v6934_v52 }
 0x53f   : > { %v6783_v43 = vpop.permute.xlu1 %6782 }
 0x540   : > { %v6608_v53 = vpop.permute.xlu0 %6607  ;;  %6792 = vst.msk [vmem:[#allocation4 + $0x90] sm:$0xff] %vm2632_vm5, %v6783_v43 }
 0x541   : > { %6616 = vst.msk [vmem:[#allocation4 + $0xc0] sm:$0xff] %vm2374_vm3, %v6608_v53 }
 0x542   : > { %7468 = vmatmul.mubr.bf16.vlgmr.msra.gmra.mrb[180].mxu1 %v6925_v49 }
 0x543   : > { %9923 = vmatpush3.bf16.msra.mxu1 %v13056_v36  ;;  %7475 = vmatprep.mubr.bf16.mxu1 %v6933_v3  ;;  %v6528_v41 = vpop.permute.xlu1 %6527  ;;  %v6929_v36 = vld [vmem:[#allocation4 + $0x30] sm:$0xff]  ;;  %v8924_v3 = vld [vmem:[%s13460_s6] ss:$0 sm:$0xff] }
 0x544   : > { %v6640_v22 = vpop.permute.xlu0 %6639  ;;  %9924 = vmatprep.subr.bf16.mxu1 %v10190_v60  ;;  %6536 = vst.msk [vmem:[#allocation4 + $0xb8] sm:$0xff] %vm2503_vm4, %v6528_v41  ;;  %v6940_v24 = vld [vmem:[#allocation4 + $0x88] sm:$0xff] }
 0x545   : > { %6648 = vst.msk [vmem:[#allocation4 + $0xc0] sm:$0xff] %vm2503_vm4, %v6640_v22 }
 0x547   : > { %9925 = vmatpush3.bf16.msra.mxu1 %v10190_v60  ;;  %v6560_v10 = vpop.permute.xlu1 %6559  ;;  %v6941_v28 = vld [vmem:[#allocation4 + $0x90] sm:$0xff] }
 0x548   : > { %v6673_v31 = vpop.permute.xlu0 %6672  ;;  %6568 = vst.msk [vmem:[#allocation4 + $0xb8] sm:$0xff] %vm2632_vm5, %v6560_v10  ;;  %9647 = vmatprep.subr.bf16.mxu1 %v10193_v23 }
 0x549   : > { %6681 = vst.msk [vmem:[#allocation4 + $0xc0] sm:$0xff] %vm2632_vm5, %v6673_v31 }
 0x54a   : > { %7476 = vmatmul.mubr.bf16.gmra.mrb[184].mxu1 %v6932_v9 }
 0x54b   : > { %7483 = vmatprep.mubr.bf16.mxu1 %v6940_v24  ;;  %v6721_v16 = vpop.permute.xlu1 %6720 }
 0x54c   : > { %v6832_v56 = vpop.permute.xlu0 %6831  ;;  %6729 = vst.msk [vmem:[#allocation4 + $0xc8] sm:$0xff] %vm2374_vm3, %v6721_v16 }
 0x54d   : > { %6841 = vst.msk [vmem:[#allocation4 + $0x98] sm:$0xff] %vm2374_vm3, %v6832_v56 }
 0x54f   : > { %v6753_v7 = vpop.permute.xlu1 %6752  ;;  %v6946_v5 = vld [vmem:[#allocation4 + $0xb8] sm:$0xff] }
 0x550   : > { %v6864_v58 = vpop.permute.xlu0 %6863  ;;  %6761 = vst.msk [vmem:[#allocation4 + $0xc8] sm:$0xff] %vm2503_vm4, %v6753_v7  ;;  %v6947_v59 = vld [vmem:[#allocation4 + $0xc0] sm:$0xff] }
 0x551   : > { %6873 = vst.msk [vmem:[#allocation4 + $0x98] sm:$0xff] %vm2503_vm4, %v6864_v58 }
 0x552   : > { %7484 = vmatmul.mubr.bf16.gmra.mrb[188].mxu1 %v6939_v34 }
 0x553   : > { %7491 = vmatprep.mubr.bf16.mxu1 %v6947_v59  ;;  %v6785_v62 = vpop.permute.xlu1 %6784 }
 0x554   : > { %v6896_v6 = vpop.permute.xlu0 %6895  ;;  %6793 = vst.msk [vmem:[#allocation4 + $0xc8] sm:$0xff] %vm2632_vm5, %v6785_v62 }
 0x555   : > { %6905 = vst.msk [vmem:[#allocation4 + $0x98] sm:$0xff] %vm2632_vm5, %v6896_v6 }
 0x558   : > { %v6866_v57 = vpop.permute.xlu0 %6865 }
 0x559   : > { %6874 = vst.msk [vmem:[#allocation4 + $0xd0] sm:$0xff] %vm2503_vm4, %v6866_v57 }
 0x55a   : > { %7492 = vmatmul.mubr.bf16.gmra.mrb[192].mxu1 %v6946_v5 }
 0x55b   : > { %9926 = vmatprep.mubr.msk.bf16.mxu1 %vm385_vm1, %v6929_v36  ;;  %v6948_v35 = vld [vmem:[#allocation4 + $0xc8] sm:$0xff] }
 0x55c   : > { %v6898_v51 = vpop.permute.xlu0 %6897  ;;  %v6942_v42 = vld [vmem:[#allocation4 + $0x98] sm:$0xff] }
 0x55d   : > { %6906 = vst.msk [vmem:[#allocation4 + $0xd0] sm:$0xff] %vm2632_vm5, %v6898_v51  ;;  %7548 = vmatprep.mubr.bf16.mxu0 %v6942_v42 }
 0x55e   : > { %7549 = vmatmul.mubr.bf16.gmra.mrb[196].mxu0 %v6941_v28 }
 0x562   : > { %9927 = vmatmul.mubr.msk.bf16.vlgmr.msra.gmra.mrb[196].mxu1 %vm385_vm1, %v6936_v2 }
 0x563   : > { %9930 = vmatprep.mubr.msk.bf16.mxu1 %vm385_vm1, %v6943_v37 }
 0x564   : > { %v6949_v27 = vld [vmem:[#allocation4 + $0xd0] sm:$0xff] }
 0x565   : > { %7556 = vmatprep.mubr.bf16.mxu0 %v6949_v27 }
 0x566   : > { %7557 = vmatmul.mubr.bf16.gmra.mrb[200].mxu0 %v6948_v35 }
 0x56a   : > { %9931 = vmatmul.mubr.msk.bf16.gmra.mrb[200].mxu1 %vm385_vm1, %v6950_v13 }
 0x5b5   : > { %v9515_v54 = vpop.f32.mrb[164].mxu1 }
 0x5b6   : > { %v9516_v17 = vpop.f32.mrb[165].mxu1 }
 0x5b7   : > { %v9517_v39 = vadd.f32 %v9516_v17, %v9515_v54  ;;  %v9518_v0 = vpop.f32.mrb[166].mxu1 }
 0x5b8   : > { %v9519_v48 = vpop.f32.mrb[167].mxu1 }
 0x5b9   : > { %v9520_v61 = vadd.f32 %v9519_v48, %v9518_v0  ;;  %v7405_v9 = vadd.f32 %v9517_v39, %v8924_v3 }
 0x5bb   : > { %v7408_v58 = vadd.f32 %v9520_v61, %v8924_v3 }
 0x5c9   : > { %v9521_v14 = vpop.f32.mrb[168].mxu1 }
 0x5ca   : > { %v9522_v33 = vpop.f32.mrb[169].mxu1 }
 0x5cb   : > { %v9523_v29 = vadd.f32 %v9522_v33, %v9521_v14  ;;  %v9524_v44 = vpop.f32.mrb[170].mxu1 }
 0x5cc   : > { %v9525_v40 = vpop.f32.mrb[171].mxu1 }
 0x5cd   : > { %v9526_v55 = vadd.f32 %v9525_v40, %v9524_v44  ;;  %v7413_v36 = vadd.f32 %v9523_v29, %v8924_v3 }
 0x5cf   : > { %v7416_v2 = vadd.f32 %v9526_v55, %v8924_v3 }
 0x5e1   : > { %v9595_v47 = vpop.f32.mrb[188].mxu0 }
 0x5e2   : > { %v9596_v45 = vpop.f32.mrb[189].mxu0 }
 0x5e3   : > { %v9597_v19 = vadd.f32 %v9596_v45, %v9595_v47  ;;  %v9598_v20 = vpop.f32.mrb[190].mxu0 }
 0x5e4   : > { %v9599_v25 = vpop.f32.mrb[191].mxu0 }
 0x5e5   : > { %v9600_v21 = vadd.f32 %v9599_v25, %v9598_v20 }
 0x5ed   : > { %v9527_v12 = vpop.f32.mrb[172].mxu1 }
 0x5ee   : > { %v9528_v4 = vpop.f32.mrb[173].mxu1 }
 0x5ef   : > { %v9529_v26 = vadd.f32 %v9528_v4, %v9527_v12  ;;  %v9530_v15 = vpop.f32.mrb[174].mxu1 }
 0x5f0   : > { %v9531_v1 = vpop.f32.mrb[175].mxu1 }
 0x5f1   : > { %v9532_v63 = vadd.f32 %v9531_v1, %v9530_v15  ;;  %v7421_v0 = vadd.f32 %v9529_v26, %v8924_v3 }
 0x5f3   : > { %v7424_v33 = vadd.f32 %v9532_v63, %v8924_v3 }
 0x60d   : > { %v9533_v18 = vpop.f32.mrb[176].mxu1 }
 0x60e   : > { %v9534_v11 = vpop.f32.mrb[177].mxu1 }
 0x60f   : > { %v9535_v38 = vadd.f32 %v9534_v11, %v9533_v18  ;;  %v9536_v8 = vpop.f32.mrb[178].mxu1 }
 0x610   : > { %v9537_v30 = vpop.f32.mrb[179].mxu1 }
 0x611   : > { %v9538_v52 = vadd.f32 %v9537_v30, %v9536_v8  ;;  %v9601_v53 = vpop.f32.mrb[192].mxu0 }
 0x612   : > { %v9602_v43 = vpop.f32.mrb[193].mxu0 }
 0x613   : > { %v9603_v60 = vadd.f32 %v9602_v43, %v9601_v53  ;;  %v9604_v49 = vpop.f32.mrb[194].mxu0 }
 0x614   : > { %v9605_v22 = vpop.f32.mrb[195].mxu0 }
 0x615   : > { %v9606_v41 = vadd.f32 %v9605_v22, %v9604_v49  ;;  %v9555_v31 = vpop.f32.mrb[180].mxu1 }
 0x616   : > { %v9556_v10 = vpop.f32.mrb[181].mxu1 }
 0x617   : > { %v9557_v24 = vadd.f32 %v9556_v10, %v9555_v31  ;;  %v9558_v56 = vpop.f32.mrb[182].mxu1 }
 0x618   : > { %v9559_v16 = vpop.f32.mrb[183].mxu1 }
 0x619   : > { %v7470_v7 = vadd.f32 %v9557_v24, %v7405_v9  ;;  %v9560_v34 = vadd.f32 %v9559_v16, %v9558_v56 }
 0x61b   : > { %v7473_v59 = vadd.f32 %v9560_v34, %v7408_v58  ;;  %v7535_v6 = vadd.f32 %v9597_v19, %v7470_v7  ;;  %v7429_v19 = vadd.f32 %v9535_v38, %v8924_v3 }
 0x61d   : > { %v9561_v62 = vpop.f32.mrb[184].mxu1  ;;  %v7538_v57 = vadd.f32 %v9600_v21, %v7473_v59  ;;  %v7432_v21 = vadd.f32 %v9538_v52, %v8924_v3 }
 0x61e   : > { %v9562_v5 = vpop.f32.mrb[185].mxu1 }
 0x61f   : > { %v9563_v51 = vadd.f32 %v9562_v5, %v9561_v62  ;;  %v9564_v42 = vpop.f32.mrb[186].mxu1 }
 0x620   : > { %v9565_v28 = vpop.f32.mrb[187].mxu1 }
 0x621   : > { %v7478_v37 = vadd.f32 %v9563_v51, %v7413_v36  ;;  %v9566_v27 = vadd.f32 %v9565_v28, %v9564_v42  ;;  %v10331_v28 = vmov 1966171168  }
 0x623   : > { %v7481_v35 = vadd.f32 %v9566_v27, %v7416_v2  ;;  %v7543_v13 = vadd.f32 %v9603_v60, %v7478_v37  ;;  %v7657_v2 = vunpack.c.l.s4 %v10331_v28  ;;  %v7659_v37 = vlaneseq  ;;  %v10211_v28 = vld [vmem:[%s13461_s7 + $0x68] sm:$0xff]  }
 0x625   : > { %v9567_v54 = vpop.f32.mrb[188].mxu1  ;;  %v7546_v17 = vadd.f32 %v9606_v41, %v7481_v35  ;;  %v7658_v27 = vunpack.c.0.s8 %v7657_v2  ;;  %v7660_v35 = vshrl.u32 %v7659_v37, 7  ;;  %v10212_v37 = vld [vmem:[%s13461_s7 + $0x28] sm:$0xff]  }
 0x626   : > { %v9568_v39 = vpop.f32.mrb[189].mxu1 }
 0x627   : > { %v9569_v48 = vadd.f32 %v9568_v39, %v9567_v54  ;;  %v9570_v61 = vpop.f32.mrb[190].mxu1  ;;  %v10195_v39 = vld [vmem:[%s13461_s7 + $0x48] sm:$0xff]  }
 0x628   : > { %v9571_v14 = vpop.f32.mrb[191].mxu1  ;;  %9627 = vmatprep.subr.bf16.mxu0 %v10195_v39 }
 0x629   : > { %v7486_v44 = vadd.f32 %v9569_v48, %v7421_v0  ;;  %v9572_v40 = vadd.f32 %v9571_v14, %v9570_v61 }
 0x62b   : > { %v7489_v47 = vadd.f32 %v9572_v40, %v7424_v33  ;;  %v13137_v33 = vsub.s32 %v7658_v27, %v7660_v35  ;;  %v10197_v40 = vld [vmem:[%s13461_s7 + $0xc8] sm:$0xff]   ;;  %v10215_v35 = vld [vmem:[%s13461_s7 + $0x70] sm:$0xff]  }
 0x62c   : > { %v10213_v27 = vld [vmem:[%s13461_s7 + $0xe8] sm:$0xff]  }
 0x62d   : > { %v9573_v29 = vpop.f32.mrb[192].mxu1 }
 0x62e   : > { %v9574_v45 = vpop.f32.mrb[193].mxu1 }
 0x62f   : > { %v9575_v20 = vadd.f32 %v9574_v45, %v9573_v29  ;;  %v9576_v55 = vpop.f32.mrb[194].mxu1  ;;  %v7652_v29 = vld [vmem:[#allocation7] sm:$0x1] }
 0x630   : > { %v9577_v25 = vpop.f32.mrb[195].mxu1 }
 0x631   : > { %v7494_v32 = vadd.f32 %v9575_v20, %v7429_v19  ;;  %v9578_v46 = vadd.f32 %v9577_v25, %v9576_v55  ;;  %v9607_v23 = vpop.f32.mrb[196].mxu0  ;;  %v10198_v20 = vld [vmem:[%s13461_s7 + $0x88] sm:$0xff]   ;;  %v10199_v55 = vld [vmem:[%s13461_s7 + $0x50] sm:$0xff]  }
 0x632   : > { %v9608_v12 = vpop.f32.mrb[197].mxu0 }
 0x633   : > { %v7497_v4 = vadd.f32 %v9578_v46, %v7432_v21  ;;  %v9609_v26 = vadd.f32 %v9608_v12, %v9607_v23  ;;  %v9610_v15 = vpop.f32.mrb[198].mxu0  ;;  %v10200_v46 = vld [vmem:[%s13461_s7 + $0x10] sm:$0xff]  }
 0x634   : > { %v9611_v1 = vpop.f32.mrb[199].mxu0  ;;  %v10201_v23 = vld [vmem:[%s13461_s7 + $0xd0] sm:$0xff]  }
 0x635   : > { %v9612_v18 = vadd.f32 %v9611_v1, %v9610_v15  ;;  %v9928_v63 = vpop.f32.mrb[196].mxu1  ;;  %v7551_v11 = vadd.f32 %v9609_v26, %v7486_v44  ;;  %v10196_v44 = vld [vmem:[%s13461_s7 + $0x8] sm:$0xff]   ;;  %v7754_v1 = vld [vmem:[#allocation7 + $0x4] sm:$0x1] }
 0x636   : > { %v7608_v8 = vadd.f32 %v9928_v63, %v7543_v13  ;;  %v7599_v30 = vpop.f32.mrb[197].mxu1  ;;  %9628 = vmatpush3.bf16.msra.mxu0 %v10196_v44  ;;  %v10203_v63 = vld [vmem:[%s13461_s7 + $0x58] sm:$0xff]  }
 0x637   : > { %v7600_v53 = vadd.f32 %v7599_v30, %v7535_v6  ;;  %v9929_v43 = vpop.f32.mrb[198].mxu1  ;;  %v7554_v38 = vadd.f32 %v9612_v18, %v7489_v47  ;;  %9629 = vmatprep.subr.bf16.mxu0 %v10199_v55  ;;  %v10202_v18 = vld [vmem:[%s13461_s7 + $0x90] sm:$0xff]   ;;  %v10221_v44 = vld [vmem:[%s13461_s7 + $0xf8] sm:$0xff]  }
 0x638   : > { %v7611_v60 = vadd.f32 %v9929_v43, %v7546_v17  ;;  %v7602_v49 = vpop.f32.mrb[199].mxu1  ;;  %v10194_v17 = vld [vmem:[%s13461_s7 + $0x80] sm:$0xff]   ;;  %v10220_v47 = vld [vmem:[%s13461_s7 + $0x38] sm:$0xff]  }
 0x639   : > { %v7603_v52 = vadd.f32 %v7602_v49, %v7538_v57  ;;  %v9613_v3 = vpop.f32.mrb[200].mxu0  ;;  %9648 = vmatpush3.bf16.msra.mxu1 %v10194_v17  ;;  %v7777_v43 = vld [vmem:[#allocation7 + $0x5] sm:$0x1]  ;;  %v10217_v17 = vld [vmem:[%s13461_s7 + $0xf0] sm:$0xff]  }
 0x63a   : > { %v7631_v22 = vmax.f32 %v7608_v8, %v7611_v60  ;;  %v9614_v41 = vpop.f32.mrb[201].mxu0  ;;  %9649 = vmatprep.subr.bf16.mxu1 %v10197_v40  ;;  %9630 = vmatpush3.bf16.msra.mxu0 %v10200_v46  ;;  %v10205_v60 = vld [vmem:[%s13461_s7 + $0xd8] sm:$0xff]  }
 0x63b   : > { %v7630_v31 = vmax.f32 %v7600_v53, %v7603_v52  ;;  %v9615_v10 = vadd.f32 %v9614_v41, %v9613_v3  ;;  %v9616_v9 = vpop.f32.mrb[202].mxu0  ;;  %9631 = vmatprep.subr.bf16.mxu0 %v10203_v63  ;;  %v7724_v41 = vld [vmem:[#allocation7 + $0x3] sm:$0x1] }
 0x63c   : > { %7636 = vst.msk [vmem:[#allocation6 + $0x8] sm:$0xff] %vm7634_vm6, %v7631_v22  ;;  %v9617_v24 = vpop.f32.mrb[203].mxu0  ;;  %v7708_v22 = vld [vmem:[#allocation7 + $0x2] sm:$0x1] }
 0x63d   : > { %7635 = vst.msk [vmem:[#allocation6] sm:$0xff] %vm7634_vm6, %v7630_v31  ;;  %v9618_v56 = vadd.f32 %v9617_v24, %v9616_v9  ;;  %v7559_v16 = vadd.f32 %v9615_v10, %v7494_v32  ;;  %v9932_v58 = vpop.f32.mrb[200].mxu1  ;;  %9650 = vmatpush3.bf16.msra.mxu1 %v10198_v20  ;;  %v7793_v31 = vld [vmem:[#allocation7 + $0x6] sm:$0x1]  ;;  %v10252_v20 = vld [vmem:[%s13461_s7 + $0x178] sm:$0xff]  }
 0x63e   : > { %v7615_v7 = vpop.f32.mrb[201].mxu1  ;;  %9651 = vmatprep.subr.bf16.mxu1 %v10201_v23 }
 0x63f   : > { %v7624_v34 = vadd.f32 %v9932_v58, %v7559_v16  ;;  %v7616_v59 = vadd.f32 %v7615_v7, %v7551_v11  ;;  %v7562_v6 = vadd.f32 %v9618_v56, %v7497_v4  ;;  %v9933_v62 = vpop.f32.mrb[202].mxu1  ;;  %v7692_v11 = vld [vmem:[#allocation7 + $0x1] sm:$0x1]  ;;  %v10206_v56 = vld [vmem:[%s13461_s7 + $0x98] sm:$0xff]   ;;  %v7809_v58 = vld [vmem:[#allocation7 + $0x7] sm:$0x1] }
 0x640   : > { %v7618_v57 = vpop.f32.mrb[203].mxu1  ;;  %v10207_v16 = vld [vmem:[%s13461_s7 + $0x60] sm:$0xff]  }
 0x641   : > { %v7627_v5 = vadd.f32 %v9933_v62, %v7562_v6  ;;  %v7619_v36 = vadd.f32 %v7618_v57, %v7554_v38  ;;  %9652 = vmatpush3.bf16.msra.mxu1 %v10202_v18  ;;  %v10204_v38 = vld [vmem:[%s13461_s7 + $0x18] sm:$0xff]   ;;  %v10208_v57 = vld [vmem:[%s13461_s7 + $0x20] sm:$0xff]  }
 0x642   : > { %9632 = vmatpush3.bf16.msra.mxu0 %v10204_v38  ;;  %9653 = vmatprep.subr.bf16.mxu1 %v10205_v60 }
 0x643   : > { %v7633_v51 = vmax.f32 %v7624_v34, %v7627_v5  ;;  %v7632_v42 = vmax.f32 %v7616_v59, %v7619_v36  ;;  %v10209_v5 = vld [vmem:[%s13461_s7 + $0xe0] sm:$0xff]   ;;  %9633 = vmatprep.subr.bf16.mxu0 %v10207_v16 }
 0x644   : > { %v7639_v13 = vld [vmem:[#allocation6] ss:$2 sm:$0xff]  ;;  %v7643_v54 = vld [vmem:[#allocation6 + $0x1] ss:$2 sm:$0xff] }
 0x645   : > { %7638 = vst.msk [vmem:[#allocation6 + $0x18] sm:$0xff] %vm7634_vm6, %v7633_v51  ;;  %7637 = vst.msk [vmem:[#allocation6 + $0x10] sm:$0xff] %vm7634_vm6, %v7632_v42  ;;  %v7646_v61 = vmax.f32 %v7639_v13, %v7643_v54  ;;  %9654 = vmatpush3.bf16.msra.mxu1 %v10206_v56  ;;  %v10210_v42 = vld [vmem:[%s13461_s7 + $0xa0] sm:$0xff]   ;;  %v10214_v54 = vld [vmem:[%s13461_s7 + $0xa8] sm:$0xff]  }
 0x646   : > { %9634 = vmatpush3.bf16.msra.mxu0 %v10208_v57  ;;  %9655 = vmatprep.subr.bf16.mxu1 %v10209_v5  ;;  %v10230_v5 = vld [vmem:[%s13461_s7 + $0x1c8] sm:$0xff]  }
 0x647   : > { %9635 = vmatprep.subr.bf16.mxu0 %v10211_v28  ;;  %v10231_v28 = vld [vmem:[%s13461_s7 + $0x188] sm:$0xff]  }
 0x649   : > { %9656 = vmatpush3.bf16.msra.mxu1 %v10210_v42  ;;  %v10232_v42 = vld [vmem:[%s13461_s7 + $0x150] sm:$0xff]  }
 0x64a   : > { %9657 = vmatprep.subr.bf16.mxu1 %v10213_v27  ;;  %9636 = vmatpush3.bf16.msra.mxu0 %v10212_v37  ;;  %v10233_v37 = vld [vmem:[%s13461_s7 + $0x110] sm:$0xff]   ;;  %v10236_v27 = vld [vmem:[%s13461_s7 + $0x158] sm:$0xff]  }
 0x64b   : > { %9637 = vmatprep.subr.bf16.mxu0 %v10215_v35  ;;  %v10235_v35 = vld [vmem:[%s13461_s7 + $0x190] sm:$0xff]  }
 0x64c   : > { %v7641_v0 = vld [vmem:[#allocation6 + $0x10] ss:$2 sm:$0xff]  ;;  %v7645_v48 = vld [vmem:[#allocation6 + $0x11] ss:$2 sm:$0xff] }
 0x64d   : > { %v7647_v14 = vmax.f32 %v7641_v0, %v7645_v48  ;;  %v10216_v0 = vld [vmem:[%s13461_s7 + $0x30] sm:$0xff]   ;;  %v10219_v48 = vld [vmem:[%s13461_s7 + $0x78] sm:$0xff]   ;;  %9658 = vmatpush3.bf16.msra.mxu1 %v10214_v54 }
 0x64e   : > { %9659 = vmatprep.subr.bf16.mxu1 %v10217_v17  ;;  %9638 = vmatpush3.bf16.msra.mxu0 %v10216_v0  ;;  %v10237_v54 = vld [vmem:[%s13461_s7 + $0x118] sm:$0xff]   ;;  %v10240_v17 = vld [vmem:[%s13461_s7 + $0x160] sm:$0xff]  }
 0x64f   : > { %v7648_v45 = vpack.c.bf16 %v7647_v14, %v7646_v61  ;;  %v8983_v19 = vpack.c.bf16 %v7647_v14, %v7647_v14  ;;  %v10218_v14 = vld [vmem:[%s13461_s7 + $0xb0] sm:$0xff]   ;;  %9639 = vmatprep.subr.bf16.mxu0 %v10219_v48  ;;  %v10242_v0 = vld [vmem:[%s13461_s7 + $0x1e0] sm:$0xff]  }
 0x650   : > { %v10241_v48 = vld [vmem:[%s13461_s7 + $0x120] sm:$0xff]  }
 0x651   : > { %v7662_v25 = vrot.slane %v7648_v45, %v13137_v33  ;;  %v7745_v21 = vrot.slane %v8983_v19, %v13137_v33  ;;  %v7653_v32 = vsel %vm13146_vm9, %v7648_v45, %v7652_v29  ;;  %9660 = vmatpush3.bf16.msra.mxu1 %v10218_v14  ;;  %v10222_v29 = vld [vmem:[%s13461_s7 + $0xb8] sm:$0xff]   ;;  %v10223_v45 = vld [vmem:[%s13461_s7 + $0x140] sm:$0xff]  }
 0x652   : > { %7654 = vst [vmem:[#allocation7] sm:$0x1] %v7653_v32  ;;  %9661 = vmatprep.subr.bf16.mxu1 %v10221_v44  ;;  %9640 = vmatpush3.bf16.msra.mxu0 %v10220_v47  ;;  %v10226_v19 = vld [vmem:[%s13461_s7 + $0x1c0] sm:$0xff]   ;;  %v10246_v44 = vld [vmem:[%s13461_s7 + $0x1e8] sm:$0xff]   ;;  %v10248_v47 = vld [vmem:[%s13461_s7 + $0x170] sm:$0xff]  }
 0x653   : > { %v7669_v12 = vrot.slane %v7662_v25, %v13137_v33  ;;  %v7683_v4 = vcombine.high %v7662_v25, %v7662_v25  ;;  %v7752_v26 = vrot.slane %v7745_v21, %v13137_v33  ;;  %v7768_v15 = vcombine.high %v7745_v21, %v7745_v21  ;;  %9669 = vmatprep.subr.bf16.mxu0 %v10223_v45  ;;  %v10243_v14 = vld [vmem:[%s13461_s7 + $0x1a0] sm:$0xff]   ;;  %v10250_v45 = vld [vmem:[%s13461_s7 + $0x1f0] sm:$0xff]  }
 0x655   : > { %v7671_v8 = vshrl.u32 %v7669_v12, 16  ;;  %v7690_v30 = vrot.slane %v7683_v4, %v13137_v33  ;;  %v7775_v53 = vrot.slane %v7768_v15, %v13137_v33  ;;  %v7706_v49 = vcombine.high %v7669_v12, %v7669_v12  ;;  %9662 = vmatpush3.bf16.msra.mxu1 %v10222_v29  ;;  %v10247_v29 = vld [vmem:[%s13461_s7 + $0x1a8] sm:$0xff]  }
 0x656   : > { %v7791_v52 = vcombine.high %v7752_v26, %v7752_v26  ;;  %v7755_v3 = vsel %vm13146_vm9, %v7752_v26, %v7754_v1  ;;  %v7758_v59 = vshrl.u32 %v7752_v26, 16  ;;  %9691 = vmatprep.subr.bf16.mxu1 %v10226_v19  ;;  %v10249_v19 = vld [vmem:[%s13461_s7 + $0x130] sm:$0xff]  }
 0x657   : > { %7675 = vrot.lane.b32.xlu0 %v7671_v8, %s10328_s29  ;;  %v7696_v10 = vshrl.u32 %v7690_v30, 16  ;;  %v7722_v9 = vcombine.high %v7690_v30, %v7690_v30  ;;  %v7807_v24 = vcombine.high %v7775_v53, %v7775_v53  ;;  %7756 = vst [vmem:[#allocation7 + $0x4] sm:$0x1] %v7755_v3  ;;  %v7693_v7 = vsel %vm13146_vm9, %v7690_v30, %v7692_v11 }
 0x658   : > { %v7778_v34 = vsel %vm13146_vm9, %v7775_v53, %v7777_v43  ;;  %7694 = vst [vmem:[#allocation7 + $0x1] sm:$0x1] %v7693_v7  ;;  %v7709_v6 = vsel %vm13146_vm9, %v7706_v49, %v7708_v22  ;;  %v7794_v36 = vsel %vm13146_vm9, %v7791_v52, %v7793_v31  ;;  %v7781_v2 = vshrl.u32 %v7775_v53, 16 }
 0x659   : > { %7700 = vrot.lane.b32.xlu1 %v7696_v10, %s10328_s29  ;;  %7779 = vst [vmem:[#allocation7 + $0x5] sm:$0x1] %v7778_v34  ;;  %v7725_v62 = vsel %vm13146_vm9, %v7722_v9, %v7724_v41  ;;  %7710 = vst [vmem:[#allocation7 + $0x2] sm:$0x1] %v7709_v6  ;;  %v7810_v51 = vsel %vm13146_vm9, %v7807_v24, %v7809_v58  ;;  %v7712_v13 = vshrl.u32 %v7706_v49, 16  ;;  %v7728_v39 = vshrl.u32 %v7722_v9, 16 }
 0x65a   : > { %7726 = vst [vmem:[#allocation7 + $0x3] sm:$0x1] %v7725_v62  ;;  %7795 = vst [vmem:[#allocation7 + $0x6] sm:$0x1] %v7794_v36  ;;  %v7797_v61 = vshrl.u32 %v7791_v52, 16  ;;  %v7813_v40 = vshrl.u32 %v7807_v24, 16 }
 0x65b   : > { %7762 = vrot.lane.b32.xlu0 %v7758_v59, %s10328_s29  ;;  %7811 = vst [vmem:[#allocation7 + $0x7] sm:$0x1] %v7810_v51  ;;  %v7680_v25 = vld [vmem:[#allocation7] sm:$0x1]  ;;  %v10228_v62 = vld [vmem:[%s13461_s7 + $0x148] sm:$0xff]  }
 0x65c   : > { %v10224_v58 = vld [vmem:[%s13461_s7 + $0x100] sm:$0xff]   ;;  %v10229_v51 = vld [vmem:[%s13461_s7 + $0x108] sm:$0xff]  }
 0x65d   : > { %7785 = vrot.lane.b32.xlu1 %v7781_v2, %s10328_s29  ;;  %v10227_v6 = vld [vmem:[%s13461_s7 + $0x180] sm:$0xff]   ;;  %v10234_v2 = vld [vmem:[%s13461_s7 + $0x1d0] sm:$0xff]  }
 0x65e   : > { %v7765_v12 = vld [vmem:[#allocation7 + $0x4] sm:$0x1] }
 0x65f   : > { %7716 = vrot.lane.b32.xlu0 %v7712_v13, %s10328_s29  ;;  %v7703_v46 = vld [vmem:[#allocation7 + $0x1] sm:$0x1]  ;;  %v10238_v13 = vld [vmem:[%s13461_s7 + $0x1d8] sm:$0xff]  }
 0x660   : > { %v7788_v15 = vld [vmem:[#allocation7 + $0x5] sm:$0x1]  ;;  %v7719_v63 = vld [vmem:[#allocation7 + $0x2] sm:$0x1] }
 0x661   : > { %7732 = vrot.lane.b32.xlu1 %v7728_v39, %s10328_s29  ;;  %v7735_v30 = vld [vmem:[#allocation7 + $0x3] sm:$0x1]  ;;  %v7804_v38 = vld [vmem:[#allocation7 + $0x6] sm:$0x1]  ;;  %v10239_v39 = vld [vmem:[%s13461_s7 + $0x198] sm:$0xff]  }
 0x662   : > { %v7820_v52 = vld [vmem:[#allocation7 + $0x7] sm:$0x1] }
 0x663   : > { %7801 = vrot.lane.b32.xlu0 %v7797_v61, %s10328_s29  ;;  %v10244_v61 = vld [vmem:[%s13461_s7 + $0x168] sm:$0xff]  }
 0x665   : > { %7817 = vrot.lane.b32.xlu1 %v7813_v40, %s10328_s29  ;;  %v10245_v40 = vld [vmem:[%s13461_s7 + $0x128] sm:$0xff]  }
 0x6c9   : > { %v7676_v55 = vpop.permute.xlu0 %7675 }
 0x6ca   : > { %v7681_v21 = vsel %vm13262_vm11, %v7676_v55, %v7680_v25  ;;  %v10251_v55 = vld [vmem:[%s13461_s7 + $0x1b0] sm:$0xff]   ;;  %v10254_v25 = vld [vmem:[%s13461_s7 + $0x1f8] sm:$0xff]  }
 0x6cb   : > { %7682 = vst [vmem:[#allocation7] sm:$0x1] %v7681_v21  ;;  %v7701_v32 = vpop.permute.xlu1 %7700  ;;  %v10253_v21 = vld [vmem:[%s13461_s7 + $0x138] sm:$0xff]  }
 0x6cc   : > { %v7704_v23 = vsel %vm13262_vm11, %v7701_v32, %v7703_v46  ;;  %v10255_v32 = vld [vmem:[%s13461_s7 + $0x1b8] sm:$0xff]  }
 0x6cd   : > { %7705 = vst [vmem:[#allocation7 + $0x1] sm:$0x1] %v7704_v23  ;;  %v7763_v4 = vpop.permute.xlu0 %7762 }
 0x6ce   : > { %v7766_v26 = vsel %vm13262_vm11, %v7763_v4, %v7765_v12  ;;  %v10256_v12 = vld [vmem:[%s13463_s9] sm:$0xff]   ;;  %v10257_v4 = vld [vmem:[%s13463_s9 + $0x8] sm:$0xff]  }
 0x6cf   : > { %7767 = vst [vmem:[#allocation7 + $0x4] sm:$0x1] %v7766_v26  ;;  %v7786_v1 = vpop.permute.xlu1 %7785  ;;  %v10259_v26 = vld [vmem:[%s13463_s9 + $0x18] sm:$0xff]  }
 0x6d0   : > { %v7789_v18 = vsel %vm13262_vm11, %v7786_v1, %v7788_v15  ;;  %v7952_v1 = vld [vmem:[%s13462_s8] sm:$0x1] }
 0x6d1   : > { %7790 = vst [vmem:[#allocation7 + $0x5] sm:$0x1] %v7789_v18  ;;  %v7717_v11 = vpop.permute.xlu0 %7716 }
 0x6d2   : > { %v7720_v8 = vsel %vm13262_vm11, %v7717_v11, %v7719_v63 }
 0x6d3   : > { %7721 = vst [vmem:[#allocation7 + $0x2] sm:$0x1] %v7720_v8  ;;  %v7733_v53 = vpop.permute.xlu1 %7732 }
 0x6d4   : > { %v7736_v43 = vsel %vm13262_vm11, %v7733_v53, %v7735_v30 }
 0x6d5   : > { %7737 = vst [vmem:[#allocation7 + $0x3] sm:$0x1] %v7736_v43  ;;  %v7802_v60 = vpop.permute.xlu0 %7801 }
 0x6d6   : > { %v7805_v49 = vsel %vm13262_vm11, %v7802_v60, %v7804_v38 }
 0x6d7   : > { %7806 = vst [vmem:[#allocation7 + $0x6] sm:$0x1] %v7805_v49  ;;  %v7818_v3 = vpop.permute.xlu1 %7817 }
 0x6d8   : > { %v7821_v22 = vsel %vm13262_vm11, %v7818_v3, %v7820_v52 }
 0x6d9   : > { %7822 = vst [vmem:[#allocation7 + $0x7] sm:$0x1] %v7821_v22 }
 0x6e0   : > { %v7823_v41 = vld [vmem:[#allocation7] sm:$0xff] }
 0x6e1   : > { %v7961_v31 = vrot.slane %v7823_v41, %v13137_v33  ;;  %v7954_v10 = vcombine.high %v7823_v41, %v7823_v41 }
 0x6e3   : > { %v7969_v9 = vcombine.high %v7961_v31, %v7961_v31  ;;  %v13284_v24 = vrot.slane %v7954_v10, %v13137_v33  ;;  %v7977_v56 = vrot.slane %v7961_v31, %v13137_v33 }
 0x6e5   : > { %v7991_v16 = vrot.slane %v7969_v9, %v13137_v33  ;;  %v7970_v7 = vcombine.high %v13284_v24, %v13284_v24  ;;  %v7999_v57 = vcombine.high %v7977_v56, %v7977_v56  ;;  %v7984_v46 = vrot.slane %v13284_v24, %v13137_v33 }
 0x6e7   : > { %8427 = vmatprep.mubr.bf16.mxu0 %v7991_v16  ;;  %v8001_v34 = vcombine.high %v7991_v16, %v7991_v16  ;;  %v7998_v59 = vrot.slane %v7970_v7, %v13137_v33  ;;  %v8000_v23 = vcombine.high %v7984_v46, %v7984_v46  ;;  %v10258_v33 = vld [vmem:[%s13463_s9 + $0x10] sm:$0xff]  }
 0x6e8   : > { %8428 = vmatmul.mubr.bf16.vlgmr.msra.gmra.mrb[204].mxu0 %v7977_v56 }
 0x6e9   : > { %9670 = vmatpush3.bf16.msra.mxu0 %v10224_v58  ;;  %8467 = vmatprep.mubr.bf16.mxu1 %v8001_v34  ;;  %v8002_v36 = vcombine.high %v7998_v59, %v7998_v59 }
 0x6ea   : > { %8507 = vmatprep.mubr.bf16.mxu0 %v7998_v59  ;;  %8468 = vmatmul.mubr.bf16.vlgmr.msra.gmra.mrb[204].mxu1 %v7999_v57  ;;  %v8564_v59 = vld [vmem:[%s13464_s10] sm:$0x1] }
 0x6eb   : > { %9692 = vmatpush3.bf16.msra.mxu1 %v10227_v6  ;;  %9671 = vmatprep.subr.bf16.mxu0 %v10228_v62 }
 0x6ec   : > { %8547 = vmatprep.mubr.bf16.mxu1 %v8002_v36  ;;  %9693 = vmatprep.subr.bf16.mxu1 %v10230_v5 }
 0x6ed   : > { %9672 = vmatpush3.bf16.msra.mxu0 %v10229_v51 }
 0x6ee   : > { %9673 = vmatprep.subr.bf16.mxu0 %v10232_v42 }
 0x6ef   : > { %9694 = vmatpush3.bf16.msra.mxu1 %v10231_v28 }
 0x6f0   : > { %9695 = vmatprep.subr.bf16.mxu1 %v10234_v2 }
 0x6f1   : > { %9674 = vmatpush3.bf16.msra.mxu0 %v10233_v37 }
 0x6f2   : > { %9675 = vmatprep.subr.bf16.mxu0 %v10236_v27 }
 0x6f3   : > { %9696 = vmatpush3.bf16.msra.mxu1 %v10235_v35 }
 0x6f4   : > { %9697 = vmatprep.subr.bf16.mxu1 %v10238_v13 }
 0x6f5   : > { %9676 = vmatpush3.bf16.msra.mxu0 %v10237_v54 }
 0x6f6   : > { %9677 = vmatprep.subr.bf16.mxu0 %v10240_v17 }
 0x6f7   : > { %9698 = vmatpush3.bf16.msra.mxu1 %v10239_v39 }
 0x6f8   : > { %9699 = vmatprep.subr.bf16.mxu1 %v10242_v0 }
 0x6f9   : > { %9678 = vmatpush3.bf16.msra.mxu0 %v10241_v48 }
 0x6fa   : > { %9679 = vmatprep.subr.bf16.mxu0 %v10244_v61 }
 0x6fb   : > { %9700 = vmatpush3.bf16.msra.mxu1 %v10243_v14 }
 0x6fc   : > { %9701 = vmatprep.subr.bf16.mxu1 %v10246_v44 }
 0x6fd   : > { %9680 = vmatpush3.bf16.msra.mxu0 %v10245_v40 }
 0x6fe   : > { %9681 = vmatprep.subr.bf16.mxu0 %v10248_v47 }
 0x6ff   : > { %9702 = vmatpush3.bf16.msra.mxu1 %v10247_v29 }
 0x700   : > { %9703 = vmatprep.subr.bf16.mxu1 %v10250_v45 }
 0x701   : > { %9682 = vmatpush3.bf16.msra.mxu0 %v10249_v19 }
 0x702   : > { %9683 = vmatprep.subr.bf16.mxu0 %v10252_v20 }
 0x703   : > { %9704 = vmatpush3.bf16.msra.mxu1 %v10251_v55 }
 0x704   : > { %9705 = vmatprep.subr.bf16.mxu1 %v10254_v25 }
 0x705   : > { %9684 = vmatpush3.bf16.msra.mxu0 %v10253_v21 }
 0x706   : > { %9934 = vmatprep.subr.bf16.mxu0 %v10327_v50 }
 0x707   : > { %9706 = vmatpush3.bf16.msra.mxu1 %v10255_v32 }
 0x708   : > { %8508 = vmatmul.mubr.bf16.vlgmr.msra.gmra.mrb[208].mxu0 %v7984_v46 }
 0x709   : > { %9935 = vmatpush3.bf16.msra.mxu0 %v10256_v12  ;;  %9942 = vmatprep.mubr.msk.bf16.mxu0 %vm10332_vm12, %v10327_v50 }
 0x70a   : > { %8548 = vmatmul.mubr.bf16.vlgmr.msra.gmra.mrb[208].mxu1 %v8000_v23  ;;  %9936 = vmatprep.subr.bf16.mxu0 %v10327_v50 }
 0x70d   : > { %9937 = vmatpush3.bf16.msra.mxu0 %v10257_v4 }
 0x70e   : > { %9938 = vmatprep.subr.bf16.mxu0 %v10327_v50 }
 0x711   : > { %9939 = vmatpush3.bf16.msra.mxu0 %v10258_v33 }
 0x712   : > { %9940 = vmatprep.subr.bf16.mxu0 %v10327_v50 }
 0x715   : > { %9941 = vmatpush3.bf16.msra.mxu0 %v10259_v26 }
 0x7bb   : > { %v9641_v15 = vpop.f32.mrb[204].mxu0 }
 0x7bc   : > { %v9642_v18 = vpop.f32.mrb[205].mxu0 }
 0x7bd   : > { %v9643_v63 = vadd.f32 %v9642_v18, %v9641_v15  ;;  %v9644_v11 = vpop.f32.mrb[206].mxu0  ;;  %v9663_v8 = vpop.f32.mrb[204].mxu1 }
 0x7be   : > { %v9645_v30 = vpop.f32.mrb[207].mxu0  ;;  %v9664_v53 = vpop.f32.mrb[205].mxu1 }
 0x7bf   : > { %v8430_v43 = vadd.f32 %v9643_v63, %v7952_v1  ;;  %v9665_v38 = vadd.f32 %v9664_v53, %v9663_v8  ;;  %v9666_v60 = vpop.f32.mrb[206].mxu1 }
 0x7c0   : > { %v9667_v49 = vpop.f32.mrb[207].mxu1 }
 0x7c1   : > { %v8470_v52 = vadd.f32 %v9665_v38, %v8430_v43 }
 0x7db   : > { %v9685_v3 = vpop.f32.mrb[208].mxu0 }
 0x7dc   : > { %v9686_v50 = vpop.f32.mrb[209].mxu0 }
 0x7dd   : > { %v9687_v22 = vadd.f32 %v9686_v50, %v9685_v3  ;;  %v9688_v41 = vpop.f32.mrb[210].mxu0  ;;  %v9707_v31 = vpop.f32.mrb[208].mxu1 }
 0x7de   : > { %v9689_v10 = vpop.f32.mrb[211].mxu0  ;;  %v9708_v9 = vpop.f32.mrb[209].mxu1 }
 0x7df   : > { %v8510_v24 = vadd.f32 %v9687_v22, %v8470_v52  ;;  %v9709_v56 = vadd.f32 %v9708_v9, %v9707_v31  ;;  %v9710_v16 = vpop.f32.mrb[210].mxu1 }
 0x7e0   : > { %v9711_v58 = vpop.f32.mrb[211].mxu1 }
 0x7e1   : > { %v8550_v7 = vadd.f32 %v9709_v56, %v8510_v24 }
 0x7e3   : > { %v8555_v34 = vpack.c.bf16 %v8550_v7, %v8550_v7 }
 0x7e5   : > { %9943 = vmatmul.mubr.msk.bf16.vlgmr.msra.gmra.mrb[212].mxu0 %vm7634_vm6, %v8555_v34 }
 0x8b8   : > { %v8626_v6 = vpop.f32.mrb[212].mxu0 }
 0x8b9   : > { %v8627_v62 = vadd.f32 %v8626_v6, %v8564_v59  ;;  %v9944_v57 = vpop.f32.mrb[213].mxu0 }
 0x8ba   : > { %v8629_v5 = vpop.f32.mrb[214].mxu0 }
 0x8bb   : > { %v9945_v36 = vpop.f32.mrb[215].mxu0  ;;  %8633 = vst.msk [vmem:[%s378_s15] sm:$0x1] %vm8632_vm13, %v8627_v62 }
 0x8bc   : > { %10276 = shalt.err (!%p10273_p3)
}
 0x8bd   : > { %s10277_s12 = scalar_lea.hbm %s13412_s26, 16  ;;  %s10281_s24 = scalar_lea.hbm %s13465_s11, 32 }
 0x8be   : > { %p10278_p4 = scmp.ne.s32.totalorder %s13412_s26, %s10277_s12  ;;  %p10282_p9 = scmp.lt.u32.totalorder %s13412_s26, %s13465_s11 }
 0x8bf   : > { %p10283_p10 = scmp.lt.u32.totalorder %s10281_s24, %s10277_s12  ;;  %p10285_p12 = scmp.lt.u32.totalorder %s10277_s12, %s13412_s26 }
 0x8c0   : > { %p10279_p7 = pnand %p10278_p4, %p10432_p5 }
 0x8c1   : > { %p10284_p11 = por %p10283_p10, %p10282_p9 }
 0x8c2   : > { %p10280_p8 = pneg %p10279_p7 }
 0x8c3   : > { %p10286_p13 = por %p10285_p12, %p10284_p11 }
 0x8c5   : > { %p10287_p0 = pnand %p10286_p13, %p10280_p8 }
 0x8c7   : > { %10290 = shalt.err (!%p10287_p0)
}
 0x8c8   : > { %9962 = dma.vmem_to_hbm [thread:$0]  (%p10432_p5), %s13414_s22, 16, %s13412_s26, %s8635_s21  }
 0x8c9 PF: > { %p9968_p1 = scmp.ge.s32.totalorder %s10325_s20, 2  ;;  %s8659_s25 = sand.u32 1, %s10313_s17  }
 0x8ca   : > { %s8660_s13 = scalar_lea.sflag [#allocation9], %s8659_s25 }
 0x8cb   : > { %p9965_p2 = pnand %p9968_p1, %p10436_p6 }
 0x8cd   : > { %10308 = dma.done.wait (!%p9965_p2), %s8660_s13, 16  }
 0x8ce   : > { %10310 = vsyncadd (!%p9965_p2), %s8660_s13, 4294967280  ;;  %s13473_s16 = sld [smem:[#allocation11_spill]]  ;;  %p21_p3 = scmp.ge.s32.totalorder %s10419_s23, 4  }
 0x8cf   : > { %s13474_s17 = smov %s10317_s18  ;;  %s13475_s18 = smov %s10321_s19 }
 0x8d0   : > { %s13477_s20 = smov %s10419_s23  ;;  %23 = sbr.rel (!%p21_p3) target bundleno = 3 (0x3), region = 128 }
 0x8d4   : > { %s13476_s19 = smov %s13473_s16 }
 0x8d7   :  { %8664 = vsyncpa [#allocation9], 1 }
 0x8d8   :  { %8666 = vsyncpa [#allocation9 + $0x1], 1 }

</bundles_post_ra>
